<compile_context>
chip_gen: v7x
topology: tpu7x:2x2x1
jax: 0.10.0
libtpu: 0.0.40
codegen_flags: <defaults>
</compile_context>

<pallas_src>
import functools

import jax
import jax.numpy as jnp
from jax.experimental import pallas as pl
from jax.experimental.pallas import tpu as pltpu

LEAKY_SLOPE = 0.01    # PyTorch nn.LeakyReLU default
BN_EPS = 1e-5         # PyTorch nn.BatchNorm1d default
HIDDEN = (500, 400, 300, 200, 100, 50)
LANE = 128
SUBLANE_BF16 = 16
GROUP = 128           # rows per grid step == one BatchNorm statistics group


def _round_up(n, m):
    return ((n + m - 1) // m) * m


# -----------------------------------------------------------------------------
# Kernel: one grid step = one independent GROUP-row forward pass
# -----------------------------------------------------------------------------
def mlp_kernel(x_ref, vec_ref, *refs, layer_meta, out_size):
    """refs = (W1..W7 [bf16, lane-padded, VMEM-resident], out_ref).

    vec_ref is a single (1, TOTAL) f32 row packing, per layer:
      bias | gamma | beta   (gamma/beta only for the 6 hidden layers).
    layer_meta[i] = (padded_width, bias_off, gamma_off, beta_off)  (static ints).
    """
    out_ref = refs[-1]
    w_refs = refs[:-1]
    n_layers = len(layer_meta)

    h = x_ref[...]                                 # bf16 (cast in the wrapper)
    inv_n = jnp.float32(1.0 / h.shape[0])          # rows per BN group (no row padding)

    for li in range(n_layers):                     # unrolled at trace time
        width, b_off, g_off, be_off = layer_meta[li]
        b = vec_ref[:, b_off:b_off + width]        # (1, width) f32
        # Linear: bf16 operands on the MXU, f32 accumulation.
        h = jnp.dot(h.astype(jnp.bfloat16), w_refs[li][...],
                    preferred_element_type=jnp.float32) + b

        if li < n_layers - 1:
            # LeakyReLU (f32, VPU)
            h = jnp.where(h > 0, h, LEAKY_SLOPE * h)
            # Training-mode BatchNorm1d, fused: one-pass stats then h*s + t.
            gamma = vec_ref[:, g_off:g_off + width]
            beta = vec_ref[:, be_off:be_off + width]
            mean = jnp.sum(h, axis=0, keepdims=True) * inv_n
            mean_sq = jnp.sum(h * h, axis=0, keepdims=True) * inv_n
            var = jnp.maximum(mean_sq - mean * mean, 0.0)    # biased variance
            s = gamma * jax.lax.rsqrt(var + BN_EPS)          # EUP rsqrt
            t = beta - mean * s
            h = h * s + t

    # LogSoftmax over the real (unpadded) classes only; padded lanes are masked
    # out of max/sum and sliced off outside the kernel.
    logits = h
    lane = jax.lax.broadcasted_iota(jnp.int32, logits.shape, 1)
    valid = lane < out_size
    m = jnp.max(jnp.where(valid, logits, -jnp.inf), axis=-1, keepdims=True)
    p = jnp.where(valid, jnp.exp(logits - m), 0.0)
    lse = m + jnp.log(jnp.sum(p, axis=-1, keepdims=True))
    out_ref[...] = logits - lse


# -----------------------------------------------------------------------------
# Wrapper
# -----------------------------------------------------------------------------
@functools.partial(jax.jit, static_argnames=("out_size", "layer_meta"))
def forward(x, vec, ws, *, out_size, layer_meta):
    batch, in_size = x.shape
    assert batch % GROUP == 0, "batch must be a multiple of the BN group size"
    n_groups = batch // GROUP

    p_in = ws[0].shape[0]
    if in_size != p_in:                        # pad input features (sublane tile only)
        x = jnp.pad(x, ((0, 0), (0, p_in - in_size)))
    x = x.astype(jnp.bfloat16)                 # halve x DMA, drop the in-kernel cast

    padded_out = layer_meta[-1][0]
    kernel = functools.partial(mlp_kernel, layer_meta=layer_meta,
                               out_size=out_size)

    const = lambda g: (0, 0)                   # weights/vec: same block every step
    in_specs = [pl.BlockSpec((GROUP, p_in), lambda g: (g, 0)),          # activations
                pl.BlockSpec((1, vec.shape[1]), const)]                 # packed bias/gamma/beta
    in_specs += [pl.BlockSpec(w.shape, const) for w in ws]              # resident weights

    out = pl.pallas_call(
        kernel,
        out_shape=jax.ShapeDtypeStruct((batch, padded_out), jnp.float32),
        grid=(n_groups,),
        in_specs=in_specs,
        out_specs=pl.BlockSpec((GROUP, padded_out), lambda g: (g, 0)),
        compiler_params=pltpu.CompilerParams(
            dimension_semantics=("parallel",)),   # v7x: split groups across TCs
    )(x, vec, *ws)
    return out[:, :out_size]


# -----------------------------------------------------------------------------
# Parameters (deterministic synthetic init, PyTorch-style Linear bounds)
# -----------------------------------------------------------------------------
def make_params(key, input_size, output_size):
    sizes = [input_size, *HIDDEN, output_size]
    # Input features padded only to the bf16 sublane tile (16); hidden/output
    # widths lane-padded to multiples of 128.
    padded = [_round_up(input_size, SUBLANE_BF16)] + \
             [_round_up(s, LANE) for s in sizes[1:]]
    n_layers = len(sizes) - 1

    ws = []          # padded bf16 weights, (p_in, p_out)
    vec_chunks = []  # packed f32 bias/gamma/beta rows
    layer_meta = []  # (padded_width, bias_off, gamma_off, beta_off)
    raw = []         # unpadded params for the pure-JAX reference
    off = 0

    for i in range(n_layers):
        fan_in, fan_out = sizes[i], sizes[i + 1]
        p_in, p_out = padded[i], padded[i + 1]
        key, kw, kb = jax.random.split(key, 3)
        bound = 1.0 / float(fan_in) ** 0.5
        w = jax.random.uniform(kw, (fan_in, fan_out), jnp.float32, -bound, bound)
        b = jax.random.uniform(kb, (1, fan_out), jnp.float32, -bound, bound)

        w_pad = jnp.zeros((p_in, p_out), jnp.float32).at[:fan_in, :fan_out].set(w)
        b_pad = jnp.zeros((1, p_out), jnp.float32).at[:, :fan_out].set(b)
        ws.append(w_pad.astype(jnp.bfloat16))

        if i < n_layers - 1:   # hidden block -> has BatchNorm params
            key, kg, kbe = jax.random.split(key, 3)
            gamma = 1.0 + 0.1 * jax.random.normal(kg, (1, fan_out), jnp.float32)
            beta = 0.1 * jax.random.normal(kbe, (1, fan_out), jnp.float32)
            g_pad = jnp.ones((1, p_out), jnp.float32).at[:, :fan_out].set(gamma)
            be_pad = jnp.zeros((1, p_out), jnp.float32).at[:, :fan_out].set(beta)
            vec_chunks += [b_pad, g_pad, be_pad]
            layer_meta.append((p_out, off, off + p_out, off + 2 * p_out))
            off += 3 * p_out
            raw.append((w, b, gamma, beta))
        else:
            vec_chunks += [b_pad]
            layer_meta.append((p_out, off, -1, -1))
            off += p_out
            raw.append((w, b))

    vec = jnp.concatenate(vec_chunks, axis=1)
    return tuple(ws), vec, tuple(layer_meta), raw


# -----------------------------------------------------------------------------
# Pure-JAX reference (same bf16-matmul / f32-elementwise semantics), applied to
# ONE BatchNorm group (i.e. one independent module forward pass).
# -----------------------------------------------------------------------------
def reference(x, raw):
    h = x.astype(jnp.float32)
    for w, b, g, be in raw[:-1]:
        h = jnp.dot(h.astype(jnp.bfloat16), w.astype(jnp.bfloat16),
                    preferred_element_type=jnp.float32) + b
        h = jnp.where(h > 0, h, LEAKY_SLOPE * h)
        mean = jnp.mean(h, axis=0, keepdims=True)
        var = jnp.mean((h - mean) ** 2, axis=0, keepdims=True)
        h = g * (h - mean) * jax.lax.rsqrt(var + BN_EPS) + be
    w, b = raw[-1]
    logits = jnp.dot(h.astype(jnp.bfloat16), w.astype(jnp.bfloat16),
                     preferred_element_type=jnp.float32) + b
    return jax.nn.log_softmax(logits, axis=-1)


if __name__ == "__main__":
    # Two independent 128-row forward passes batched into one pallas_call so the
    # weights are DMA'd once and reused across grid steps (perf review #2).
    # BN statistics are per 128-row group in both the kernel and the reference.
    input_size, output_size = 64, 10
    batch = 2 * GROUP

    key = jax.random.PRNGKey(0)
    key, kx = jax.random.split(key)
    x = jax.random.normal(kx, (batch, input_size), jnp.float32)

    ws, vec, layer_meta, raw = make_params(key, input_size, output_size)

    y = forward(x, vec, ws, out_size=output_size, layer_meta=layer_meta)
    jax.block_until_ready(y)

    y_ref = jnp.concatenate(
        [reference(x[g * GROUP:(g + 1) * GROUP], raw)
         for g in range(batch // GROUP)], axis=0)

    assert y.shape == (batch, output_size)
    assert bool(jnp.all(jnp.isfinite(y)))
    # bf16 matmul weights -> modest tolerance vs the matched pure-JAX reference.
    assert jnp.allclose(y, y_ref, atol=2e-2), "Pallas kernel mismatch vs JAX reference"

    print("KERNEL_OK")
</pallas_src>

<mosaic_0001>
module attributes {stable_mosaic.version = 11 : i64} {
  func.func @mlp_kernel(%arg0: i32, %arg1: memref<128x64xbf16, #tpu.memory_space<vmem>>, %arg2: memref<1x5888xf32, #tpu.memory_space<vmem>>, %arg3: memref<64x512xbf16, #tpu.memory_space<vmem>>, %arg4: memref<512x512xbf16, #tpu.memory_space<vmem>>, %arg5: memref<512x384xbf16, #tpu.memory_space<vmem>>, %arg6: memref<384x256xbf16, #tpu.memory_space<vmem>>, %arg7: memref<256x128xbf16, #tpu.memory_space<vmem>>, %arg8: memref<128x128xbf16, #tpu.memory_space<vmem>>, %arg9: memref<128x128xbf16, #tpu.memory_space<vmem>>, %arg10: memref<128x128xf32, #tpu.memory_space<vmem>>) attributes {dimension_semantics = [#tpu.dimension_semantics<parallel>], iteration_bounds = array<i64: 2>, scalar_prefetch = 0 : i64, scratch_operands = 0 : i64, tpu.core_type = #tpu.core_type<tc>, window_params = [{transform_indices = @transform_0, window_bounds = array<i64: 128, 64>}, {pipeline_mode = #tpu.pipeline_mode<synchronous>, transform_indices = @transform_1, window_bounds = array<i64: 1, 5888>}, {pipeline_mode = #tpu.pipeline_mode<synchronous>, transform_indices = @transform_2, window_bounds = array<i64: 64, 512>}, {pipeline_mode = #tpu.pipeline_mode<synchronous>, transform_indices = @transform_3, window_bounds = array<i64: 512, 512>}, {pipeline_mode = #tpu.pipeline_mode<synchronous>, transform_indices = @transform_4, window_bounds = array<i64: 512, 384>}, {pipeline_mode = #tpu.pipeline_mode<synchronous>, transform_indices = @transform_5, window_bounds = array<i64: 384, 256>}, {pipeline_mode = #tpu.pipeline_mode<synchronous>, transform_indices = @transform_6, window_bounds = array<i64: 256, 128>}, {pipeline_mode = #tpu.pipeline_mode<synchronous>, transform_indices = @transform_7, window_bounds = array<i64: 128, 128>}, {pipeline_mode = #tpu.pipeline_mode<synchronous>, transform_indices = @transform_8, window_bounds = array<i64: 128, 128>}, {transform_indices = @transform_9, window_bounds = array<i64: 128, 128>}]} {
    %c0 = arith.constant 0 : index
    %c0_0 = arith.constant 0 : index
    %0 = vector.load %arg1[%c0, %c0_0] : memref<128x64xbf16, #tpu.memory_space<vmem>>, vector<128x64xbf16>
    %c0_1 = arith.constant 0 : index
    %c0_2 = arith.constant 0 : index
    %1 = vector.load %arg2[%c0_1, %c0_2] : memref<1x5888xf32, #tpu.memory_space<vmem>>, vector<1x512xf32>
    %c0_3 = arith.constant 0 : index
    %c0_4 = arith.constant 0 : index
    %2 = vector.load %arg3[%c0_3, %c0_4] : memref<64x512xbf16, #tpu.memory_space<vmem>>, vector<64x512xbf16>
    %cst = arith.constant dense<0.000000e+00> : vector<128x512xf32>
    %3 = tpu.matmul %0, %2, %cst {dimension_numbers = #tpu.dot_dimension_numbers<[1], [0], [0], [1], [0, 0, 1, 1], [], []>} : vector<128x64xbf16>, vector<64x512xbf16>, vector<128x512xf32> -> vector<128x512xf32>
    %4 = vector.broadcast %1 : vector<1x512xf32> to vector<128x512xf32>
    %5 = arith.addf %3, %4 : vector<128x512xf32>
    %cst_5 = arith.constant 0.000000e+00 : f32
    %6 = vector.broadcast %cst_5 : f32 to vector<128x512xf32>
    %7 = arith.cmpf ogt, %5, %6 : vector<128x512xf32>
    %cst_6 = arith.constant 0.00999999977 : f32
    %8 = vector.broadcast %cst_6 : f32 to vector<128x512xf32>
    %9 = arith.mulf %8, %5 : vector<128x512xf32>
    %10 = arith.select %7, %5, %9 : vector<128x512xi1>, vector<128x512xf32>
    %c0_7 = arith.constant 0 : index
    %c512 = arith.constant 512 : index
    %11 = vector.load %arg2[%c0_7, %c512] : memref<1x5888xf32, #tpu.memory_space<vmem>>, vector<1x512xf32>
    %c0_8 = arith.constant 0 : index
    %c1024 = arith.constant 1024 : index
    %12 = vector.load %arg2[%c0_8, %c1024] : memref<1x5888xf32, #tpu.memory_space<vmem>>, vector<1x512xf32>
    %cst_9 = arith.constant dense<0.000000e+00> : vector<512xf32>
    %13 = vector.multi_reduction <add>, %10, %cst_9 [0] : vector<128x512xf32> to vector<512xf32>
    %14 = vector.shape_cast %13 : vector<512xf32> to vector<1x512xf32>
    %cst_10 = arith.constant 7.812500e-03 : f32
    %15 = vector.broadcast %cst_10 : f32 to vector<1x512xf32>
    %16 = arith.mulf %14, %15 : vector<1x512xf32>
    %17 = arith.mulf %10, %10 : vector<128x512xf32>
    %cst_11 = arith.constant dense<0.000000e+00> : vector<512xf32>
    %18 = vector.multi_reduction <add>, %17, %cst_11 [0] : vector<128x512xf32> to vector<512xf32>
    %19 = vector.shape_cast %18 : vector<512xf32> to vector<1x512xf32>
    %cst_12 = arith.constant 7.812500e-03 : f32
    %20 = vector.broadcast %cst_12 : f32 to vector<1x512xf32>
    %21 = arith.mulf %19, %20 : vector<1x512xf32>
    %22 = arith.mulf %16, %16 : vector<1x512xf32>
    %23 = arith.subf %21, %22 : vector<1x512xf32>
    %cst_13 = arith.constant 0.000000e+00 : f32
    %24 = vector.broadcast %cst_13 : f32 to vector<1x512xf32>
    %25 = arith.maximumf %23, %24 : vector<1x512xf32>
    %cst_14 = arith.constant 9.99999974E-6 : f32
    %26 = vector.broadcast %cst_14 : f32 to vector<1x512xf32>
    %27 = arith.addf %25, %26 : vector<1x512xf32>
    %28 = math.rsqrt %27 : vector<1x512xf32>
    %29 = arith.mulf %11, %28 : vector<1x512xf32>
    %30 = arith.mulf %16, %29 : vector<1x512xf32>
    %31 = arith.subf %12, %30 : vector<1x512xf32>
    %32 = vector.broadcast %29 : vector<1x512xf32> to vector<128x512xf32>
    %33 = arith.mulf %10, %32 : vector<128x512xf32>
    %34 = vector.broadcast %31 : vector<1x512xf32> to vector<128x512xf32>
    %35 = arith.addf %33, %34 : vector<128x512xf32>
    %c0_15 = arith.constant 0 : index
    %c1536 = arith.constant 1536 : index
    %36 = vector.load %arg2[%c0_15, %c1536] : memref<1x5888xf32, #tpu.memory_space<vmem>>, vector<1x512xf32>
    %37 = arith.truncf %35 : vector<128x512xf32> to vector<128x512xbf16>
    %c0_16 = arith.constant 0 : index
    %c0_17 = arith.constant 0 : index
    %38 = vector.load %arg4[%c0_16, %c0_17] : memref<512x512xbf16, #tpu.memory_space<vmem>>, vector<512x512xbf16>
    %cst_18 = arith.constant dense<0.000000e+00> : vector<128x512xf32>
    %39 = tpu.matmul %37, %38, %cst_18 {dimension_numbers = #tpu.dot_dimension_numbers<[1], [0], [0], [1], [0, 0, 1, 1], [], []>} : vector<128x512xbf16>, vector<512x512xbf16>, vector<128x512xf32> -> vector<128x512xf32>
    %40 = vector.broadcast %36 : vector<1x512xf32> to vector<128x512xf32>
    %41 = arith.addf %39, %40 : vector<128x512xf32>
    %cst_19 = arith.constant 0.000000e+00 : f32
    %42 = vector.broadcast %cst_19 : f32 to vector<128x512xf32>
    %43 = arith.cmpf ogt, %41, %42 : vector<128x512xf32>
    %cst_20 = arith.constant 0.00999999977 : f32
    %44 = vector.broadcast %cst_20 : f32 to vector<128x512xf32>
    %45 = arith.mulf %44, %41 : vector<128x512xf32>
    %46 = arith.select %43, %41, %45 : vector<128x512xi1>, vector<128x512xf32>
    %c0_21 = arith.constant 0 : index
    %c2048 = arith.constant 2048 : index
    %47 = vector.load %arg2[%c0_21, %c2048] : memref<1x5888xf32, #tpu.memory_space<vmem>>, vector<1x512xf32>
    %c0_22 = arith.constant 0 : index
    %c2560 = arith.constant 2560 : index
    %48 = vector.load %arg2[%c0_22, %c2560] : memref<1x5888xf32, #tpu.memory_space<vmem>>, vector<1x512xf32>
    %cst_23 = arith.constant dense<0.000000e+00> : vector<512xf32>
    %49 = vector.multi_reduction <add>, %46, %cst_23 [0] : vector<128x512xf32> to vector<512xf32>
    %50 = vector.shape_cast %49 : vector<512xf32> to vector<1x512xf32>
    %cst_24 = arith.constant 7.812500e-03 : f32
    %51 = vector.broadcast %cst_24 : f32 to vector<1x512xf32>
    %52 = arith.mulf %50, %51 : vector<1x512xf32>
    %53 = arith.mulf %46, %46 : vector<128x512xf32>
    %cst_25 = arith.constant dense<0.000000e+00> : vector<512xf32>
    %54 = vector.multi_reduction <add>, %53, %cst_25 [0] : vector<128x512xf32> to vector<512xf32>
    %55 = vector.shape_cast %54 : vector<512xf32> to vector<1x512xf32>
    %cst_26 = arith.constant 7.812500e-03 : f32
    %56 = vector.broadcast %cst_26 : f32 to vector<1x512xf32>
    %57 = arith.mulf %55, %56 : vector<1x512xf32>
    %58 = arith.mulf %52, %52 : vector<1x512xf32>
    %59 = arith.subf %57, %58 : vector<1x512xf32>
    %cst_27 = arith.constant 0.000000e+00 : f32
    %60 = vector.broadcast %cst_27 : f32 to vector<1x512xf32>
    %61 = arith.maximumf %59, %60 : vector<1x512xf32>
    %cst_28 = arith.constant 9.99999974E-6 : f32
    %62 = vector.broadcast %cst_28 : f32 to vector<1x512xf32>
    %63 = arith.addf %61, %62 : vector<1x512xf32>
    %64 = math.rsqrt %63 : vector<1x512xf32>
    %65 = arith.mulf %47, %64 : vector<1x512xf32>
    %66 = arith.mulf %52, %65 : vector<1x512xf32>
    %67 = arith.subf %48, %66 : vector<1x512xf32>
    %68 = vector.broadcast %65 : vector<1x512xf32> to vector<128x512xf32>
    %69 = arith.mulf %46, %68 : vector<128x512xf32>
    %70 = vector.broadcast %67 : vector<1x512xf32> to vector<128x512xf32>
    %71 = arith.addf %69, %70 : vector<128x512xf32>
    %c0_29 = arith.constant 0 : index
    %c3072 = arith.constant 3072 : index
    %72 = vector.load %arg2[%c0_29, %c3072] : memref<1x5888xf32, #tpu.memory_space<vmem>>, vector<1x384xf32>
    %73 = arith.truncf %71 : vector<128x512xf32> to vector<128x512xbf16>
    %c0_30 = arith.constant 0 : index
    %c0_31 = arith.constant 0 : index
    %74 = vector.load %arg5[%c0_30, %c0_31] : memref<512x384xbf16, #tpu.memory_space<vmem>>, vector<512x384xbf16>
    %cst_32 = arith.constant dense<0.000000e+00> : vector<128x384xf32>
    %75 = tpu.matmul %73, %74, %cst_32 {dimension_numbers = #tpu.dot_dimension_numbers<[1], [0], [0], [1], [0, 0, 1, 1], [], []>} : vector<128x512xbf16>, vector<512x384xbf16>, vector<128x384xf32> -> vector<128x384xf32>
    %76 = vector.broadcast %72 : vector<1x384xf32> to vector<128x384xf32>
    %77 = arith.addf %75, %76 : vector<128x384xf32>
    %cst_33 = arith.constant 0.000000e+00 : f32
    %78 = vector.broadcast %cst_33 : f32 to vector<128x384xf32>
    %79 = arith.cmpf ogt, %77, %78 : vector<128x384xf32>
    %cst_34 = arith.constant 0.00999999977 : f32
    %80 = vector.broadcast %cst_34 : f32 to vector<128x384xf32>
    %81 = arith.mulf %80, %77 : vector<128x384xf32>
    %82 = arith.select %79, %77, %81 : vector<128x384xi1>, vector<128x384xf32>
    %c0_35 = arith.constant 0 : index
    %c3456 = arith.constant 3456 : index
    %83 = vector.load %arg2[%c0_35, %c3456] : memref<1x5888xf32, #tpu.memory_space<vmem>>, vector<1x384xf32>
    %c0_36 = arith.constant 0 : index
    %c3840 = arith.constant 3840 : index
    %84 = vector.load %arg2[%c0_36, %c3840] : memref<1x5888xf32, #tpu.memory_space<vmem>>, vector<1x384xf32>
    %cst_37 = arith.constant dense<0.000000e+00> : vector<384xf32>
    %85 = vector.multi_reduction <add>, %82, %cst_37 [0] : vector<128x384xf32> to vector<384xf32>
    %86 = vector.shape_cast %85 : vector<384xf32> to vector<1x384xf32>
    %cst_38 = arith.constant 7.812500e-03 : f32
    %87 = vector.broadcast %cst_38 : f32 to vector<1x384xf32>
    %88 = arith.mulf %86, %87 : vector<1x384xf32>
    %89 = arith.mulf %82, %82 : vector<128x384xf32>
    %cst_39 = arith.constant dense<0.000000e+00> : vector<384xf32>
    %90 = vector.multi_reduction <add>, %89, %cst_39 [0] : vector<128x384xf32> to vector<384xf32>
    %91 = vector.shape_cast %90 : vector<384xf32> to vector<1x384xf32>
    %cst_40 = arith.constant 7.812500e-03 : f32
    %92 = vector.broadcast %cst_40 : f32 to vector<1x384xf32>
    %93 = arith.mulf %91, %92 : vector<1x384xf32>
    %94 = arith.mulf %88, %88 : vector<1x384xf32>
    %95 = arith.subf %93, %94 : vector<1x384xf32>
    %cst_41 = arith.constant 0.000000e+00 : f32
    %96 = vector.broadcast %cst_41 : f32 to vector<1x384xf32>
    %97 = arith.maximumf %95, %96 : vector<1x384xf32>
    %cst_42 = arith.constant 9.99999974E-6 : f32
    %98 = vector.broadcast %cst_42 : f32 to vector<1x384xf32>
    %99 = arith.addf %97, %98 : vector<1x384xf32>
    %100 = math.rsqrt %99 : vector<1x384xf32>
    %101 = arith.mulf %83, %100 : vector<1x384xf32>
    %102 = arith.mulf %88, %101 : vector<1x384xf32>
    %103 = arith.subf %84, %102 : vector<1x384xf32>
    %104 = vector.broadcast %101 : vector<1x384xf32> to vector<128x384xf32>
    %105 = arith.mulf %82, %104 : vector<128x384xf32>
    %106 = vector.broadcast %103 : vector<1x384xf32> to vector<128x384xf32>
    %107 = arith.addf %105, %106 : vector<128x384xf32>
    %c0_43 = arith.constant 0 : index
    %c4224 = arith.constant 4224 : index
    %108 = vector.load %arg2[%c0_43, %c4224] : memref<1x5888xf32, #tpu.memory_space<vmem>>, vector<1x256xf32>
    %109 = arith.truncf %107 : vector<128x384xf32> to vector<128x384xbf16>
    %c0_44 = arith.constant 0 : index
    %c0_45 = arith.constant 0 : index
    %110 = vector.load %arg6[%c0_44, %c0_45] : memref<384x256xbf16, #tpu.memory_space<vmem>>, vector<384x256xbf16>
    %cst_46 = arith.constant dense<0.000000e+00> : vector<128x256xf32>
    %111 = tpu.matmul %109, %110, %cst_46 {dimension_numbers = #tpu.dot_dimension_numbers<[1], [0], [0], [1], [0, 0, 1, 1], [], []>} : vector<128x384xbf16>, vector<384x256xbf16>, vector<128x256xf32> -> vector<128x256xf32>
    %112 = vector.broadcast %108 : vector<1x256xf32> to vector<128x256xf32>
    %113 = arith.addf %111, %112 : vector<128x256xf32>
    %cst_47 = arith.constant 0.000000e+00 : f32
    %114 = vector.broadcast %cst_47 : f32 to vector<128x256xf32>
    %115 = arith.cmpf ogt, %113, %114 : vector<128x256xf32>
    %cst_48 = arith.constant 0.00999999977 : f32
    %116 = vector.broadcast %cst_48 : f32 to vector<128x256xf32>
    %117 = arith.mulf %116, %113 : vector<128x256xf32>
    %118 = arith.select %115, %113, %117 : vector<128x256xi1>, vector<128x256xf32>
    %c0_49 = arith.constant 0 : index
    %c4480 = arith.constant 4480 : index
    %119 = vector.load %arg2[%c0_49, %c4480] : memref<1x5888xf32, #tpu.memory_space<vmem>>, vector<1x256xf32>
    %c0_50 = arith.constant 0 : index
    %c4736 = arith.constant 4736 : index
    %120 = vector.load %arg2[%c0_50, %c4736] : memref<1x5888xf32, #tpu.memory_space<vmem>>, vector<1x256xf32>
    %cst_51 = arith.constant dense<0.000000e+00> : vector<256xf32>
    %121 = vector.multi_reduction <add>, %118, %cst_51 [0] : vector<128x256xf32> to vector<256xf32>
    %122 = vector.shape_cast %121 : vector<256xf32> to vector<1x256xf32>
    %cst_52 = arith.constant 7.812500e-03 : f32
    %123 = vector.broadcast %cst_52 : f32 to vector<1x256xf32>
    %124 = arith.mulf %122, %123 : vector<1x256xf32>
    %125 = arith.mulf %118, %118 : vector<128x256xf32>
    %cst_53 = arith.constant dense<0.000000e+00> : vector<256xf32>
    %126 = vector.multi_reduction <add>, %125, %cst_53 [0] : vector<128x256xf32> to vector<256xf32>
    %127 = vector.shape_cast %126 : vector<256xf32> to vector<1x256xf32>
    %cst_54 = arith.constant 7.812500e-03 : f32
    %128 = vector.broadcast %cst_54 : f32 to vector<1x256xf32>
    %129 = arith.mulf %127, %128 : vector<1x256xf32>
    %130 = arith.mulf %124, %124 : vector<1x256xf32>
    %131 = arith.subf %129, %130 : vector<1x256xf32>
    %cst_55 = arith.constant 0.000000e+00 : f32
    %132 = vector.broadcast %cst_55 : f32 to vector<1x256xf32>
    %133 = arith.maximumf %131, %132 : vector<1x256xf32>
    %cst_56 = arith.constant 9.99999974E-6 : f32
    %134 = vector.broadcast %cst_56 : f32 to vector<1x256xf32>
    %135 = arith.addf %133, %134 : vector<1x256xf32>
    %136 = math.rsqrt %135 : vector<1x256xf32>
    %137 = arith.mulf %119, %136 : vector<1x256xf32>
    %138 = arith.mulf %124, %137 : vector<1x256xf32>
    %139 = arith.subf %120, %138 : vector<1x256xf32>
    %140 = vector.broadcast %137 : vector<1x256xf32> to vector<128x256xf32>
    %141 = arith.mulf %118, %140 : vector<128x256xf32>
    %142 = vector.broadcast %139 : vector<1x256xf32> to vector<128x256xf32>
    %143 = arith.addf %141, %142 : vector<128x256xf32>
    %c0_57 = arith.constant 0 : index
    %c4992 = arith.constant 4992 : index
    %144 = vector.load %arg2[%c0_57, %c4992] : memref<1x5888xf32, #tpu.memory_space<vmem>>, vector<1x128xf32>
    %145 = arith.truncf %143 : vector<128x256xf32> to vector<128x256xbf16>
    %c0_58 = arith.constant 0 : index
    %c0_59 = arith.constant 0 : index
    %146 = vector.load %arg7[%c0_58, %c0_59] : memref<256x128xbf16, #tpu.memory_space<vmem>>, vector<256x128xbf16>
    %cst_60 = arith.constant dense<0.000000e+00> : vector<128x128xf32>
    %147 = tpu.matmul %145, %146, %cst_60 {dimension_numbers = #tpu.dot_dimension_numbers<[1], [0], [0], [1], [0, 0, 1, 1], [], []>} : vector<128x256xbf16>, vector<256x128xbf16>, vector<128x128xf32> -> vector<128x128xf32>
    %148 = vector.broadcast %144 : vector<1x128xf32> to vector<128x128xf32>
    %149 = arith.addf %147, %148 : vector<128x128xf32>
    %cst_61 = arith.constant 0.000000e+00 : f32
    %150 = vector.broadcast %cst_61 : f32 to vector<128x128xf32>
    %151 = arith.cmpf ogt, %149, %150 : vector<128x128xf32>
    %cst_62 = arith.constant 0.00999999977 : f32
    %152 = vector.broadcast %cst_62 : f32 to vector<128x128xf32>
    %153 = arith.mulf %152, %149 : vector<128x128xf32>
    %154 = arith.select %151, %149, %153 : vector<128x128xi1>, vector<128x128xf32>
    %c0_63 = arith.constant 0 : index
    %c5120 = arith.constant 5120 : index
    %155 = vector.load %arg2[%c0_63, %c5120] : memref<1x5888xf32, #tpu.memory_space<vmem>>, vector<1x128xf32>
    %c0_64 = arith.constant 0 : index
    %c5248 = arith.constant 5248 : index
    %156 = vector.load %arg2[%c0_64, %c5248] : memref<1x5888xf32, #tpu.memory_space<vmem>>, vector<1x128xf32>
    %cst_65 = arith.constant dense<0.000000e+00> : vector<128xf32>
    %157 = vector.multi_reduction <add>, %154, %cst_65 [0] : vector<128x128xf32> to vector<128xf32>
    %158 = vector.shape_cast %157 : vector<128xf32> to vector<1x128xf32>
    %cst_66 = arith.constant 7.812500e-03 : f32
    %159 = vector.broadcast %cst_66 : f32 to vector<1x128xf32>
    %160 = arith.mulf %158, %159 : vector<1x128xf32>
    %161 = arith.mulf %154, %154 : vector<128x128xf32>
    %cst_67 = arith.constant dense<0.000000e+00> : vector<128xf32>
    %162 = vector.multi_reduction <add>, %161, %cst_67 [0] : vector<128x128xf32> to vector<128xf32>
    %163 = vector.shape_cast %162 : vector<128xf32> to vector<1x128xf32>
    %cst_68 = arith.constant 7.812500e-03 : f32
    %164 = vector.broadcast %cst_68 : f32 to vector<1x128xf32>
    %165 = arith.mulf %163, %164 : vector<1x128xf32>
    %166 = arith.mulf %160, %160 : vector<1x128xf32>
    %167 = arith.subf %165, %166 : vector<1x128xf32>
    %cst_69 = arith.constant 0.000000e+00 : f32
    %168 = vector.broadcast %cst_69 : f32 to vector<1x128xf32>
    %169 = arith.maximumf %167, %168 : vector<1x128xf32>
    %cst_70 = arith.constant 9.99999974E-6 : f32
    %170 = vector.broadcast %cst_70 : f32 to vector<1x128xf32>
    %171 = arith.addf %169, %170 : vector<1x128xf32>
    %172 = math.rsqrt %171 : vector<1x128xf32>
    %173 = arith.mulf %155, %172 : vector<1x128xf32>
    %174 = arith.mulf %160, %173 : vector<1x128xf32>
    %175 = arith.subf %156, %174 : vector<1x128xf32>
    %176 = vector.broadcast %173 : vector<1x128xf32> to vector<128x128xf32>
    %177 = arith.mulf %154, %176 : vector<128x128xf32>
    %178 = vector.broadcast %175 : vector<1x128xf32> to vector<128x128xf32>
    %179 = arith.addf %177, %178 : vector<128x128xf32>
    %c0_71 = arith.constant 0 : index
    %c5376 = arith.constant 5376 : index
    %180 = vector.load %arg2[%c0_71, %c5376] : memref<1x5888xf32, #tpu.memory_space<vmem>>, vector<1x128xf32>
    %181 = arith.truncf %179 : vector<128x128xf32> to vector<128x128xbf16>
    %c0_72 = arith.constant 0 : index
    %c0_73 = arith.constant 0 : index
    %182 = vector.load %arg8[%c0_72, %c0_73] : memref<128x128xbf16, #tpu.memory_space<vmem>>, vector<128x128xbf16>
    %cst_74 = arith.constant dense<0.000000e+00> : vector<128x128xf32>
    %183 = tpu.matmul %181, %182, %cst_74 {dimension_numbers = #tpu.dot_dimension_numbers<[1], [0], [0], [1], [0, 0, 1, 1], [], []>} : vector<128x128xbf16>, vector<128x128xbf16>, vector<128x128xf32> -> vector<128x128xf32>
    %184 = vector.broadcast %180 : vector<1x128xf32> to vector<128x128xf32>
    %185 = arith.addf %183, %184 : vector<128x128xf32>
    %cst_75 = arith.constant 0.000000e+00 : f32
    %186 = vector.broadcast %cst_75 : f32 to vector<128x128xf32>
    %187 = arith.cmpf ogt, %185, %186 : vector<128x128xf32>
    %cst_76 = arith.constant 0.00999999977 : f32
    %188 = vector.broadcast %cst_76 : f32 to vector<128x128xf32>
    %189 = arith.mulf %188, %185 : vector<128x128xf32>
    %190 = arith.select %187, %185, %189 : vector<128x128xi1>, vector<128x128xf32>
    %c0_77 = arith.constant 0 : index
    %c5504 = arith.constant 5504 : index
    %191 = vector.load %arg2[%c0_77, %c5504] : memref<1x5888xf32, #tpu.memory_space<vmem>>, vector<1x128xf32>
    %c0_78 = arith.constant 0 : index
    %c5632 = arith.constant 5632 : index
    %192 = vector.load %arg2[%c0_78, %c5632] : memref<1x5888xf32, #tpu.memory_space<vmem>>, vector<1x128xf32>
    %cst_79 = arith.constant dense<0.000000e+00> : vector<128xf32>
    %193 = vector.multi_reduction <add>, %190, %cst_79 [0] : vector<128x128xf32> to vector<128xf32>
    %194 = vector.shape_cast %193 : vector<128xf32> to vector<1x128xf32>
    %cst_80 = arith.constant 7.812500e-03 : f32
    %195 = vector.broadcast %cst_80 : f32 to vector<1x128xf32>
    %196 = arith.mulf %194, %195 : vector<1x128xf32>
    %197 = arith.mulf %190, %190 : vector<128x128xf32>
    %cst_81 = arith.constant dense<0.000000e+00> : vector<128xf32>
    %198 = vector.multi_reduction <add>, %197, %cst_81 [0] : vector<128x128xf32> to vector<128xf32>
    %199 = vector.shape_cast %198 : vector<128xf32> to vector<1x128xf32>
    %cst_82 = arith.constant 7.812500e-03 : f32
    %200 = vector.broadcast %cst_82 : f32 to vector<1x128xf32>
    %201 = arith.mulf %199, %200 : vector<1x128xf32>
    %202 = arith.mulf %196, %196 : vector<1x128xf32>
    %203 = arith.subf %201, %202 : vector<1x128xf32>
    %cst_83 = arith.constant 0.000000e+00 : f32
    %204 = vector.broadcast %cst_83 : f32 to vector<1x128xf32>
    %205 = arith.maximumf %203, %204 : vector<1x128xf32>
    %cst_84 = arith.constant 9.99999974E-6 : f32
    %206 = vector.broadcast %cst_84 : f32 to vector<1x128xf32>
    %207 = arith.addf %205, %206 : vector<1x128xf32>
    %208 = math.rsqrt %207 : vector<1x128xf32>
    %209 = arith.mulf %191, %208 : vector<1x128xf32>
    %210 = arith.mulf %196, %209 : vector<1x128xf32>
    %211 = arith.subf %192, %210 : vector<1x128xf32>
    %212 = vector.broadcast %209 : vector<1x128xf32> to vector<128x128xf32>
    %213 = arith.mulf %190, %212 : vector<128x128xf32>
    %214 = vector.broadcast %211 : vector<1x128xf32> to vector<128x128xf32>
    %215 = arith.addf %213, %214 : vector<128x128xf32>
    %c0_85 = arith.constant 0 : index
    %c5760 = arith.constant 5760 : index
    %216 = vector.load %arg2[%c0_85, %c5760] : memref<1x5888xf32, #tpu.memory_space<vmem>>, vector<1x128xf32>
    %217 = arith.truncf %215 : vector<128x128xf32> to vector<128x128xbf16>
    %c0_86 = arith.constant 0 : index
    %c0_87 = arith.constant 0 : index
    %218 = vector.load %arg9[%c0_86, %c0_87] : memref<128x128xbf16, #tpu.memory_space<vmem>>, vector<128x128xbf16>
    %cst_88 = arith.constant dense<0.000000e+00> : vector<128x128xf32>
    %219 = tpu.matmul %217, %218, %cst_88 {dimension_numbers = #tpu.dot_dimension_numbers<[1], [0], [0], [1], [0, 0, 1, 1], [], []>} : vector<128x128xbf16>, vector<128x128xbf16>, vector<128x128xf32> -> vector<128x128xf32>
    %220 = vector.broadcast %216 : vector<1x128xf32> to vector<128x128xf32>
    %221 = arith.addf %219, %220 : vector<128x128xf32>
    %222 = tpu.iota {dimensions = array<i32: 1>} : vector<128x128xi32>
    %c10_i32 = arith.constant 10 : i32
    %223 = vector.broadcast %c10_i32 : i32 to vector<128x128xi32>
    %224 = arith.cmpi slt, %222, %223 : vector<128x128xi32>
    %cst_89 = arith.constant 0xFF800000 : f32
    %225 = vector.broadcast %cst_89 : f32 to vector<128x128xf32>
    %226 = arith.select %224, %221, %225 : vector<128x128xi1>, vector<128x128xf32>
    %cst_90 = arith.constant dense<0xFF800000> : vector<128xf32>
    %227 = vector.multi_reduction <maximumf>, %226, %cst_90 [1] : vector<128x128xf32> to vector<128xf32>
    %228 = vector.shape_cast %227 : vector<128xf32> to vector<128x1xf32>
    %229 = vector.broadcast %228 : vector<128x1xf32> to vector<128x128xf32>
    %230 = arith.subf %221, %229 : vector<128x128xf32>
    %231 = math.exp %230 : vector<128x128xf32>
    %cst_91 = arith.constant 0.000000e+00 : f32
    %232 = vector.broadcast %cst_91 : f32 to vector<128x128xf32>
    %233 = arith.select %224, %231, %232 : vector<128x128xi1>, vector<128x128xf32>
    %cst_92 = arith.constant dense<0.000000e+00> : vector<128xf32>
    %234 = vector.multi_reduction <add>, %233, %cst_92 [1] : vector<128x128xf32> to vector<128xf32>
    %235 = vector.shape_cast %234 : vector<128xf32> to vector<128x1xf32>
    %236 = math.log %235 : vector<128x1xf32>
    %237 = arith.addf %228, %236 : vector<128x1xf32>
    %238 = vector.broadcast %237 : vector<128x1xf32> to vector<128x128xf32>
    %239 = arith.subf %221, %238 : vector<128x128xf32>
    %c0_93 = arith.constant 0 : index
    %c0_94 = arith.constant 0 : index
    %240 = vector.load %arg10[%c0_93, %c0_94] : memref<128x128xf32, #tpu.memory_space<vmem>>, vector<128x128xf32>
    tpu.vector_store %arg10[%c0_93, %c0_94], %239 {strides = array<i32>} : memref<128x128xf32, #tpu.memory_space<vmem>>, vector<128x128xf32>,
    return
  }
  func.func @transform_0(%arg0: i32) -> (i32, i32) {
    %c0_i32 = arith.constant 0 : i32
    %c0_i32_0 = arith.constant 0 : i32
    return %arg0, %c0_i32 : i32, i32
  }
  func.func @transform_1(%arg0: i32) -> (i32, i32) {
    %c0_i32 = arith.constant 0 : i32
    %c0_i32_0 = arith.constant 0 : i32
    %c0_i32_1 = arith.constant 0 : i32
    return %c0_i32, %c0_i32_0 : i32, i32
  }
  func.func @transform_2(%arg0: i32) -> (i32, i32) {
    %c0_i32 = arith.constant 0 : i32
    %c0_i32_0 = arith.constant 0 : i32
    %c0_i32_1 = arith.constant 0 : i32
    return %c0_i32, %c0_i32_0 : i32, i32
  }
  func.func @transform_3(%arg0: i32) -> (i32, i32) {
    %c0_i32 = arith.constant 0 : i32
    %c0_i32_0 = arith.constant 0 : i32
    %c0_i32_1 = arith.constant 0 : i32
    return %c0_i32, %c0_i32_0 : i32, i32
  }
  func.func @transform_4(%arg0: i32) -> (i32, i32) {
    %c0_i32 = arith.constant 0 : i32
    %c0_i32_0 = arith.constant 0 : i32
    %c0_i32_1 = arith.constant 0 : i32
    return %c0_i32, %c0_i32_0 : i32, i32
  }
  func.func @transform_5(%arg0: i32) -> (i32, i32) {
    %c0_i32 = arith.constant 0 : i32
    %c0_i32_0 = arith.constant 0 : i32
    %c0_i32_1 = arith.constant 0 : i32
    return %c0_i32, %c0_i32_0 : i32, i32
  }
  func.func @transform_6(%arg0: i32) -> (i32, i32) {
    %c0_i32 = arith.constant 0 : i32
    %c0_i32_0 = arith.constant 0 : i32
    %c0_i32_1 = arith.constant 0 : i32
    return %c0_i32, %c0_i32_0 : i32, i32
  }
  func.func @transform_7(%arg0: i32) -> (i32, i32) {
    %c0_i32 = arith.constant 0 : i32
    %c0_i32_0 = arith.constant 0 : i32
    %c0_i32_1 = arith.constant 0 : i32
    return %c0_i32, %c0_i32_0 : i32, i32
  }
  func.func @transform_8(%arg0: i32) -> (i32, i32) {
    %c0_i32 = arith.constant 0 : i32
    %c0_i32_0 = arith.constant 0 : i32
    %c0_i32_1 = arith.constant 0 : i32
    return %c0_i32, %c0_i32_0 : i32, i32
  }
  func.func @transform_9(%arg0: i32) -> (i32, i32) {
    %c0_i32 = arith.constant 0 : i32
    %c0_i32_0 = arith.constant 0 : i32
    return %arg0, %c0_i32 : i32, i32
  }
}

</mosaic_0001>

<bundles_post_ra>
// kernel: forward.1
= control target key start
LH: loop header
LB: loop body
LE: loop exit
PB: predicated region body
PF: predicated region fallthrough
CT: control target
= control target key end

     0   :  { %14 = vsyncpa [#allocation3], 0  ;;  %s12900_s0 = inlined_call_operand.vmem [shape: bf16[256,64], index: 0, kind: input, shape index: {}]   ;;  %s12901_s1 = inlined_call_operand.hbm [shape: f32[1,5888], index: 1, kind: input, shape index: {}]   ;;  %s12902_s2 = inlined_call_operand.hbm [shape: bf16[64,512], index: 2, kind: input, shape index: {}]   ;;  %s12903_s3 = inlined_call_operand.hbm [shape: bf16[512,512], index: 3, kind: input, shape index: {}]   ;;  %s12904_s4 = inlined_call_operand.hbm [shape: bf16[512,384], index: 4, kind: input, shape index: {}]   ;;  %s12905_s5 = inlined_call_operand.vmem [shape: bf16[384,256], index: 5, kind: input, shape index: {}]   ;;  %s12906_s6 = inlined_call_operand.hbm [shape: bf16[256,128], index: 6, kind: input, shape index: {}]   ;;  %s12907_s7 = inlined_call_operand.hbm [shape: bf16[128,128], index: 7, kind: input, shape index: {}]   ;;  %s12908_s8 = inlined_call_operand.hbm [shape: bf16[128,128], index: 8, kind: input, shape index: {}]   ;;  %s12909_s9 = inlined_call_operand.vmem [shape: f32[256,128], index: 9, kind: output, shape index: {}]  }
   0x1   :  { %15 = vsyncpa [#allocation5], 0 }
   0x2   :  { %16 = vsyncpa [#allocation8], 0 }
   0x3   :  { %17 = vsyncpa [#allocation11], 0  ;;  %s9167_s30 = smov 0  }
   0x4 LB: > { %s9102_s10 = smov [#allocation4]   ;;  %s12910_s12 = sadd.s32 4294967295, %s9100_s30   ;;  %s9100_s30 = sphi %s9167_s30, %s23_s30  }
   0x5   : > { %s271_s11 = sshll.u32 %s9102_s10, 4  ;;  %p7331_p0 = scmp.ge.s32.totalorder %s9100_s30, 1  ;;  %s9181_s11 = int_to_ptr.vmem [resolvable:$true] %s271_s11 }
   0x6   : > { %p248_p1 = scmp.lt.s32.totalorder %s9100_s30, 3  ;;  %p9177_p2 = scmp.eq.s32.totalorder %s12910_s12, 0 }
   0x7   : > { %s9103_s15 = smov [#allocation7]   ;;  %s8882_s20 = scalar_lea.hbm %s12902_s2, 2048 }
   0x8   : > { %s13039_s13 = scalar_select %p9177_p2, 1, 0 }
   0x9   : > { %p9183_p3 = pnand %p7331_p0, %p248_p1  ;;  %s297_s16 = sshll.u32 %s9103_s15, 4  ;;  %s9189_s16 = int_to_ptr.vmem [resolvable:$true] %s297_s16 }
   0xa   : > { %p8883_p6 = scmp.ne.s32.totalorder %s12902_s2, %s8882_s20  ;;  %p8889_p10 = scmp.lt.u32.totalorder %s8882_s20, %s12902_s2 }
   0xb   : > { %s13040_s14 = scalar_select %p9183_p3, 1, 0 }
   0xc   : > { %p8273_p4 = pneg %p9183_p3 }
   0xe   : > { %p9193_p5 = pnand %p9177_p2, %p8273_p4 }
  0x10   : > { %p9205_p7 = pneg %p9193_p5 }
  0x12   : > { %p8885_p8 = pnand %p9205_p7, %p8883_p6 }
  0x14   : > { %p8886_p9 = pneg %p8885_p8 }
  0x16   : > { %p8891_p11 = pnand %p8889_p10, %p8886_p9 }
  0x18   : > { %8894 = shalt.err (!%p8891_p11)
}
  0x19   : > { %s8895_s26 = scalar_lea.vmem %s9181_s11, 2048  ;;  %p8903_p1 = scmp.lt.s32.totalorder %s9181_s11, %s9181_s11 }
  0x1a   : > { %p8896_p12 = scmp.ne.s32.totalorder %s9181_s11, %s8895_s26  ;;  %p8904_p4 = scmp.lt.s32.totalorder %s8895_s26, %s8895_s26 }
  0x1c   : > { %p8898_p13 = pnand %p8896_p12, %p9205_p7  ;;  %p8905_p6 = por %p8904_p4, %p8903_p1 }
  0x1e   : > { %p8899_p0 = pneg %p8898_p13 }
  0x20   : > { %p8906_p8 = pnand %p8905_p6, %p8899_p0 }
  0x22   : > { %8909 = shalt.err (!%p8906_p8)
}
  0x23   : > { %s12911_s27 = smov 256   ;;  %s12912_s28 = smov 16  }
  0x24   : > { %8279 = dma.hbm_to_vmem [thread:$0]  (!%p9193_p5), %s12902_s2, 2048, %s9181_s11, [#allocation5], %s12911_s27, %s12911_s27, %s12912_s28  }
  0x25   : > { %s8910_s19 = scalar_lea.hbm %s12904_s4, 12288 }
  0x26   : > { %p8911_p9 = scmp.ne.s32.totalorder %s12904_s4, %s8910_s19  ;;  %p8917_p12 = scmp.lt.u32.totalorder %s8910_s19, %s12904_s4 }
  0x28   : > { %p8913_p10 = pnand %p8911_p9, %p9205_p7 }
  0x2a   : > { %p8914_p11 = pneg %p8913_p10 }
  0x2c   : > { %p8919_p13 = pnand %p8917_p12, %p8914_p11 }
  0x2e   : > { %8922 = shalt.err (!%p8919_p13)
}
  0x2f   : > { %s8923_s11 = scalar_lea.vmem %s9189_s16, 12288  ;;  %p8931_p6 = scmp.lt.s32.totalorder %s9189_s16, %s9189_s16 }
  0x30   : > { %p8924_p0 = scmp.ne.s32.totalorder %s9189_s16, %s8923_s11  ;;  %p8932_p8 = scmp.lt.s32.totalorder %s8923_s11, %s8923_s11 }
  0x32   : > { %p8926_p1 = pnand %p8924_p0, %p9205_p7  ;;  %p8933_p9 = por %p8932_p8, %p8931_p6 }
  0x34   : > { %p8927_p4 = pneg %p8926_p1 }
  0x36   : > { %p8934_p10 = pnand %p8933_p9, %p8927_p4 }
  0x38   : > { %8937 = shalt.err (!%p8934_p10)
}
  0x39   : > { %s9106_s25 = smov 192   ;;  %s9107_s26 = smov 12  }
  0x3a   : > { %8285 = dma.hbm_to_vmem [thread:$0]  (!%p9193_p5), %s12904_s4, 12288, %s9189_s16, [#allocation8], %s9106_s25, %s9106_s25, %s9107_s26  }
  0x3b   : > { %s9108_s15 = smov [#allocation10]   ;;  %s9109_s19 = smov [#allocation2]  }
  0x3c   : > { %s326_s18 = sshll.u32 %s9108_s15, 4  ;;  %s261_s20 = sshll.u32 %s9109_s19, 4  ;;  %s327_s18 = int_to_ptr.vmem [resolvable:$true] %s326_s18  ;;  %s262_s20 = int_to_ptr.vmem [resolvable:$true] %s261_s20 }
  0x3d   : > { %s8938_s24 = scalar_lea.hbm %s12907_s7, 1024 }
  0x3e   : > { %p8939_p11 = scmp.ne.s32.totalorder %s12907_s7, %s8938_s24  ;;  %p8945_p0 = scmp.lt.u32.totalorder %s8938_s24, %s12907_s7 }
  0x40   : > { %p8941_p12 = pnand %p8939_p11, %p9205_p7 }
  0x42   : > { %p8942_p13 = pneg %p8941_p12 }
  0x44   : > { %p8947_p1 = pnand %p8945_p0, %p8942_p13 }
  0x46   : > { %8950 = shalt.err (!%p8947_p1)
}
  0x47   : > { %s8951_s16 = scalar_lea.vmem %s327_s18, 1024  ;;  %p8959_p9 = scmp.lt.s32.totalorder %s327_s18, %s327_s18 }
  0x48   : > { %p8952_p4 = scmp.ne.s32.totalorder %s327_s18, %s8951_s16  ;;  %p8960_p10 = scmp.lt.s32.totalorder %s8951_s16, %s8951_s16 }
  0x4a   : > { %p8954_p6 = pnand %p8952_p4, %p9205_p7  ;;  %p8961_p2 = por %p8960_p10, %p8959_p9 }
  0x4c   : > { %p8955_p8 = pneg %p8954_p6 }
  0x4e   : > { %p8962_p3 = pnand %p8961_p2, %p8955_p8 }
  0x50   : > { %8965 = shalt.err (!%p8962_p3)
}
  0x51   : > { %s9110_s12 = smov 64   ;;  %s9111_s25 = smov 4  }
  0x52   : > { %8291 = dma.hbm_to_vmem [thread:$0]  (!%p9193_p5), %s12907_s7, 1024, %s327_s18, [#allocation11], %s9110_s12, %s9110_s12, %s9111_s25  }
  0x53   : > { %s8966_s10 = scalar_lea.hbm %s12901_s1, 736 }
  0x54   : > { %p8967_p2 = scmp.ne.s32.totalorder %s12901_s1, %s8966_s10  ;;  %p8973_p12 = scmp.lt.u32.totalorder %s8966_s10, %s12901_s1 }
  0x56   : > { %p8969_p3 = pnand %p8967_p2, %p9205_p7 }
  0x58   : > { %p8970_p11 = pneg %p8969_p3 }
  0x5a   : > { %p8975_p13 = pnand %p8973_p12, %p8970_p11 }
  0x5c   : > { %8978 = shalt.err (!%p8975_p13)
}
  0x5d   : > { %s8979_s24 = scalar_lea.vmem %s262_s20, 736  ;;  %p8987_p6 = scmp.lt.s32.totalorder %s262_s20, %s262_s20 }
  0x5e   : > { %p8980_p0 = scmp.ne.s32.totalorder %s262_s20, %s8979_s24  ;;  %p8988_p8 = scmp.lt.s32.totalorder %s8979_s24, %s8979_s24 }
  0x60   : > { %p8982_p1 = pnand %p8980_p0, %p9205_p7  ;;  %p8989_p9 = por %p8988_p8, %p8987_p6 }
  0x62   : > { %p8983_p4 = pneg %p8982_p1 }
  0x64   : > { %p8990_p10 = pnand %p8989_p9, %p8983_p4 }
  0x66   : > { %8993 = shalt.err (!%p8990_p10)
}
  0x67   : > { %8276 = dma.hbm_to_vmem [thread:$0]  (!%p9193_p5), %s12901_s1, 736, %s262_s20, [#allocation3]  }
  0x68   : > { %s9112_s16 = smov [#allocation6]   ;;  %s9113_s28 = smov [#allocation9]  }
  0x69   : > { %s284_s27 = sshll.u32 %s9112_s16, 4  ;;  %s313_s26 = sshll.u32 %s9113_s28, 4  ;;  %s285_s27 = int_to_ptr.vmem [resolvable:$true] %s284_s27  ;;  %s314_s26 = int_to_ptr.vmem [resolvable:$true] %s313_s26 }
  0x6a   : > { %s8994_s15 = scalar_lea.hbm %s12903_s3, 16384 }
  0x6b   : > { %p8995_p2 = scmp.ne.s32.totalorder %s12903_s3, %s8994_s15  ;;  %p9001_p12 = scmp.lt.u32.totalorder %s8994_s15, %s12903_s3 }
  0x6d   : > { %p8997_p3 = pnand %p8995_p2, %p9205_p7 }
  0x6f   : > { %p8998_p11 = pneg %p8997_p3 }
  0x71   : > { %p9003_p13 = pnand %p9001_p12, %p8998_p11 }
  0x73   : > { %9006 = shalt.err (!%p9003_p13)
}
  0x74   : > { %s9007_s20 = scalar_lea.vmem %s285_s27, 16384  ;;  %p9015_p6 = scmp.lt.s32.totalorder %s285_s27, %s285_s27 }
  0x75   : > { %p9008_p0 = scmp.ne.s32.totalorder %s285_s27, %s9007_s20  ;;  %p9016_p8 = scmp.lt.s32.totalorder %s9007_s20, %s9007_s20 }
  0x77   : > { %p9010_p1 = pnand %p9008_p0, %p9205_p7  ;;  %p9017_p9 = por %p9016_p8, %p9015_p6 }
  0x79   : > { %p9011_p4 = pneg %p9010_p1 }
  0x7b   : > { %p9018_p10 = pnand %p9017_p9, %p9011_p4 }
  0x7d   : > { %9021 = shalt.err (!%p9018_p10)
}
  0x7e   : > { %s13043_s18 = smov 16   ;;  %s13044_s11 = smov 256  }
  0x7f   : > { %8282 = dma.hbm_to_vmem [thread:$0]  (!%p9193_p5), %s12903_s3, 16384, %s285_s27, [#allocation5], %s13044_s11, %s13044_s11, %s13043_s18  }
  0x80   : > { %s9022_s15 = scalar_lea.hbm %s12906_s6, 2048 }
  0x81   : > { %p9023_p2 = scmp.ne.s32.totalorder %s12906_s6, %s9022_s15  ;;  %p9029_p12 = scmp.lt.u32.totalorder %s9022_s15, %s12906_s6 }
  0x83   : > { %p9025_p3 = pnand %p9023_p2, %p9205_p7 }
  0x85   : > { %p9026_p11 = pneg %p9025_p3 }
  0x87   : > { %p9031_p13 = pnand %p9029_p12, %p9026_p11 }
  0x89   : > { %9034 = shalt.err (!%p9031_p13)
}
  0x8a   : > { %s9035_s20 = scalar_lea.vmem %s314_s26, 2048  ;;  %p9043_p6 = scmp.lt.s32.totalorder %s314_s26, %s314_s26 }
  0x8b   : > { %p9036_p0 = scmp.ne.s32.totalorder %s314_s26, %s9035_s20  ;;  %p9044_p8 = scmp.lt.s32.totalorder %s9035_s20, %s9035_s20 }
  0x8d   : > { %p9038_p1 = pnand %p9036_p0, %p9205_p7  ;;  %p9045_p9 = por %p9044_p8, %p9043_p6 }
  0x8f   : > { %p9039_p4 = pneg %p9038_p1 }
  0x91   : > { %p9046_p10 = pnand %p9045_p9, %p9039_p4 }
  0x93   : > { %9049 = shalt.err (!%p9046_p10)
}
  0x94   : > { %8288 = dma.hbm_to_vmem [thread:$0]  (!%p9193_p5), %s12906_s6, 2048, %s314_s26, [#allocation8], %s9110_s12, %s9110_s12, %s9111_s25  }
  0x95   : > { %s9114_s11 = smov [#allocation12]   ;;  %s9050_s10 = scalar_lea.hbm %s12908_s8, 1024 }
  0x96   : > { %s339_s16 = sshll.u32 %s9114_s11, 4  ;;  %p9051_p2 = scmp.ne.s32.totalorder %s12908_s8, %s9050_s10  ;;  %s340_s16 = int_to_ptr.vmem [resolvable:$true] %s339_s16 }
  0x97   : > { %p9057_p12 = scmp.lt.u32.totalorder %s9050_s10, %s12908_s8 }
  0x98   : > { %p9053_p3 = pnand %p9051_p2, %p9205_p7 }
  0x9a   : > { %p9054_p11 = pneg %p9053_p3 }
  0x9c   : > { %p9059_p13 = pnand %p9057_p12, %p9054_p11 }
  0x9e   : > { %9062 = shalt.err (!%p9059_p13)
}
  0x9f   : > { %s9063_s26 = scalar_lea.vmem %s340_s16, 1024  ;;  %p9071_p6 = scmp.lt.s32.totalorder %s340_s16, %s340_s16 }
  0xa0   : > { %p9064_p0 = scmp.ne.s32.totalorder %s340_s16, %s9063_s26  ;;  %p9072_p8 = scmp.lt.s32.totalorder %s9063_s26, %s9063_s26 }
  0xa2   : > { %p9066_p1 = pnand %p9064_p0, %p9205_p7  ;;  %p9073_p9 = por %p9072_p8, %p9071_p6 }
  0xa4   : > { %p9067_p4 = pneg %p9066_p1 }
  0xa6   : > { %p9074_p10 = pnand %p9073_p9, %p9067_p4 }
  0xa8   : > { %9077 = shalt.err (!%p9074_p10)
}
  0xa9   : > { %8294 = dma.hbm_to_vmem [thread:$0]  (!%p9193_p5), %s12908_s8, 1024, %s340_s16, [#allocation11], %s9110_s12, %s9110_s12, %s9111_s25  }
  0xaa   : > { %p13045_p2 = scmp.ne.s32.totalorder %s13040_s14, 0 }
  0xac   : > { %364 = sbr.rel (%p13045_p2) target bundleno = 3071 (0xbff), region = 56 }
  0xb3   : > { %p13046_p7 = scmp.ne.s32.totalorder %s13039_s13, 0 }
  0xb5   : > { %9083 = dma.done.wait (%p13046_p7), [#allocation3], 736  }
  0xb6   : > { %9085 = vsyncadd (%p13046_p7), [#allocation3], 4294966560 }
  0xb7   : > { %9087 = dma.done.wait (%p13046_p7), [#allocation5], 18432  }
  0xb8   : > { %9089 = vsyncadd (%p13046_p7), [#allocation5], 4294948864 }
  0xb9   : > { %9091 = dma.done.wait (%p13046_p7), [#allocation8], 14336  }
  0xba   : > { %9093 = vsyncadd (%p13046_p7), [#allocation8], 4294952960 }
  0xbb   : > { %9095 = dma.done.wait (%p13046_p7), [#allocation11], 2048  }
  0xbc   : > { %9097 = vsyncadd (%p13046_p7), [#allocation11], 4294965248  ;;  %v12917_v0 = vmov 0   ;;  %s13047_s14 = sadd.s32 4294967295, %s9100_s30   ;;  %v8332_v1 = vld [vmem:[#allocation4 + $0x4] ss:$16 sps:$4 sm:$0xff]   ;;  %v12916_v25 = vlaneseq }
  0xbd   : > { %668 = vmatprep.mubr.bf16.mxu0 %v12917_v0  ;;  %781 = vmatprep.mubr.bf16.mxu1 %v12917_v0  ;;  %s7348_s17 = sshll.u32 %s13047_s14, 4  ;;  %v8334_v2 = vld [vmem:[#allocation4 + $0xc] ss:$16 sps:$4 sm:$0xff]   ;;  %v8336_v3 = vld [vmem:[#allocation4] ss:$16 sps:$4 sm:$0xff]   ;;  %vm611_vm0 = vcmask 523264  }
  0xbe   : > { %p425_p5 = scmp.lt.s32.totalorder %s7348_s17, 31  ;;  %636 = vmatprep.subr.bf16.mxu0 %v8332_v1  ;;  %v8337_v4 = vld [vmem:[#allocation4 + $0x8] ss:$16 sps:$4 sm:$0xff]   ;;  %749 = vmatprep.subr.bf16.mxu1 %v8334_v2  ;;  %v8338_v5 = vld [vmem:[#allocation4 + $0x24] ss:$16 sps:$4 sm:$0xff]   ;;  %v9423_v30 = vshrl.u32 %v12916_v25, 7 }
  0xbf   : > { %637 = vmatpush1.bf16.msra.mxu0 %v8336_v3  ;;  %750 = vmatpush1.bf16.msra.mxu1 %v8337_v4  ;;  %v8340_v6 = vld [vmem:[#allocation4 + $0x2c] ss:$16 sps:$4 sm:$0xff]   ;;  %v8342_v7 = vld [vmem:[#allocation4 + $0x20] ss:$16 sps:$4 sm:$0xff]   ;;  %v8343_v8 = vld [vmem:[#allocation4 + $0x28] ss:$16 sps:$4 sm:$0xff]  }
  0xc0   : > { %s13278_s17 = smov (!%p425_p5, %s7348_s17), 31  ;;  %638 = vmatprep.subr.bf16.mxu0 %v8338_v5  ;;  %751 = vmatprep.subr.bf16.mxu1 %v8340_v6  ;;  %v8344_v9 = vld [vmem:[#allocation4 + $0x44] ss:$16 sps:$4 sm:$0xff]   ;;  %v8346_v10 = vld [vmem:[#allocation4 + $0x4c] ss:$16 sps:$4 sm:$0xff]   ;;  %v9426_v36 = vsub.s32 0, %v9423_v30 }
  0xc1   : > { %s7349_s13 = sshll.u32 %s13278_s17, 2  ;;  %v8348_v11 = vld [vmem:[#allocation4 + $0x40] ss:$16 sps:$4 sm:$0xff]   ;;  %v8349_v12 = vld [vmem:[#allocation4 + $0x48] ss:$16 sps:$4 sm:$0xff]   ;;  %v9429_v37 = vsub.s32 2, %v9423_v30 }
  0xc2   : > { %v8350_v13 = vld [vmem:[#allocation4 + $0x64] ss:$16 sps:$4 sm:$0xff]   ;;  %v8352_v14 = vld [vmem:[#allocation4 + $0x6c] ss:$16 sps:$4 sm:$0xff]   ;;  %s9382_s25 = scalar_lea.vmem %s12900_s0, %s7349_s13  ;;  %v8354_v15 = vld [vmem:[#allocation4 + $0x60] ss:$16 sps:$4 sm:$0xff]  }
  0xc3   : > { %639 = vmatpush1.bf16.msra.mxu0 %v8342_v7  ;;  %752 = vmatpush1.bf16.msra.mxu1 %v8343_v8  ;;  %v8355_v16 = vld [vmem:[#allocation4 + $0x68] ss:$16 sps:$4 sm:$0xff]   ;;  %v8366_v26 = vld [vmem:[#allocation6 + $0x4] ss:$16 sps:$4 sm:$0xff]   ;;  %v8369_v27 = vld [vmem:[#allocation6 + $0xc] ss:$16 sps:$4 sm:$0xff]  }
  0xc4   : > { %640 = vmatprep.subr.bf16.mxu0 %v8344_v9  ;;  %753 = vmatprep.subr.bf16.mxu1 %v8346_v10  ;;  %v8356_v17 = vld [vmem:[%s9382_s25] sm:$0xff]   ;;  %v8357_v18 = vld [vmem:[%s9382_s25 + $0x8] sm:$0xff]   ;;  %v8358_v19 = vld [vmem:[%s9382_s25 + $0x10] sm:$0xff]   ;;  %13048 = vst [vmem:[#allocation17_spill] sm:$0xff] %v9426_v36  ;;  %v9432_v38 = vsub.s32 1, %v9423_v30  ;;  %v9435_v39 = vsub.s32 3, %v9423_v30 }
  0xc5   : > { %v8359_v20 = vld [vmem:[%s9382_s25 + $0x18] sm:$0xff]   ;;  %v8360_v21 = vld [vmem:[%s9382_s25 + $0x20] sm:$0xff]   ;;  %v8361_v22 = vld [vmem:[%s9382_s25 + $0x28] sm:$0xff]   ;;  %13049 = vst [vmem:[#allocation18_spill] sm:$0xff] %v9429_v37  ;;  %s7351_s18 = sshll.u32 %s13278_s17, 3 }
  0xc6   : > { %v8362_v23 = vld [vmem:[%s9382_s25 + $0x30] sm:$0xff]   ;;  %v8363_v24 = vld [vmem:[%s9382_s25 + $0x38] sm:$0xff]   ;;  %v453_v35 = vld [vmem:[#allocation2] sm:$0xf]  ;;  %13050 = vst [vmem:[#allocation19_spill] sm:$0xff] %v9432_v38  ;;  %s12848_s28 = scalar_lea.vmem %s12909_s9, %s7351_s18 }
  0xc7   : > { %641 = vmatpush1.bf16.msra.mxu0 %v8348_v11  ;;  %754 = vmatpush1.bf16.msra.mxu1 %v8349_v12  ;;  %v8364_v28 = vld [vmem:[#allocation6] ss:$16 sps:$4 sm:$0xff]   ;;  %v8367_v29 = vld [vmem:[#allocation6 + $0x8] ss:$16 sps:$4 sm:$0xff]   ;;  %v8372_v31 = vld [vmem:[#allocation6 + $0x24] ss:$16 sps:$4 sm:$0xff]   ;;  %v9438_v44 = vrot.slane %v453_v35, %v9426_v36  ;;  %v9441_v45 = vrot.slane %v453_v35, %v9429_v37  ;;  %v9444_v46 = vrot.slane %v453_v35, %v9432_v38 }
  0xc8   : > { %642 = vmatprep.subr.bf16.mxu0 %v8350_v13  ;;  %755 = vmatprep.subr.bf16.mxu1 %v8352_v14  ;;  %v8375_v32 = vld [vmem:[#allocation6 + $0x2c] ss:$16 sps:$4 sm:$0xff]   ;;  %v8370_v33 = vld [vmem:[#allocation6 + $0x20] ss:$16 sps:$4 sm:$0xff]   ;;  %v8373_v34 = vld [vmem:[#allocation6 + $0x28] ss:$16 sps:$4 sm:$0xff]   ;;  %v9447_v47 = vrot.slane %v453_v35, %v9435_v39 }
  0xc9   : > { %13051 = vst [vmem:[#allocation20_spill] sm:$0xff] %v9435_v39  ;;  %v8378_v40 = vld [vmem:[#allocation6 + $0x44] ss:$16 sps:$4 sm:$0xff]   ;;  %v8381_v41 = vld [vmem:[#allocation6 + $0x4c] ss:$16 sps:$4 sm:$0xff]  }
  0xca   : > { %v8376_v42 = vld [vmem:[#allocation6 + $0x40] ss:$16 sps:$4 sm:$0xff]   ;;  %v8379_v43 = vld [vmem:[#allocation6 + $0x48] ss:$16 sps:$4 sm:$0xff]   ;;  %v8384_v48 = vld [vmem:[#allocation6 + $0x64] ss:$16 sps:$4 sm:$0xff]  }
  0xcb   : > { %643 = vmatpush1.bf16.msra.mxu0 %v8354_v15  ;;  %756 = vmatpush1.bf16.msra.mxu1 %v8355_v16  ;;  %v8387_v49 = vld [vmem:[#allocation6 + $0x6c] ss:$16 sps:$4 sm:$0xff]   ;;  %v8382_v50 = vld [vmem:[#allocation6 + $0x60] ss:$16 sps:$4 sm:$0xff]   ;;  %v8385_v51 = vld [vmem:[#allocation6 + $0x68] ss:$16 sps:$4 sm:$0xff]  }
  0xcc   : > { %2372 = vmatprep.subr.bf16.mxu0 %v8366_v26  ;;  %2598 = vmatprep.subr.bf16.mxu1 %v8369_v27  ;;  %v8390_v62 = vld [vmem:[#allocation6 + $0x84] ss:$16 sps:$4 sm:$0xff]   ;;  %v8393_v63 = vld [vmem:[#allocation6 + $0x8c] ss:$16 sps:$4 sm:$0xff]   ;;  %v8388_v10 = vld [vmem:[#allocation6 + $0x80] ss:$16 sps:$4 sm:$0xff]  }
  0xcd   : > { %v8391_v11 = vld [vmem:[#allocation6 + $0x88] ss:$16 sps:$4 sm:$0xff]   ;;  %v8396_v13 = vld [vmem:[#allocation6 + $0xa4] ss:$16 sps:$4 sm:$0xff]   ;;  %v8399_v14 = vld [vmem:[#allocation6 + $0xac] ss:$16 sps:$4 sm:$0xff]  }
  0xce   : > { %7376 = vmatmul.mubr.msk.bf16.vlgmr.msra.gmra.mrb[0].mxu0 %vm611_vm0, %v8356_v17  ;;  %7384 = vmatmul.mubr.msk.bf16.vlgmr.msra.gmra.mrb[0].mxu1 %vm611_vm0, %v8356_v17 }
  0xcf   : > { %678 = vmatprep.mubr.bf16.mxu0 %v12917_v0  ;;  %791 = vmatprep.mubr.bf16.mxu1 %v12917_v0 }
  0xd0   : > { %2373 = vmatpush1.bf16.msra.mxu0 %v8364_v28  ;;  %2599 = vmatpush1.bf16.msra.mxu1 %v8367_v29 }
  0xd1   : > { %2374 = vmatprep.subr.bf16.mxu0 %v8372_v31  ;;  %2600 = vmatprep.subr.bf16.mxu1 %v8375_v32  ;;  %v8397_v32 = vld [vmem:[#allocation6 + $0xa8] ss:$16 sps:$4 sm:$0xff]  }
  0xd4   : > { %2375 = vmatpush1.bf16.msra.mxu0 %v8370_v33  ;;  %2601 = vmatpush1.bf16.msra.mxu1 %v8373_v34 }
  0xd5   : > { %2376 = vmatprep.subr.bf16.mxu0 %v8378_v40  ;;  %2602 = vmatprep.subr.bf16.mxu1 %v8381_v41 }
  0xd6   : > { %7377 = vmatmul.mubr.msk.bf16.gmra.mrb[4].mxu0 %vm611_vm0, %v8357_v18  ;;  %7385 = vmatmul.mubr.msk.bf16.gmra.mrb[4].mxu1 %vm611_vm0, %v8357_v18  ;;  %v8394_v18 = vld [vmem:[#allocation6 + $0xa0] ss:$16 sps:$4 sm:$0xff]  }
  0xd7   : > { %688 = vmatprep.mubr.bf16.mxu0 %v12917_v0  ;;  %801 = vmatprep.mubr.bf16.mxu1 %v12917_v0 }
  0xd8   : > { %2377 = vmatpush1.bf16.msra.mxu0 %v8376_v42  ;;  %2603 = vmatpush1.bf16.msra.mxu1 %v8379_v43  ;;  %v8402_v42 = vld [vmem:[#allocation6 + $0xc4] ss:$16 sps:$4 sm:$0xff]  }
  0xd9   : > { %2378 = vmatprep.subr.bf16.mxu0 %v8384_v48  ;;  %2604 = vmatprep.subr.bf16.mxu1 %v8387_v49 }
  0xdc   : > { %2379 = vmatpush1.bf16.msra.mxu0 %v8382_v50  ;;  %2605 = vmatpush1.bf16.msra.mxu1 %v8385_v51 }
  0xdd   : > { %2380 = vmatprep.subr.bf16.mxu0 %v8390_v62  ;;  %2606 = vmatprep.subr.bf16.mxu1 %v8393_v63  ;;  %v8403_v63 = vld [vmem:[#allocation6 + $0xc8] ss:$16 sps:$4 sm:$0xff]  }
  0xde   : > { %7378 = vmatmul.mubr.msk.bf16.gmra.mrb[8].mxu0 %vm611_vm0, %v8358_v19  ;;  %7386 = vmatmul.mubr.msk.bf16.gmra.mrb[8].mxu1 %vm611_vm0, %v8358_v19 }
  0xdf   : > { %698 = vmatprep.mubr.bf16.mxu0 %v12917_v0  ;;  %811 = vmatprep.mubr.bf16.mxu1 %v12917_v0 }
  0xe0   : > { %2381 = vmatpush1.bf16.msra.mxu0 %v8388_v10  ;;  %2607 = vmatpush1.bf16.msra.mxu1 %v8391_v11 }
  0xe1   : > { %2382 = vmatprep.subr.bf16.mxu0 %v8396_v13  ;;  %2608 = vmatprep.subr.bf16.mxu1 %v8399_v14 }
  0xe4   : > { %2383 = vmatpush1.bf16.msra.mxu0 %v8394_v18  ;;  %2609 = vmatpush1.bf16.msra.mxu1 %v8397_v32 }
  0xe5   : > { %2384 = vmatprep.subr.bf16.mxu0 %v8402_v42 }
  0xe6   : > { %7379 = vmatmul.mubr.msk.bf16.gmra.mrb[12].mxu0 %vm611_vm0, %v8359_v20  ;;  %7387 = vmatmul.mubr.msk.bf16.gmra.mrb[12].mxu1 %vm611_vm0, %v8359_v20 }
  0xe7   : > { %708 = vmatprep.mubr.bf16.mxu0 %v12917_v0  ;;  %821 = vmatprep.mubr.bf16.mxu1 %v12917_v0 }
  0xee   : > { %7380 = vmatmul.mubr.msk.bf16.gmra.mrb[16].mxu0 %vm611_vm0, %v8360_v21  ;;  %7388 = vmatmul.mubr.msk.bf16.gmra.mrb[16].mxu1 %vm611_vm0, %v8360_v21 }
  0xef   : > { %718 = vmatprep.mubr.bf16.mxu0 %v12917_v0  ;;  %831 = vmatprep.mubr.bf16.mxu1 %v12917_v0 }
  0xf6   : > { %7381 = vmatmul.mubr.msk.bf16.gmra.mrb[20].mxu0 %vm611_vm0, %v8361_v22  ;;  %7389 = vmatmul.mubr.msk.bf16.gmra.mrb[20].mxu1 %vm611_vm0, %v8361_v22 }
  0xf7   : > { %728 = vmatprep.mubr.bf16.mxu0 %v12917_v0  ;;  %841 = vmatprep.mubr.bf16.mxu1 %v12917_v0 }
  0xfe   : > { %7382 = vmatmul.mubr.msk.bf16.gmra.mrb[24].mxu0 %vm611_vm0, %v8362_v23  ;;  %7390 = vmatmul.mubr.msk.bf16.gmra.mrb[24].mxu1 %vm611_vm0, %v8362_v23 }
  0xff   : > { %738 = vmatprep.mubr.bf16.mxu0 %v12917_v0  ;;  %851 = vmatprep.mubr.bf16.mxu1 %v12917_v0 }
 0x106   : > { %7383 = vmatmul.mubr.msk.bf16.gmra.mrb[28].mxu0 %vm611_vm0, %v8363_v24  ;;  %7391 = vmatmul.mubr.msk.bf16.gmra.mrb[28].mxu1 %vm611_vm0, %v8363_v24 }
 0x1a1   : > { %v670_v52 = vpop.f32.mrb[0].mxu0  ;;  %v783_v53 = vpop.f32.mrb[0].mxu1 }
 0x1a2   : > { %v671_v54 = vadd.f32 %v670_v52, %v9438_v44  ;;  %v784_v55 = vadd.f32 %v783_v53, %v9441_v45  ;;  %v672_v56 = vpop.f32.mrb[1].mxu0  ;;  %v785_v57 = vpop.f32.mrb[1].mxu1 }
 0x1a3   : > { %v673_v58 = vadd.f32 %v672_v56, %v9444_v46  ;;  %v786_v59 = vadd.f32 %v785_v57, %v9447_v47  ;;  %v674_v60 = vpop.f32.mrb[2].mxu0  ;;  %v787_v61 = vpop.f32.mrb[2].mxu1 }
 0x1a4   : > { %vm862_vm1 = vcmp.gt.f32.partialorder %v671_v54, 0.0  ;;  %v926_v1 = vmul.f32 0.01, %v671_v54  ;;  %vm864_vm2 = vcmp.gt.f32.partialorder %v784_v55, 0.0  ;;  %v928_v2 = vmul.f32 0.01, %v784_v55 }
 0x1a5   : > { %vm863_vm3 = vcmp.gt.f32.partialorder %v673_v58, 0.0  ;;  %v927_v3 = vmul.f32 0.01, %v673_v58  ;;  %v929_v4 = vmul.f32 0.01, %v786_v59  ;;  %v675_v6 = vadd.f32 %v674_v60, %v9438_v44  ;;  %v676_v8 = vpop.f32.mrb[3].mxu0 }
 0x1a6   : > { %v9453_v5 = vsel %vm862_vm1, %v671_v54, %v926_v1  ;;  %v788_v7 = vadd.f32 %v787_v61, %v9441_v45  ;;  %v789_v9 = vpop.f32.mrb[3].mxu1  ;;  %v9457_v12 = vsel %vm864_vm2, %v784_v55, %v928_v2  ;;  %vm865_vm4 = vcmp.gt.f32.partialorder %v786_v59, 0.0  ;;  %v8405_v1 = vld [vmem:[#allocation6 + $0xcc] ss:$16 sps:$4 sm:$0xff]   ;;  %v8408_v2 = vld [vmem:[#allocation6 + $0xe4] ss:$16 sps:$4 sm:$0xff]  }
 0x1a7   : > { %13052 = vst [vmem:[#allocation21_spill] sm:$0xff] %v9453_v5  ;;  %13053 = vst [vmem:[#allocation22_spill] sm:$0xff] %v9457_v12  ;;  %v1144_v15 = vmul.f32 %v9453_v5, %v9453_v5  ;;  %v9462_v16 = vsel %vm863_vm3, %v673_v58, %v927_v3  ;;  %vm866_vm5 = vcmp.gt.f32.partialorder %v675_v6, 0.0  ;;  %v930_v17 = vmul.f32 0.01, %v675_v6  ;;  %2610 = vmatprep.subr.bf16.mxu1 %v8405_v1 }
 0x1a8   : > { %vm868_vm6 = vcmp.gt.f32.partialorder %v788_v7, 0.0  ;;  %v932_v19 = vmul.f32 0.01, %v788_v7  ;;  %v677_v20 = vadd.f32 %v676_v8, %v9444_v46  ;;  %v790_v21 = vadd.f32 %v789_v9, %v9447_v47  ;;  %v8400_v58 = vld [vmem:[#allocation6 + $0xc0] ss:$16 sps:$4 sm:$0xff]   ;;  %2611 = vmatpush1.bf16.msra.mxu1 %v8403_v63 }
 0x1a9   : > { %v680_v22 = vpop.f32.mrb[4].mxu0  ;;  %v793_v23 = vpop.f32.mrb[4].mxu1  ;;  %v9467_v24 = vsel %vm865_vm4, %v786_v59, %v929_v4  ;;  %v9469_v26 = vsel %vm866_vm5, %v675_v6, %v930_v17  ;;  %v1146_v33 = vmul.f32 %v9457_v12, %v9457_v12  ;;  %v1145_v34 = vmul.f32 %v9462_v16, %v9462_v16  ;;  %2385 = vmatpush1.bf16.msra.mxu0 %v8400_v58  ;;  %v8406_v8 = vld [vmem:[#allocation6 + $0xe0] ss:$16 sps:$4 sm:$0xff]   ;;  %v8411_v9 = vld [vmem:[#allocation6 + $0xec] ss:$16 sps:$4 sm:$0xff]  }
 0x1aa   : > { %13054 = vst [vmem:[#allocation23_spill] sm:$0xff] %v9467_v24  ;;  %13055 = vst [vmem:[#allocation24_spill] sm:$0xff] %v9469_v26  ;;  %v681_v27 = vadd.f32 %v680_v22, %v9438_v44  ;;  %v794_v28 = vadd.f32 %v793_v23, %v9441_v45  ;;  %v682_v29 = vpop.f32.mrb[5].mxu0  ;;  %v795_v31 = vpop.f32.mrb[5].mxu1  ;;  %v9478_v35 = vsel %vm868_vm6, %v788_v7, %v932_v19  ;;  %vm867_vm7 = vcmp.gt.f32.partialorder %v677_v20, 0.0 }
 0x1ab   : > { %13056 = vst [vmem:[#allocation25_spill] sm:$0xff] %v9478_v35  ;;  %v684_v40 = vpop.f32.mrb[6].mxu0  ;;  %v797_v41 = vpop.f32.mrb[6].mxu1  ;;  %v1148_v43 = vmul.f32 %v9469_v26, %v9469_v26  ;;  %v1150_v48 = vmul.f32 %v9478_v35, %v9478_v35  ;;  %v931_v49 = vmul.f32 0.01, %v677_v20  ;;  %vm869_vm8 = vcmp.gt.f32.partialorder %v790_v21, 0.0  ;;  %2386 = vmatprep.subr.bf16.mxu0 %v8408_v2  ;;  %2612 = vmatprep.subr.bf16.mxu1 %v8411_v9 }
 0x1ac   : > { %v686_v50 = vpop.f32.mrb[7].mxu0  ;;  %v799_v51 = vpop.f32.mrb[7].mxu1  ;;  %v1147_v52 = vmul.f32 %v9467_v24, %v9467_v24  ;;  %v933_v53 = vmul.f32 0.01, %v790_v21  ;;  %vm870_vm9 = vcmp.gt.f32.partialorder %v681_v27, 0.0  ;;  %v1056_v55 = vadd.f32 %v9469_v26, %v9453_v5 }
 0x1ad   : > { %v934_v54 = vmul.f32 0.01, %v681_v27  ;;  %v9489_v56 = vsel %vm867_vm7, %v677_v20, %v931_v49  ;;  %vm872_vm10 = vcmp.gt.f32.partialorder %v794_v28, 0.0  ;;  %v936_v57 = vmul.f32 0.01, %v794_v28  ;;  %2387 = vmatpush1.bf16.msra.mxu0 %v8406_v8 }
 0x1ae   : > { %v1098_v59 = vadd.f32 %v9478_v35, %v9457_v12  ;;  %v1149_v60 = vmul.f32 %v9489_v56, %v9489_v56  ;;  %v9496_v61 = vsel %vm869_vm8, %v790_v21, %v933_v53  ;;  %v1208_v3 = vadd.f32 %v1148_v43, %v1144_v15  ;;  %v8414_v49 = vld [vmem:[#allocation6 + $0x104] ss:$16 sps:$4 sm:$0xff]   ;;  %v8415_v1 = vld [vmem:[#allocation6 + $0x108] ss:$16 sps:$4 sm:$0xff]  }
 0x1af   : > { %13057 = vst [vmem:[#allocation26_spill] sm:$0xff] %v9496_v61  ;;  %v9498_v62 = vsel %vm870_vm9, %v681_v27, %v934_v54  ;;  %v1250_v4 = vadd.f32 %v1150_v48, %v1146_v33  ;;  %v1077_v6 = vadd.f32 %v9489_v56, %v9462_v16  ;;  %v1151_v7 = vmul.f32 %v9496_v61, %v9496_v61  ;;  %v8409_v27 = vld [vmem:[#allocation6 + $0xe8] ss:$16 sps:$4 sm:$0xff]   ;;  %v8412_v48 = vld [vmem:[#allocation6 + $0x100] ss:$16 sps:$4 sm:$0xff]  }
 0x1b0   : > { %13058 = vst [vmem:[#allocation27_spill] sm:$0xff] %v9498_v62  ;;  %v1152_v10 = vmul.f32 %v9498_v62, %v9498_v62  ;;  %v9507_v11 = vsel %vm872_vm10, %v794_v28, %v936_v57  ;;  %v683_v13 = vadd.f32 %v682_v29, %v9444_v46  ;;  %v796_v14 = vadd.f32 %v795_v31, %v9447_v47 }
 0x1b1   : > { %13059 = vst [vmem:[#allocation28_spill] sm:$0xff] %v9507_v11  ;;  %v690_v15 = vpop.f32.mrb[8].mxu0  ;;  %v9511_v17 = vpop.f32.mrb[8].mxu1  ;;  %v1229_v18 = vadd.f32 %v1149_v60, %v1145_v34  ;;  %v1119_v19 = vadd.f32 %v9496_v61, %v9467_v24  ;;  %v9516_v20 = vadd.f32 %v1056_v55, %v9498_v62  ;;  %v1154_v21 = vmul.f32 %v9507_v11, %v9507_v11 }
 0x1b2   : > { %v9520_v22 = vpop.f32.mrb[9].mxu0  ;;  %v9522_v23 = vpop.f32.mrb[9].mxu1  ;;  %vm871_vm11 = vcmp.gt.f32.partialorder %v683_v13, 0.0  ;;  %v935_v28 = vmul.f32 0.01, %v683_v13  ;;  %vm873_vm12 = vcmp.gt.f32.partialorder %v796_v14, 0.0  ;;  %v1271_v31 = vadd.f32 %v1151_v7, %v1147_v52  ;;  %2613 = vmatpush1.bf16.msra.mxu1 %v8409_v27  ;;  %2388 = vmatprep.subr.bf16.mxu0 %v8414_v49 }
 0x1b3   : > { %v937_v29 = vmul.f32 0.01, %v796_v14  ;;  %v685_v32 = vadd.f32 %v684_v40, %v9438_v44  ;;  %v798_v33 = vadd.f32 %v797_v41, %v9441_v45  ;;  %v687_v34 = vadd.f32 %v686_v50, %v9444_v46  ;;  %v9527_v42 = vpop.f32.mrb[10].mxu0  ;;  %v9529_v43 = vpop.f32.mrb[10].mxu1  ;;  %v8417_v50 = vld [vmem:[#allocation6 + $0x10c] ss:$16 sps:$4 sm:$0xff]   ;;  %2389 = vmatpush1.bf16.msra.mxu0 %v8412_v48 }
 0x1b4   : > { %v1209_v53 = vadd.f32 %v1208_v3, %v1152_v10  ;;  %v9532_v54 = vsel %vm871_vm11, %v683_v13, %v935_v28  ;;  %v800_v52 = vadd.f32 %v799_v51, %v9447_v47  ;;  %v9537_v40 = vpop.f32.mrb[11].mxu0  ;;  %v9539_v41 = vpop.f32.mrb[11].mxu1  ;;  %v1099_v57 = vadd.f32 %v1098_v59, %v9507_v11  ;;  %2614 = vmatprep.subr.bf16.mxu1 %v8417_v50 }
 0x1b5   : > { %13060 = vst [vmem:[#allocation29_spill] sm:$0xff] %v9532_v54  ;;  %v9534_v55 = vsel %vm873_vm12, %v796_v14, %v937_v29  ;;  %v1251_v58 = vadd.f32 %v1250_v4, %v1154_v21  ;;  %v1153_v60 = vmul.f32 %v9532_v54, %v9532_v54  ;;  %v691_v63 = vadd.f32 %v690_v15, %v9438_v44  ;;  %v8418_v4 = vld [vmem:[#allocation6 + $0x120] ss:$16 sps:$4 sm:$0xff]  }
 0x1b6   : > { %13061 = vst [vmem:[#allocation30_spill] sm:$0xff] %v9534_v55  ;;  %vm874_vm13 = vcmp.gt.f32.partialorder %v685_v32, 0.0  ;;  %v938_v2 = vmul.f32 0.01, %v685_v32  ;;  %vm876_vm14 = vcmp.gt.f32.partialorder %v798_v33, 0.0  ;;  %v1078_v51 = vadd.f32 %v1077_v6, %v9532_v54  ;;  %2615 = vmatpush1.bf16.msra.mxu1 %v8415_v1 }
 0x1b7   : > { %v940_v3 = vmul.f32 0.01, %v798_v33  ;;  %v1155_v7 = vmul.f32 %v9534_v55, %v9534_v55  ;;  %vm875_vm15 = vcmp.gt.f32.partialorder %v687_v34, 0.0  ;;  %v939_v59 = vmul.f32 0.01, %v687_v34 }
 0x1b8   : > { %v9548_v8 = vsel %vm874_vm13, %v685_v32, %v938_v2  ;;  %vm877_vm0 = vcmp.gt.f32.partialorder %v800_v52, 0.0  ;;  %v941_v10 = vmul.f32 0.01, %v800_v52  ;;  %v1230_v15 = vadd.f32 %v1229_v18, %v1153_v60  ;;  %v8420_v32 = vld [vmem:[#allocation6 + $0x124] ss:$16 sps:$4 sm:$0xff]  }
 0x1b9   : > { %13062 = vst [vmem:[#allocation31_spill] sm:$0xff] %v9548_v8  ;;  %v9550_v9 = vsel %vm876_vm14, %v798_v33, %v940_v3  ;;  %v9552_v13 = vpop.f32.mrb[12].mxu0  ;;  %v9554_v14 = vpop.f32.mrb[12].mxu1  ;;  %v1120_v6 = vadd.f32 %v1119_v19, %v9534_v55  ;;  %v1156_v21 = vmul.f32 %v9548_v8, %v9548_v8  ;;  %v8421_v33 = vld [vmem:[#allocation6 + $0x128] ss:$16 sps:$4 sm:$0xff]   ;;  %v9566_v48 = vsel %vm875_vm15, %v687_v34, %v939_v59 }
 0x1ba   : > { %13063 = vst [vmem:[#allocation32_spill] sm:$0xff] %v9550_v9  ;;  %v1158_v27 = vmul.f32 %v9550_v9, %v9550_v9  ;;  %v9561_v28 = vpop.f32.mrb[13].mxu0  ;;  %v9563_v29 = vpop.f32.mrb[13].mxu1  ;;  %13064 = vst [vmem:[#allocation33_spill] sm:$0xff] %v9566_v48  ;;  %v9568_v49 = vsel %vm877_vm0, %v800_v52, %v941_v10  ;;  %vm878_vm1 = vcmp.gt.f32.partialorder %v691_v63, 0.0  ;;  %v1272_v60 = vadd.f32 %v1271_v31, %v1155_v7 }
 0x1bb   : > { %13065 = vst [vmem:[#allocation34_spill] sm:$0xff] %v9568_v49  ;;  %v942_v18 = vmul.f32 0.01, %v691_v63  ;;  %v9570_v19 = vpop.f32.mrb[14].mxu0  ;;  %v9572_v50 = vpop.f32.mrb[14].mxu1  ;;  %v1058_v2 = vadd.f32 %v9516_v20, %v9548_v8  ;;  %v1100_v3 = vadd.f32 %v1099_v57, %v9550_v9  ;;  %v1157_v1 = vmul.f32 %v9566_v48, %v9566_v48  ;;  %2390 = vmatprep.subr.bf16.mxu0 %v8420_v32 }
 0x1bc   : > { %v9579_v25 = vpop.f32.mrb[15].mxu0  ;;  %v9581_v34 = vpop.f32.mrb[15].mxu1  ;;  %v8423_v52 = vld [vmem:[#allocation6 + $0x12c] ss:$16 sps:$4 sm:$0xff]   ;;  %v1210_v59 = vadd.f32 %v1209_v53, %v1156_v21  ;;  %v9583_v10 = vadd.f32 %v1251_v58, %v1158_v27  ;;  %v804_v31 = vadd.f32 %v9511_v17, %v9441_v45  ;;  %2391 = vmatpush1.bf16.msra.mxu0 %v8418_v4  ;;  %v8424_v20 = vld [vmem:[#allocation6 + $0x140] ss:$16 sps:$4 sm:$0xff]   ;;  %v1079_v9 = vadd.f32 %v1078_v51, %v9566_v48 }
 0x1bd   : > { %v9585_v0 = vsel %vm878_vm1, %v691_v63, %v942_v18  ;;  %v8426_v57 = vld [vmem:[#allocation6 + $0x144] ss:$16 sps:$4 sm:$0xff]   ;;  %v8429_v7 = vld [vmem:[#allocation6 + $0x14c] ss:$16 sps:$4 sm:$0xff]   ;;  %v1121_v11 = vadd.f32 %v1120_v6, %v9568_v49  ;;  %v1159_v32 = vmul.f32 %v9568_v49, %v9568_v49  ;;  %v693_v53 = vadd.f32 %v9520_v22, %v9444_v46  ;;  %2616 = vmatprep.subr.bf16.mxu1 %v8423_v52  ;;  %v8427_v58 = vld [vmem:[#allocation6 + $0x148] ss:$16 sps:$4 sm:$0xff]  }
 0x1be   : > { %13066 = vst [vmem:[#allocation35_spill] sm:$0xff] %v9585_v0  ;;  %v1160_v63 = vmul.f32 %v9585_v0, %v9585_v0  ;;  %vm880_vm2 = vcmp.gt.f32.partialorder %v804_v31, 0.0  ;;  %v944_v17 = vmul.f32 0.01, %v804_v31  ;;  %v806_v4 = vadd.f32 %v9522_v23, %v9447_v47  ;;  %2617 = vmatpush1.bf16.msra.mxu1 %v8421_v33  ;;  %2392 = vmatprep.subr.bf16.mxu0 %v8426_v57  ;;  %v8432_v51 = vld [vmem:[#allocation6 + $0x164] ss:$16 sps:$4 sm:$0xff]  }
 0x1bf   : > { %v1231_v6 = vadd.f32 %v1230_v15, %v1157_v1  ;;  %vm879_vm3 = vcmp.gt.f32.partialorder %v693_v53, 0.0  ;;  %v943_v21 = vmul.f32 0.01, %v693_v53  ;;  %v695_v27 = vadd.f32 %v9527_v42, %v9438_v44  ;;  %2618 = vmatprep.subr.bf16.mxu1 %v8429_v7  ;;  %v8430_v22 = vld [vmem:[#allocation6 + $0x160] ss:$16 sps:$4 sm:$0xff]  }
 0x1c0   : > { %v9601_v18 = vsel %vm880_vm2, %v804_v31, %v944_v17  ;;  %vm881_vm4 = vcmp.gt.f32.partialorder %v806_v4, 0.0  ;;  %v945_v52 = vmul.f32 0.01, %v806_v4  ;;  %v808_v49 = vadd.f32 %v9529_v43, %v9441_v45  ;;  %2393 = vmatpush1.bf16.msra.mxu0 %v8424_v20  ;;  %v8433_v57 = vld [vmem:[#allocation6 + $0x168] ss:$16 sps:$4 sm:$0xff]  }
 0x1c1   : > { %13067 = vst [vmem:[#allocation36_spill] sm:$0xff] %v9601_v18  ;;  %v9605_v55 = vpop.f32.mrb[16].mxu0  ;;  %v9607_v23 = vpop.f32.mrb[16].mxu1  ;;  %v1059_v15 = vadd.f32 %v1058_v2, %v9585_v0  ;;  %v1162_v33 = vmul.f32 %v9601_v18, %v9601_v18  ;;  %v9612_v42 = vsel %vm879_vm3, %v693_v53, %v943_v21  ;;  %vm882_vm5 = vcmp.gt.f32.partialorder %v695_v27, 0.0  ;;  %2394 = vmatprep.subr.bf16.mxu0 %v8432_v51  ;;  %v8435_v53 = vld [vmem:[#allocation6 + $0x16c] ss:$16 sps:$4 sm:$0xff]  }
 0x1c2   : > { %13068 = vst [vmem:[#allocation37_spill] sm:$0xff] %v9612_v42  ;;  %v9614_v1 = vpop.f32.mrb[17].mxu0  ;;  %v9616_v31 = vpop.f32.mrb[17].mxu1  ;;  %v1273_v43 = vadd.f32 %v1272_v60, %v1159_v32  ;;  %v1211_v7 = vadd.f32 %v1210_v59, %v1160_v63  ;;  %v9619_v17 = vsel %vm881_vm4, %v806_v4, %v945_v52  ;;  %v946_v20 = vmul.f32 0.01, %v695_v27  ;;  %2619 = vmatpush1.bf16.msra.mxu1 %v8427_v58 }
 0x1c3   : > { %13069 = vst [vmem:[#allocation38_spill] sm:$0xff] %v9619_v17  ;;  %v9621_v35 = vpop.f32.mrb[18].mxu0  ;;  %v9623_v2 = vpop.f32.mrb[18].mxu1  ;;  %v1101_v21 = vadd.f32 %v1100_v3, %v9601_v18  ;;  %v1161_v12 = vmul.f32 %v9612_v42, %v9612_v42  ;;  %v1163_v51 = vmul.f32 %v9619_v17, %v9619_v17  ;;  %vm884_vm6 = vcmp.gt.f32.partialorder %v808_v49, 0.0  ;;  %2620 = vmatprep.subr.bf16.mxu1 %v8435_v53  ;;  %v8436_v4 = vld [vmem:[#allocation6 + $0x180] ss:$16 sps:$4 sm:$0xff]  }
 0x1c4   : > { %v9630_v60 = vpop.f32.mrb[19].mxu0  ;;  %v9632_v59 = vpop.f32.mrb[19].mxu1  ;;  %v1080_v32 = vadd.f32 %v1079_v9, %v9612_v42  ;;  %v9636_v63 = vsel %vm882_vm5, %v695_v27, %v946_v20  ;;  %v948_v58 = vmul.f32 0.01, %v808_v49  ;;  %v697_v3 = vadd.f32 %v9537_v40, %v9444_v46  ;;  %2395 = vmatpush1.bf16.msra.mxu0 %v8430_v22  ;;  %v8438_v52 = vld [vmem:[#allocation6 + $0x184] ss:$16 sps:$4 sm:$0xff]  }
 0x1c5   : > { %13070 = vst [vmem:[#allocation39_spill] sm:$0xff] %v9636_v63  ;;  %v1253_v18 = vadd.f32 %v9583_v10, %v1162_v33  ;;  %v1122_v61 = vadd.f32 %v1121_v11, %v9619_v17  ;;  %v1164_v24 = vmul.f32 %v9636_v63, %v9636_v63  ;;  %v810_v9 = vadd.f32 %v9539_v41, %v9447_v47  ;;  %v8439_v27 = vld [vmem:[#allocation6 + $0x188] ss:$16 sps:$4 sm:$0xff]   ;;  %v8441_v20 = vld [vmem:[#allocation6 + $0x18c] ss:$16 sps:$4 sm:$0xff]  }
 0x1c6   : > { %v9647_v0 = vsel %vm884_vm6, %v808_v49, %v948_v58  ;;  %vm883_vm7 = vcmp.gt.f32.partialorder %v697_v3, 0.0  ;;  %v947_v40 = vmul.f32 0.01, %v697_v3  ;;  %v701_v22 = vadd.f32 %v9552_v13, %v9438_v44  ;;  %2621 = vmatpush1.bf16.msra.mxu1 %v8433_v57  ;;  %2396 = vmatprep.subr.bf16.mxu0 %v8438_v52  ;;  %v8444_v10 = vld [vmem:[#allocation6 + $0x1a4] ss:$16 sps:$4 sm:$0xff]  }
 0x1c7   : > { %13071 = vst [vmem:[#allocation40_spill] sm:$0xff] %v9647_v0  ;;  %v1232_v11 = vadd.f32 %v1231_v6, %v1161_v12  ;;  %v1274_v33 = vadd.f32 %v1273_v43, %v1163_v51  ;;  %v1166_v53 = vmul.f32 %v9647_v0, %v9647_v0  ;;  %vm885_vm8 = vcmp.gt.f32.partialorder %v810_v9, 0.0  ;;  %2622 = vmatprep.subr.bf16.mxu1 %v8441_v20  ;;  %v8442_v41 = vld [vmem:[#allocation6 + $0x1a0] ss:$16 sps:$4 sm:$0xff]   ;;  %v8451_v48 = vld [vmem:[#allocation6 + $0x1c8] ss:$16 sps:$4 sm:$0xff]  }
 0x1c8   : > { %v9653_v17 = vsel %vm883_vm7, %v697_v3, %v947_v40  ;;  %v949_v49 = vmul.f32 0.01, %v810_v9  ;;  %vm886_vm9 = vcmp.gt.f32.partialorder %v701_v22, 0.0  ;;  %v950_v58 = vmul.f32 0.01, %v701_v22  ;;  %2397 = vmatpush1.bf16.msra.mxu0 %v8436_v4 }
 0x1c9   : > { %13072 = vst [vmem:[#allocation41_spill] sm:$0xff] %v9653_v17  ;;  %v9655_v42 = vpop.f32.mrb[20].mxu0  ;;  %v1060_v13 = vadd.f32 %v1059_v15, %v9636_v63  ;;  %v1212_v57 = vadd.f32 %v1211_v7, %v1164_v24  ;;  %v1165_v12 = vmul.f32 %v9653_v17, %v9653_v17  ;;  %v814_v6 = vadd.f32 %v9554_v14, %v9441_v45  ;;  %v9662_v43 = vpop.f32.mrb[20].mxu1  ;;  %v8447_v3 = vld [vmem:[#allocation6 + $0x1ac] ss:$16 sps:$4 sm:$0xff]  }
 0x1ca   : > { %v9664_v51 = vpop.f32.mrb[21].mxu0  ;;  %2398 = vmatprep.subr.bf16.mxu0 %v8444_v10  ;;  %v9667_v52 = vsel %vm885_vm8, %v810_v9, %v949_v49  ;;  %v9669_v20 = vsel %vm886_vm9, %v701_v22, %v950_v58  ;;  %v703_v24 = vadd.f32 %v9561_v28, %v9444_v46  ;;  %v816_v15 = vadd.f32 %v9563_v29, %v9447_v47  ;;  %v9675_v7 = vpop.f32.mrb[21].mxu1  ;;  %v8445_v4 = vld [vmem:[#allocation6 + $0x1a8] ss:$16 sps:$4 sm:$0xff]   ;;  %v8450_v40 = vld [vmem:[#allocation6 + $0x1c4] ss:$16 sps:$4 sm:$0xff]  }
 0x1cb   : > { %13073 = vst [vmem:[#allocation42_spill] sm:$0xff] %v9667_v52  ;;  %13074 = vst [vmem:[#allocation43_spill] sm:$0xff] %v9669_v20  ;;  %v9677_v14 = vpop.f32.mrb[22].mxu0  ;;  %2623 = vmatpush1.bf16.msra.mxu1 %v8439_v27  ;;  %v1102_v10 = vadd.f32 %v1101_v21, %v9647_v0  ;;  %v9680_v63 = vadd.f32 %v1253_v18, %v1166_v53  ;;  %v1081_v9 = vadd.f32 %v1080_v32, %v9653_v17  ;;  %v9685_v28 = vpop.f32.mrb[22].mxu1  ;;  %v8448_v29 = vld [vmem:[#allocation6 + $0x1c0] ss:$16 sps:$4 sm:$0xff]  }
 0x1cc   : > { %v1167_v22 = vmul.f32 %v9667_v52, %v9667_v52  ;;  %v9687_v49 = vpop.f32.mrb[23].mxu0  ;;  %2624 = vmatprep.subr.bf16.mxu1 %v8447_v3  ;;  %v8453_v58 = vld [vmem:[#allocation6 + $0x1cc] ss:$16 sps:$4 sm:$0xff]   ;;  %v1168_v27 = vmul.f32 %v9669_v20, %v9669_v20  ;;  %vm888_vm10 = vcmp.gt.f32.partialorder %v814_v6, 0.0  ;;  %v952_v8 = vmul.f32 0.01, %v814_v6  ;;  %2399 = vmatpush1.bf16.msra.mxu0 %v8442_v41 }
 0x1cd   : > { %vm887_vm11 = vcmp.gt.f32.partialorder %v703_v24, 0.0  ;;  %v9691_v18 = vpop.f32.mrb[23].mxu1  ;;  %v1233_v21 = vadd.f32 %v1232_v11, %v1165_v12  ;;  %v951_v32 = vmul.f32 0.01, %v703_v24  ;;  %vm889_vm12 = vcmp.gt.f32.partialorder %v816_v15, 0.0  ;;  %2400 = vmatprep.subr.bf16.mxu0 %v8450_v40 }
 0x1ce   : > { %v953_v53 = vmul.f32 0.01, %v816_v15  ;;  %v1123_v0 = vadd.f32 %v1122_v61, %v9667_v52  ;;  %v9694_v17 = vsel %vm888_vm10, %v814_v6, %v952_v8  ;;  %v705_v3 = vadd.f32 %v9570_v19, %v9438_v44  ;;  %v8456_v54 = vld [vmem:[#allocation6 + $0x1e4] ss:$16 sps:$4 sm:$0xff]   ;;  %v8459_v61 = vld [vmem:[#allocation6 + $0x1ec] ss:$16 sps:$4 sm:$0xff]  }
 0x1cf   : > { %13075 = vst [vmem:[#allocation44_spill] sm:$0xff] %v9694_v17  ;;  %v818_v62 = vadd.f32 %v9572_v50, %v9441_v45  ;;  %2625 = vmatpush1.bf16.msra.mxu1 %v8445_v4  ;;  %v1275_v26 = vadd.f32 %v1274_v33, %v1167_v22  ;;  %v1061_v11 = vadd.f32 %v1060_v13, %v9669_v20  ;;  %v8454_v13 = vld [vmem:[#allocation6 + $0x1e0] ss:$16 sps:$4 sm:$0xff]   ;;  %v8462_v52 = vld [vmem:[#allocation6 + $0x204] ss:$16 sps:$4 sm:$0xff]  }
 0x1d0   : > { %v9702_v41 = vsel %vm887_vm11, %v703_v24, %v951_v32  ;;  %v9704_v12 = vsel %vm889_vm12, %v816_v15, %v953_v53  ;;  %2626 = vmatprep.subr.bf16.mxu1 %v8453_v58  ;;  %v1213_v8 = vadd.f32 %v1212_v57, %v1168_v27  ;;  %v1103_v6 = vadd.f32 %v1102_v10, %v9694_v17  ;;  %v8457_v32 = vld [vmem:[#allocation6 + $0x1e8] ss:$16 sps:$4 sm:$0xff]  }
 0x1d1   : > { %13076 = vst [vmem:[#allocation45_spill] sm:$0xff] %v9702_v41  ;;  %13077 = vst [vmem:[#allocation46_spill] sm:$0xff] %v9704_v12  ;;  %v1170_v19 = vmul.f32 %v9694_v17, %v9694_v17  ;;  %v1169_v50 = vmul.f32 %v9702_v41, %v9702_v41  ;;  %v9711_v4 = vpop.f32.mrb[24].mxu0  ;;  %v9713_v33 = vpop.f32.mrb[24].mxu1  ;;  %2401 = vmatpush1.bf16.msra.mxu0 %v8448_v29  ;;  %v1082_v24 = vadd.f32 %v1081_v9, %v9702_v41 }
 0x1d2   : > { %vm890_vm13 = vcmp.gt.f32.partialorder %v705_v3, 0.0  ;;  %v954_v15 = vmul.f32 0.01, %v705_v3  ;;  %vm892_vm14 = vcmp.gt.f32.partialorder %v818_v62, 0.0  ;;  %v9716_v57 = vpop.f32.mrb[25].mxu0  ;;  %v9718_v40 = vpop.f32.mrb[25].mxu1  ;;  %2402 = vmatprep.subr.bf16.mxu0 %v8456_v54  ;;  %v1124_v10 = vadd.f32 %v1123_v0, %v9704_v12 }
 0x1d3   : > { %v1171_v22 = vmul.f32 %v9704_v12, %v9704_v12  ;;  %v956_v58 = vmul.f32 0.01, %v818_v62  ;;  %v707_v29 = vadd.f32 %v9579_v25, %v9444_v46  ;;  %v9725_v27 = vpop.f32.mrb[26].mxu0  ;;  %v9727_v9 = vpop.f32.mrb[26].mxu1  ;;  %2627 = vmatpush1.bf16.msra.mxu1 %v8451_v48  ;;  %v820_v54 = vadd.f32 %v9581_v34, %v9447_v47  ;;  %v8465_v34 = vld [vmem:[#allocation6 + $0x20c] ss:$16 sps:$4 sm:$0xff]  }
 0x1d4   : > { %v9729_v53 = vsel %vm890_vm13, %v705_v3, %v954_v15  ;;  %v711_v0 = vadd.f32 %v9605_v55, %v9438_v44  ;;  %v824_v17 = vadd.f32 %v9607_v23, %v9441_v45  ;;  %v9737_v12 = vpop.f32.mrb[27].mxu0  ;;  %v9739_v25 = vpop.f32.mrb[27].mxu1  ;;  %2628 = vmatprep.subr.bf16.mxu1 %v8459_v61  ;;  %v1255_v48 = vadd.f32 %v9680_v63, %v1170_v19 }
 0x1d5   : > { %13078 = vst [vmem:[#allocation47_spill] sm:$0xff] %v9729_v53  ;;  %v1234_v20 = vadd.f32 %v1233_v21, %v1169_v50  ;;  %v9743_v3 = vsel %vm892_vm14, %v818_v62, %v956_v58  ;;  %vm891_vm15 = vcmp.gt.f32.partialorder %v707_v29, 0.0  ;;  %2403 = vmatpush1.bf16.msra.mxu0 %v8454_v13  ;;  %v1172_v55 = vmul.f32 %v9729_v53, %v9729_v53 }
 0x1d6   : > { %13079 = vst [vmem:[#allocation48_spill] sm:$0xff] %v9743_v3  ;;  %v1174_v23 = vmul.f32 %v9743_v3, %v9743_v3  ;;  %v955_v15 = vmul.f32 0.01, %v707_v29  ;;  %vm893_vm0 = vcmp.gt.f32.partialorder %v820_v54, 0.0  ;;  %2485 = vmatprep.subr.bf16.mxu0 %v8462_v52  ;;  %v1276_v61 = vadd.f32 %v1275_v26, %v1171_v22 }
 0x1d7   : > { %v957_v41 = vmul.f32 0.01, %v820_v54  ;;  %vm894_vm1 = vcmp.gt.f32.partialorder %v711_v0, 0.0  ;;  %v958_v63 = vmul.f32 0.01, %v711_v0  ;;  %2629 = vmatpush1.bf16.msra.mxu1 %v8457_v32  ;;  %v1062_v62 = vadd.f32 %v1061_v11, %v9729_v53 }
 0x1d8   : > { %v9750_v21 = vsel %vm891_vm15, %v707_v29, %v955_v15  ;;  %vm896_vm2 = vcmp.gt.f32.partialorder %v824_v17, 0.0  ;;  %v960_v19 = vmul.f32 0.01, %v824_v17  ;;  %2711 = vmatprep.subr.bf16.mxu1 %v8465_v34  ;;  %v1104_v50 = vadd.f32 %v1103_v6, %v9743_v3 }
 0x1d9   : > { %13080 = vst [vmem:[#allocation49_spill] sm:$0xff] %v9750_v21  ;;  %v1173_v13 = vmul.f32 %v9750_v21, %v9750_v21  ;;  %v9755_v58 = vsel %vm893_vm0, %v820_v54, %v957_v41  ;;  %v9757_v52 = vsel %vm894_vm1, %v711_v0, %v958_v63  ;;  %v9759_v26 = vpop.f32.mrb[28].mxu0  ;;  %v9761_v22 = vpop.f32.mrb[28].mxu1  ;;  %v1214_v32 = vadd.f32 %v1213_v8, %v1172_v55 }
 0x1da   : > { %13081 = vst [vmem:[#allocation50_spill] sm:$0xff] %v9755_v58  ;;  %13082 = vst [vmem:[#allocation51_spill] sm:$0xff] %v9757_v52  ;;  %v1256_v11 = vadd.f32 %v1255_v48, %v1174_v23  ;;  %v1083_v29 = vadd.f32 %v1082_v24, %v9750_v21  ;;  %v1175_v34 = vmul.f32 %v9755_v58, %v9755_v58  ;;  %v9766_v15 = vpop.f32.mrb[29].mxu0  ;;  %v9768_v6 = vpop.f32.mrb[29].mxu1 }
 0x1db   : > { %v1176_v41 = vmul.f32 %v9757_v52, %v9757_v52  ;;  %v9773_v54 = vsel %vm896_vm2, %v824_v17, %v960_v19  ;;  %v713_v0 = vadd.f32 %v9614_v1, %v9444_v46  ;;  %v826_v8 = vadd.f32 %v9616_v31, %v9447_v47  ;;  %v9779_v24 = vpop.f32.mrb[30].mxu0  ;;  %v9781_v48 = vpop.f32.mrb[30].mxu1 }
 0x1dc   : > { %13083 = vst [vmem:[#allocation52_spill] sm:$0xff] %v9773_v54  ;;  %v1235_v55 = vadd.f32 %v1234_v20, %v1173_v13  ;;  %v1125_v23 = vadd.f32 %v1124_v10, %v9755_v58  ;;  %v1063_v63 = vadd.f32 %v1062_v62, %v9757_v52  ;;  %v1178_v3 = vmul.f32 %v9773_v54, %v9773_v54  ;;  %v9787_v17 = vpop.f32.mrb[31].mxu0  ;;  %v9789_v19 = vpop.f32.mrb[31].mxu1 }
 0x1dd   : > { %vm895_vm3 = vcmp.gt.f32.partialorder %v713_v0, 0.0  ;;  %v959_v1 = vmul.f32 0.01, %v713_v0  ;;  %vm897_vm4 = vcmp.gt.f32.partialorder %v826_v8, 0.0  ;;  %v961_v31 = vmul.f32 0.01, %v826_v8 }
 0x1de   : > { %v1277_v53 = vadd.f32 %v1276_v61, %v1175_v34  ;;  %v715_v21 = vadd.f32 %v9621_v35, %v9438_v44  ;;  %v828_v20 = vadd.f32 %v9623_v2, %v9441_v45  ;;  %v717_v10 = vadd.f32 %v9630_v60, %v9444_v46 }
 0x1df   : > { %v1215_v62 = vadd.f32 %v1214_v32, %v1176_v41  ;;  %v9797_v13 = vsel %vm895_vm3, %v713_v0, %v959_v1  ;;  %v9799_v58 = vsel %vm897_vm4, %v826_v8, %v961_v31  ;;  %v830_v52 = vadd.f32 %v9632_v59, %v9447_v47 }
 0x1e0   : > { %v1105_v5 = vadd.f32 %v1104_v50, %v9773_v54  ;;  %v1257_v61 = vadd.f32 %v1256_v11, %v1178_v3  ;;  %v1177_v35 = vmul.f32 %v9797_v13, %v9797_v13  ;;  %v721_v2 = vadd.f32 %v9655_v42, %v9438_v44 }
 0x1e1   : > { %vm898_vm5 = vcmp.gt.f32.partialorder %v715_v21, 0.0  ;;  %v962_v34 = vmul.f32 0.01, %v715_v21  ;;  %vm900_vm6 = vcmp.gt.f32.partialorder %v828_v20, 0.0  ;;  %v964_v60 = vmul.f32 0.01, %v828_v20 }
 0x1e2   : > { %v1084_v32 = vadd.f32 %v1083_v29, %v9797_v13  ;;  %v1179_v41 = vmul.f32 %v9799_v58, %v9799_v58  ;;  %vm899_vm7 = vcmp.gt.f32.partialorder %v717_v10, 0.0  ;;  %v963_v59 = vmul.f32 0.01, %v717_v10 }
 0x1e3   : > { %v9811_v0 = vsel %vm898_vm5, %v715_v21, %v962_v34  ;;  %v9813_v3 = vsel %vm900_vm6, %v828_v20, %v964_v60  ;;  %vm901_vm8 = vcmp.gt.f32.partialorder %v830_v52, 0.0  ;;  %v965_v50 = vmul.f32 0.01, %v830_v52 }
 0x1e4   : > { %v1236_v11 = vadd.f32 %v1235_v55, %v1177_v35  ;;  %v1126_v42 = vadd.f32 %v1125_v23, %v9799_v58  ;;  %v1180_v8 = vmul.f32 %v9811_v0, %v9811_v0  ;;  %v1182_v29 = vmul.f32 %v9813_v3, %v9813_v3 }
 0x1e5   : > { %v9820_v1 = vsel %vm899_vm7, %v717_v10, %v963_v59  ;;  %v9822_v31 = vsel %vm901_vm8, %v830_v52, %v965_v50  ;;  %vm902_vm9 = vcmp.gt.f32.partialorder %v721_v2, 0.0  ;;  %v966_v21 = vmul.f32 0.01, %v721_v2 }
 0x1e6   : > { %v1278_v34 = vadd.f32 %v1277_v53, %v1179_v41  ;;  %v1064_v20 = vadd.f32 %v1063_v63, %v9811_v0  ;;  %v1106_v60 = vadd.f32 %v1105_v5, %v9813_v3  ;;  %v1181_v55 = vmul.f32 %v9820_v1, %v9820_v1 }
 0x1e7   : > { %v1216_v23 = vadd.f32 %v1215_v62, %v1180_v8  ;;  %v1258_v35 = vadd.f32 %v1257_v61, %v1182_v29  ;;  %v9828_v54 = vsel %vm902_vm9, %v721_v2, %v966_v21  ;;  %v834_v10 = vadd.f32 %v9662_v43, %v9441_v45 }
 0x1e8   : > { %v1085_v52 = vadd.f32 %v1084_v32, %v9820_v1  ;;  %v1127_v59 = vadd.f32 %v1126_v42, %v9822_v31  ;;  %v1183_v53 = vmul.f32 %v9822_v31, %v9822_v31  ;;  %v723_v5 = vadd.f32 %v9664_v51, %v9444_v46 }
 0x1e9   : > { %v1184_v63 = vmul.f32 %v9828_v54, %v9828_v54  ;;  %vm904_vm10 = vcmp.gt.f32.partialorder %v834_v10, 0.0  ;;  %v968_v62 = vmul.f32 0.01, %v834_v10  ;;  %v836_v61 = vadd.f32 %v9675_v7, %v9447_v47 }
 0x1ea   : > { %v1237_v2 = vadd.f32 %v1236_v11, %v1181_v55  ;;  %vm903_vm11 = vcmp.gt.f32.partialorder %v723_v5, 0.0  ;;  %v967_v43 = vmul.f32 0.01, %v723_v5  ;;  %v725_v32 = vadd.f32 %v9677_v14, %v9438_v44 }
 0x1eb   : > { %v9844_v41 = vsel %vm904_vm10, %v834_v10, %v968_v62  ;;  %vm905_vm12 = vcmp.gt.f32.partialorder %v836_v61, 0.0  ;;  %v969_v50 = vmul.f32 0.01, %v836_v61  ;;  %v838_v51 = vadd.f32 %v9685_v28, %v9441_v45 }
 0x1ec   : > { %13084 = vst [vmem:[#allocation53_spill] sm:$0xff] %v9844_v41  ;;  %v1065_v42 = vadd.f32 %v1064_v20, %v9828_v54  ;;  %v1186_v8 = vmul.f32 %v9844_v41, %v9844_v41  ;;  %v9851_v29 = vsel %vm903_vm11, %v723_v5, %v967_v43  ;;  %vm906_vm13 = vcmp.gt.f32.partialorder %v725_v32, 0.0 }
 0x1ed   : > { %v1279_v7 = vadd.f32 %v1278_v34, %v1183_v53  ;;  %v1217_v11 = vadd.f32 %v1216_v23, %v1184_v63  ;;  %v9853_v21 = vsel %vm905_vm12, %v836_v61, %v969_v50  ;;  %v970_v14 = vmul.f32 0.01, %v725_v32 }
 0x1ee   : > { %v1107_v55 = vadd.f32 %v1106_v60, %v9844_v41  ;;  %v1185_v10 = vmul.f32 %v9851_v29, %v9851_v29  ;;  %v1187_v28 = vmul.f32 %v9853_v21, %v9853_v21  ;;  %vm908_vm14 = vcmp.gt.f32.partialorder %v838_v51, 0.0 }
 0x1ef   : > { %v1086_v20 = vadd.f32 %v1085_v52, %v9851_v29  ;;  %v9861_v62 = vsel %vm906_vm13, %v725_v32, %v970_v14  ;;  %v972_v5 = vmul.f32 0.01, %v838_v51  ;;  %v727_v34 = vadd.f32 %v9687_v49, %v9444_v46 }
 0x1f0   : > { %v1259_v23 = vadd.f32 %v1258_v35, %v1186_v8  ;;  %v1128_v53 = vadd.f32 %v1127_v59, %v9853_v21  ;;  %v1188_v60 = vmul.f32 %v9861_v62, %v9861_v62  ;;  %v840_v63 = vadd.f32 %v9691_v18, %v9447_v47 }
 0x1f1   : > { %v9870_v61 = vsel %vm908_vm14, %v838_v51, %v972_v5  ;;  %vm907_vm15 = vcmp.gt.f32.partialorder %v727_v34, 0.0  ;;  %v971_v43 = vmul.f32 0.01, %v727_v34  ;;  %v731_v52 = vadd.f32 %v9711_v4, %v9438_v44 }
 0x1f2   : > { %13085 = vst [vmem:[#allocation54_spill] sm:$0xff] %v9870_v61  ;;  %v1238_v32 = vadd.f32 %v1237_v2, %v1185_v10  ;;  %v1280_v50 = vadd.f32 %v1279_v7, %v1187_v28  ;;  %v1190_v49 = vmul.f32 %v9870_v61, %v9870_v61  ;;  %vm909_vm0 = vcmp.gt.f32.partialorder %v840_v63, 0.0 }
 0x1f3   : > { %v9876_v35 = vsel %vm907_vm15, %v727_v34, %v971_v43  ;;  %v973_v59 = vmul.f32 0.01, %v840_v63  ;;  %vm910_vm1 = vcmp.gt.f32.partialorder %v731_v52, 0.0  ;;  %v974_v8 = vmul.f32 0.01, %v731_v52 }
 0x1f4   : > { %v1066_v18 = vadd.f32 %v1065_v42, %v9861_v62  ;;  %v1218_v51 = vadd.f32 %v1217_v11, %v1188_v60  ;;  %v1189_v14 = vmul.f32 %v9876_v35, %v9876_v35  ;;  %v844_v4 = vadd.f32 %v9713_v33, %v9441_v45 }
 0x1f5   : > { %v9883_v2 = vsel %vm909_vm0, %v840_v63, %v973_v59  ;;  %v9885_v7 = vsel %vm910_vm1, %v731_v52, %v974_v8  ;;  %v733_v10 = vadd.f32 %v9716_v57, %v9444_v46  ;;  %v846_v28 = vadd.f32 %v9718_v40, %v9447_v47 }
 0x1f6   : > { %13086 = vst [vmem:[#allocation55_spill] sm:$0xff] %v9883_v2  ;;  %v1108_v5 = vadd.f32 %v1107_v55, %v9870_v61  ;;  %v1260_v42 = vadd.f32 %v1259_v23, %v1190_v49  ;;  %v1087_v11 = vadd.f32 %v1086_v20, %v9876_v35  ;;  %v1191_v34 = vmul.f32 %v9883_v2, %v9883_v2 }
 0x1f7   : > { %v1192_v33 = vmul.f32 %v9885_v7, %v9885_v7  ;;  %vm912_vm2 = vcmp.gt.f32.partialorder %v844_v4, 0.0  ;;  %v976_v60 = vmul.f32 0.01, %v844_v4  ;;  %vm911_vm3 = vcmp.gt.f32.partialorder %v733_v10, 0.0 }
 0x1f8   : > { %v1239_v63 = vadd.f32 %v1238_v32, %v1189_v14  ;;  %v975_v43 = vmul.f32 0.01, %v733_v10  ;;  %vm913_vm4 = vcmp.gt.f32.partialorder %v846_v28, 0.0  ;;  %v977_v57 = vmul.f32 0.01, %v846_v28 }
 0x1f9   : > { %v1129_v40 = vadd.f32 %v1128_v53, %v9883_v2  ;;  %v9898_v52 = vsel %vm912_vm2, %v844_v4, %v976_v60  ;;  %v735_v55 = vadd.f32 %v9725_v27, %v9438_v44  ;;  %v848_v20 = vadd.f32 %v9727_v9, %v9441_v45 }
 0x1fa   : > { %13087 = vst [vmem:[#allocation56_spill] sm:$0xff] %v9898_v52  ;;  %v1281_v23 = vadd.f32 %v1280_v50, %v1191_v34  ;;  %v1067_v49 = vadd.f32 %v1066_v18, %v9885_v7  ;;  %v9905_v59 = vsel %vm911_vm3, %v733_v10, %v975_v43  ;;  %v9907_v8 = vsel %vm913_vm4, %v846_v28, %v977_v57 }
 0x1fb   : > { %13088 = vst [vmem:[#allocation57_spill] sm:$0xff] %v9907_v8  ;;  %v1219_v32 = vadd.f32 %v1218_v51, %v1192_v33  ;;  %v1109_v14 = vadd.f32 %v1108_v5, %v9898_v52  ;;  %v1194_v53 = vmul.f32 %v9898_v52, %v9898_v52  ;;  %v1193_v4 = vmul.f32 %v9905_v59, %v9905_v59 }
 0x1fc   : > { %v1088_v27 = vadd.f32 %v1087_v11, %v9905_v59  ;;  %vm914_vm5 = vcmp.gt.f32.partialorder %v735_v55, 0.0  ;;  %v978_v9 = vmul.f32 0.01, %v735_v55  ;;  %vm916_vm6 = vcmp.gt.f32.partialorder %v848_v20, 0.0 }
 0x1fd   : > { %v1130_v50 = vadd.f32 %v1129_v40, %v9907_v8  ;;  %v1195_v18 = vmul.f32 %v9907_v8, %v9907_v8  ;;  %v980_v10 = vmul.f32 0.01, %v848_v20  ;;  %v737_v51 = vadd.f32 %v9737_v12, %v9444_v46  ;;  %v8460_v8 = vld [vmem:[#allocation6 + $0x200] ss:$16 sps:$4 sm:$0xff]  }
 0x1fe   : > { %v9920_v28 = vsel %vm914_vm5, %v735_v55, %v978_v9  ;;  %v850_v5 = vadd.f32 %v9739_v25, %v9447_v47  ;;  %v741_v11 = vadd.f32 %v9759_v26, %v9438_v44  ;;  %v854_v34 = vadd.f32 %v9761_v22, %v9441_v45 }
 0x1ff   : > { %v1261_v33 = vadd.f32 %v1260_v42, %v1194_v53  ;;  %v1240_v60 = vadd.f32 %v1239_v63, %v1193_v4  ;;  %v9928_v43 = vsel %vm916_vm6, %v848_v20, %v980_v10  ;;  %vm915_vm7 = vcmp.gt.f32.partialorder %v737_v51, 0.0 }
 0x200   : > { %13089 = vst [vmem:[#allocation58_spill] sm:$0xff] %v9928_v43  ;;  %v1196_v57 = vmul.f32 %v9920_v28, %v9920_v28  ;;  %v1198_v12 = vmul.f32 %v9928_v43, %v9928_v43  ;;  %v979_v40 = vmul.f32 0.01, %v737_v51  ;;  %vm917_vm8 = vcmp.gt.f32.partialorder %v850_v5, 0.0 }
 0x201   : > { %v1282_v25 = vadd.f32 %v1281_v23, %v1195_v18  ;;  %v981_v55 = vmul.f32 0.01, %v850_v5  ;;  %vm918_vm9 = vcmp.gt.f32.partialorder %v741_v11, 0.0  ;;  %v982_v26 = vmul.f32 0.01, %v741_v11 }
 0x202   : > { %v1068_v9 = vadd.f32 %v1067_v49, %v9920_v28  ;;  %v9935_v22 = vsel %vm915_vm7, %v737_v51, %v979_v40  ;;  %vm920_vm10 = vcmp.gt.f32.partialorder %v854_v34, 0.0  ;;  %v984_v42 = vmul.f32 0.01, %v854_v34 }
 0x203   : > { %v1110_v63 = vadd.f32 %v1109_v14, %v9928_v43  ;;  %v1197_v20 = vmul.f32 %v9935_v22, %v9935_v22  ;;  %v9940_v53 = vsel %vm917_vm8, %v850_v5, %v981_v55  ;;  %v9942_v4 = vsel %vm918_vm9, %v741_v11, %v982_v26 }
 0x204   : > { %13090 = vst [vmem:[#allocation59_spill] sm:$0xff] %v9940_v53  ;;  %v1220_v10 = vadd.f32 %v1219_v32, %v1196_v57  ;;  %v1262_v23 = vadd.f32 %v1261_v33, %v1198_v12  ;;  %v1089_v18 = vadd.f32 %v1088_v27, %v9935_v22  ;;  %v1199_v49 = vmul.f32 %v9940_v53, %v9940_v53 }
 0x205   : > { %v1200_v51 = vmul.f32 %v9942_v4, %v9942_v4  ;;  %v9949_v40 = vsel %vm920_vm10, %v854_v34, %v984_v42  ;;  %v743_v14 = vadd.f32 %v9766_v15, %v9444_v46  ;;  %v856_v5 = vadd.f32 %v9768_v6, %v9447_v47 }
 0x206   : > { %13091 = vst [vmem:[#allocation60_spill] sm:$0xff] %v9949_v40  ;;  %v1241_v11 = vadd.f32 %v1240_v60, %v1197_v20  ;;  %v1131_v32 = vadd.f32 %v1130_v50, %v9940_v53  ;;  %v1069_v33 = vadd.f32 %v1068_v9, %v9942_v4  ;;  %v1202_v27 = vmul.f32 %v9949_v40, %v9949_v40 }
 0x207   : > { %vm919_vm11 = vcmp.gt.f32.partialorder %v743_v14, 0.0  ;;  %v983_v57 = vmul.f32 0.01, %v743_v14  ;;  %vm921_vm12 = vcmp.gt.f32.partialorder %v856_v5, 0.0  ;;  %v985_v12 = vmul.f32 0.01, %v856_v5 }
 0x208   : > { %v1283_v34 = vadd.f32 %v1282_v25, %v1199_v49  ;;  %v745_v55 = vadd.f32 %v9779_v24, %v9438_v44  ;;  %v858_v15 = vadd.f32 %v9781_v48, %v9441_v45  ;;  %v747_v6 = vadd.f32 %v9787_v17, %v9444_v46 }
 0x209   : > { %v1221_v50 = vadd.f32 %v1220_v10, %v1200_v51  ;;  %v9965_v60 = vsel %vm919_vm11, %v743_v14, %v983_v57  ;;  %v9967_v26 = vsel %vm921_vm12, %v856_v5, %v985_v12  ;;  %v860_v9 = vadd.f32 %v9789_v19, %v9447_v47 }
 0x20a   : > { %13092 = vst [vmem:[#allocation61_spill] sm:$0xff] %v9967_v26  ;;  %v1111_v42 = vadd.f32 %v1110_v63, %v9949_v40  ;;  %v1263_v25 = vadd.f32 %v1262_v23, %v1202_v27  ;;  %v1201_v44 = vmul.f32 %v9965_v60, %v9965_v60  ;;  %v1203_v45 = vmul.f32 %v9967_v26, %v9967_v26 }
 0x20b   : > { %vm922_vm13 = vcmp.gt.f32.partialorder %v745_v55, 0.0  ;;  %v986_v24 = vmul.f32 0.01, %v745_v55  ;;  %vm924_vm14 = vcmp.gt.f32.partialorder %v858_v15, 0.0  ;;  %v988_v46 = vmul.f32 0.01, %v858_v15 }
 0x20c   : > { %v1090_v48 = vadd.f32 %v1089_v18, %v9965_v60  ;;  %v1132_v17 = vadd.f32 %v1131_v32, %v9967_v26  ;;  %vm923_vm15 = vcmp.gt.f32.partialorder %v747_v6, 0.0  ;;  %v987_v20 = vmul.f32 0.01, %v747_v6 }
 0x20d   : > { %v9978_v47 = vsel %vm922_vm13, %v745_v55, %v986_v24  ;;  %v9980_v19 = vsel %vm924_vm14, %v858_v15, %v988_v46  ;;  %vm925_vm0 = vcmp.gt.f32.partialorder %v860_v9, 0.0  ;;  %v989_v63 = vmul.f32 0.01, %v860_v9 }
 0x20e   : > { %13093 = vst [vmem:[#allocation62_spill] sm:$0xff] %v9980_v19  ;;  %v1070_v10 = vadd.f32 %v1069_v33, %v9978_v47  ;;  %v1204_v23 = vmul.f32 %v9978_v47, %v9978_v47  ;;  %v1112_v49 = vadd.f32 %v1111_v42, %v9980_v19  ;;  %v1206_v18 = vmul.f32 %v9980_v19, %v9980_v19 }
 0x20f   : > { %v1242_v51 = vadd.f32 %v1241_v11, %v1201_v44  ;;  %v1284_v14 = vadd.f32 %v1283_v34, %v1203_v45  ;;  %v9988_v5 = vsel %vm923_vm15, %v747_v6, %v987_v20  ;;  %v9990_v32 = vsel %vm925_vm0, %v860_v9, %v989_v63 }
 0x210   : > { %v1071_v27 = vrot.slane %v1070_v10, 4  ;;  %v1222_v57 = vadd.f32 %v1221_v50, %v1204_v23  ;;  %v1113_v12 = vrot.slane %v1112_v49, 4  ;;  %v1264_v55 = vadd.f32 %v1263_v25, %v1206_v18 }
 0x211   : > { %v1091_v33 = vadd.f32 %v1090_v48, %v9988_v5  ;;  %v1205_v15 = vmul.f32 %v9988_v5, %v9988_v5  ;;  %v1133_v42 = vadd.f32 %v1132_v17, %v9990_v32  ;;  %v1207_v24 = vmul.f32 %v9990_v32, %v9990_v32 }
 0x212   : > { %v1072_v11 = vadd.f32 %v1071_v27, %v1070_v10  ;;  %v1223_v34 = vrot.slane %v1222_v57, 4  ;;  %v1114_v6 = vadd.f32 %v1113_v12, %v1112_v49  ;;  %v1265_v44 = vrot.slane %v1264_v55, 4 }
 0x213   : > { %v1092_v9 = vrot.slane %v1091_v33, 4  ;;  %v1243_v45 = vadd.f32 %v1242_v51, %v1205_v15  ;;  %v1134_v46 = vrot.slane %v1133_v42, 4  ;;  %v1285_v50 = vadd.f32 %v1284_v14, %v1207_v24 }
 0x214   : > { %v1073_v20 = vrot.slane %v1072_v11, 2  ;;  %v1224_v25 = vadd.f32 %v1223_v34, %v1222_v57  ;;  %v1115_v63 = vrot.slane %v1114_v6, 2  ;;  %v1266_v48 = vadd.f32 %v1265_v44, %v1264_v55 }
 0x215   : > { %v1093_v23 = vadd.f32 %v1092_v9, %v1091_v33  ;;  %v1244_v18 = vrot.slane %v1243_v45, 4  ;;  %v1135_v19 = vadd.f32 %v1134_v46, %v1133_v42  ;;  %v1286_v40 = vrot.slane %v1285_v50, 4 }
 0x216   : > { %v1074_v17 = vadd.f32 %v1073_v20, %v1072_v11  ;;  %v1225_v26 = vrot.slane %v1224_v25, 2  ;;  %v1116_v43 = vadd.f32 %v1115_v63, %v1114_v6  ;;  %v1267_v52 = vrot.slane %v1266_v48, 2 }
 0x217   : > { %v1094_v10 = vrot.slane %v1093_v23, 2  ;;  %v1245_v27 = vadd.f32 %v1244_v18, %v1243_v45  ;;  %v1136_v49 = vrot.slane %v1135_v19, 2  ;;  %v1287_v12 = vadd.f32 %v1286_v40, %v1285_v50 }
 0x218   : > { %v1075_v53 = vrot.slane %v1074_v17, 1  ;;  %v1226_v51 = vadd.f32 %v1225_v26, %v1224_v25  ;;  %v1117_v15 = vrot.slane %v1116_v43, 1  ;;  %v1268_v14 = vadd.f32 %v1267_v52, %v1266_v48 }
 0x219   : > { %v1095_v24 = vadd.f32 %v1094_v10, %v1093_v23  ;;  %v1246_v57 = vrot.slane %v1245_v27, 2  ;;  %v1137_v34 = vadd.f32 %v1136_v49, %v1135_v19  ;;  %v1288_v55 = vrot.slane %v1287_v12, 2 }
 0x21a   : > { %v1076_v33 = vadd.f32 %v1075_v53, %v1074_v17  ;;  %v1227_v44 = vrot.slane %v1226_v51, 1  ;;  %v1118_v42 = vadd.f32 %v1117_v15, %v1116_v43  ;;  %v1269_v9 = vrot.slane %v1268_v14, 1 }
 0x21b   : > { %v1096_v11 = vrot.slane %v1095_v24, 1  ;;  %v1247_v46 = vadd.f32 %v1246_v57, %v1245_v27  ;;  %v1138_v6 = vrot.slane %v1137_v34, 1  ;;  %v1289_v20 = vadd.f32 %v1288_v55, %v1287_v12 }
 0x21c   : > { %v1140_v63 = vmul.f32 0.0078125, %v1076_v33  ;;  %v1228_v45 = vadd.f32 %v1227_v44, %v1226_v51  ;;  %v1142_v18 = vmul.f32 0.0078125, %v1118_v42  ;;  %v1270_v40 = vadd.f32 %v1269_v9, %v1268_v14 }
 0x21d   : > { %v1097_v50 = vadd.f32 %v1096_v11, %v1095_v24  ;;  %v1248_v26 = vrot.slane %v1247_v46, 1  ;;  %v1139_v25 = vadd.f32 %v1138_v6, %v1137_v34  ;;  %v1290_v52 = vrot.slane %v1289_v20, 1 }
 0x21e   : > { %v1292_v48 = vmul.f32 0.0078125, %v1228_v45  ;;  %v1296_v23 = vmul.f32 %v1140_v63, %v1140_v63  ;;  %v1294_v19 = vmul.f32 0.0078125, %v1270_v40  ;;  %v1298_v10 = vmul.f32 %v1142_v18, %v1142_v18 }
 0x21f   : > { %v1141_v53 = vmul.f32 0.0078125, %v1097_v50  ;;  %v1249_v17 = vadd.f32 %v1248_v26, %v1247_v46  ;;  %v1143_v43 = vmul.f32 0.0078125, %v1139_v25  ;;  %v1291_v49 = vadd.f32 %v1290_v52, %v1289_v20 }
 0x220   : > { %v1300_v15 = vsub.f32 %v1292_v48, %v1296_v23  ;;  %v1302_v27 = vsub.f32 %v1294_v19, %v1298_v10  ;;  %v9116_v46 = vmov 1966171168  }
 0x221   : > { %v1293_v57 = vmul.f32 0.0078125, %v1249_v17  ;;  %v1297_v12 = vmul.f32 %v1141_v53, %v1141_v53  ;;  %v1295_v55 = vmul.f32 0.0078125, %v1291_v49  ;;  %v1299_v51 = vmul.f32 %v1143_v43, %v1143_v43 }
 0x222   : > { %v1304_v33 = vmax.f32 %v1300_v15, 0.0  ;;  %v1306_v14 = vmax.f32 %v1302_v27, 0.0  ;;  %v1323_v20 = vunpack.c.l.s4 %v9116_v46  ;;  %v1054_v15 = vld [vmem:[#allocation2 + $0x4] sm:$0xf] }
 0x223   : > { %v1301_v24 = vsub.f32 %v1293_v57, %v1297_v12  ;;  %v1303_v44 = vsub.f32 %v1295_v55, %v1299_v51 }
 0x224   : > { %v1308_v34 = vadd.f32 1e-05, %v1304_v33  ;;  %v1310_v42 = vadd.f32 1e-05, %v1306_v14  ;;  %v1324_v40 = vunpack.c.0.s8 %v1323_v20  ;;  %v13097_v20 = vld [vmem:[#allocation24_spill] sm:$0xff] }
 0x225   : > { %v1305_v9 = vmax.f32 %v1301_v24, 0.0  ;;  %v1307_v11 = vmax.f32 %v1303_v44, 0.0 }
 0x226   : > { %8788 = vrsqrt.f32 %v1308_v34  ;;  %v9999_v25 = vsub.s32 %v1324_v40, %v9423_v30 }
 0x227   : > { %v1309_v6 = vadd.f32 1e-05, %v1305_v9  ;;  %v1311_v45 = vadd.f32 1e-05, %v1307_v11  ;;  %8790 = vrsqrt.f32 %v1310_v42  ;;  %v13096_v11 = vld [vmem:[#allocation21_spill] sm:$0xff] }
 0x228   : > { %13094 = vst [vmem:[#allocation63_spill] sm:$0xff] %v9999_v25 }
 0x229   : > { %8792 = vrsqrt.f32 %v1309_v6 }
 0x22a   : > { %8794 = vrsqrt.f32 %v1311_v45 }
 0x230   : > { %v8789_v50 = vpop.eup %8788 }
 0x231   : > { %v8791_v26 = vpop.eup %8790 }
 0x233   : > { %v8793_v52 = vpop.eup %8792 }
 0x234   : > { %v8795_v48 = vpop.eup %8794  ;;  %v1320_v23 = vcombine.low %v8789_v50, %v8793_v52  ;;  %v13099_v50 = vld [vmem:[#allocation33_spill] sm:$0xff]  ;;  %v13101_v52 = vld [vmem:[#allocation31_spill] sm:$0xff] }
 0x235   : > { %v1321_v19 = vcombine.low %v8791_v26, %v8795_v48  ;;  %v13100_v26 = vld [vmem:[#allocation27_spill] sm:$0xff] }
 0x236   : > { %v1328_v10 = vrot.slane %v1320_v23, %v9999_v25 }
 0x237   : > { %v1335_v17 = vrot.slane %v1321_v19, %v9999_v25  ;;  %v13103_v19 = vld [vmem:[#allocation41_spill] sm:$0xff] }
 0x239   : > { %v1336_v49 = vcombine.low %v1328_v10, %v1335_v17  ;;  %v13104_v17 = vld [vmem:[#allocation35_spill] sm:$0xff] }
 0x23b   : > { %v1343_v27 = vrot.slane %v1336_v49, %v9999_v25 }
 0x23d   : > { %v1345_v57 = vmul.f32 %v1343_v27, %v1054_v15  ;;  %v13105_v15 = vld [vmem:[#allocation39_spill] sm:$0xff] }
 0x23f   : > { %v1350_v12 = vrot.slane %v1345_v57, %v9426_v36  ;;  %v1354_v55 = vrot.slane %v1345_v57, %v9432_v38  ;;  %v10007_v30 = vrot.slane %v1345_v57, %v9429_v37  ;;  %v10010_v51 = vrot.slane %v1345_v57, %v9435_v39  ;;  %v13106_v57 = vld [vmem:[#allocation45_spill] sm:$0xff] }
 0x241   : > { %v1367_v33 = vmul.f32 %v1350_v12, %v1140_v63  ;;  %v1368_v14 = vmul.f32 %v1354_v55, %v1141_v53  ;;  %v1369_v24 = vmul.f32 %v10007_v30, %v1142_v18  ;;  %v1370_v44 = vmul.f32 %v10010_v51, %v1143_v43  ;;  %v13098_v63 = vld [vmem:[#allocation29_spill] sm:$0xff] }
 0x242   : > { %v10016_v34 = vmul.f32 %v10010_v51, %v9990_v32  ;;  %v1402_v42 = vmul.f32 %v1354_v55, %v9462_v16  ;;  %v1406_v9 = vmul.f32 %v1354_v55, %v9489_v56  ;;  %v1401_v6 = vmul.f32 %v1350_v12, %v13096_v11  ;;  %v13102_v32 = vld [vmem:[#allocation37_spill] sm:$0xff] }
 0x243   : > { %v1375_v45 = vcombine.low %v1367_v33, %v1368_v14  ;;  %v1376_v46 = vcombine.low %v1369_v24, %v1370_v44  ;;  %v1405_v40 = vmul.f32 %v1350_v12, %v13097_v20  ;;  %v1410_v53 = vmul.f32 %v1354_v55, %v13098_v63  ;;  %v13107_v14 = vld [vmem:[#allocation49_spill] sm:$0xff]  ;;  %v13108_v44 = vld [vmem:[#allocation43_spill] sm:$0xff] }
 0x244   : > { %13095 = vst [vmem:[#allocation64_spill] sm:$0xff] %v10016_v34  ;;  %v1414_v18 = vmul.f32 %v1354_v55, %v13099_v50  ;;  %v1409_v43 = vmul.f32 %v1350_v12, %v13100_v26  ;;  %v1413_v48 = vmul.f32 %v1350_v12, %v13101_v52  ;;  %v1418_v23 = vmul.f32 %v1354_v55, %v13102_v32  ;;  %v13109_v63 = vld [vmem:[#allocation47_spill] sm:$0xff] }
 0x245   : > { %v1383_v16 = vrot.slane %v1375_v45, %v9999_v25  ;;  %v1390_v56 = vrot.slane %v1376_v46, %v9999_v25  ;;  %v1422_v10 = vmul.f32 %v1354_v55, %v13103_v19  ;;  %v1417_v49 = vmul.f32 %v1350_v12, %v13104_v17  ;;  %v1055_v46 = vld [vmem:[#allocation2 + $0x8] sm:$0xf]  ;;  %v13110_v52 = vld [vmem:[#allocation51_spill] sm:$0xff] }
 0x246   : > { %v1421_v27 = vmul.f32 %v1350_v12, %v13105_v15  ;;  %v1426_v33 = vmul.f32 %v1354_v55, %v13106_v57  ;;  %v1430_v24 = vmul.f32 %v1354_v55, %v13107_v14  ;;  %v1425_v11 = vmul.f32 %v1350_v12, %v13108_v44  ;;  %v13112_v44 = vld [vmem:[#allocation26_spill] sm:$0xff] }
 0x247   : > { %v1391_v20 = vcombine.low %v1383_v16, %v1390_v56  ;;  %v1429_v50 = vmul.f32 %v1350_v12, %v13109_v63  ;;  %v10037_v26 = vmul.f32 %v1354_v55, %v9797_v13  ;;  %v10040_v45 = vmul.f32 %v1354_v55, %v9820_v1 }
 0x248   : > { %v10043_v32 = vmul.f32 %v1350_v12, %v13110_v52  ;;  %v10046_v19 = vmul.f32 %v1350_v12, %v9811_v0  ;;  %v10049_v17 = vmul.f32 %v1354_v55, %v9851_v29  ;;  %v10052_v16 = vmul.f32 %v1354_v55, %v9876_v35 }
 0x249   : > { %v1398_v56 = vrot.slane %v1391_v20, %v9999_v25  ;;  %v10056_v13 = vmul.f32 %v1350_v12, %v9828_v54  ;;  %v10059_v1 = vmul.f32 %v1350_v12, %v9861_v62  ;;  %v10062_v15 = vmul.f32 %v1354_v55, %v9905_v59 }
 0x24a   : > { %v10065_v0 = vmul.f32 %v1354_v55, %v9935_v22  ;;  %v10068_v29 = vmul.f32 %v1350_v12, %v9885_v7  ;;  %v10071_v35 = vmul.f32 %v1350_v12, %v9920_v28  ;;  %v10074_v57 = vmul.f32 %v1354_v55, %v9965_v60  ;;  %v13111_v22 = vld [vmem:[#allocation23_spill] sm:$0xff]  ;;  %v13113_v60 = vld [vmem:[#allocation22_spill] sm:$0xff] }
 0x24b   : > { %v1400_v54 = vsub.f32 %v1055_v46, %v1398_v56  ;;  %v10077_v14 = vmul.f32 %v1354_v55, %v9988_v5  ;;  %v10080_v62 = vmul.f32 %v1350_v12, %v9942_v4  ;;  %v10083_v59 = vmul.f32 %v1350_v12, %v9978_v47  ;;  %v13114_v5 = vld [vmem:[#allocation25_spill] sm:$0xff]  ;;  %v13115_v46 = vld [vmem:[#allocation30_spill] sm:$0xff] }
 0x24c   : > { %v10087_v7 = vmul.f32 %v10010_v51, %v13111_v22  ;;  %v10091_v28 = vmul.f32 %v10010_v51, %v13112_v44  ;;  %v10095_v20 = vmul.f32 %v10007_v30, %v13113_v60  ;;  %v10099_v55 = vmul.f32 %v10007_v30, %v13114_v5  ;;  %v13116_v56 = vld [vmem:[#allocation34_spill] sm:$0xff]  ;;  %v13117_v44 = vld [vmem:[#allocation28_spill] sm:$0xff] }
 0x24d   : > { %v10102_v4 = vrot.slane %v1400_v54, %v9426_v36  ;;  %v10105_v47 = vrot.slane %v1400_v54, %v9432_v38  ;;  %v10108_v12 = vrot.slane %v1400_v54, %v9429_v37  ;;  %v10111_v63 = vrot.slane %v1400_v54, %v9435_v39  ;;  %v13118_v5 = vld [vmem:[#allocation32_spill] sm:$0xff] }
 0x24e   : > { %v10115_v52 = vmul.f32 %v10010_v51, %v13115_v46  ;;  %v10119_v22 = vmul.f32 %v10010_v51, %v13116_v56  ;;  %v10123_v60 = vmul.f32 %v10007_v30, %v13117_v44  ;;  %v10127_v25 = vmul.f32 %v10007_v30, %v13118_v5  ;;  %v8463_v5 = vld [vmem:[#allocation6 + $0x208] ss:$16 sps:$4 sm:$0xff]  }
 0x24f   : > { %v1487_v38 = vadd.f32 %v10105_v47, %v1402_v42  ;;  %v1491_v54 = vadd.f32 %v10105_v47, %v1406_v9  ;;  %v1486_v39 = vadd.f32 %v10102_v4, %v1401_v6  ;;  %v1490_v46 = vadd.f32 %v10102_v4, %v1405_v40 }
 0x250   : > { %v1495_v37 = vadd.f32 %v10105_v47, %v1410_v53  ;;  %v1499_v56 = vadd.f32 %v10105_v47, %v1414_v18  ;;  %v1494_v36 = vadd.f32 %v10102_v4, %v1409_v43  ;;  %v1498_v44 = vadd.f32 %v10102_v4, %v1413_v48  ;;  %v8468_v18 = vld [vmem:[#allocation6 + $0x224] ss:$16 sps:$4 sm:$0xff]   ;;  %v8471_v43 = vld [vmem:[#allocation6 + $0x22c] ss:$16 sps:$4 sm:$0xff]  }
 0x251   : > { %v1552_v34 = vpack.c.bf16 %v1491_v54, %v1487_v38  ;;  %v1551_v61 = vpack.c.bf16 %v1490_v46, %v1486_v39  ;;  %v1503_v42 = vadd.f32 %v10105_v47, %v1418_v23  ;;  %v1507_v9 = vadd.f32 %v10105_v47, %v1422_v10  ;;  %v8466_v23 = vld [vmem:[#allocation6 + $0x220] ss:$16 sps:$4 sm:$0xff]   ;;  %v8469_v10 = vld [vmem:[#allocation6 + $0x228] ss:$16 sps:$4 sm:$0xff]  }
 0x252   : > { %v1556_v41 = vpack.c.bf16 %v1499_v56, %v1495_v37  ;;  %v1555_v6 = vpack.c.bf16 %v1498_v44, %v1494_v36  ;;  %v1502_v40 = vadd.f32 %v10102_v4, %v1417_v49  ;;  %v1506_v53 = vadd.f32 %v10102_v4, %v1421_v27  ;;  %v8472_v46 = vld [vmem:[#allocation6 + $0x240] ss:$16 sps:$4 sm:$0xff]   ;;  %v8475_v56 = vld [vmem:[#allocation6 + $0x248] ss:$16 sps:$4 sm:$0xff]  }
 0x253   : > { %2404 = vmatprep.mubr.bf16.mxu0 %v1552_v34  ;;  %2630 = vmatprep.mubr.bf16.mxu1 %v1552_v34  ;;  %v1560_v2 = vpack.c.bf16 %v1507_v9, %v1503_v42  ;;  %v1511_v38 = vadd.f32 %v10105_v47, %v1426_v33  ;;  %v1515_v48 = vadd.f32 %v10105_v47, %v1430_v24  ;;  %v8477_v33 = vld [vmem:[#allocation6 + $0x24c] ss:$16 sps:$4 sm:$0xff]  }
 0x254   : > { %2405 = vmatmul.mubr.bf16.vlgmr.msra.gmra.mrb[32].mxu0 %v1551_v61  ;;  %2631 = vmatmul.mubr.bf16.vlgmr.msra.gmra.mrb[32].mxu1 %v1551_v61  ;;  %v10143_v39 = vpack.c.bf16 %v1506_v53, %v1502_v40  ;;  %v1510_v37 = vadd.f32 %v10102_v4, %v1425_v11  ;;  %v1514_v36 = vadd.f32 %v10102_v4, %v1429_v50  ;;  %v8474_v61 = vld [vmem:[#allocation6 + $0x244] ss:$16 sps:$4 sm:$0xff]   ;;  %v8483_v42 = vld [vmem:[#allocation6 + $0x26c] ss:$16 sps:$4 sm:$0xff]  }
 0x255   : > { %2486 = vmatpush1.bf16.msra.mxu0 %v8460_v8  ;;  %2712 = vmatpush1.bf16.msra.mxu1 %v8463_v5  ;;  %v10147_v34 = vpack.c.bf16 %v1515_v48, %v1511_v38  ;;  %v1519_v49 = vadd.f32 %v10105_v47, %v10037_v26  ;;  %v1523_v27 = vadd.f32 %v10105_v47, %v10040_v45  ;;  %v8480_v5 = vld [vmem:[#allocation6 + $0x264] ss:$16 sps:$4 sm:$0xff]  }
 0x256   : > { %2414 = vmatprep.mubr.bf16.mxu0 %v1556_v41  ;;  %2640 = vmatprep.mubr.bf16.mxu1 %v1556_v41  ;;  %v10153_v24 = vpack.c.bf16 %v1514_v36, %v1510_v37  ;;  %v1518_v8 = vadd.f32 %v10102_v4, %v10043_v32  ;;  %v1522_v11 = vadd.f32 %v10102_v4, %v10046_v19  ;;  %v13119_v37 = vld [vmem:[#allocation38_spill] sm:$0xff] }
 0x257   : > { %2487 = vmatprep.subr.bf16.mxu0 %v8468_v18  ;;  %2713 = vmatprep.subr.bf16.mxu1 %v8471_v43  ;;  %v10159_v50 = vpack.c.bf16 %v1523_v27, %v1519_v49  ;;  %v1527_v26 = vadd.f32 %v10105_v47, %v10049_v17  ;;  %v1531_v41 = vadd.f32 %v10105_v47, %v10052_v16  ;;  %v8478_v18 = vld [vmem:[#allocation6 + $0x260] ss:$16 sps:$4 sm:$0xff]   ;;  %v8487_v49 = vld [vmem:[#allocation6 + $0x288] ss:$16 sps:$4 sm:$0xff]  }
 0x258   : > { %v10165_v45 = vpack.c.bf16 %v1522_v11, %v1518_v8  ;;  %v1526_v54 = vadd.f32 %v10102_v4, %v10056_v13  ;;  %v1530_v32 = vadd.f32 %v10102_v4, %v10059_v1  ;;  %v1535_v19 = vadd.f32 %v10105_v47, %v10062_v15 }
 0x259   : > { %2488 = vmatpush1.bf16.msra.mxu0 %v8466_v23  ;;  %2714 = vmatpush1.bf16.msra.mxu1 %v8469_v10  ;;  %v10173_v44 = vpack.c.bf16 %v1531_v41, %v1527_v26  ;;  %v1539_v17 = vadd.f32 %v10105_v47, %v10065_v0  ;;  %v1534_v16 = vadd.f32 %v10102_v4, %v10068_v29  ;;  %v8492_v26 = vld [vmem:[#allocation6 + $0x2a4] ss:$16 sps:$4 sm:$0xff]   ;;  %v8495_v41 = vld [vmem:[#allocation6 + $0x2ac] ss:$16 sps:$4 sm:$0xff]  }
 0x25a   : > { %2489 = vmatprep.subr.bf16.mxu0 %v8474_v61  ;;  %2715 = vmatprep.subr.bf16.mxu1 %v8477_v33  ;;  %v10179_v13 = vpack.c.bf16 %v1530_v32, %v1526_v54  ;;  %v1538_v1 = vadd.f32 %v10102_v4, %v10071_v35  ;;  %v1543_v15 = vadd.f32 %v10105_v47, %v10074_v57  ;;  %v13123_v32 = vld [vmem:[#allocation46_spill] sm:$0xff] }
 0x25b   : > { %v10185_v9 = vpack.c.bf16 %v1539_v17, %v1535_v19  ;;  %v1547_v0 = vadd.f32 %v10105_v47, %v10077_v14  ;;  %v1542_v29 = vadd.f32 %v10102_v4, %v10080_v62  ;;  %v1546_v40 = vadd.f32 %v10102_v4, %v10083_v59  ;;  %v8481_v14 = vld [vmem:[#allocation6 + $0x268] ss:$16 sps:$4 sm:$0xff]   ;;  %v8486_v4 = vld [vmem:[#allocation6 + $0x284] ss:$16 sps:$4 sm:$0xff]  }
 0x25c   : > { %2415 = vmatmul.mubr.bf16.gmra.mrb[36].mxu0 %v1555_v6  ;;  %2641 = vmatmul.mubr.bf16.gmra.mrb[36].mxu1 %v1555_v6  ;;  %v10193_v53 = vpack.c.bf16 %v1538_v1, %v1534_v16  ;;  %v1489_v35 = vadd.f32 %v10111_v63, %v10087_v7  ;;  %v1493_v57 = vadd.f32 %v10111_v63, %v10091_v28  ;;  %v8489_v6 = vld [vmem:[#allocation6 + $0x28c] ss:$16 sps:$4 sm:$0xff]  }
 0x25d   : > { %2490 = vmatpush1.bf16.msra.mxu0 %v8472_v46  ;;  %2716 = vmatpush1.bf16.msra.mxu1 %v8475_v56  ;;  %v10199_v47 = vpack.c.bf16 %v1547_v0, %v1543_v15  ;;  %v10201_v62 = vpack.c.bf16 %v1546_v40, %v1542_v29  ;;  %v1488_v59 = vadd.f32 %v10108_v12, %v10095_v20  ;;  %v13124_v46 = vld [vmem:[#allocation50_spill] sm:$0xff]  ;;  %v13125_v17 = vld [vmem:[#allocation44_spill] sm:$0xff]  ;;  %v8490_v0 = vld [vmem:[#allocation6 + $0x2a0] ss:$16 sps:$4 sm:$0xff]  }
 0x25e   : > { %2424 = vmatprep.mubr.bf16.mxu0 %v1560_v2  ;;  %2650 = vmatprep.mubr.bf16.mxu1 %v1560_v2  ;;  %v10205_v43 = vpack.c.bf16 %v1493_v57, %v1489_v35  ;;  %v1492_v7 = vadd.f32 %v10108_v12, %v10099_v55  ;;  %v1497_v28 = vadd.f32 %v10111_v63, %v10115_v52  ;;  %v13120_v55 = vld [vmem:[#allocation42_spill] sm:$0xff]  ;;  %v13121_v52 = vld [vmem:[#allocation36_spill] sm:$0xff] }
 0x25f   : > { %2491 = vmatprep.subr.bf16.mxu0 %v8480_v5  ;;  %2717 = vmatprep.subr.bf16.mxu1 %v8483_v42  ;;  %v1501_v38 = vadd.f32 %v10111_v63, %v10119_v22  ;;  %v1496_v20 = vadd.f32 %v10108_v12, %v10123_v60  ;;  %v1500_v2 = vadd.f32 %v10108_v12, %v10127_v25  ;;  %v8484_v22 = vld [vmem:[#allocation6 + $0x280] ss:$16 sps:$4 sm:$0xff]   ;;  %v13122_v25 = vld [vmem:[#allocation40_spill] sm:$0xff] }
 0x260   : > { %v10217_v48 = vpack.c.bf16 %v1492_v7, %v1488_v59  ;;  %v1420_v36 = vmul.f32 %v10010_v51, %v13119_v37  ;;  %v1424_v23 = vmul.f32 %v10010_v51, %v13120_v55  ;;  %v1419_v10 = vmul.f32 %v10007_v30, %v13121_v52  ;;  %v13126_v15 = vld [vmem:[#allocation48_spill] sm:$0xff]  ;;  %v13128_v55 = vld [vmem:[#allocation55_spill] sm:$0xff]  ;;  %v13129_v52 = vld [vmem:[#allocation53_spill] sm:$0xff] }
 0x261   : > { %2492 = vmatpush1.bf16.msra.mxu0 %v8478_v18  ;;  %2718 = vmatpush1.bf16.msra.mxu1 %v8481_v14  ;;  %v10225_v27 = vpack.c.bf16 %v1501_v38, %v1497_v28  ;;  %v10227_v60 = vpack.c.bf16 %v1500_v2, %v1496_v20  ;;  %v1423_v61 = vmul.f32 %v10007_v30, %v13122_v25  ;;  %v8493_v29 = vld [vmem:[#allocation6 + $0x2a8] ss:$16 sps:$4 sm:$0xff]   ;;  %v8501_v18 = vld [vmem:[#allocation6 + $0x2cc] ss:$16 sps:$4 sm:$0xff]  }
 0x262   : > { %2493 = vmatprep.subr.bf16.mxu0 %v8486_v4  ;;  %2719 = vmatprep.subr.bf16.mxu1 %v8489_v6  ;;  %v1505_v33 = vadd.f32 %v10111_v63, %v1420_v36  ;;  %v1509_v8 = vadd.f32 %v10111_v63, %v1424_v23  ;;  %v1504_v11 = vadd.f32 %v10108_v12, %v1419_v10  ;;  %v13127_v7 = vld [vmem:[#allocation52_spill] sm:$0xff] }
 0x263   : > { %v1508_v54 = vadd.f32 %v10108_v12, %v1423_v61  ;;  %v1428_v19 = vmul.f32 %v10010_v51, %v13123_v32  ;;  %v1432_v56 = vmul.f32 %v10010_v51, %v13124_v46  ;;  %v1427_v16 = vmul.f32 %v10007_v30, %v13125_v17  ;;  %v8499_v37 = vld [vmem:[#allocation6 + $0x2c8] ss:$16 sps:$4 sm:$0xff]   ;;  %v8507_v25 = vld [vmem:[#allocation6 + $0x2ec] ss:$16 sps:$4 sm:$0xff]   ;;  %v13132_v32 = vld [vmem:[#allocation59_spill] sm:$0xff] }
 0x264   : > { %2425 = vmatmul.mubr.bf16.gmra.mrb[40].mxu0 %v10143_v39  ;;  %2651 = vmatmul.mubr.bf16.gmra.mrb[40].mxu1 %v10143_v39  ;;  %v10243_v1 = vpack.c.bf16 %v1509_v8, %v1505_v33  ;;  %v1431_v5 = vmul.f32 %v10007_v30, %v13126_v15  ;;  %v1436_v42 = vmul.f32 %v10010_v51, %v9799_v58  ;;  %v8498_v39 = vld [vmem:[#allocation6 + $0x2c4] ss:$16 sps:$4 sm:$0xff]   ;;  %v13130_v33 = vld [vmem:[#allocation54_spill] sm:$0xff]  ;;  %v13133_v46 = vld [vmem:[#allocation56_spill] sm:$0xff] }
 0x265   : > { %2494 = vmatpush1.bf16.msra.mxu0 %v8484_v22  ;;  %2720 = vmatpush1.bf16.msra.mxu1 %v8487_v49  ;;  %v10249_v40 = vpack.c.bf16 %v1508_v54, %v1504_v11  ;;  %v1513_v35 = vadd.f32 %v10111_v63, %v1428_v19  ;;  %v1517_v57 = vadd.f32 %v10111_v63, %v1432_v56  ;;  %v8504_v49 = vld [vmem:[#allocation6 + $0x2e4] ss:$16 sps:$4 sm:$0xff]   ;;  %v8502_v17 = vld [vmem:[#allocation6 + $0x2e0] ss:$16 sps:$4 sm:$0xff]  }
 0x266   : > { %2434 = vmatprep.mubr.bf16.mxu0 %v10147_v34  ;;  %2660 = vmatprep.mubr.bf16.mxu1 %v10147_v34  ;;  %v1512_v14 = vadd.f32 %v10108_v12, %v1427_v16  ;;  %v1516_v58 = vadd.f32 %v10108_v12, %v1431_v5  ;;  %v1440_v59 = vmul.f32 %v10010_v51, %v9822_v31  ;;  %v8496_v31 = vld [vmem:[#allocation6 + $0x2c0] ss:$16 sps:$4 sm:$0xff]   ;;  %v8505_v16 = vld [vmem:[#allocation6 + $0x2e8] ss:$16 sps:$4 sm:$0xff]  }
 0x267   : > { %2495 = vmatprep.subr.bf16.mxu0 %v8492_v26  ;;  %2721 = vmatprep.subr.bf16.mxu1 %v8495_v41  ;;  %v10259_v4 = vpack.c.bf16 %v1517_v57, %v1513_v35  ;;  %v1521_v6 = vadd.f32 %v10111_v63, %v1436_v42  ;;  %v1435_v28 = vmul.f32 %v10007_v30, %v13127_v7  ;;  %v13131_v26 = vld [vmem:[#allocation57_spill] sm:$0xff]  ;;  %v13134_v35 = vld [vmem:[#allocation58_spill] sm:$0xff] }
 0x268   : > { %v10264_v38 = vpack.c.bf16 %v1516_v58, %v1512_v14  ;;  %v1525_v34 = vadd.f32 %v10111_v63, %v1440_v59  ;;  %v1439_v20 = vmul.f32 %v10007_v30, %v9813_v3  ;;  %v1444_v2 = vmul.f32 %v10010_v51, %v9853_v21  ;;  %v13135_v14 = vld [vmem:[#allocation61_spill] sm:$0xff]  ;;  %v13136_v59 = vld [vmem:[#allocation64_spill] sm:$0xff] }
 0x269   : > { %2496 = vmatpush1.bf16.msra.mxu0 %v8490_v0  ;;  %2722 = vmatpush1.bf16.msra.mxu1 %v8493_v29  ;;  %v1520_v36 = vadd.f32 %v10108_v12, %v1435_v28  ;;  %v1448_v23 = vmul.f32 %v10010_v51, %v13128_v55  ;;  %v1443_v10 = vmul.f32 %v10007_v30, %v13129_v52  ;;  %v8513_v0 = vld [vmem:[#allocation6 + $0x30c] ss:$16 sps:$4 sm:$0xff]   ;;  %v8516_v52 = vld [vmem:[#allocation6 + $0x324] ss:$16 sps:$4 sm:$0xff]  }
 0x26a   : > { %2497 = vmatprep.subr.bf16.mxu0 %v8498_v39  ;;  %2723 = vmatprep.subr.bf16.mxu1 %v8501_v18  ;;  %v10276_v22 = vpack.c.bf16 %v1525_v34, %v1521_v6  ;;  %v1524_v3 = vadd.f32 %v10108_v12, %v1439_v20  ;;  %v1529_v21 = vadd.f32 %v10111_v63, %v1444_v2  ;;  %v13137_v28 = vld [vmem:[#allocation60_spill] sm:$0xff]  ;;  %v13138_v20 = vld [vmem:[#allocation62_spill] sm:$0xff] }
 0x26b   : > { %v1533_v61 = vadd.f32 %v10111_v63, %v1448_v23  ;;  %v1447_v8 = vmul.f32 %v10007_v30, %v13130_v33  ;;  %v1528_v11 = vadd.f32 %v10108_v12, %v1443_v10  ;;  %v1452_v41 = vmul.f32 %v10010_v51, %v13131_v26  ;;  %v8519_v10 = vld [vmem:[#allocation6 + $0x32c] ss:$16 sps:$4 sm:$0xff]  }
 0x26c   : > { %2435 = vmatmul.mubr.bf16.gmra.mrb[44].mxu0 %v10153_v24  ;;  %2661 = vmatmul.mubr.bf16.gmra.mrb[44].mxu1 %v10153_v24  ;;  %v10288_v54 = vpack.c.bf16 %v1524_v3, %v1520_v36  ;;  %v1456_v19 = vmul.f32 %v10010_v51, %v13132_v32  ;;  %v1451_v56 = vmul.f32 %v10007_v30, %v13133_v46  ;;  %v8510_v24 = vld [vmem:[#allocation6 + $0x304] ss:$16 sps:$4 sm:$0xff]   ;;  %v8531_v33 = vld [vmem:[#allocation6 + $0x36c] ss:$16 sps:$4 sm:$0xff]   ;;  %v8535_v32 = vld [vmem:[#allocation6 + $0x388] ss:$16 sps:$4 sm:$0xff]  }
 0x26d   : > { %2498 = vmatpush1.bf16.msra.mxu0 %v8496_v31  ;;  %2724 = vmatpush1.bf16.msra.mxu1 %v8499_v37  ;;  %v10294_v15 = vpack.c.bf16 %v1533_v61, %v1529_v21  ;;  %v1532_v5 = vadd.f32 %v10108_v12, %v1447_v8  ;;  %v1537_v42 = vadd.f32 %v10111_v63, %v1452_v41  ;;  %v8508_v31 = vld [vmem:[#allocation6 + $0x300] ss:$16 sps:$4 sm:$0xff]   ;;  %v8511_v37 = vld [vmem:[#allocation6 + $0x308] ss:$16 sps:$4 sm:$0xff]   ;;  %v8537_v26 = vld [vmem:[#allocation6 + $0x38c] ss:$16 sps:$4 sm:$0xff]  }
 0x26e   : > { %2444 = vmatprep.mubr.bf16.mxu0 %v10159_v50  ;;  %2670 = vmatprep.mubr.bf16.mxu1 %v10159_v50  ;;  %v1541_v29 = vadd.f32 %v10111_v63, %v1456_v19  ;;  %v1455_v57 = vmul.f32 %v10007_v30, %v13134_v35  ;;  %v1536_v39 = vadd.f32 %v10108_v12, %v1451_v56  ;;  %v8517_v21 = vld [vmem:[#allocation6 + $0x328] ss:$16 sps:$4 sm:$0xff]   ;;  %v8526_v8 = vld [vmem:[#allocation6 + $0x360] ss:$16 sps:$4 sm:$0xff]   ;;  %v8540_v19 = vld [vmem:[#allocation6 + $0x3a4] ss:$16 sps:$4 sm:$0xff]  }
 0x26f   : > { %2499 = vmatprep.subr.bf16.mxu0 %v8504_v49  ;;  %2725 = vmatprep.subr.bf16.mxu1 %v8507_v25  ;;  %v10304_v18 = vpack.c.bf16 %v1532_v5, %v1528_v11  ;;  %v1460_v58 = vmul.f32 %v10010_v51, %v13135_v14  ;;  %v1549_v6 = vadd.f32 %v10111_v63, %v13136_v59  ;;  %v8522_v49 = vld [vmem:[#allocation6 + $0x344] ss:$16 sps:$4 sm:$0xff]   ;;  %v8520_v25 = vld [vmem:[#allocation6 + $0x340] ss:$16 sps:$4 sm:$0xff]   ;;  %v8523_v61 = vld [vmem:[#allocation6 + $0x348] ss:$16 sps:$4 sm:$0xff]  }
 0x270   : > { %v10310_v50 = vpack.c.bf16 %v1541_v29, %v1537_v42  ;;  %v1540_v7 = vadd.f32 %v10108_v12, %v1455_v57  ;;  %v1459_v34 = vmul.f32 %v10007_v30, %v13137_v28  ;;  %v1463_v2 = vmul.f32 %v10007_v30, %v13138_v20  ;;  %v8534_v11 = vld [vmem:[#allocation6 + $0x384] ss:$16 sps:$4 sm:$0xff]   ;;  %v8532_v41 = vld [vmem:[#allocation6 + $0x380] ss:$16 sps:$4 sm:$0xff]   ;;  %v8547_v5 = vld [vmem:[#allocation6 + $0x3c8] ss:$16 sps:$4 sm:$0xff]  }
 0x271   : > { %2500 = vmatpush1.bf16.msra.mxu0 %v8502_v17  ;;  %2726 = vmatpush1.bf16.msra.mxu1 %v8505_v16  ;;  %v1545_v36 = vadd.f32 %v10111_v63, %v1460_v58  ;;  %v8514_v63 = vld [vmem:[#allocation6 + $0x320] ss:$16 sps:$4 sm:$0xff]   ;;  %v8546_v56 = vld [vmem:[#allocation6 + $0x3c4] ss:$16 sps:$4 sm:$0xff]   ;;  %v8549_v17 = vld [vmem:[#allocation6 + $0x3cc] ss:$16 sps:$4 sm:$0xff]  }
 0x272   : > { %2501 = vmatprep.subr.bf16.mxu0 %v8510_v24  ;;  %2727 = vmatprep.subr.bf16.mxu1 %v8513_v0  ;;  %v10318_v51 = vpack.c.bf16 %v1540_v7, %v1536_v39  ;;  %v1544_v55 = vadd.f32 %v10108_v12, %v1459_v34  ;;  %v1548_v23 = vadd.f32 %v10108_v12, %v1463_v2  ;;  %v8525_v12 = vld [vmem:[#allocation6 + $0x34c] ss:$16 sps:$4 sm:$0xff]   ;;  %v8538_v46 = vld [vmem:[#allocation6 + $0x3a0] ss:$16 sps:$4 sm:$0xff]   ;;  %v8552_v42 = vld [vmem:[#allocation6 + $0x3e4] ss:$16 sps:$4 sm:$0xff]  }
 0x273   : > { %v10322_v3 = vpack.c.bf16 %v1549_v6, %v1545_v36  ;;  %v8544_v16 = vld [vmem:[#allocation6 + $0x3c0] ss:$16 sps:$4 sm:$0xff]   ;;  %v13142_v29 = vld [vmem:[#allocation20_spill] sm:$0xff]  ;;  %v8569_v39 = vld [vmem:[#allocation7 + $0x48] ss:$12 sps:$4 sm:$0xff]  }
 0x274   : > { %2445 = vmatmul.mubr.bf16.gmra.mrb[48].mxu0 %v10165_v45  ;;  %2671 = vmatmul.mubr.bf16.gmra.mrb[48].mxu1 %v10165_v45  ;;  %v10326_v30 = vpack.c.bf16 %v1548_v23, %v1544_v55  ;;  %v8528_v45 = vld [vmem:[#allocation6 + $0x364] ss:$16 sps:$4 sm:$0xff]   ;;  %v8550_v24 = vld [vmem:[#allocation6 + $0x3e0] ss:$16 sps:$4 sm:$0xff]   ;;  %v8571_v57 = vld [vmem:[#allocation7 + $0x4c] ss:$12 sps:$4 sm:$0xff]  }
 0x275   : > { %2502 = vmatpush1.bf16.msra.mxu0 %v8508_v31  ;;  %2728 = vmatpush1.bf16.msra.mxu1 %v8511_v37  ;;  %v8574_v2 = vld [vmem:[#allocation7 + $0x64] ss:$12 sps:$4 sm:$0xff]  }
 0x276   : > { %2454 = vmatprep.mubr.bf16.mxu0 %v10173_v44  ;;  %2680 = vmatprep.mubr.bf16.mxu1 %v10173_v44  ;;  %v8529_v44 = vld [vmem:[#allocation6 + $0x368] ss:$16 sps:$4 sm:$0xff]  }
 0x277   : > { %2503 = vmatprep.subr.bf16.mxu0 %v8516_v52  ;;  %2729 = vmatprep.subr.bf16.mxu1 %v8519_v10 }
 0x279   : > { %2504 = vmatpush1.bf16.msra.mxu0 %v8514_v63  ;;  %2730 = vmatpush1.bf16.msra.mxu1 %v8517_v21  ;;  %v8579_v21 = vld [vmem:[#allocation7 + $0x7c] ss:$12 sps:$4 sm:$0xff]  }
 0x27a   : > { %2505 = vmatprep.subr.bf16.mxu0 %v8522_v49  ;;  %2731 = vmatprep.subr.bf16.mxu1 %v8525_v12 }
 0x27c   : > { %2455 = vmatmul.mubr.bf16.gmra.mrb[52].mxu0 %v10179_v13  ;;  %2681 = vmatmul.mubr.bf16.gmra.mrb[52].mxu1 %v10179_v13  ;;  %v8543_v13 = vld [vmem:[#allocation6 + $0x3ac] ss:$16 sps:$4 sm:$0xff]  }
 0x27d   : > { %2506 = vmatpush1.bf16.msra.mxu0 %v8520_v25  ;;  %2732 = vmatpush1.bf16.msra.mxu1 %v8523_v61  ;;  %v8577_v61 = vld [vmem:[#allocation7 + $0x78] ss:$12 sps:$4 sm:$0xff]  }
 0x27e   : > { %2464 = vmatprep.mubr.bf16.mxu0 %v10185_v9  ;;  %2690 = vmatprep.mubr.bf16.mxu1 %v10185_v9  ;;  %v8541_v9 = vld [vmem:[#allocation6 + $0x3a8] ss:$16 sps:$4 sm:$0xff]  }
 0x27f   : > { %2507 = vmatprep.subr.bf16.mxu0 %v8528_v45  ;;  %2733 = vmatprep.subr.bf16.mxu1 %v8531_v33 }
 0x281   : > { %2508 = vmatpush1.bf16.msra.mxu0 %v8526_v8  ;;  %2734 = vmatpush1.bf16.msra.mxu1 %v8529_v44 }
 0x282   : > { %2509 = vmatprep.subr.bf16.mxu0 %v8534_v11  ;;  %2735 = vmatprep.subr.bf16.mxu1 %v8537_v26 }
 0x284   : > { %2465 = vmatmul.mubr.bf16.gmra.mrb[56].mxu0 %v10193_v53  ;;  %2691 = vmatmul.mubr.bf16.gmra.mrb[56].mxu1 %v10193_v53  ;;  %v8555_v53 = vld [vmem:[#allocation6 + $0x3ec] ss:$16 sps:$4 sm:$0xff]  }
 0x285   : > { %2510 = vmatpush1.bf16.msra.mxu0 %v8532_v41  ;;  %2736 = vmatpush1.bf16.msra.mxu1 %v8535_v32 }
 0x286   : > { %2474 = vmatprep.mubr.bf16.mxu0 %v10199_v47  ;;  %2700 = vmatprep.mubr.bf16.mxu1 %v10199_v47  ;;  %v8553_v47 = vld [vmem:[#allocation6 + $0x3e8] ss:$16 sps:$4 sm:$0xff]  }
 0x287   : > { %2511 = vmatprep.subr.bf16.mxu0 %v8540_v19  ;;  %2737 = vmatprep.subr.bf16.mxu1 %v8543_v13 }
 0x289   : > { %2512 = vmatpush1.bf16.msra.mxu0 %v8538_v46  ;;  %2738 = vmatpush1.bf16.msra.mxu1 %v8541_v9 }
 0x28a   : > { %2513 = vmatprep.subr.bf16.mxu0 %v8546_v56  ;;  %2739 = vmatprep.subr.bf16.mxu1 %v8549_v17 }
 0x28c   : > { %2475 = vmatmul.mubr.bf16.gmra.mrb[60].mxu0 %v10201_v62  ;;  %2701 = vmatmul.mubr.bf16.gmra.mrb[60].mxu1 %v10201_v62  ;;  %v8558_v62 = vld [vmem:[#allocation7 + $0x4] ss:$12 sps:$4 sm:$0xff]  }
 0x28d   : > { %2514 = vmatpush1.bf16.msra.mxu0 %v8544_v16  ;;  %2740 = vmatpush1.bf16.msra.mxu1 %v8547_v5 }
 0x28e   : > { %2517 = vmatprep.mubr.bf16.mxu0 %v10205_v43  ;;  %2743 = vmatprep.mubr.bf16.mxu1 %v10205_v43  ;;  %v8556_v43 = vld [vmem:[#allocation7] ss:$12 sps:$4 sm:$0xff]  }
 0x28f   : > { %2515 = vmatprep.subr.bf16.mxu0 %v8552_v42  ;;  %2741 = vmatprep.subr.bf16.mxu1 %v8555_v53  ;;  %v8582_v42 = vld [vmem:[#allocation7 + $0x94] ss:$12 sps:$4 sm:$0xff]  }
 0x291   : > { %2516 = vmatpush1.bf16.msra.mxu0 %v8550_v24  ;;  %2742 = vmatpush1.bf16.msra.mxu1 %v8553_v47 }
 0x292   : > { %4201 = vmatprep.subr.bf16.mxu0 %v8558_v62 }
 0x294   : > { %2518 = vmatmul.mubr.bf16.vlgmr.msra.gmra.mrb[32].mxu0 %v10217_v48  ;;  %2744 = vmatmul.mubr.bf16.vlgmr.msra.gmra.mrb[32].mxu1 %v10217_v48  ;;  %v8563_v48 = vld [vmem:[#allocation7 + $0x1c] ss:$12 sps:$4 sm:$0xff]  }
 0x295   : > { %2527 = vmatprep.mubr.bf16.mxu0 %v10225_v27  ;;  %2753 = vmatprep.mubr.bf16.mxu1 %v10225_v27  ;;  %v8561_v27 = vld [vmem:[#allocation7 + $0x18] ss:$12 sps:$4 sm:$0xff]  }
 0x296   : > { %4202 = vmatpush1.bf16.msra.mxu0 %v8556_v43 }
 0x297   : > { %4203 = vmatprep.subr.bf16.mxu0 %v8563_v48 }
 0x29a   : > { %4204 = vmatpush1.bf16.msra.mxu0 %v8561_v27 }
 0x29c   : > { %2528 = vmatmul.mubr.bf16.gmra.mrb[36].mxu0 %v10227_v60  ;;  %2754 = vmatmul.mubr.bf16.gmra.mrb[36].mxu1 %v10227_v60  ;;  %v1550_v60 = vld [vmem:[#allocation2 + $0xc] sm:$0xf] }
 0x29d   : > { %2537 = vmatprep.mubr.bf16.mxu0 %v10243_v1  ;;  %2763 = vmatprep.mubr.bf16.mxu1 %v10243_v1  ;;  %v8566_v1 = vld [vmem:[#allocation7 + $0x34] ss:$12 sps:$4 sm:$0xff]   ;;  %v10382_v35 = vrot.slane %v1550_v60, %v13142_v29 }
 0x29e   : > { %4205 = vmatprep.subr.bf16.mxu0 %v8566_v1 }
 0x2a4   : > { %2538 = vmatmul.mubr.bf16.gmra.mrb[40].mxu0 %v10249_v40  ;;  %2764 = vmatmul.mubr.bf16.gmra.mrb[40].mxu1 %v10249_v40  ;;  %v8564_v40 = vld [vmem:[#allocation7 + $0x30] ss:$12 sps:$4 sm:$0xff]  }
 0x2a5   : > { %2547 = vmatprep.mubr.bf16.mxu0 %v10259_v4  ;;  %2773 = vmatprep.mubr.bf16.mxu1 %v10259_v4  ;;  %v13139_v4 = vld [vmem:[#allocation17_spill] sm:$0xff] }
 0x2a6   : > { %4206 = vmatpush1.bf16.msra.mxu0 %v8564_v40 }
 0x2a7   : > { %4207 = vmatprep.subr.bf16.mxu0 %v8571_v57 }
 0x2aa   : > { %4208 = vmatpush1.bf16.msra.mxu0 %v8569_v39  ;;  %v8580_v39 = vld [vmem:[#allocation7 + $0x90] ss:$12 sps:$4 sm:$0xff]  }
 0x2ab   : > { %4209 = vmatprep.subr.bf16.mxu0 %v8574_v2 }
 0x2ac   : > { %2548 = vmatmul.mubr.bf16.gmra.mrb[44].mxu0 %v10264_v38  ;;  %2774 = vmatmul.mubr.bf16.gmra.mrb[44].mxu1 %v10264_v38  ;;  %v10373_v38 = vrot.slane %v1550_v60, %v13139_v4 }
 0x2ad   : > { %2557 = vmatprep.mubr.bf16.mxu0 %v10276_v22  ;;  %2783 = vmatprep.mubr.bf16.mxu1 %v10276_v22  ;;  %v13140_v22 = vld [vmem:[#allocation18_spill] sm:$0xff] }
 0x2b4   : > { %2558 = vmatmul.mubr.bf16.gmra.mrb[48].mxu0 %v10288_v54  ;;  %2784 = vmatmul.mubr.bf16.gmra.mrb[48].mxu1 %v10288_v54  ;;  %v10376_v54 = vrot.slane %v1550_v60, %v13140_v22 }
 0x2b5   : > { %2567 = vmatprep.mubr.bf16.mxu0 %v10294_v15  ;;  %2793 = vmatprep.mubr.bf16.mxu1 %v10294_v15  ;;  %v13141_v15 = vld [vmem:[#allocation19_spill] sm:$0xff] }
 0x2b6   : > { %v10379_v0 = vrot.slane %v1550_v60, %v13141_v15 }
 0x2bc   : > { %2568 = vmatmul.mubr.bf16.gmra.mrb[52].mxu0 %v10304_v18  ;;  %2794 = vmatmul.mubr.bf16.gmra.mrb[52].mxu1 %v10304_v18 }
 0x2bd   : > { %2577 = vmatprep.mubr.bf16.mxu0 %v10310_v50  ;;  %2803 = vmatprep.mubr.bf16.mxu1 %v10310_v50 }
 0x2c4   : > { %2578 = vmatmul.mubr.bf16.gmra.mrb[56].mxu0 %v10318_v51  ;;  %2804 = vmatmul.mubr.bf16.gmra.mrb[56].mxu1 %v10318_v51 }
 0x2c5   : > { %2587 = vmatprep.mubr.bf16.mxu0 %v10322_v3  ;;  %2813 = vmatprep.mubr.bf16.mxu1 %v10322_v3 }
 0x2cc   : > { %2588 = vmatmul.mubr.bf16.gmra.mrb[60].mxu0 %v10326_v30  ;;  %2814 = vmatmul.mubr.bf16.gmra.mrb[60].mxu1 %v10326_v30  ;;  %v8572_v30 = vld [vmem:[#allocation7 + $0x60] ss:$12 sps:$4 sm:$0xff]  }
 0x2cd   : > { %4210 = vmatpush1.bf16.msra.mxu0 %v8572_v30 }
 0x2ce   : > { %4211 = vmatprep.subr.bf16.mxu0 %v8579_v21 }
 0x2d1   : > { %4212 = vmatpush1.bf16.msra.mxu0 %v8577_v61 }
 0x2d2   : > { %4213 = vmatprep.subr.bf16.mxu0 %v8582_v42 }
 0x2d5   : > { %4214 = vmatpush1.bf16.msra.mxu0 %v8580_v39 }
 0x367   : > { %v2519_v18 = vpop.f32.mrb[32].mxu0  ;;  %v2745_v14 = vpop.f32.mrb[32].mxu1 }
 0x368   : > { %v7989_v58 = vadd.f32 %v2519_v18, %v10373_v38  ;;  %v8021_v59 = vadd.f32 %v2745_v14, %v10376_v54  ;;  %v2521_v6 = vpop.f32.mrb[33].mxu0  ;;  %v2747_v50 = vpop.f32.mrb[33].mxu1 }
 0x369   : > { %v7990_v7 = vadd.f32 %v2521_v6, %v10379_v0  ;;  %v8022_v28 = vadd.f32 %v2747_v50, %v10382_v35  ;;  %v2523_v34 = vpop.f32.mrb[34].mxu0  ;;  %v2749_v20 = vpop.f32.mrb[34].mxu1  ;;  %v8587_v6 = vld [vmem:[#allocation7 + $0xac] ss:$12 sps:$4 sm:$0xff]  }
 0x36a   : > { %vm2824_vm1 = vcmp.gt.f32.partialorder %v7989_v58, 0.0  ;;  %v2888_v31 = vmul.f32 0.01, %v7989_v58  ;;  %vm2826_vm2 = vcmp.gt.f32.partialorder %v8021_v59, 0.0  ;;  %v2890_v37 = vmul.f32 0.01, %v8021_v59  ;;  %4215 = vmatprep.subr.bf16.mxu0 %v8587_v6 }
 0x36b   : > { %vm2825_vm3 = vcmp.gt.f32.partialorder %v7990_v7, 0.0  ;;  %v2889_v36 = vmul.f32 0.01, %v7990_v7  ;;  %v2891_v55 = vmul.f32 0.01, %v8022_v28  ;;  %v7991_v23 = vadd.f32 %v2523_v34, %v10373_v38  ;;  %v2525_v10 = vpop.f32.mrb[35].mxu0 }
 0x36c   : > { %v10388_v51 = vsel %vm2824_vm1, %v7989_v58, %v2888_v31  ;;  %v8023_v52 = vadd.f32 %v2749_v20, %v10376_v54  ;;  %v2751_v3 = vpop.f32.mrb[35].mxu1  ;;  %v10392_v63 = vsel %vm2826_vm2, %v8021_v59, %v2890_v37  ;;  %vm2827_vm4 = vcmp.gt.f32.partialorder %v8022_v28, 0.0  ;;  %v8585_v20 = vld [vmem:[#allocation7 + $0xa8] ss:$12 sps:$4 sm:$0xff]  }
 0x36d   : > { %13143 = vst [vmem:[#allocation21_spill] sm:$0xff] %v10392_v63  ;;  %v3106_v49 = vmul.f32 %v10388_v51, %v10388_v51  ;;  %v10396_v12 = vsel %vm2825_vm3, %v7990_v7, %v2889_v36  ;;  %vm2828_vm5 = vcmp.gt.f32.partialorder %v7991_v23, 0.0  ;;  %v2892_v25 = vmul.f32 0.01, %v7991_v23  ;;  %4216 = vmatpush1.bf16.msra.mxu0 %v8585_v20 }
 0x36e   : > { %vm2830_vm6 = vcmp.gt.f32.partialorder %v8023_v52, 0.0  ;;  %v2894_v45 = vmul.f32 0.01, %v8023_v52  ;;  %v7992_v33 = vadd.f32 %v2525_v10, %v10379_v0  ;;  %v8024_v8 = vadd.f32 %v2751_v3, %v10382_v35 }
 0x36f   : > { %v2529_v44 = vpop.f32.mrb[36].mxu0  ;;  %v2755_v11 = vpop.f32.mrb[36].mxu1  ;;  %v10400_v26 = vsel %vm2827_vm4, %v8022_v28, %v2891_v55  ;;  %v10402_v41 = vsel %vm2828_vm5, %v7991_v23, %v2892_v25  ;;  %v3108_v9 = vmul.f32 %v10392_v63, %v10392_v63  ;;  %v3107_v56 = vmul.f32 %v10396_v12, %v10396_v12 }
 0x370   : > { %13144 = vst [vmem:[#allocation24_spill] sm:$0xff] %v10400_v26  ;;  %13145 = vst [vmem:[#allocation29_spill] sm:$0xff] %v10402_v41  ;;  %v7993_v32 = vadd.f32 %v2529_v44, %v10373_v38  ;;  %v8025_v19 = vadd.f32 %v2755_v11, %v10376_v54  ;;  %v2531_v13 = vpop.f32.mrb[37].mxu0  ;;  %v2757_v46 = vpop.f32.mrb[37].mxu1  ;;  %v10410_v17 = vsel %vm2830_vm6, %v8023_v52, %v2894_v45  ;;  %vm2829_vm7 = vcmp.gt.f32.partialorder %v7992_v33, 0.0 }
 0x371   : > { %13146 = vst [vmem:[#allocation33_spill] sm:$0xff] %v10410_v17  ;;  %v2533_v16 = vpop.f32.mrb[38].mxu0  ;;  %v2759_v5 = vpop.f32.mrb[38].mxu1  ;;  %v3110_v53 = vmul.f32 %v10402_v41, %v10402_v41  ;;  %v3112_v24 = vmul.f32 %v10410_v17, %v10410_v17  ;;  %v2893_v47 = vmul.f32 0.01, %v7992_v33  ;;  %vm2831_vm8 = vcmp.gt.f32.partialorder %v8024_v8, 0.0 }
 0x372   : > { %v2535_v62 = vpop.f32.mrb[39].mxu0  ;;  %v2761_v43 = vpop.f32.mrb[39].mxu1  ;;  %v3109_v48 = vmul.f32 %v10400_v26, %v10400_v26  ;;  %v2895_v27 = vmul.f32 0.01, %v8024_v8  ;;  %vm2832_vm9 = vcmp.gt.f32.partialorder %v7993_v32, 0.0  ;;  %v3018_v1 = vadd.f32 %v10402_v41, %v10388_v51 }
 0x373   : > { %v2896_v60 = vmul.f32 0.01, %v7993_v32  ;;  %v10421_v40 = vsel %vm2829_vm7, %v7992_v33, %v2893_v47  ;;  %vm2834_vm10 = vcmp.gt.f32.partialorder %v8025_v19, 0.0  ;;  %v2898_v57 = vmul.f32 0.01, %v8025_v19 }
 0x374   : > { %v3060_v18 = vadd.f32 %v10410_v17, %v10392_v63  ;;  %v3111_v14 = vmul.f32 %v10421_v40, %v10421_v40  ;;  %v10428_v58 = vsel %vm2831_vm8, %v8024_v8, %v2895_v27  ;;  %v3170_v50 = vadd.f32 %v3110_v53, %v3106_v49 }
 0x375   : > { %13147 = vst [vmem:[#allocation27_spill] sm:$0xff] %v10428_v58  ;;  %v10430_v59 = vsel %vm2832_vm9, %v7993_v32, %v2896_v60  ;;  %v3212_v7 = vadd.f32 %v3112_v24, %v3108_v9  ;;  %v3039_v28 = vadd.f32 %v10421_v40, %v10396_v12  ;;  %v3113_v34 = vmul.f32 %v10428_v58, %v10428_v58  ;;  %v8590_v24 = vld [vmem:[#allocation7 + $0xc4] ss:$12 sps:$4 sm:$0xff]  }
 0x376   : > { %13148 = vst [vmem:[#allocation31_spill] sm:$0xff] %v10430_v59  ;;  %v3114_v2 = vmul.f32 %v10430_v59, %v10430_v59  ;;  %v10438_v31 = vsel %vm2834_vm10, %v8025_v19, %v2898_v57  ;;  %v7994_v37 = vadd.f32 %v2531_v13, %v10379_v0  ;;  %v8026_v36 = vadd.f32 %v2757_v46, %v10382_v35  ;;  %v8559_v19 = vld [vmem:[#allocation7 + $0xc8] ss:$12 sps:$4 sm:$0xff]  }
 0x377   : > { %13149 = vst [vmem:[#allocation37_spill] sm:$0xff] %v10438_v31  ;;  %v2539_v55 = vpop.f32.mrb[40].mxu0  ;;  %v10442_v23 = vpop.f32.mrb[40].mxu1  ;;  %v3191_v52 = vadd.f32 %v3111_v14, %v3107_v56  ;;  %v3081_v10 = vadd.f32 %v10428_v58, %v10400_v26  ;;  %v10447_v3 = vadd.f32 %v3018_v1, %v10430_v59  ;;  %v3116_v30 = vmul.f32 %v10438_v31, %v10438_v31  ;;  %v8560_v13 = vld [vmem:[#allocation7 + $0x8] ss:$12 sps:$4 sm:$0xff]  }
 0x378   : > { %v10451_v21 = vpop.f32.mrb[41].mxu0  ;;  %v10453_v49 = vpop.f32.mrb[41].mxu1  ;;  %vm2833_vm11 = vcmp.gt.f32.partialorder %v7994_v37, 0.0  ;;  %v2897_v25 = vmul.f32 0.01, %v7994_v37  ;;  %vm2835_vm12 = vcmp.gt.f32.partialorder %v8026_v36, 0.0  ;;  %v3233_v45 = vadd.f32 %v3113_v34, %v3109_v48  ;;  %7701 = vmatprep.subr.bf16.mxu1 %v8559_v19  ;;  %4217 = vmatprep.subr.bf16.mxu0 %v8590_v24 }
 0x379   : > { %v2899_v61 = vmul.f32 0.01, %v8026_v36  ;;  %v7995_v33 = vadd.f32 %v2533_v16, %v10373_v38  ;;  %v8027_v8 = vadd.f32 %v2759_v5, %v10376_v54  ;;  %v7996_v44 = vadd.f32 %v2535_v62, %v10379_v0  ;;  %v10458_v11 = vpop.f32.mrb[42].mxu0  ;;  %v10460_v32 = vpop.f32.mrb[42].mxu1  ;;  %v8588_v5 = vld [vmem:[#allocation7 + $0xc0] ss:$12 sps:$4 sm:$0xff]   ;;  %7702 = vmatpush3.bf16.msra.mxu1 %v8560_v13 }
 0x37a   : > { %v3171_v46 = vadd.f32 %v3170_v50, %v3114_v2  ;;  %v10462_v9 = vsel %vm2833_vm11, %v7994_v37, %v2897_v25  ;;  %v8028_v42 = vadd.f32 %v2761_v43, %v10382_v35  ;;  %v10467_v53 = vpop.f32.mrb[43].mxu0  ;;  %v10469_v16 = vpop.f32.mrb[43].mxu1  ;;  %v3061_v47 = vadd.f32 %v3060_v18, %v10438_v31  ;;  %v8567_v18 = vld [vmem:[#allocation7 + $0xe0] ss:$12 sps:$4 sm:$0xff]   ;;  %4218 = vmatpush1.bf16.msra.mxu0 %v8588_v5  ;;  %v8593_v25 = vld [vmem:[#allocation7 + $0xd8] ss:$12 sps:$4 sm:$0xff]  }
 0x37b   : > { %13150 = vst [vmem:[#allocation41_spill] sm:$0xff] %v10462_v9  ;;  %v10464_v56 = vsel %vm2835_vm12, %v8026_v36, %v2899_v61  ;;  %v3213_v62 = vadd.f32 %v3212_v7, %v3116_v30  ;;  %v3115_v48 = vmul.f32 %v10462_v9, %v10462_v9  ;;  %v7997_v27 = vadd.f32 %v2539_v55, %v10373_v38  ;;  %v8568_v30 = vld [vmem:[#allocation7 + $0x20] ss:$12 sps:$4 sm:$0xff]  }
 0x37c   : > { %13151 = vst [vmem:[#allocation35_spill] sm:$0xff] %v10464_v56  ;;  %vm2836_vm13 = vcmp.gt.f32.partialorder %v7995_v33, 0.0  ;;  %v2900_v60 = vmul.f32 0.01, %v7995_v33  ;;  %vm2838_vm14 = vcmp.gt.f32.partialorder %v8027_v8, 0.0  ;;  %v3040_v43 = vadd.f32 %v3039_v28, %v10462_v9  ;;  %7703 = vmatprep.subr.bf16.mxu1 %v8567_v18 }
 0x37d   : > { %v2902_v1 = vmul.f32 0.01, %v8027_v8  ;;  %v3117_v57 = vmul.f32 %v10464_v56, %v10464_v56  ;;  %vm2837_vm15 = vcmp.gt.f32.partialorder %v7996_v44, 0.0  ;;  %v2901_v39 = vmul.f32 0.01, %v7996_v44  ;;  %7704 = vmatpush3.bf16.msra.mxu1 %v8568_v30 }
 0x37e   : > { %v10478_v14 = vsel %vm2836_vm13, %v7995_v33, %v2900_v60  ;;  %vm2839_vm0 = vcmp.gt.f32.partialorder %v8028_v42, 0.0  ;;  %v2903_v50 = vmul.f32 0.01, %v8028_v42  ;;  %v3192_v20 = vadd.f32 %v3191_v52, %v3115_v48  ;;  %v8576_v60 = vld [vmem:[#allocation7 + $0x38] ss:$12 sps:$4 sm:$0xff]  }
 0x37f   : > { %13152 = vst [vmem:[#allocation39_spill] sm:$0xff] %v10478_v14  ;;  %v10480_v6 = vsel %vm2838_vm14, %v8027_v8, %v2902_v1  ;;  %v10482_v7 = vpop.f32.mrb[44].mxu0  ;;  %v10484_v34 = vpop.f32.mrb[44].mxu1  ;;  %v3082_v28 = vadd.f32 %v3081_v10, %v10464_v56  ;;  %v3118_v2 = vmul.f32 %v10478_v14, %v10478_v14  ;;  %v10496_v61 = vsel %vm2837_vm15, %v7996_v44, %v2901_v39  ;;  %v8591_v56 = vld [vmem:[#allocation7 + $0x128] ss:$12 sps:$4 sm:$0xff]  }
 0x380   : > { %13153 = vst [vmem:[#allocation45_spill] sm:$0xff] %v10480_v6  ;;  %v3120_v37 = vmul.f32 %v10480_v6, %v10480_v6  ;;  %v10491_v36 = vpop.f32.mrb[45].mxu0  ;;  %v10493_v55 = vpop.f32.mrb[45].mxu1  ;;  %13154 = vst [vmem:[#allocation49_spill] sm:$0xff] %v10496_v61  ;;  %v10498_v33 = vsel %vm2839_vm0, %v8028_v42, %v2903_v50  ;;  %vm2840_vm1 = vcmp.gt.f32.partialorder %v7997_v27, 0.0  ;;  %v3234_v19 = vadd.f32 %v3233_v45, %v3117_v57 }
 0x381   : > { %13155 = vst [vmem:[#allocation43_spill] sm:$0xff] %v10498_v33  ;;  %v2904_v52 = vmul.f32 0.01, %v7997_v27  ;;  %v10500_v10 = vpop.f32.mrb[46].mxu0  ;;  %v10502_v8 = vpop.f32.mrb[46].mxu1  ;;  %v3020_v13 = vadd.f32 %v10447_v3, %v10478_v14  ;;  %v3062_v5 = vadd.f32 %v3061_v47, %v10480_v6  ;;  %v3119_v24 = vmul.f32 %v10496_v61, %v10496_v61 }
 0x382   : > { %v10509_v48 = vpop.f32.mrb[47].mxu0  ;;  %v10511_v44 = vpop.f32.mrb[47].mxu1  ;;  %v8575_v42 = vld [vmem:[#allocation7 + $0xf8] ss:$12 sps:$4 sm:$0xff]   ;;  %v3172_v1 = vadd.f32 %v3171_v46, %v3118_v2  ;;  %v3214_v39 = vadd.f32 %v3213_v62, %v3120_v37  ;;  %v8029_v45 = vadd.f32 %v10442_v23, %v10376_v54  ;;  %v8595_v3 = vld [vmem:[#allocation7 + $0xdc] ss:$12 sps:$4 sm:$0xff]   ;;  %v3041_v47 = vadd.f32 %v3040_v43, %v10496_v61 }
 0x383   : > { %v10513_v18 = vsel %vm2840_vm1, %v7997_v27, %v2904_v52  ;;  %v8598_v57 = vld [vmem:[#allocation7 + $0xf4] ss:$12 sps:$4 sm:$0xff]   ;;  %v3083_v50 = vadd.f32 %v3082_v28, %v10498_v33  ;;  %v3121_v6 = vmul.f32 %v10498_v33, %v10498_v33  ;;  %v7998_v30 = vadd.f32 %v10451_v21, %v10379_v0  ;;  %7705 = vmatprep.subr.bf16.mxu1 %v8575_v42  ;;  %v8596_v46 = vld [vmem:[#allocation7 + $0xf0] ss:$12 sps:$4 sm:$0xff]  }
 0x384   : > { %13156 = vst [vmem:[#allocation47_spill] sm:$0xff] %v10513_v18  ;;  %v3122_v62 = vmul.f32 %v10513_v18, %v10513_v18  ;;  %vm2842_vm2 = vcmp.gt.f32.partialorder %v8029_v45, 0.0  ;;  %v2906_v27 = vmul.f32 0.01, %v8029_v45  ;;  %v8030_v23 = vadd.f32 %v10453_v49, %v10382_v35  ;;  %v8583_v2 = vld [vmem:[#allocation7 + $0x110] ss:$12 sps:$4 sm:$0xff]   ;;  %4219 = vmatprep.subr.bf16.mxu0 %v8595_v3  ;;  %7706 = vmatpush3.bf16.msra.mxu1 %v8576_v60 }
 0x385   : > { %v3193_v43 = vadd.f32 %v3192_v20, %v3119_v24  ;;  %vm2841_vm3 = vcmp.gt.f32.partialorder %v7998_v30, 0.0  ;;  %v2905_v28 = vmul.f32 0.01, %v7998_v30  ;;  %v7999_v37 = vadd.f32 %v10458_v11, %v10373_v38  ;;  %v8584_v21 = vld [vmem:[#allocation7 + $0x50] ss:$12 sps:$4 sm:$0xff]   ;;  %4220 = vmatpush1.bf16.msra.mxu0 %v8593_v25  ;;  %7707 = vmatprep.subr.bf16.mxu1 %v8583_v2 }
 0x386   : > { %v10529_v52 = vsel %vm2842_vm2, %v8029_v45, %v2906_v27  ;;  %vm2843_vm4 = vcmp.gt.f32.partialorder %v8030_v23, 0.0  ;;  %v2907_v42 = vmul.f32 0.01, %v8030_v23  ;;  %v8031_v31 = vadd.f32 %v10460_v32, %v10376_v54  ;;  %4221 = vmatprep.subr.bf16.mxu0 %v8598_v57  ;;  %v8601_v32 = vld [vmem:[#allocation7 + $0x108] ss:$12 sps:$4 sm:$0xff]  }
 0x387   : > { %13157 = vst [vmem:[#allocation51_spill] sm:$0xff] %v10529_v52  ;;  %v10533_v33 = vpop.f32.mrb[48].mxu0  ;;  %v10535_v49 = vpop.f32.mrb[48].mxu1  ;;  %v3021_v20 = vadd.f32 %v3020_v13, %v10513_v18  ;;  %v3124_v11 = vmul.f32 %v10529_v52, %v10529_v52  ;;  %v10541_v25 = vsel %vm2841_vm3, %v7998_v30, %v2905_v28  ;;  %vm2844_vm5 = vcmp.gt.f32.partialorder %v7999_v37, 0.0  ;;  %v8615_v61 = vld [vmem:[#allocation7 + $0x170] ss:$12 sps:$4 sm:$0xff]  }
 0x388   : > { %13158 = vst [vmem:[#allocation23_spill] sm:$0xff] %v10541_v25  ;;  %v10543_v24 = vpop.f32.mrb[49].mxu0  ;;  %v10545_v60 = vpop.f32.mrb[49].mxu1  ;;  %v3235_v45 = vadd.f32 %v3234_v19, %v3121_v6  ;;  %v3173_v3 = vadd.f32 %v3172_v1, %v3122_v62  ;;  %v10548_v27 = vsel %vm2843_vm4, %v8030_v23, %v2907_v42  ;;  %v2908_v57 = vmul.f32 0.01, %v7999_v37  ;;  %7708 = vmatpush3.bf16.msra.mxu1 %v8584_v21 }
 0x389   : > { %13159 = vst [vmem:[#allocation26_spill] sm:$0xff] %v10548_v27  ;;  %v10550_v2 = vpop.f32.mrb[50].mxu0  ;;  %v10552_v13 = vpop.f32.mrb[50].mxu1  ;;  %v3063_v30 = vadd.f32 %v3062_v5, %v10529_v52  ;;  %v3123_v28 = vmul.f32 %v10541_v25, %v10541_v25  ;;  %v3125_v17 = vmul.f32 %v10548_v27, %v10548_v27  ;;  %vm2846_vm6 = vcmp.gt.f32.partialorder %v8031_v31, 0.0  ;;  %v8592_v1 = vld [vmem:[#allocation7 + $0x68] ss:$12 sps:$4 sm:$0xff]   ;;  %4222 = vmatpush1.bf16.msra.mxu0 %v8596_v46 }
 0x38a   : > { %v10559_v6 = vpop.f32.mrb[51].mxu0  ;;  %v10561_v19 = vpop.f32.mrb[51].mxu1  ;;  %v3042_v62 = vadd.f32 %v3041_v47, %v10541_v25  ;;  %v10565_v23 = vsel %vm2844_vm5, %v7999_v37, %v2908_v57  ;;  %v2910_v5 = vmul.f32 0.01, %v8031_v31  ;;  %v8000_v42 = vadd.f32 %v10467_v53, %v10379_v0  ;;  %7709 = vmatprep.subr.bf16.mxu1 %v8591_v56  ;;  %v8603_v52 = vld [vmem:[#allocation7 + $0x10c] ss:$12 sps:$4 sm:$0xff]  }
 0x38b   : > { %13160 = vst [vmem:[#allocation22_spill] sm:$0xff] %v10565_v23  ;;  %v3215_v63 = vadd.f32 %v3214_v39, %v3124_v11  ;;  %v3084_v58 = vadd.f32 %v3083_v50, %v10548_v27  ;;  %v3126_v26 = vmul.f32 %v10565_v23, %v10565_v23  ;;  %v8032_v46 = vadd.f32 %v10469_v16, %v10382_v35  ;;  %v8606_v21 = vld [vmem:[#allocation7 + $0x124] ss:$12 sps:$4 sm:$0xff]   ;;  %v8599_v56 = vld [vmem:[#allocation7 + $0x140] ss:$12 sps:$4 sm:$0xff]  }
 0x38c   : > { %v10575_v47 = vsel %vm2846_vm6, %v8031_v31, %v2910_v5  ;;  %vm2845_vm7 = vcmp.gt.f32.partialorder %v8000_v42, 0.0  ;;  %v2909_v37 = vmul.f32 0.01, %v8000_v42  ;;  %v8001_v53 = vadd.f32 %v10482_v7, %v10373_v38  ;;  %4223 = vmatprep.subr.bf16.mxu0 %v8603_v52  ;;  %7710 = vmatpush3.bf16.msra.mxu1 %v8592_v1  ;;  %v8600_v57 = vld [vmem:[#allocation7 + $0x80] ss:$12 sps:$4 sm:$0xff]  }
 0x38d   : > { %13161 = vst [vmem:[#allocation25_spill] sm:$0xff] %v10575_v47  ;;  %v3194_v39 = vadd.f32 %v3193_v43, %v3123_v28  ;;  %v3236_v11 = vadd.f32 %v3235_v45, %v3125_v17  ;;  %v3128_v50 = vmul.f32 %v10575_v47, %v10575_v47  ;;  %vm2847_vm8 = vcmp.gt.f32.partialorder %v8032_v46, 0.0  ;;  %4224 = vmatpush1.bf16.msra.mxu0 %v8601_v32  ;;  %v8604_v16 = vld [vmem:[#allocation7 + $0x120] ss:$12 sps:$4 sm:$0xff]   ;;  %v8611_v28 = vld [vmem:[#allocation7 + $0x13c] ss:$12 sps:$4 sm:$0xff]  }
 0x38e   : > { %v10581_v27 = vsel %vm2845_vm7, %v8000_v42, %v2909_v37  ;;  %v2911_v31 = vmul.f32 0.01, %v8032_v46  ;;  %vm2848_vm9 = vcmp.gt.f32.partialorder %v8001_v53, 0.0  ;;  %v2912_v5 = vmul.f32 0.01, %v8001_v53  ;;  %7711 = vmatprep.subr.bf16.mxu1 %v8599_v56  ;;  %4225 = vmatprep.subr.bf16.mxu0 %v8606_v21 }
 0x38f   : > { %13162 = vst [vmem:[#allocation30_spill] sm:$0xff] %v10581_v27  ;;  %v10583_v18 = vpop.f32.mrb[52].mxu0  ;;  %v3022_v7 = vadd.f32 %v3021_v20, %v10565_v23  ;;  %v3174_v17 = vadd.f32 %v3173_v3, %v3126_v26  ;;  %v3127_v43 = vmul.f32 %v10581_v27, %v10581_v27  ;;  %v8033_v52 = vadd.f32 %v10484_v34, %v10376_v54  ;;  %v10590_v32 = vpop.f32.mrb[52].mxu1  ;;  %v8607_v34 = vld [vmem:[#allocation7 + $0x158] ss:$12 sps:$4 sm:$0xff]  }
 0x390   : > { %v10592_v45 = vpop.f32.mrb[53].mxu0  ;;  %v10595_v1 = vsel %vm2847_vm8, %v8032_v46, %v2911_v31  ;;  %v10597_v42 = vsel %vm2848_vm9, %v8001_v53, %v2912_v5  ;;  %v8002_v20 = vadd.f32 %v10491_v36, %v10379_v0  ;;  %v8034_v26 = vadd.f32 %v10493_v55, %v10382_v35  ;;  %v10603_v3 = vpop.f32.mrb[53].mxu1  ;;  %v8609_v37 = vld [vmem:[#allocation7 + $0x138] ss:$12 sps:$4 sm:$0xff]   ;;  %7712 = vmatpush3.bf16.msra.mxu1 %v8600_v57  ;;  %v8614_v5 = vld [vmem:[#allocation7 + $0x154] ss:$12 sps:$4 sm:$0xff]  }
 0x391   : > { %13163 = vst [vmem:[#allocation34_spill] sm:$0xff] %v10595_v1  ;;  %13164 = vst [vmem:[#allocation28_spill] sm:$0xff] %v10597_v42  ;;  %v10605_v21 = vpop.f32.mrb[54].mxu0  ;;  %v3064_v56 = vadd.f32 %v3063_v30, %v10575_v47  ;;  %v3216_v23 = vadd.f32 %v3215_v63, %v3128_v50  ;;  %v3043_v46 = vadd.f32 %v3042_v62, %v10581_v27  ;;  %v10611_v31 = vpop.f32.mrb[54].mxu1  ;;  %v8608_v55 = vld [vmem:[#allocation7 + $0x98] ss:$12 sps:$4 sm:$0xff]   ;;  %7713 = vmatprep.subr.bf16.mxu1 %v8607_v34 }
 0x392   : > { %v3129_v53 = vmul.f32 %v10595_v1, %v10595_v1  ;;  %v10613_v36 = vpop.f32.mrb[55].mxu0  ;;  %v3130_v25 = vmul.f32 %v10597_v42, %v10597_v42  ;;  %vm2850_vm10 = vcmp.gt.f32.partialorder %v8033_v52, 0.0  ;;  %v2914_v14 = vmul.f32 0.01, %v8033_v52  ;;  %v10617_v30 = vpop.f32.mrb[55].mxu1  ;;  %4226 = vmatpush1.bf16.msra.mxu0 %v8604_v16 }
 0x393   : > { %vm2849_vm11 = vcmp.gt.f32.partialorder %v8002_v20, 0.0  ;;  %v3195_v63 = vadd.f32 %v3194_v39, %v3127_v43  ;;  %v2913_v62 = vmul.f32 0.01, %v8002_v20  ;;  %vm2851_vm12 = vcmp.gt.f32.partialorder %v8034_v26, 0.0  ;;  %4227 = vmatprep.subr.bf16.mxu0 %v8611_v28  ;;  %v8616_v43 = vld [vmem:[#allocation7 + $0xb0] ss:$12 sps:$4 sm:$0xff]  }
 0x394   : > { %v2915_v50 = vmul.f32 0.01, %v8034_v26  ;;  %v3085_v47 = vadd.f32 %v3084_v58, %v10595_v1  ;;  %v10620_v57 = vsel %vm2850_vm10, %v8033_v52, %v2914_v14  ;;  %v8003_v27 = vadd.f32 %v10500_v10, %v10373_v38  ;;  %7714 = vmatpush3.bf16.msra.mxu1 %v8608_v55  ;;  %v8619_v28 = vld [vmem:[#allocation7 + $0x16c] ss:$12 sps:$4 sm:$0xff]  }
 0x395   : > { %13165 = vst [vmem:[#allocation32_spill] sm:$0xff] %v10620_v57  ;;  %v8035_v59 = vadd.f32 %v10502_v8, %v10376_v54  ;;  %v3237_v9 = vadd.f32 %v3236_v11, %v3129_v53  ;;  %v3023_v34 = vadd.f32 %v3022_v7, %v10597_v42  ;;  %v10628_v39 = vsel %vm2849_vm11, %v8002_v20, %v2913_v62  ;;  %v8612_v7 = vld [vmem:[#allocation7 + $0x150] ss:$12 sps:$4 sm:$0xff]  }
 0x396   : > { %13166 = vst [vmem:[#allocation38_spill] sm:$0xff] %v10628_v39  ;;  %v10630_v16 = vsel %vm2851_vm12, %v8034_v26, %v2915_v50  ;;  %v3175_v58 = vadd.f32 %v3174_v17, %v3130_v25  ;;  %v3065_v14 = vadd.f32 %v3064_v56, %v10620_v57  ;;  %v3132_v10 = vmul.f32 %v10620_v57, %v10620_v57 }
 0x397   : > { %13167 = vst [vmem:[#allocation42_spill] sm:$0xff] %v10630_v16  ;;  %v3131_v8 = vmul.f32 %v10628_v39, %v10628_v39  ;;  %v10637_v52 = vpop.f32.mrb[56].mxu0  ;;  %v10639_v11 = vpop.f32.mrb[56].mxu1  ;;  %4228 = vmatpush1.bf16.msra.mxu0 %v8609_v37  ;;  %v3044_v20 = vadd.f32 %v3043_v46, %v10628_v39  ;;  %vm2852_vm13 = vcmp.gt.f32.partialorder %v8003_v27, 0.0  ;;  %v2916_v26 = vmul.f32 0.01, %v8003_v27  ;;  %7715 = vmatprep.subr.bf16.mxu1 %v8615_v61 }
 0x398   : > { %vm2854_vm14 = vcmp.gt.f32.partialorder %v8035_v59, 0.0  ;;  %v10642_v25 = vpop.f32.mrb[57].mxu0  ;;  %v10644_v17 = vpop.f32.mrb[57].mxu1  ;;  %4229 = vmatprep.subr.bf16.mxu0 %v8614_v5  ;;  %v3086_v56 = vadd.f32 %v3085_v47, %v10630_v16  ;;  %v3133_v53 = vmul.f32 %v10630_v16, %v10630_v16  ;;  %v2918_v55 = vmul.f32 0.01, %v8035_v59  ;;  %7716 = vmatpush3.bf16.msra.mxu1 %v8616_v43 }
 0x399   : > { %v8004_v37 = vadd.f32 %v10509_v48, %v10379_v0  ;;  %v10651_v62 = vpop.f32.mrb[58].mxu0  ;;  %v10653_v46 = vpop.f32.mrb[58].mxu1  ;;  %v10655_v50 = vsel %vm2852_vm13, %v8003_v27, %v2916_v26  ;;  %v8036_v57 = vadd.f32 %v10511_v44, %v10382_v35  ;;  %v8005_v61 = vadd.f32 %v10533_v33, %v10373_v38  ;;  %v8623_v48 = vld [vmem:[#allocation7 + $0x248] ss:$12 sps:$4 sm:$0xff]   ;;  %v8622_v39 = vld [vmem:[#allocation7 + $0x184] ss:$12 sps:$4 sm:$0xff]  }
 0x39a   : > { %13168 = vst [vmem:[#allocation36_spill] sm:$0xff] %v10655_v50  ;;  %v8037_v47 = vadd.f32 %v10535_v49, %v10376_v54  ;;  %v10663_v5 = vpop.f32.mrb[59].mxu0  ;;  %v10665_v16 = vpop.f32.mrb[59].mxu1  ;;  %v3217_v1 = vadd.f32 %v3216_v23, %v3132_v10  ;;  %v3196_v42 = vadd.f32 %v3195_v63, %v3131_v8  ;;  %v10668_v27 = vsel %vm2854_vm14, %v8035_v59, %v2918_v55  ;;  %v8617_v44 = vld [vmem:[#allocation7 + $0x168] ss:$12 sps:$4 sm:$0xff]  }
 0x39b   : > { %13169 = vst [vmem:[#allocation40_spill] sm:$0xff] %v10668_v27  ;;  %vm2853_vm15 = vcmp.gt.f32.partialorder %v8004_v37, 0.0  ;;  %4230 = vmatpush1.bf16.msra.mxu0 %v8612_v7  ;;  %v3134_v33 = vmul.f32 %v10655_v50, %v10655_v50  ;;  %v3136_v49 = vmul.f32 %v10668_v27, %v10668_v27  ;;  %v2917_v26 = vmul.f32 0.01, %v8004_v37  ;;  %7765 = vmatprep.subr.bf16.mxu1 %v8623_v48 }
 0x39c   : > { %vm2855_vm0 = vcmp.gt.f32.partialorder %v8036_v57, 0.0  ;;  %4231 = vmatprep.subr.bf16.mxu0 %v8619_v28  ;;  %v3238_v43 = vadd.f32 %v3237_v9, %v3133_v53  ;;  %v2919_v23 = vmul.f32 0.01, %v8036_v57  ;;  %vm2856_vm1 = vcmp.gt.f32.partialorder %v8005_v61, 0.0 }
 0x39d   : > { %v2920_v63 = vmul.f32 0.01, %v8005_v61  ;;  %v3024_v59 = vadd.f32 %v3023_v34, %v10655_v50  ;;  %v10675_v10 = vsel %vm2853_vm15, %v8004_v37, %v2917_v26  ;;  %vm2858_vm2 = vcmp.gt.f32.partialorder %v8037_v47, 0.0 }
 0x39e   : > { %13170 = vst [vmem:[#allocation46_spill] sm:$0xff] %v10675_v10  ;;  %v2922_v8 = vmul.f32 0.01, %v8037_v47  ;;  %v3066_v7 = vadd.f32 %v3065_v14, %v10668_v27  ;;  %v3135_v55 = vmul.f32 %v10675_v10, %v10675_v10  ;;  %v10680_v41 = vsel %vm2855_vm0, %v8036_v57, %v2919_v23 }
 0x39f   : > { %13171 = vst [vmem:[#allocation50_spill] sm:$0xff] %v10680_v41  ;;  %v10682_v28 = vsel %vm2856_vm1, %v8005_v61, %v2920_v63  ;;  %v10684_v48 = vpop.f32.mrb[60].mxu0  ;;  %v10686_v9 = vpop.f32.mrb[60].mxu1  ;;  %4232 = vmatpush1.bf16.msra.mxu0 %v8617_v44  ;;  %v3176_v53 = vadd.f32 %v3175_v58, %v3134_v33  ;;  %v3218_v34 = vadd.f32 %v3217_v1, %v3136_v49 }
 0x3a0   : > { %13172 = vst [vmem:[#allocation44_spill] sm:$0xff] %v10682_v28  ;;  %v3045_v37 = vadd.f32 %v3044_v20, %v10675_v10  ;;  %v3137_v26 = vmul.f32 %v10680_v41, %v10680_v41  ;;  %v10691_v14 = vpop.f32.mrb[61].mxu0  ;;  %v10693_v27 = vpop.f32.mrb[61].mxu1  ;;  %4314 = vmatprep.subr.bf16.mxu0 %v8622_v39  ;;  %v3138_v57 = vmul.f32 %v10682_v28, %v10682_v28 }
 0x3a1   : > { %v10698_v61 = vsel %vm2858_vm2, %v8037_v47, %v2922_v8  ;;  %v8006_v58 = vadd.f32 %v10543_v24, %v10379_v0  ;;  %v8038_v1 = vadd.f32 %v10545_v60, %v10382_v35  ;;  %v10704_v20 = vpop.f32.mrb[62].mxu0  ;;  %v10706_v44 = vpop.f32.mrb[62].mxu1  ;;  %v3197_v33 = vadd.f32 %v3196_v42, %v3135_v55 }
 0x3a2   : > { %13173 = vst [vmem:[#allocation48_spill] sm:$0xff] %v10698_v61  ;;  %v3087_v49 = vadd.f32 %v3086_v56, %v10680_v41  ;;  %v3025_v39 = vadd.f32 %v3024_v59, %v10682_v28  ;;  %v3140_v23 = vmul.f32 %v10698_v61, %v10698_v61  ;;  %v10712_v47 = vpop.f32.mrb[63].mxu0  ;;  %v10714_v63 = vpop.f32.mrb[63].mxu1  ;;  %v3239_v8 = vadd.f32 %v3238_v43, %v3137_v26 }
 0x3a3   : > { %vm2857_vm3 = vcmp.gt.f32.partialorder %v8006_v58, 0.0  ;;  %v2921_v24 = vmul.f32 0.01, %v8006_v58  ;;  %vm2859_vm4 = vcmp.gt.f32.partialorder %v8038_v1, 0.0  ;;  %v2923_v60 = vmul.f32 0.01, %v8038_v1 }
 0x3a4   : > { %v8007_v50 = vadd.f32 %v10550_v2, %v10373_v38  ;;  %v8039_v42 = vadd.f32 %v10552_v13, %v10376_v54  ;;  %v8008_v56 = vadd.f32 %v10559_v6, %v10379_v0  ;;  %v3177_v59 = vadd.f32 %v3176_v53, %v3138_v57 }
 0x3a5   : > { %v10722_v55 = vsel %vm2857_vm3, %v8006_v58, %v2921_v24  ;;  %v10724_v41 = vsel %vm2859_vm4, %v8038_v1, %v2923_v60  ;;  %v8040_v28 = vadd.f32 %v10561_v19, %v10382_v35  ;;  %v3067_v10 = vadd.f32 %v3066_v7, %v10698_v61 }
 0x3a6   : > { %v3219_v43 = vadd.f32 %v3218_v34, %v3140_v23  ;;  %v3139_v2 = vmul.f32 %v10722_v55, %v10722_v55  ;;  %v8009_v13 = vadd.f32 %v10583_v18, %v10373_v38  ;;  %vm2860_vm5 = vcmp.gt.f32.partialorder %v8007_v50, 0.0 }
 0x3a7   : > { %v2924_v26 = vmul.f32 0.01, %v8007_v50  ;;  %vm2862_vm6 = vcmp.gt.f32.partialorder %v8039_v42, 0.0  ;;  %v2926_v6 = vmul.f32 0.01, %v8039_v42  ;;  %v3046_v53 = vadd.f32 %v3045_v37, %v10722_v55 }
 0x3a8   : > { %v3141_v57 = vmul.f32 %v10724_v41, %v10724_v41  ;;  %vm2861_vm7 = vcmp.gt.f32.partialorder %v8008_v56, 0.0  ;;  %v2925_v19 = vmul.f32 0.01, %v8008_v56  ;;  %vm2863_vm8 = vcmp.gt.f32.partialorder %v8040_v28, 0.0 }
 0x3a9   : > { %v10736_v58 = vsel %vm2860_vm5, %v8007_v50, %v2924_v26  ;;  %v10738_v7 = vsel %vm2862_vm6, %v8039_v42, %v2926_v6  ;;  %v2927_v34 = vmul.f32 0.01, %v8040_v28  ;;  %v3198_v1 = vadd.f32 %v3197_v33, %v3139_v2 }
 0x3aa   : > { %v3088_v18 = vadd.f32 %v3087_v49, %v10724_v41  ;;  %v3142_v23 = vmul.f32 %v10736_v58, %v10736_v58  ;;  %v3144_v37 = vmul.f32 %v10738_v7, %v10738_v7  ;;  %v10745_v24 = vsel %vm2861_vm7, %v8008_v56, %v2925_v19 }
 0x3ab   : > { %v10747_v60 = vsel %vm2863_vm8, %v8040_v28, %v2927_v34  ;;  %vm2864_vm9 = vcmp.gt.f32.partialorder %v8009_v13, 0.0  ;;  %v2928_v50 = vmul.f32 0.01, %v8009_v13  ;;  %v3240_v26 = vadd.f32 %v3239_v8, %v3141_v57 }
 0x3ac   : > { %v3026_v42 = vadd.f32 %v3025_v39, %v10736_v58  ;;  %v3068_v6 = vadd.f32 %v3067_v10, %v10738_v7  ;;  %v3143_v33 = vmul.f32 %v10745_v24, %v10745_v24  ;;  %v3178_v49 = vadd.f32 %v3177_v59, %v3142_v23 }
 0x3ad   : > { %v3220_v2 = vadd.f32 %v3219_v43, %v3144_v37  ;;  %v10753_v61 = vsel %vm2864_vm9, %v8009_v13, %v2928_v50  ;;  %v8041_v56 = vadd.f32 %v10590_v32, %v10376_v54  ;;  %v3047_v28 = vadd.f32 %v3046_v53, %v10745_v24 }
 0x3ae   : > { %v3089_v19 = vadd.f32 %v3088_v18, %v10747_v60  ;;  %v3145_v8 = vmul.f32 %v10747_v60, %v10747_v60  ;;  %v8010_v10 = vadd.f32 %v10592_v45, %v10379_v0  ;;  %v3146_v39 = vmul.f32 %v10753_v61, %v10753_v61 }
 0x3af   : > { %vm2866_vm10 = vcmp.gt.f32.partialorder %v8041_v56, 0.0  ;;  %v2930_v59 = vmul.f32 0.01, %v8041_v56  ;;  %v8042_v43 = vadd.f32 %v10603_v3, %v10382_v35  ;;  %v3199_v13 = vadd.f32 %v3198_v1, %v3143_v33 }
 0x3b0   : > { %vm2865_vm11 = vcmp.gt.f32.partialorder %v8010_v10, 0.0  ;;  %v2929_v32 = vmul.f32 0.01, %v8010_v10  ;;  %v8011_v53 = vadd.f32 %v10605_v21, %v10373_v38  ;;  %v8043_v45 = vadd.f32 %v10611_v31, %v10376_v54 }
 0x3b1   : > { %v10769_v57 = vsel %vm2866_vm10, %v8041_v56, %v2930_v59  ;;  %vm2867_vm12 = vcmp.gt.f32.partialorder %v8042_v43, 0.0  ;;  %v2931_v34 = vmul.f32 0.01, %v8042_v43  ;;  %v3027_v18 = vadd.f32 %v3026_v42, %v10753_v61 }
 0x3b2   : > { %13174 = vst [vmem:[#allocation52_spill] sm:$0xff] %v10769_v57  ;;  %v3148_v23 = vmul.f32 %v10769_v57, %v10769_v57  ;;  %v10776_v37 = vsel %vm2865_vm11, %v8010_v10, %v2929_v32  ;;  %vm2868_vm13 = vcmp.gt.f32.partialorder %v8011_v53, 0.0  ;;  %v3241_v3 = vadd.f32 %v3240_v26, %v3145_v8 }
 0x3b3   : > { %v3179_v1 = vadd.f32 %v3178_v49, %v3146_v39  ;;  %v10778_v50 = vsel %vm2867_vm12, %v8042_v43, %v2931_v34  ;;  %v2932_v21 = vmul.f32 0.01, %v8011_v53  ;;  %v3069_v33 = vadd.f32 %v3068_v6, %v10769_v57 }
 0x3b4   : > { %v3147_v56 = vmul.f32 %v10776_v37, %v10776_v37  ;;  %v3149_v31 = vmul.f32 %v10778_v50, %v10778_v50  ;;  %vm2870_vm14 = vcmp.gt.f32.partialorder %v8043_v45, 0.0  ;;  %v3048_v42 = vadd.f32 %v3047_v28, %v10776_v37 }
 0x3b5   : > { %v10786_v59 = vsel %vm2868_vm13, %v8011_v53, %v2932_v21  ;;  %v2934_v10 = vmul.f32 0.01, %v8043_v45  ;;  %v8012_v26 = vadd.f32 %v10613_v36, %v10379_v0  ;;  %v3221_v49 = vadd.f32 %v3220_v2, %v3148_v23 }
 0x3b6   : > { %v3090_v8 = vadd.f32 %v3089_v19, %v10778_v50  ;;  %v3150_v6 = vmul.f32 %v10786_v59, %v10786_v59  ;;  %v8044_v39 = vadd.f32 %v10617_v30, %v10382_v35  ;;  %v8013_v28 = vadd.f32 %v10637_v52, %v10373_v38 }
 0x3b7   : > { %v10795_v43 = vsel %vm2870_vm14, %v8043_v45, %v2934_v10  ;;  %vm2869_vm15 = vcmp.gt.f32.partialorder %v8012_v26, 0.0  ;;  %v2933_v32 = vmul.f32 0.01, %v8012_v26  ;;  %v3200_v53 = vadd.f32 %v3199_v13, %v3147_v56 }
 0x3b8   : > { %13175 = vst [vmem:[#allocation55_spill] sm:$0xff] %v10795_v43  ;;  %v3242_v34 = vadd.f32 %v3241_v3, %v3149_v31  ;;  %v3152_v36 = vmul.f32 %v10795_v43, %v10795_v43  ;;  %vm2871_vm0 = vcmp.gt.f32.partialorder %v8044_v39, 0.0  ;;  %v2935_v19 = vmul.f32 0.01, %v8044_v39 }
 0x3b9   : > { %v10801_v2 = vsel %vm2869_vm15, %v8012_v26, %v2933_v32  ;;  %vm2872_vm1 = vcmp.gt.f32.partialorder %v8013_v28, 0.0  ;;  %v2936_v23 = vmul.f32 0.01, %v8013_v28  ;;  %v3028_v30 = vadd.f32 %v3027_v18, %v10786_v59 }
 0x3ba   : > { %v3180_v45 = vadd.f32 %v3179_v1, %v3150_v6  ;;  %v3151_v21 = vmul.f32 %v10801_v2, %v10801_v2  ;;  %v8045_v52 = vadd.f32 %v10639_v11, %v10376_v54  ;;  %v10808_v13 = vsel %vm2871_vm0, %v8044_v39, %v2935_v19 }
 0x3bb   : > { %13176 = vst [vmem:[#allocation53_spill] sm:$0xff] %v10808_v13  ;;  %v10810_v3 = vsel %vm2872_vm1, %v8013_v28, %v2936_v23  ;;  %v8014_v56 = vadd.f32 %v10642_v25, %v10379_v0  ;;  %v8046_v31 = vadd.f32 %v10644_v17, %v10382_v35  ;;  %v3070_v10 = vadd.f32 %v3069_v33, %v10795_v43  ;;  %v8624_v43 = vld [vmem:[#allocation7 + $0x188] ss:$12 sps:$4 sm:$0xff]  }
 0x3bc   : > { %v3222_v18 = vadd.f32 %v3221_v49, %v3152_v36  ;;  %v3049_v1 = vadd.f32 %v3048_v42, %v10801_v2  ;;  %v3153_v26 = vmul.f32 %v10808_v13, %v10808_v13  ;;  %v3154_v11 = vmul.f32 %v10810_v3, %v10810_v3 }
 0x3bd   : > { %vm2874_vm2 = vcmp.gt.f32.partialorder %v8045_v52, 0.0  ;;  %v2938_v6 = vmul.f32 0.01, %v8045_v52  ;;  %vm2873_vm3 = vcmp.gt.f32.partialorder %v8014_v56, 0.0  ;;  %v3201_v39 = vadd.f32 %v3200_v53, %v3151_v21 }
 0x3be   : > { %v2937_v32 = vmul.f32 0.01, %v8014_v56  ;;  %vm2875_vm4 = vcmp.gt.f32.partialorder %v8046_v31, 0.0  ;;  %v2939_v25 = vmul.f32 0.01, %v8046_v31  ;;  %v3091_v17 = vadd.f32 %v3090_v8, %v10808_v13 }
 0x3bf   : > { %v10823_v28 = vsel %vm2874_vm2, %v8045_v52, %v2938_v6  ;;  %v8015_v33 = vadd.f32 %v10651_v62, %v10373_v38  ;;  %v8047_v42 = vadd.f32 %v10653_v46, %v10376_v54  ;;  %v3243_v49 = vadd.f32 %v3242_v34, %v3153_v26 }
 0x3c0   : > { %13177 = vst [vmem:[#allocation54_spill] sm:$0xff] %v10823_v28  ;;  %v3029_v36 = vadd.f32 %v3028_v30, %v10810_v3  ;;  %v10830_v19 = vsel %vm2873_vm3, %v8014_v56, %v2937_v32  ;;  %v10832_v23 = vsel %vm2875_vm4, %v8046_v31, %v2939_v25  ;;  %v3181_v53 = vadd.f32 %v3180_v45, %v3154_v11 }
 0x3c1   : > { %13178 = vst [vmem:[#allocation57_spill] sm:$0xff] %v10832_v23  ;;  %v3071_v21 = vadd.f32 %v3070_v10, %v10823_v28  ;;  %v3156_v8 = vmul.f32 %v10823_v28, %v10823_v28  ;;  %v3155_v52 = vmul.f32 %v10830_v19, %v10830_v19  ;;  %v3050_v62 = vadd.f32 %v3049_v1, %v10830_v19 }
 0x3c2   : > { %vm2876_vm5 = vcmp.gt.f32.partialorder %v8015_v33, 0.0  ;;  %v2940_v46 = vmul.f32 0.01, %v8015_v33  ;;  %vm2878_vm6 = vcmp.gt.f32.partialorder %v8047_v42, 0.0  ;;  %v3092_v34 = vadd.f32 %v3091_v17, %v10832_v23 }
 0x3c3   : > { %v3157_v30 = vmul.f32 %v10832_v23, %v10832_v23  ;;  %v2942_v56 = vmul.f32 0.01, %v8047_v42  ;;  %v8016_v45 = vadd.f32 %v10663_v5, %v10379_v0  ;;  %v8048_v10 = vadd.f32 %v10665_v16, %v10382_v35  ;;  %v8620_v23 = vld [vmem:[#allocation7 + $0x180] ss:$12 sps:$4 sm:$0xff]  }
 0x3c4   : > { %v10845_v31 = vsel %vm2876_vm5, %v8015_v33, %v2940_v46  ;;  %v8017_v1 = vadd.f32 %v10684_v48, %v10373_v38  ;;  %v8049_v26 = vadd.f32 %v10686_v9, %v10376_v54  ;;  %v3223_v11 = vadd.f32 %v3222_v18, %v3156_v8 }
 0x3c5   : > { %v3202_v6 = vadd.f32 %v3201_v39, %v3155_v52  ;;  %v10853_v32 = vsel %vm2878_vm6, %v8047_v42, %v2942_v56  ;;  %vm2877_vm7 = vcmp.gt.f32.partialorder %v8016_v45, 0.0  ;;  %v3158_v25 = vmul.f32 %v10845_v31, %v10845_v31 }
 0x3c6   : > { %13179 = vst [vmem:[#allocation59_spill] sm:$0xff] %v10853_v32  ;;  %v3160_v5 = vmul.f32 %v10853_v32, %v10853_v32  ;;  %v2941_v17 = vmul.f32 0.01, %v8016_v45  ;;  %vm2879_vm8 = vcmp.gt.f32.partialorder %v8048_v10, 0.0  ;;  %v3244_v16 = vadd.f32 %v3243_v49, %v3157_v30 }
 0x3c7   : > { %v2943_v33 = vmul.f32 0.01, %v8048_v10  ;;  %vm2880_vm9 = vcmp.gt.f32.partialorder %v8017_v1, 0.0  ;;  %v2944_v48 = vmul.f32 0.01, %v8017_v1  ;;  %v3030_v46 = vadd.f32 %v3029_v36, %v10845_v31 }
 0x3c8   : > { %v10860_v9 = vsel %vm2877_vm7, %v8016_v45, %v2941_v17  ;;  %vm2882_vm10 = vcmp.gt.f32.partialorder %v8049_v26, 0.0  ;;  %v2946_v18 = vmul.f32 0.01, %v8049_v26  ;;  %v3072_v39 = vadd.f32 %v3071_v21, %v10853_v32 }
 0x3c9   : > { %v3159_v42 = vmul.f32 %v10860_v9, %v10860_v9  ;;  %v10865_v8 = vsel %vm2879_vm8, %v8048_v10, %v2943_v33  ;;  %v10867_v52 = vsel %vm2880_vm9, %v8017_v1, %v2944_v48  ;;  %v3182_v56 = vadd.f32 %v3181_v53, %v3158_v25 }
 0x3ca   : > { %13180 = vst [vmem:[#allocation56_spill] sm:$0xff] %v10865_v8  ;;  %v3224_v49 = vadd.f32 %v3223_v11, %v3160_v5  ;;  %v3051_v30 = vadd.f32 %v3050_v62, %v10860_v9  ;;  %v3161_v36 = vmul.f32 %v10865_v8, %v10865_v8  ;;  %v3162_v45 = vmul.f32 %v10867_v52, %v10867_v52 }
 0x3cb   : > { %v10874_v17 = vsel %vm2882_vm10, %v8049_v26, %v2946_v18  ;;  %v8018_v21 = vadd.f32 %v10691_v14, %v10379_v0  ;;  %v8050_v10 = vadd.f32 %v10693_v27, %v10382_v35  ;;  %v3203_v1 = vadd.f32 %v3202_v6, %v3159_v42 }
 0x3cc   : > { %13181 = vst [vmem:[#allocation58_spill] sm:$0xff] %v10874_v17  ;;  %v3093_v53 = vadd.f32 %v3092_v34, %v10865_v8  ;;  %v3031_v11 = vadd.f32 %v3030_v46, %v10867_v52  ;;  %v3164_v62 = vmul.f32 %v10874_v17, %v10874_v17  ;;  %v3245_v26 = vadd.f32 %v3244_v16, %v3161_v36 }
 0x3cd   : > { %vm2881_vm11 = vcmp.gt.f32.partialorder %v8018_v21, 0.0  ;;  %v2945_v25 = vmul.f32 0.01, %v8018_v21  ;;  %vm2883_vm12 = vcmp.gt.f32.partialorder %v8050_v10, 0.0  ;;  %v2947_v5 = vmul.f32 0.01, %v8050_v10 }
 0x3ce   : > { %v8019_v33 = vadd.f32 %v10704_v20, %v10373_v38  ;;  %v8051_v14 = vadd.f32 %v10706_v44, %v10376_v54  ;;  %v8020_v27 = vadd.f32 %v10712_v47, %v10379_v0  ;;  %v3183_v34 = vadd.f32 %v3182_v56, %v3162_v45 }
 0x3cf   : > { %v10890_v6 = vsel %vm2881_vm11, %v8018_v21, %v2945_v25  ;;  %v10892_v48 = vsel %vm2883_vm12, %v8050_v10, %v2947_v5  ;;  %v8052_v46 = vadd.f32 %v10714_v63, %v10382_v35  ;;  %v3073_v18 = vadd.f32 %v3072_v39, %v10874_v17 }
 0x3d0   : > { %13182 = vst [vmem:[#allocation61_spill] sm:$0xff] %v10892_v48  ;;  %v3225_v16 = vadd.f32 %v3224_v49, %v3164_v62  ;;  %v3163_v38 = vmul.f32 %v10890_v6, %v10890_v6  ;;  %v3165_v54 = vmul.f32 %v10892_v48, %v10892_v48  ;;  %vm2884_vm13 = vcmp.gt.f32.partialorder %v8019_v33, 0.0 }
 0x3d1   : > { %v2948_v20 = vmul.f32 0.01, %v8019_v33  ;;  %vm2886_vm14 = vcmp.gt.f32.partialorder %v8051_v14, 0.0  ;;  %v2950_v0 = vmul.f32 0.01, %v8051_v14  ;;  %v3052_v44 = vadd.f32 %v3051_v30, %v10890_v6 }
 0x3d2   : > { %v3094_v47 = vadd.f32 %v3093_v53, %v10892_v48  ;;  %vm2885_vm15 = vcmp.gt.f32.partialorder %v8020_v27, 0.0  ;;  %v2949_v42 = vmul.f32 0.01, %v8020_v27  ;;  %vm2887_vm0 = vcmp.gt.f32.partialorder %v8052_v46, 0.0 }
 0x3d3   : > { %v10903_v35 = vsel %vm2884_vm13, %v8019_v33, %v2948_v20  ;;  %v10905_v63 = vsel %vm2886_vm14, %v8051_v14, %v2950_v0  ;;  %v2951_v39 = vmul.f32 0.01, %v8052_v46  ;;  %v3204_v45 = vadd.f32 %v3203_v1, %v3163_v38 }
 0x3d4   : > { %13183 = vst [vmem:[#allocation64_spill] sm:$0xff] %v10905_v63  ;;  %v3032_v56 = vadd.f32 %v3031_v11, %v10903_v35  ;;  %v3166_v49 = vmul.f32 %v10903_v35, %v10903_v35  ;;  %v3074_v36 = vadd.f32 %v3073_v18, %v10905_v63  ;;  %v3168_v30 = vmul.f32 %v10905_v63, %v10905_v63 }
 0x3d5   : > { %v3246_v21 = vadd.f32 %v3245_v26, %v3165_v54  ;;  %v10913_v10 = vsel %vm2885_vm15, %v8020_v27, %v2949_v42  ;;  %v10915_v53 = vsel %vm2887_vm0, %v8052_v46, %v2951_v39 }
 0x3d6   : > { %v3033_v62 = vrot.slane %v3032_v56, 4  ;;  %v3184_v25 = vadd.f32 %v3183_v34, %v3166_v49  ;;  %v3075_v5 = vrot.slane %v3074_v36, 4  ;;  %v3226_v33 = vadd.f32 %v3225_v16, %v3168_v30 }
 0x3d7   : > { %v3053_v11 = vadd.f32 %v3052_v44, %v10913_v10  ;;  %v3167_v14 = vmul.f32 %v10913_v10, %v10913_v10  ;;  %v3095_v18 = vadd.f32 %v3094_v47, %v10915_v53  ;;  %v3169_v20 = vmul.f32 %v10915_v53, %v10915_v53 }
 0x3d8   : > { %v3034_v1 = vadd.f32 %v3033_v62, %v3032_v56  ;;  %v3185_v26 = vrot.slane %v3184_v25, 4  ;;  %v3076_v27 = vadd.f32 %v3075_v5, %v3074_v36  ;;  %v3227_v38 = vrot.slane %v3226_v33, 4 }
 0x3d9   : > { %v3054_v46 = vrot.slane %v3053_v11, 4  ;;  %v3205_v54 = vadd.f32 %v3204_v45, %v3167_v14  ;;  %v3096_v0 = vrot.slane %v3095_v18, 4  ;;  %v3247_v34 = vadd.f32 %v3246_v21, %v3169_v20 }
 0x3da   : > { %v3035_v42 = vrot.slane %v3034_v1, 2  ;;  %v3186_v16 = vadd.f32 %v3185_v26, %v3184_v25  ;;  %v3077_v39 = vrot.slane %v3076_v27, 2  ;;  %v3228_v44 = vadd.f32 %v3227_v38, %v3226_v33 }
 0x3db   : > { %v3055_v49 = vadd.f32 %v3054_v46, %v3053_v11  ;;  %v3206_v30 = vrot.slane %v3205_v54, 4  ;;  %v3097_v63 = vadd.f32 %v3096_v0, %v3095_v18  ;;  %v3248_v17 = vrot.slane %v3247_v34, 4 }
 0x3dc   : > { %v3036_v47 = vadd.f32 %v3035_v42, %v3034_v1  ;;  %v3187_v48 = vrot.slane %v3186_v16, 2  ;;  %v3078_v32 = vadd.f32 %v3077_v39, %v3076_v27  ;;  %v3229_v28 = vrot.slane %v3228_v44, 2 }
 0x3dd   : > { %v3056_v56 = vrot.slane %v3055_v49, 2  ;;  %v3207_v62 = vadd.f32 %v3206_v30, %v3205_v54  ;;  %v3098_v36 = vrot.slane %v3097_v63, 2  ;;  %v3249_v5 = vadd.f32 %v3248_v17, %v3247_v34 }
 0x3de   : > { %v3037_v8 = vrot.slane %v3036_v47, 1  ;;  %v3188_v45 = vadd.f32 %v3187_v48, %v3186_v16  ;;  %v3079_v14 = vrot.slane %v3078_v32, 1  ;;  %v3230_v21 = vadd.f32 %v3229_v28, %v3228_v44 }
 0x3df   : > { %v3057_v20 = vadd.f32 %v3056_v56, %v3055_v49  ;;  %v3208_v25 = vrot.slane %v3207_v62, 2  ;;  %v3099_v26 = vadd.f32 %v3098_v36, %v3097_v63  ;;  %v3250_v33 = vrot.slane %v3249_v5, 2 }
 0x3e0   : > { %v3038_v11 = vadd.f32 %v3037_v8, %v3036_v47  ;;  %v3189_v38 = vrot.slane %v3188_v45, 1  ;;  %v3080_v18 = vadd.f32 %v3079_v14, %v3078_v32  ;;  %v3231_v46 = vrot.slane %v3230_v21, 1 }
 0x3e1   : > { %v3058_v1 = vrot.slane %v3057_v20, 1  ;;  %v3209_v0 = vadd.f32 %v3208_v25, %v3207_v62  ;;  %v3100_v27 = vrot.slane %v3099_v26, 1  ;;  %v3251_v42 = vadd.f32 %v3250_v33, %v3249_v5 }
 0x3e2   : > { %v3102_v39 = vmul.f32 0.0078125, %v3038_v11  ;;  %v3190_v54 = vadd.f32 %v3189_v38, %v3188_v45  ;;  %v3104_v30 = vmul.f32 0.0078125, %v3080_v18  ;;  %v3232_v17 = vadd.f32 %v3231_v46, %v3230_v21 }
 0x3e3   : > { %v3059_v34 = vadd.f32 %v3058_v1, %v3057_v20  ;;  %v3210_v48 = vrot.slane %v3209_v0, 1  ;;  %v3101_v16 = vadd.f32 %v3100_v27, %v3099_v26  ;;  %v3252_v28 = vrot.slane %v3251_v42, 1 }
 0x3e4   : > { %v3254_v44 = vmul.f32 0.0078125, %v3190_v54  ;;  %v3258_v49 = vmul.f32 %v3102_v39, %v3102_v39  ;;  %v3256_v63 = vmul.f32 0.0078125, %v3232_v17  ;;  %v3260_v56 = vmul.f32 %v3104_v30, %v3104_v30 }
 0x3e5   : > { %v3103_v8 = vmul.f32 0.0078125, %v3059_v34  ;;  %v3211_v47 = vadd.f32 %v3210_v48, %v3209_v0  ;;  %v3105_v32 = vmul.f32 0.0078125, %v3101_v16  ;;  %v3253_v36 = vadd.f32 %v3252_v28, %v3251_v42  ;;  %v13184_v28 = vld [vmem:[#allocation63_spill] sm:$0xff] }
 0x3e6   : > { %v3262_v14 = vsub.f32 %v3254_v44, %v3258_v49  ;;  %v3264_v62 = vsub.f32 %v3256_v63, %v3260_v56  ;;  %v3016_v56 = vld [vmem:[#allocation2 + $0x10] sm:$0xf] }
 0x3e7   : > { %v3255_v25 = vmul.f32 0.0078125, %v3211_v47  ;;  %v3259_v5 = vmul.f32 %v3103_v8, %v3103_v8  ;;  %v3257_v33 = vmul.f32 0.0078125, %v3253_v36  ;;  %v3261_v45 = vmul.f32 %v3105_v32, %v3105_v32 }
 0x3e8   : > { %v3266_v11 = vmax.f32 %v3262_v14, 0.0  ;;  %v3268_v21 = vmax.f32 %v3264_v62, 0.0 }
 0x3e9   : > { %v3263_v20 = vsub.f32 %v3255_v25, %v3259_v5  ;;  %v3265_v38 = vsub.f32 %v3257_v33, %v3261_v45 }
 0x3ea   : > { %v3270_v26 = vadd.f32 1e-05, %v3266_v11  ;;  %v3272_v18 = vadd.f32 1e-05, %v3268_v21 }
 0x3eb   : > { %v3267_v46 = vmax.f32 %v3263_v20, 0.0  ;;  %v3269_v1 = vmax.f32 %v3265_v38, 0.0 }
 0x3ec   : > { %8796 = vrsqrt.f32 %v3270_v26 }
 0x3ed   : > { %v3271_v27 = vadd.f32 1e-05, %v3267_v46  ;;  %v3273_v54 = vadd.f32 1e-05, %v3269_v1  ;;  %8798 = vrsqrt.f32 %v3272_v18 }
 0x3ef   : > { %8800 = vrsqrt.f32 %v3271_v27  ;;  %v13186_v27 = vld [vmem:[#allocation29_spill] sm:$0xff] }
 0x3f0   : > { %8802 = vrsqrt.f32 %v3273_v54 }
 0x3f6   : > { %v8797_v0 = vpop.eup %8796 }
 0x3f7   : > { %v8799_v42 = vpop.eup %8798 }
 0x3f9   : > { %v8801_v17 = vpop.eup %8800 }
 0x3fa   : > { %v8803_v34 = vpop.eup %8802  ;;  %v3282_v48 = vcombine.low %v8797_v0, %v8801_v17  ;;  %v13188_v0 = vld [vmem:[#allocation49_spill] sm:$0xff]  ;;  %v13190_v17 = vld [vmem:[#allocation39_spill] sm:$0xff] }
 0x3fb   : > { %v3283_v16 = vcombine.low %v8799_v42, %v8803_v34  ;;  %v13189_v42 = vld [vmem:[#allocation31_spill] sm:$0xff] }
 0x3fc   : > { %v3290_v44 = vrot.slane %v3282_v48, %v13184_v28 }
 0x3fd   : > { %v3297_v49 = vrot.slane %v3283_v16, %v13184_v28  ;;  %v13192_v16 = vld [vmem:[#allocation30_spill] sm:$0xff] }
 0x3ff   : > { %v3298_v63 = vcombine.low %v3290_v44, %v3297_v49  ;;  %v13193_v44 = vld [vmem:[#allocation47_spill] sm:$0xff] }
 0x401   : > { %v3305_v47 = vrot.slane %v3298_v63, %v13184_v28  ;;  %v13194_v63 = vld [vmem:[#allocation22_spill] sm:$0xff] }
 0x403   : > { %v3307_v36 = vmul.f32 %v3305_v47, %v3016_v56  ;;  %v13195_v47 = vld [vmem:[#allocation38_spill] sm:$0xff] }
 0x405   : > { %v3312_v14 = vrot.slane %v3307_v36, %v13139_v4  ;;  %v3316_v62 = vrot.slane %v3307_v36, %v13141_v15  ;;  %v10929_v25 = vrot.slane %v3307_v36, %v13140_v22  ;;  %v10932_v5 = vrot.slane %v3307_v36, %v13142_v29 }
 0x407   : > { %v3329_v33 = vmul.f32 %v3312_v14, %v3102_v39  ;;  %v3330_v45 = vmul.f32 %v3316_v62, %v3103_v8  ;;  %v3331_v11 = vmul.f32 %v10929_v25, %v3104_v30  ;;  %v3332_v21 = vmul.f32 %v10932_v5, %v3105_v32  ;;  %v13187_v39 = vld [vmem:[#allocation41_spill] sm:$0xff] }
 0x408   : > { %v10938_v20 = vmul.f32 %v10932_v5, %v10915_v53  ;;  %v3364_v38 = vmul.f32 %v3316_v62, %v10396_v12  ;;  %v3368_v26 = vmul.f32 %v3316_v62, %v10421_v40  ;;  %v3363_v18 = vmul.f32 %v3312_v14, %v10388_v51  ;;  %v13191_v53 = vld [vmem:[#allocation23_spill] sm:$0xff] }
 0x409   : > { %v3337_v46 = vcombine.low %v3329_v33, %v3330_v45  ;;  %v3338_v1 = vcombine.low %v3331_v11, %v3332_v21  ;;  %v3367_v54 = vmul.f32 %v3312_v14, %v13186_v27  ;;  %v3372_v8 = vmul.f32 %v3316_v62, %v13187_v39  ;;  %v13196_v33 = vld [vmem:[#allocation46_spill] sm:$0xff]  ;;  %v13197_v11 = vld [vmem:[#allocation28_spill] sm:$0xff] }
 0x40a   : > { %13185 = vst [vmem:[#allocation60_spill] sm:$0xff] %v10938_v20  ;;  %v3376_v30 = vmul.f32 %v3316_v62, %v13188_v0  ;;  %v3371_v32 = vmul.f32 %v3312_v14, %v13189_v42  ;;  %v3375_v34 = vmul.f32 %v3312_v14, %v13190_v17  ;;  %v3380_v48 = vmul.f32 %v3316_v62, %v13191_v53  ;;  %v13198_v39 = vld [vmem:[#allocation36_spill] sm:$0xff] }
 0x40b   : > { %v3345_v12 = vrot.slane %v3337_v46, %v13184_v28  ;;  %v3352_v40 = vrot.slane %v3338_v1, %v13184_v28  ;;  %v3384_v51 = vmul.f32 %v3316_v62, %v13192_v16  ;;  %v3379_v49 = vmul.f32 %v3312_v14, %v13193_v44  ;;  %v3017_v1 = vld [vmem:[#allocation2 + $0x14] sm:$0xf]  ;;  %v13199_v17 = vld [vmem:[#allocation44_spill] sm:$0xff] }
 0x40c   : > { %v3383_v56 = vmul.f32 %v3312_v14, %v13194_v63  ;;  %v3388_v36 = vmul.f32 %v3316_v62, %v13195_v47  ;;  %v3392_v45 = vmul.f32 %v3316_v62, %v13196_v33  ;;  %v3387_v21 = vmul.f32 %v3312_v14, %v13197_v11  ;;  %v13201_v11 = vld [vmem:[#allocation27_spill] sm:$0xff] }
 0x40d   : > { %v3353_v27 = vcombine.low %v3345_v12, %v3352_v40  ;;  %v3391_v0 = vmul.f32 %v3312_v14, %v13198_v39  ;;  %v10959_v42 = vmul.f32 %v3316_v62, %v10722_v55  ;;  %v10962_v46 = vmul.f32 %v3316_v62, %v10745_v24 }
 0x40e   : > { %v10965_v53 = vmul.f32 %v3312_v14, %v13199_v17  ;;  %v10968_v16 = vmul.f32 %v3312_v14, %v10736_v58  ;;  %v10971_v44 = vmul.f32 %v3316_v62, %v10776_v37  ;;  %v10974_v12 = vmul.f32 %v3316_v62, %v10801_v2 }
 0x40f   : > { %v3360_v40 = vrot.slane %v3353_v27, %v13184_v28  ;;  %v10978_v55 = vmul.f32 %v3312_v14, %v10753_v61  ;;  %v10981_v24 = vmul.f32 %v3312_v14, %v10786_v59  ;;  %v10984_v63 = vmul.f32 %v3316_v62, %v10830_v19 }
 0x410   : > { %v10987_v58 = vmul.f32 %v3316_v62, %v10860_v9  ;;  %v10990_v37 = vmul.f32 %v3312_v14, %v10810_v3  ;;  %v10993_v2 = vmul.f32 %v3312_v14, %v10845_v31  ;;  %v10996_v47 = vmul.f32 %v3316_v62, %v10890_v6  ;;  %v13200_v9 = vld [vmem:[#allocation24_spill] sm:$0xff]  ;;  %v13202_v6 = vld [vmem:[#allocation21_spill] sm:$0xff] }
 0x411   : > { %v3362_v61 = vsub.f32 %v3017_v1, %v3360_v40  ;;  %v10999_v33 = vmul.f32 %v3316_v62, %v10913_v10  ;;  %v11002_v59 = vmul.f32 %v3312_v14, %v10867_v52  ;;  %v11005_v19 = vmul.f32 %v3312_v14, %v10903_v35  ;;  %v13203_v10 = vld [vmem:[#allocation33_spill] sm:$0xff]  ;;  %v13204_v1 = vld [vmem:[#allocation35_spill] sm:$0xff] }
 0x412   : > { %v11009_v3 = vmul.f32 %v10932_v5, %v13200_v9  ;;  %v11013_v31 = vmul.f32 %v10932_v5, %v13201_v11  ;;  %v11017_v27 = vmul.f32 %v10929_v25, %v13202_v6  ;;  %v11021_v62 = vmul.f32 %v10929_v25, %v13203_v10  ;;  %v13205_v40 = vld [vmem:[#allocation43_spill] sm:$0xff]  ;;  %v13206_v11 = vld [vmem:[#allocation37_spill] sm:$0xff] }
 0x413   : > { %v11024_v52 = vrot.slane %v3362_v61, %v13139_v4  ;;  %v11027_v35 = vrot.slane %v3362_v61, %v13141_v15  ;;  %v11030_v14 = vrot.slane %v3362_v61, %v13140_v22  ;;  %v11033_v39 = vrot.slane %v3362_v61, %v13142_v29  ;;  %v13207_v10 = vld [vmem:[#allocation45_spill] sm:$0xff] }
 0x414   : > { %v11037_v17 = vmul.f32 %v10932_v5, %v13204_v1  ;;  %v11041_v9 = vmul.f32 %v10932_v5, %v13205_v40  ;;  %v11045_v6 = vmul.f32 %v10929_v25, %v13206_v11  ;;  %v11049_v28 = vmul.f32 %v10929_v25, %v13207_v10 }
 0x415   : > { %v3449_v15 = vadd.f32 %v11027_v35, %v3364_v38  ;;  %v3453_v29 = vadd.f32 %v11027_v35, %v3368_v26  ;;  %v3448_v61 = vadd.f32 %v11024_v52, %v3363_v18  ;;  %v3452_v1 = vadd.f32 %v11024_v52, %v3367_v54 }
 0x416   : > { %v3457_v4 = vadd.f32 %v11027_v35, %v3372_v8  ;;  %v3461_v40 = vadd.f32 %v11027_v35, %v3376_v30  ;;  %v3456_v22 = vadd.f32 %v11024_v52, %v3371_v32  ;;  %v3460_v11 = vadd.f32 %v11024_v52, %v3375_v34  ;;  %v8627_v30 = vld [vmem:[#allocation7 + $0x19c] ss:$12 sps:$4 sm:$0xff]   ;;  %v8631_v32 = vld [vmem:[#allocation7 + $0x260] ss:$12 sps:$4 sm:$0xff]  }
 0x417   : > { %v3514_v20 = vpack.c.bf16 %v3453_v29, %v3449_v15  ;;  %v3513_v10 = vpack.c.bf16 %v3452_v1, %v3448_v61  ;;  %v3465_v38 = vadd.f32 %v11027_v35, %v3380_v48  ;;  %v3469_v26 = vadd.f32 %v11027_v35, %v3384_v51  ;;  %v8625_v51 = vld [vmem:[#allocation7 + $0x198] ss:$12 sps:$4 sm:$0xff]   ;;  %v8628_v1 = vld [vmem:[#allocation7 + $0x1b0] ss:$12 sps:$4 sm:$0xff]  }
 0x418   : > { %v3518_v57 = vpack.c.bf16 %v3461_v40, %v3457_v4  ;;  %v3517_v18 = vpack.c.bf16 %v3460_v11, %v3456_v22  ;;  %v3464_v54 = vadd.f32 %v11024_v52, %v3379_v49  ;;  %v3468_v8 = vadd.f32 %v11024_v52, %v3383_v56  ;;  %v8632_v49 = vld [vmem:[#allocation7 + $0x1a0] ss:$12 sps:$4 sm:$0xff]   ;;  %v8639_v29 = vld [vmem:[#allocation7 + $0x278] ss:$12 sps:$4 sm:$0xff]  }
 0x419   : > { %4233 = vmatprep.mubr.bf16.mxu0 %v3514_v20  ;;  %4459 = vmatprep.mubr.bf16.mxu1 %v3514_v20  ;;  %v3522_v13 = vpack.c.bf16 %v3469_v26, %v3465_v38  ;;  %v3473_v15 = vadd.f32 %v11027_v35, %v3388_v36  ;;  %v3477_v34 = vadd.f32 %v11027_v35, %v3392_v45  ;;  %v8630_v45 = vld [vmem:[#allocation7 + $0x1b4] ss:$12 sps:$4 sm:$0xff]   ;;  %v8635_v11 = vld [vmem:[#allocation7 + $0x1cc] ss:$12 sps:$4 sm:$0xff]  }
 0x41a   : > { %4234 = vmatmul.mubr.bf16.vlgmr.msra.gmra.mrb[64].mxu0 %v3513_v10  ;;  %4460 = vmatmul.mubr.bf16.vlgmr.msra.gmra.mrb[64].mxu1 %v3513_v10  ;;  %v11065_v48 = vpack.c.bf16 %v3468_v8, %v3464_v54  ;;  %v3472_v4 = vadd.f32 %v11024_v52, %v3387_v21  ;;  %v3476_v22 = vadd.f32 %v11024_v52, %v3391_v0  ;;  %v8640_v10 = vld [vmem:[#allocation7 + $0x1b8] ss:$12 sps:$4 sm:$0xff]   ;;  %v8647_v54 = vld [vmem:[#allocation7 + $0x290] ss:$12 sps:$4 sm:$0xff]  }
 0x41b   : > { %4315 = vmatpush1.bf16.msra.mxu0 %v8620_v23  ;;  %7766 = vmatpush3.bf16.msra.mxu1 %v8624_v43  ;;  %v11069_v20 = vpack.c.bf16 %v3477_v34, %v3473_v15  ;;  %v3481_v56 = vadd.f32 %v11027_v35, %v10959_v42  ;;  %v3485_v36 = vadd.f32 %v11027_v35, %v10962_v46 }
 0x41c   : > { %4243 = vmatprep.mubr.bf16.mxu0 %v3518_v57  ;;  %4467 = vmatprep.mubr.bf16.mxu1 %v3518_v57  ;;  %v11075_v61 = vpack.c.bf16 %v3476_v22, %v3472_v4  ;;  %v3480_v23 = vadd.f32 %v11024_v52, %v10965_v53  ;;  %v3484_v43 = vadd.f32 %v11024_v52, %v10968_v16  ;;  %v13210_v22 = vld [vmem:[#allocation51_spill] sm:$0xff] }
 0x41d   : > { %4316 = vmatprep.subr.bf16.mxu0 %v8627_v30  ;;  %7767 = vmatprep.subr.bf16.mxu1 %v8631_v32  ;;  %v11081_v21 = vpack.c.bf16 %v3485_v36, %v3481_v56  ;;  %v3489_v0 = vadd.f32 %v11027_v35, %v10971_v44  ;;  %v3493_v57 = vadd.f32 %v11027_v35, %v10974_v12  ;;  %v8648_v30 = vld [vmem:[#allocation7 + $0x1d0] ss:$12 sps:$4 sm:$0xff]  }
 0x41e   : > { %v11087_v42 = vpack.c.bf16 %v3484_v43, %v3480_v23  ;;  %v3488_v46 = vadd.f32 %v11024_v52, %v10978_v55  ;;  %v3492_v53 = vadd.f32 %v11024_v52, %v10981_v24  ;;  %v3497_v16 = vadd.f32 %v11027_v35, %v10984_v63  ;;  %v8643_v23 = vld [vmem:[#allocation7 + $0x1fc] ss:$12 sps:$4 sm:$0xff]  }
 0x41f   : > { %4317 = vmatpush1.bf16.msra.mxu0 %v8625_v51  ;;  %7768 = vmatpush3.bf16.msra.mxu1 %v8632_v49  ;;  %v11095_v40 = vpack.c.bf16 %v3493_v57, %v3489_v0  ;;  %v3501_v44 = vadd.f32 %v11027_v35, %v10987_v58  ;;  %v3496_v12 = vadd.f32 %v11024_v52, %v10990_v37  ;;  %v13211_v49 = vld [vmem:[#allocation25_spill] sm:$0xff] }
 0x420   : > { %4318 = vmatprep.subr.bf16.mxu0 %v8630_v45  ;;  %7769 = vmatprep.subr.bf16.mxu1 %v8639_v29  ;;  %v11101_v55 = vpack.c.bf16 %v3492_v53, %v3488_v46  ;;  %v3500_v24 = vadd.f32 %v11024_v52, %v10993_v2  ;;  %v3505_v63 = vadd.f32 %v11027_v35, %v10996_v47  ;;  %v13212_v45 = vld [vmem:[#allocation42_spill] sm:$0xff] }
 0x421   : > { %v11107_v38 = vpack.c.bf16 %v3501_v44, %v3497_v16  ;;  %v3509_v58 = vadd.f32 %v11027_v35, %v10999_v33  ;;  %v3504_v37 = vadd.f32 %v11024_v52, %v11002_v59  ;;  %v3508_v26 = vadd.f32 %v11024_v52, %v11005_v19  ;;  %v8633_v33 = vld [vmem:[#allocation7 + $0x1c8] ss:$12 sps:$4 sm:$0xff]   ;;  %v8638_v52 = vld [vmem:[#allocation7 + $0x1e4] ss:$12 sps:$4 sm:$0xff]   ;;  %v13214_v44 = vld [vmem:[#allocation32_spill] sm:$0xff] }
 0x422   : > { %4244 = vmatmul.mubr.bf16.gmra.mrb[68].mxu0 %v3517_v18  ;;  %4468 = vmatmul.mubr.bf16.gmra.mrb[68].mxu1 %v3517_v18  ;;  %v11115_v8 = vpack.c.bf16 %v3500_v24, %v3496_v12  ;;  %v3451_v2 = vadd.f32 %v11033_v39, %v11009_v3  ;;  %v3455_v47 = vadd.f32 %v11033_v39, %v11013_v31  ;;  %v13213_v46 = vld [vmem:[#allocation50_spill] sm:$0xff] }
 0x423   : > { %4319 = vmatpush1.bf16.msra.mxu0 %v8628_v1  ;;  %4253 = vmatprep.mubr.bf16.mxu0 %v3522_v13  ;;  %v11121_v35 = vpack.c.bf16 %v3509_v58, %v3505_v63  ;;  %v11123_v59 = vpack.c.bf16 %v3508_v26, %v3504_v37  ;;  %v3450_v19 = vadd.f32 %v11030_v14, %v11017_v27  ;;  %v13208_v27 = vld [vmem:[#allocation26_spill] sm:$0xff] }
 0x424   : > { %4475 = vmatprep.mubr.bf16.mxu1 %v3522_v13  ;;  %4320 = vmatprep.subr.bf16.mxu0 %v8635_v11  ;;  %v11127_v18 = vpack.c.bf16 %v3455_v47, %v3451_v2  ;;  %v3454_v3 = vadd.f32 %v11030_v14, %v11021_v62  ;;  %v3459_v31 = vadd.f32 %v11033_v39, %v11037_v17  ;;  %v13209_v62 = vld [vmem:[#allocation34_spill] sm:$0xff]  ;;  %v13215_v11 = vld [vmem:[#allocation40_spill] sm:$0xff] }
 0x425   : > { %7770 = vmatpush3.bf16.msra.mxu1 %v8640_v10  ;;  %v3463_v32 = vadd.f32 %v11033_v39, %v11041_v9  ;;  %v3458_v15 = vadd.f32 %v11030_v14, %v11045_v6  ;;  %v3462_v13 = vadd.f32 %v11030_v14, %v11049_v28  ;;  %v3382_v34 = vmul.f32 %v10932_v5, %v13208_v27  ;;  %v8636_v6 = vld [vmem:[#allocation7 + $0x1e0] ss:$12 sps:$4 sm:$0xff]   ;;  %v8655_v16 = vld [vmem:[#allocation7 + $0x2a8] ss:$12 sps:$4 sm:$0xff]  }
 0x426   : > { %7771 = vmatprep.subr.bf16.mxu1 %v8647_v54  ;;  %v11141_v4 = vpack.c.bf16 %v3454_v3, %v3450_v19  ;;  %v3386_v17 = vmul.f32 %v10932_v5, %v13209_v62  ;;  %v3381_v51 = vmul.f32 %v10929_v25, %v13210_v22  ;;  %v3385_v9 = vmul.f32 %v10929_v25, %v13211_v49  ;;  %v8656_v10 = vld [vmem:[#allocation7 + $0x1e8] ss:$12 sps:$4 sm:$0xff]   ;;  %v8641_v54 = vld [vmem:[#allocation7 + $0x1f8] ss:$12 sps:$4 sm:$0xff]   ;;  %v8663_v2 = vld [vmem:[#allocation7 + $0x2c0] ss:$12 sps:$4 sm:$0xff]  }
 0x427   : > { %4321 = vmatpush1.bf16.msra.mxu0 %v8633_v33  ;;  %v11149_v56 = vpack.c.bf16 %v3463_v32, %v3459_v31  ;;  %v11151_v28 = vpack.c.bf16 %v3462_v13, %v3458_v15  ;;  %v3467_v36 = vadd.f32 %v11033_v39, %v3382_v34  ;;  %v3390_v29 = vmul.f32 %v10932_v5, %v13212_v45  ;;  %v13216_v3 = vld [vmem:[#allocation48_spill] sm:$0xff]  ;;  %v13217_v13 = vld [vmem:[#allocation53_spill] sm:$0xff] }
 0x428   : > { %4322 = vmatprep.subr.bf16.mxu0 %v8638_v52  ;;  %v3471_v43 = vadd.f32 %v11033_v39, %v3386_v17  ;;  %v3466_v0 = vadd.f32 %v11030_v14, %v3381_v51  ;;  %v3470_v57 = vadd.f32 %v11030_v14, %v3385_v9  ;;  %v3394_v53 = vmul.f32 %v10932_v5, %v13213_v46  ;;  %v13218_v34 = vld [vmem:[#allocation52_spill] sm:$0xff]  ;;  %v13219_v17 = vld [vmem:[#allocation55_spill] sm:$0xff] }
 0x429   : > { %7772 = vmatpush3.bf16.msra.mxu1 %v8648_v30  ;;  %v3475_v1 = vadd.f32 %v11033_v39, %v3390_v29  ;;  %v3389_v12 = vmul.f32 %v10929_v25, %v13214_v44  ;;  %v3393_v24 = vmul.f32 %v10929_v25, %v13215_v11  ;;  %v3398_v63 = vmul.f32 %v10932_v5, %v10724_v41  ;;  %v8644_v51 = vld [vmem:[#allocation7 + $0x210] ss:$12 sps:$4 sm:$0xff]   ;;  %v8651_v9 = vld [vmem:[#allocation7 + $0x22c] ss:$12 sps:$4 sm:$0xff]   ;;  %v13220_v29 = vld [vmem:[#allocation57_spill] sm:$0xff] }
 0x42a   : > { %4254 = vmatmul.mubr.bf16.gmra.mrb[72].mxu0 %v11065_v48  ;;  %4476 = vmatmul.mubr.bf16.gmra.mrb[72].mxu1 %v11065_v48  ;;  %v11170_v58 = vpack.c.bf16 %v3471_v43, %v3467_v36  ;;  %v11172_v37 = vpack.c.bf16 %v3470_v57, %v3466_v0  ;;  %v3479_v26 = vadd.f32 %v11033_v39, %v3394_v53  ;;  %v8646_v48 = vld [vmem:[#allocation7 + $0x214] ss:$12 sps:$4 sm:$0xff]   ;;  %v13221_v57 = vld [vmem:[#allocation56_spill] sm:$0xff]  ;;  %v13222_v53 = vld [vmem:[#allocation54_spill] sm:$0xff] }
 0x42b   : > { %4323 = vmatpush1.bf16.msra.mxu0 %v8636_v6  ;;  %4263 = vmatprep.mubr.bf16.mxu0 %v11069_v20  ;;  %v3474_v47 = vadd.f32 %v11030_v14, %v3389_v12  ;;  %v3478_v41 = vadd.f32 %v11030_v14, %v3393_v24  ;;  %v3402_v33 = vmul.f32 %v10932_v5, %v10747_v60  ;;  %v8664_v43 = vld [vmem:[#allocation7 + $0x200] ss:$12 sps:$4 sm:$0xff]   ;;  %v8671_v12 = vld [vmem:[#allocation7 + $0x2d8] ss:$12 sps:$4 sm:$0xff]  }
 0x42c   : > { %4483 = vmatprep.mubr.bf16.mxu1 %v11069_v20  ;;  %4324 = vmatprep.subr.bf16.mxu0 %v8643_v23  ;;  %v11181_v19 = vpack.c.bf16 %v3479_v26, %v3475_v1  ;;  %v3483_v52 = vadd.f32 %v11033_v39, %v3398_v63  ;;  %v3397_v31 = vmul.f32 %v10929_v25, %v13216_v3  ;;  %v13223_v1 = vld [vmem:[#allocation59_spill] sm:$0xff] }
 0x42d   : > { %7773 = vmatprep.subr.bf16.mxu1 %v8655_v16  ;;  %v11186_v30 = vpack.c.bf16 %v3478_v41, %v3474_v47  ;;  %v3487_v32 = vadd.f32 %v11033_v39, %v3402_v33  ;;  %v3401_v15 = vmul.f32 %v10929_v25, %v10738_v7  ;;  %v3406_v60 = vmul.f32 %v10932_v5, %v10778_v50  ;;  %v13224_v47 = vld [vmem:[#allocation61_spill] sm:$0xff]  ;;  %v13225_v33 = vld [vmem:[#allocation60_spill] sm:$0xff] }
 0x42e   : > { %7774 = vmatpush3.bf16.msra.mxu1 %v8656_v10  ;;  %v3482_v20 = vadd.f32 %v11030_v14, %v3397_v31  ;;  %v3410_v27 = vmul.f32 %v10932_v5, %v13217_v13  ;;  %v3405_v62 = vmul.f32 %v10929_v25, %v13218_v34  ;;  %v3409_v22 = vmul.f32 %v10929_v25, %v13219_v17  ;;  %v8649_v10 = vld [vmem:[#allocation7 + $0x228] ss:$12 sps:$4 sm:$0xff]   ;;  %v8672_v31 = vld [vmem:[#allocation7 + $0x218] ss:$12 sps:$4 sm:$0xff]   ;;  %v8652_v13 = vld [vmem:[#allocation7 + $0x240] ss:$12 sps:$4 sm:$0xff]  }
 0x42f   : > { %4325 = vmatpush1.bf16.msra.mxu0 %v8641_v54  ;;  %7775 = vmatprep.subr.bf16.mxu1 %v8663_v2  ;;  %v11200_v49 = vpack.c.bf16 %v3487_v32, %v3483_v52  ;;  %v3486_v7 = vadd.f32 %v11030_v14, %v3401_v15  ;;  %v3491_v50 = vadd.f32 %v11033_v39, %v3406_v60  ;;  %v13226_v52 = vld [vmem:[#allocation58_spill] sm:$0xff]  ;;  %v13227_v60 = vld [vmem:[#allocation64_spill] sm:$0xff] }
 0x430   : > { %4326 = vmatprep.subr.bf16.mxu0 %v8646_v48  ;;  %v3495_v6 = vadd.f32 %v11033_v39, %v3410_v27  ;;  %v3490_v36 = vadd.f32 %v11030_v14, %v3405_v62  ;;  %v3494_v45 = vadd.f32 %v11030_v14, %v3409_v22  ;;  %v3414_v23 = vmul.f32 %v10932_v5, %v13220_v29  ;;  %v8659_v34 = vld [vmem:[#allocation7 + $0x25c] ss:$12 sps:$4 sm:$0xff]  }
 0x431   : > { %v11209_v0 = vpack.c.bf16 %v3486_v7, %v3482_v20  ;;  %v3418_v46 = vmul.f32 %v10932_v5, %v13221_v57  ;;  %v3413_v16 = vmul.f32 %v10929_v25, %v13222_v53  ;;  %v3417_v44 = vmul.f32 %v10929_v25, %v13223_v1  ;;  %v8679_v17 = vld [vmem:[#allocation7 + $0x2f0] ss:$12 sps:$4 sm:$0xff]   ;;  %v8667_v7 = vld [vmem:[#allocation7 + $0x28c] ss:$12 sps:$4 sm:$0xff]  }
 0x432   : > { %4264 = vmatmul.mubr.bf16.gmra.mrb[76].mxu0 %v11075_v61  ;;  %4484 = vmatmul.mubr.bf16.gmra.mrb[76].mxu1 %v11075_v61  ;;  %v11219_v11 = vpack.c.bf16 %v3495_v6, %v3491_v50  ;;  %v11221_v24 = vpack.c.bf16 %v3494_v45, %v3490_v36  ;;  %v3499_v63 = vadd.f32 %v11033_v39, %v3414_v23  ;;  %v8654_v61 = vld [vmem:[#allocation7 + $0x244] ss:$12 sps:$4 sm:$0xff]   ;;  %v8668_v50 = vld [vmem:[#allocation7 + $0x2a0] ss:$12 sps:$4 sm:$0xff]  }
 0x433   : > { %4327 = vmatpush1.bf16.msra.mxu0 %v8644_v51  ;;  %4273 = vmatprep.mubr.bf16.mxu0 %v11081_v21  ;;  %v3503_v26 = vadd.f32 %v11033_v39, %v3418_v46  ;;  %v3498_v54 = vadd.f32 %v11030_v14, %v3413_v16  ;;  %v3502_v2 = vadd.f32 %v11030_v14, %v3417_v44  ;;  %v8660_v51 = vld [vmem:[#allocation7 + $0x270] ss:$12 sps:$4 sm:$0xff]   ;;  %v8678_v6 = vld [vmem:[#allocation7 + $0x2d4] ss:$12 sps:$4 sm:$0xff]   ;;  %v8683_v36 = vld [vmem:[#allocation7 + $0x2ec] ss:$12 sps:$4 sm:$0xff]  }
 0x434   : > { %4491 = vmatprep.mubr.bf16.mxu1 %v11081_v21  ;;  %4328 = vmatprep.subr.bf16.mxu0 %v8651_v9  ;;  %v3422_v41 = vmul.f32 %v10932_v5, %v13224_v47  ;;  %v3511_v48 = vadd.f32 %v11033_v39, %v13225_v33  ;;  %v3421_v3 = vmul.f32 %v10929_v25, %v13226_v52  ;;  %v8675_v9 = vld [vmem:[#allocation7 + $0x2bc] ss:$12 sps:$4 sm:$0xff]  }
 0x435   : > { %7776 = vmatpush3.bf16.msra.mxu1 %v8664_v43  ;;  %v11235_v32 = vpack.c.bf16 %v3503_v26, %v3499_v63  ;;  %v11237_v15 = vpack.c.bf16 %v3502_v2, %v3498_v54  ;;  %v3425_v21 = vmul.f32 %v10929_v25, %v13227_v60  ;;  %v8680_v25 = vld [vmem:[#allocation7 + $0x230] ss:$12 sps:$4 sm:$0xff]  }
 0x436   : > { %7777 = vmatprep.subr.bf16.mxu1 %v8671_v12  ;;  %v3507_v20 = vadd.f32 %v11033_v39, %v3422_v41  ;;  %v3506_v5 = vadd.f32 %v11030_v14, %v3421_v3  ;;  %v8657_v39 = vld [vmem:[#allocation7 + $0x258] ss:$12 sps:$4 sm:$0xff]  }
 0x437   : > { %4329 = vmatpush1.bf16.msra.mxu0 %v8649_v10  ;;  %v3510_v27 = vadd.f32 %v11030_v14, %v3425_v21  ;;  %v8662_v14 = vld [vmem:[#allocation7 + $0x274] ss:$12 sps:$4 sm:$0xff]  }
 0x438   : > { %4330 = vmatprep.subr.bf16.mxu0 %v8654_v61  ;;  %v11244_v62 = vpack.c.bf16 %v3511_v48, %v3507_v20  ;;  %v8686_v3 = vld [vmem:[%s12905_s5 + $0x4] ss:$8 sps:$4 sm:$0xff]  }
 0x439   : > { %7778 = vmatpush3.bf16.msra.mxu1 %v8672_v31  ;;  %v11246_v22 = vpack.c.bf16 %v3510_v27, %v3506_v5  ;;  %v8689_v5 = vld [vmem:[%s12905_s5 + $0x14] ss:$8 sps:$4 sm:$0xff]   ;;  %v8687_v27 = vld [vmem:[%s12905_s5 + $0x10] ss:$8 sps:$4 sm:$0xff]  }
 0x43a   : > { %4274 = vmatmul.mubr.bf16.gmra.mrb[80].mxu0 %v11087_v42  ;;  %4492 = vmatmul.mubr.bf16.gmra.mrb[80].mxu1 %v11087_v42  ;;  %v8665_v42 = vld [vmem:[#allocation7 + $0x288] ss:$12 sps:$4 sm:$0xff]  }
 0x43b   : > { %4331 = vmatpush1.bf16.msra.mxu0 %v8652_v13  ;;  %4283 = vmatprep.mubr.bf16.mxu0 %v11095_v40 }
 0x43c   : > { %4499 = vmatprep.mubr.bf16.mxu1 %v11095_v40  ;;  %4332 = vmatprep.subr.bf16.mxu0 %v8659_v34  ;;  %v8670_v40 = vld [vmem:[#allocation7 + $0x2a4] ss:$12 sps:$4 sm:$0xff]   ;;  %v8692_v34 = vld [vmem:[%s12905_s5 + $0x24] ss:$8 sps:$4 sm:$0xff]  }
 0x43d   : > { %7779 = vmatprep.subr.bf16.mxu1 %v8679_v17  ;;  %v8690_v17 = vld [vmem:[%s12905_s5 + $0x20] ss:$8 sps:$4 sm:$0xff]  }
 0x43e   : > { %7780 = vmatpush3.bf16.msra.mxu1 %v8680_v25 }
 0x43f   : > { %4333 = vmatpush1.bf16.msra.mxu0 %v8657_v39 }
 0x440   : > { %4334 = vmatprep.subr.bf16.mxu0 %v8662_v14 }
 0x442   : > { %4284 = vmatmul.mubr.bf16.gmra.mrb[84].mxu0 %v11101_v55  ;;  %4500 = vmatmul.mubr.bf16.gmra.mrb[84].mxu1 %v11101_v55  ;;  %v8673_v55 = vld [vmem:[#allocation7 + $0x2b8] ss:$12 sps:$4 sm:$0xff]  }
 0x443   : > { %4335 = vmatpush1.bf16.msra.mxu0 %v8660_v51  ;;  %4293 = vmatprep.mubr.bf16.mxu0 %v11107_v38 }
 0x444   : > { %4507 = vmatprep.mubr.bf16.mxu1 %v11107_v38  ;;  %4336 = vmatprep.subr.bf16.mxu0 %v8667_v7  ;;  %v8676_v38 = vld [vmem:[#allocation7 + $0x2d0] ss:$12 sps:$4 sm:$0xff]  }
 0x445   : > { %v8695_v7 = vld [vmem:[%s12905_s5 + $0x34] ss:$8 sps:$4 sm:$0xff]  }
 0x447   : > { %4337 = vmatpush1.bf16.msra.mxu0 %v8665_v42  ;;  %v13228_v42 = vld [vmem:[#allocation18_spill] sm:$0xff] }
 0x448   : > { %4338 = vmatprep.subr.bf16.mxu0 %v8670_v40 }
 0x44a   : > { %4294 = vmatmul.mubr.bf16.gmra.mrb[88].mxu0 %v11115_v8  ;;  %4508 = vmatmul.mubr.bf16.gmra.mrb[88].mxu1 %v11115_v8  ;;  %v8681_v8 = vld [vmem:[#allocation7 + $0x2e8] ss:$12 sps:$4 sm:$0xff]  }
 0x44b   : > { %4339 = vmatpush1.bf16.msra.mxu0 %v8668_v50  ;;  %4303 = vmatprep.mubr.bf16.mxu0 %v11121_v35 }
 0x44c   : > { %4515 = vmatprep.mubr.bf16.mxu1 %v11121_v35  ;;  %4340 = vmatprep.subr.bf16.mxu0 %v8675_v9  ;;  %v8693_v9 = vld [vmem:[%s12905_s5 + $0x30] ss:$8 sps:$4 sm:$0xff]  }
 0x44f   : > { %4341 = vmatpush1.bf16.msra.mxu0 %v8673_v55  ;;  %v13229_v55 = vld [vmem:[#allocation17_spill] sm:$0xff] }
 0x450   : > { %4342 = vmatprep.subr.bf16.mxu0 %v8678_v6 }
 0x452   : > { %4304 = vmatmul.mubr.bf16.gmra.mrb[92].mxu0 %v11123_v59  ;;  %4516 = vmatmul.mubr.bf16.gmra.mrb[92].mxu1 %v11123_v59 }
 0x453   : > { %4343 = vmatpush1.bf16.msra.mxu0 %v8676_v38  ;;  %4346 = vmatprep.mubr.bf16.mxu0 %v11127_v18  ;;  %v13230_v38 = vld [vmem:[#allocation19_spill] sm:$0xff] }
 0x454   : > { %4556 = vmatprep.mubr.bf16.mxu1 %v11127_v18  ;;  %4344 = vmatprep.subr.bf16.mxu0 %v8683_v36 }
 0x457   : > { %4345 = vmatpush1.bf16.msra.mxu0 %v8681_v8  ;;  %v8698_v8 = vld [vmem:[%s12905_s5 + $0x44] ss:$8 sps:$4 sm:$0xff]  }
 0x458   : > { %5473 = vmatprep.subr.bf16.mxu0 %v8686_v3 }
 0x45a   : > { %4347 = vmatmul.mubr.bf16.vlgmr.msra.gmra.mrb[64].mxu0 %v11141_v4  ;;  %4557 = vmatmul.mubr.bf16.vlgmr.msra.gmra.mrb[96].mxu1 %v11141_v4 }
 0x45b   : > { %4356 = vmatprep.mubr.bf16.mxu0 %v11149_v56  ;;  %4564 = vmatprep.mubr.bf16.mxu1 %v11149_v56 }
 0x462   : > { %4357 = vmatmul.mubr.bf16.gmra.mrb[68].mxu0 %v11151_v28  ;;  %4565 = vmatmul.mubr.bf16.gmra.mrb[100].mxu1 %v11151_v28 }
 0x463   : > { %4366 = vmatprep.mubr.bf16.mxu0 %v11170_v58  ;;  %4572 = vmatprep.mubr.bf16.mxu1 %v11170_v58 }
 0x46a   : > { %4367 = vmatmul.mubr.bf16.gmra.mrb[72].mxu0 %v11172_v37  ;;  %4573 = vmatmul.mubr.bf16.gmra.mrb[104].mxu1 %v11172_v37 }
 0x46b   : > { %4376 = vmatprep.mubr.bf16.mxu0 %v11181_v19  ;;  %4580 = vmatprep.mubr.bf16.mxu1 %v11181_v19 }
 0x472   : > { %4377 = vmatmul.mubr.bf16.gmra.mrb[76].mxu0 %v11186_v30  ;;  %4581 = vmatmul.mubr.bf16.gmra.mrb[108].mxu1 %v11186_v30 }
 0x473   : > { %4386 = vmatprep.mubr.bf16.mxu0 %v11200_v49  ;;  %4588 = vmatprep.mubr.bf16.mxu1 %v11200_v49 }
 0x47a   : > { %4387 = vmatmul.mubr.bf16.gmra.mrb[80].mxu0 %v11209_v0  ;;  %4589 = vmatmul.mubr.bf16.gmra.mrb[112].mxu1 %v11209_v0 }
 0x47b   : > { %4396 = vmatprep.mubr.bf16.mxu0 %v11219_v11  ;;  %4596 = vmatprep.mubr.bf16.mxu1 %v11219_v11 }
 0x482   : > { %4397 = vmatmul.mubr.bf16.gmra.mrb[84].mxu0 %v11221_v24  ;;  %4597 = vmatmul.mubr.bf16.gmra.mrb[116].mxu1 %v11221_v24 }
 0x483   : > { %4406 = vmatprep.mubr.bf16.mxu0 %v11235_v32  ;;  %4604 = vmatprep.mubr.bf16.mxu1 %v11235_v32  ;;  %v8684_v32 = vld [vmem:[%s12905_s5] ss:$8 sps:$4 sm:$0xff]  }
 0x484   : > { %5474 = vmatpush1.bf16.msra.mxu0 %v8684_v32 }
 0x485   : > { %5475 = vmatprep.subr.bf16.mxu0 %v8689_v5 }
 0x488   : > { %5476 = vmatpush1.bf16.msra.mxu0 %v8687_v27 }
 0x489   : > { %5477 = vmatprep.subr.bf16.mxu0 %v8692_v34 }
 0x48a   : > { %4407 = vmatmul.mubr.bf16.gmra.mrb[88].mxu0 %v11237_v15  ;;  %4605 = vmatmul.mubr.bf16.gmra.mrb[120].mxu1 %v11237_v15 }
 0x48b   : > { %4416 = vmatprep.mubr.bf16.mxu0 %v11244_v62  ;;  %4612 = vmatprep.mubr.bf16.mxu1 %v11244_v62 }
 0x48c   : > { %5478 = vmatpush1.bf16.msra.mxu0 %v8690_v17 }
 0x48d   : > { %5479 = vmatprep.subr.bf16.mxu0 %v8695_v7 }
 0x490   : > { %5480 = vmatpush1.bf16.msra.mxu0 %v8693_v9 }
 0x491   : > { %5481 = vmatprep.subr.bf16.mxu0 %v8698_v8 }
 0x492   : > { %4417 = vmatmul.mubr.bf16.gmra.mrb[92].mxu0 %v11246_v22  ;;  %4613 = vmatmul.mubr.bf16.gmra.mrb[124].mxu1 %v11246_v22  ;;  %v3512_v22 = vld [vmem:[#allocation2 + $0x18] sm:$0x7] }
 0x493   : > { %v11330_v40 = vrot.slane %v3512_v22, %v13228_v42  ;;  %v11336_v6 = vrot.slane %v3512_v22, %v13229_v55  ;;  %v11339_v36 = vrot.slane %v3512_v22, %v13230_v38 }
 0x4ed   : > { %v7717_v35 = vpop.f32.mrb[64].mxu1 }
 0x4ee   : > { %v7718_v59 = vpop.f32.mrb[65].mxu1 }
 0x4ef   : > { %v11294_v18 = vadd.f32 %v7718_v59, %v7717_v35  ;;  %v7720_v4 = vpop.f32.mrb[66].mxu1 }
 0x4f0   : > { %v7721_v56 = vpop.f32.mrb[67].mxu1 }
 0x4f1   : > { %v11296_v28 = vadd.f32 %v7721_v56, %v7720_v4  ;;  %v4462_v35 = vadd.f32 %v11294_v18, %v11330_v40 }
 0x4f3   : > { %v4465_v59 = vadd.f32 %v11296_v28, %v11330_v40 }
 0x4f5   : > { %v7723_v58 = vpop.f32.mrb[68].mxu1 }
 0x4f6   : > { %v7724_v37 = vpop.f32.mrb[69].mxu1 }
 0x4f7   : > { %v11298_v19 = vadd.f32 %v7724_v37, %v7723_v58  ;;  %v7726_v30 = vpop.f32.mrb[70].mxu1 }
 0x4f8   : > { %v7727_v49 = vpop.f32.mrb[71].mxu1 }
 0x4f9   : > { %v7728_v45 = vadd.f32 %v7727_v49, %v7726_v30  ;;  %v11350_v4 = vadd.f32 %v11298_v19, %v11330_v40  ;;  %v8696_v30 = vld [vmem:[%s12905_s5 + $0x40] ss:$8 sps:$4 sm:$0xff]  }
 0x4fa   : > { %5482 = vmatpush1.bf16.msra.mxu0 %v8696_v30 }
 0x4fb   : > { %v11353_v56 = vadd.f32 %v7728_v45, %v11330_v40 }
 0x4fd   : > { %v7729_v29 = vpop.f32.mrb[72].mxu1 }
 0x4fe   : > { %v7730_v23 = vpop.f32.mrb[73].mxu1 }
 0x4ff   : > { %v7731_v43 = vadd.f32 %v7730_v23, %v7729_v29  ;;  %v7732_v0 = vpop.f32.mrb[74].mxu1 }
 0x500   : > { %v7733_v57 = vpop.f32.mrb[75].mxu1 }
 0x501   : > { %v7734_v46 = vadd.f32 %v7733_v57, %v7732_v0  ;;  %v11359_v49 = vadd.f32 %v7731_v43, %v11330_v40 }
 0x503   : > { %v11362_v18 = vadd.f32 %v7734_v46, %v11330_v40 }
 0x505   : > { %v7735_v53 = vpop.f32.mrb[76].mxu1 }
 0x506   : > { %v7736_v16 = vpop.f32.mrb[77].mxu1 }
 0x507   : > { %v7737_v1 = vadd.f32 %v7736_v16, %v7735_v53  ;;  %v7738_v44 = vpop.f32.mrb[78].mxu1 }
 0x508   : > { %v7739_v12 = vpop.f32.mrb[79].mxu1 }
 0x509   : > { %v7740_v11 = vadd.f32 %v7739_v12, %v7738_v44  ;;  %v11365_v28 = vadd.f32 %v7737_v1, %v11330_v40 }
 0x50b   : > { %v11369_v23 = vadd.f32 %v7740_v11, %v11330_v40 }
 0x50d   : > { %v7741_v24 = vpop.f32.mrb[80].mxu1 }
 0x50e   : > { %v7742_v63 = vpop.f32.mrb[81].mxu1 }
 0x50f   : > { %v7743_v10 = vadd.f32 %v7742_v63, %v7741_v24  ;;  %v7744_v26 = vpop.f32.mrb[82].mxu1 }
 0x510   : > { %v7745_v54 = vpop.f32.mrb[83].mxu1 }
 0x511   : > { %v7746_v2 = vadd.f32 %v7745_v54, %v7744_v26  ;;  %v11372_v0 = vadd.f32 %v7743_v10, %v11330_v40  ;;  %v8699_v26 = vld [vmem:[%s12905_s5 + $0x50] ss:$8 sps:$4 sm:$0xff]  }
 0x513   : > { %v11376_v16 = vadd.f32 %v7746_v2, %v11330_v40 }
 0x515   : > { %v7747_v61 = vpop.f32.mrb[84].mxu1 }
 0x516   : > { %v7748_v47 = vpop.f32.mrb[85].mxu1 }
 0x517   : > { %v11300_v41 = vadd.f32 %v7748_v47, %v7747_v61  ;;  %v7750_v33 = vpop.f32.mrb[86].mxu1  ;;  %v8701_v47 = vld [vmem:[%s12905_s5 + $0x54] ss:$8 sps:$4 sm:$0xff]  }
 0x518   : > { %v7751_v48 = vpop.f32.mrb[87].mxu1  ;;  %5483 = vmatprep.subr.bf16.mxu0 %v8701_v47 }
 0x519   : > { %v11302_v52 = vadd.f32 %v7751_v48, %v7750_v33  ;;  %v11385_v54 = vadd.f32 %v11300_v41, %v11330_v40  ;;  %5484 = vmatpush1.bf16.msra.mxu0 %v8699_v26  ;;  %v8710_v26 = vld [vmem:[%s12905_s5 + $0x84] ss:$8 sps:$4 sm:$0xff]  }
 0x51b   : > { %v11392_v33 = vadd.f32 %v11302_v52, %v11330_v40 }
 0x51d   : > { %v7753_v31 = vpop.f32.mrb[88].mxu1 }
 0x51e   : > { %v7754_v15 = vpop.f32.mrb[89].mxu1 }
 0x51f   : > { %v11310_v60 = vadd.f32 %v7754_v15, %v7753_v31  ;;  %v7756_v21 = vpop.f32.mrb[90].mxu1  ;;  %v8704_v15 = vld [vmem:[%s12905_s5 + $0x64] ss:$8 sps:$4 sm:$0xff]  }
 0x520   : > { %v7757_v20 = vpop.f32.mrb[91].mxu1  ;;  %5485 = vmatprep.subr.bf16.mxu0 %v8704_v15 }
 0x521   : > { %v11315_v13 = vadd.f32 %v7757_v20, %v7756_v21  ;;  %v11406_v52 = vadd.f32 %v11310_v60, %v11330_v40 }
 0x523   : > { %v11410_v21 = vadd.f32 %v11315_v13, %v11330_v40 }
 0x525   : > { %v7759_v62 = vpop.f32.mrb[92].mxu1 }
 0x526   : > { %v7760_v25 = vpop.f32.mrb[93].mxu1 }
 0x527   : > { %v7761_v39 = vadd.f32 %v7760_v25, %v7759_v62  ;;  %v7762_v14 = vpop.f32.mrb[94].mxu1  ;;  %v8702_v62 = vld [vmem:[%s12905_s5 + $0x60] ss:$8 sps:$4 sm:$0xff]  }
 0x528   : > { %v7763_v51 = vpop.f32.mrb[95].mxu1  ;;  %5486 = vmatpush1.bf16.msra.mxu0 %v8702_v62 }
 0x529   : > { %v7764_v50 = vadd.f32 %v7763_v51, %v7762_v14  ;;  %v11413_v20 = vadd.f32 %v7761_v39, %v11330_v40 }
 0x52b   : > { %v11419_v17 = vadd.f32 %v7764_v50, %v11330_v40 }
 0x52d   : > { %v4348_v58 = vpop.f32.mrb[64].mxu0  ;;  %v7781_v37 = vpop.f32.mrb[96].mxu1 }
 0x52e   : > { %v8053_v19 = vadd.f32 %v4348_v58, %v11336_v6  ;;  %v4350_v29 = vpop.f32.mrb[65].mxu0  ;;  %v7782_v45 = vpop.f32.mrb[97].mxu1 }
 0x52f   : > { %v8054_v43 = vadd.f32 %v4350_v29, %v11339_v36  ;;  %v7783_v57 = vadd.f32 %v7782_v45, %v7781_v37  ;;  %v4352_v53 = vpop.f32.mrb[66].mxu0  ;;  %v7784_v46 = vpop.f32.mrb[98].mxu1  ;;  %v8705_v45 = vld [vmem:[%s12905_s5 + $0x70] ss:$8 sps:$4 sm:$0xff]  }
 0x530   : > { %vm4621_vm1 = vcmp.gt.f32.partialorder %v8053_v19, 0.0  ;;  %v4669_v1 = vmul.f32 0.01, %v8053_v19  ;;  %v8055_v44 = vadd.f32 %v4352_v53, %v11336_v6  ;;  %v4354_v12 = vpop.f32.mrb[67].mxu0  ;;  %v7785_v24 = vpop.f32.mrb[99].mxu1 }
 0x531   : > { %vm4622_vm2 = vcmp.gt.f32.partialorder %v8054_v43, 0.0  ;;  %v4670_v11 = vmul.f32 0.01, %v8054_v43  ;;  %v4559_v63 = vadd.f32 %v7783_v57, %v4462_v35  ;;  %v8056_v10 = vadd.f32 %v4354_v12, %v11339_v36 }
 0x532   : > { %vm4624_vm3 = vcmp.gt.f32.partialorder %v8055_v44, 0.0  ;;  %v4672_v2 = vmul.f32 0.01, %v8055_v44  ;;  %v7786_v61 = vadd.f32 %v7785_v24, %v7784_v46  ;;  %v11395_v48 = vsel %vm4621_vm1, %v8053_v19, %v4669_v1 }
 0x533   : > { %v11397_v3 = vsel %vm4622_vm2, %v8054_v43, %v4670_v11  ;;  %v4671_v31 = vmul.f32 0.01, %v4559_v63  ;;  %vm4623_vm4 = vcmp.gt.f32.partialorder %v4559_v63, 0.0  ;;  %vm4625_vm5 = vcmp.gt.f32.partialorder %v8056_v10, 0.0  ;;  %v8707_v43 = vld [vmem:[%s12905_s5 + $0x74] ss:$8 sps:$4 sm:$0xff]  }
 0x534   : > { %v11399_v41 = vsel %vm4624_vm3, %v8055_v44, %v4672_v2  ;;  %v4673_v32 = vmul.f32 0.01, %v8056_v10  ;;  %v4562_v5 = vadd.f32 %v7786_v61, %v4465_v59  ;;  %v4833_v60 = vmul.f32 %v11395_v48, %v11395_v48  ;;  %5487 = vmatprep.subr.bf16.mxu0 %v8707_v43 }
 0x535   : > { %v4358_v27 = vpop.f32.mrb[68].mxu0  ;;  %v7787_v34 = vpop.f32.mrb[100].mxu1  ;;  %v4834_v14 = vmul.f32 %v11397_v3, %v11397_v3  ;;  %v11429_v51 = vsel %vm4623_vm4, %v4559_v63, %v4671_v31  ;;  %v4836_v7 = vmul.f32 %v11399_v41, %v11399_v41  ;;  %v4767_v44 = vadd.f32 %v11399_v41, %v11395_v48  ;;  %5488 = vmatpush1.bf16.msra.mxu0 %v8705_v45 }
 0x536   : > { %v11423_v22 = vsel %vm4625_vm5, %v8056_v10, %v4673_v32  ;;  %v8057_v13 = vadd.f32 %v4358_v27, %v11336_v6  ;;  %v4360_v25 = vpop.f32.mrb[69].mxu0  ;;  %v7788_v39 = vpop.f32.mrb[101].mxu1  ;;  %13231 = vst [vmem:[#allocation62_spill] sm:$0xff] %v11429_v51  ;;  %vm4626_vm6 = vcmp.gt.f32.partialorder %v4562_v5, 0.0  ;;  %v4674_v9 = vmul.f32 0.01, %v4562_v5  ;;  %5489 = vmatprep.subr.bf16.mxu0 %v8710_v26 }
 0x537   : > { %v4362_v40 = vpop.f32.mrb[70].mxu0  ;;  %v7790_v50 = vpop.f32.mrb[102].mxu1  ;;  %v8058_v35 = vadd.f32 %v4360_v25, %v11339_v36  ;;  %v4837_v58 = vmul.f32 %v11423_v22, %v11423_v22  ;;  %v7789_v37 = vadd.f32 %v7788_v39, %v7787_v34  ;;  %v4835_v1 = vmul.f32 %v11429_v51, %v11429_v51 }
 0x538   : > { %vm4627_vm7 = vcmp.gt.f32.partialorder %v8057_v13, 0.0  ;;  %v4675_v8 = vmul.f32 0.01, %v8057_v13  ;;  %v4364_v59 = vpop.f32.mrb[71].mxu0  ;;  %v8059_v30 = vadd.f32 %v4362_v40, %v11336_v6  ;;  %v7791_v29 = vpop.f32.mrb[103].mxu1  ;;  %v11445_v57 = vsel %vm4626_vm6, %v4562_v5, %v4674_v9 }
 0x539   : > { %v8060_v19 = vadd.f32 %v4364_v59, %v11339_v36  ;;  %13232 = vst [vmem:[#allocation20_spill] sm:$0xff] %v11445_v57  ;;  %vm4628_vm8 = vcmp.gt.f32.partialorder %v8058_v35, 0.0  ;;  %v4676_v46 = vmul.f32 0.01, %v8058_v35  ;;  %v4881_v12 = vadd.f32 %v4836_v7, %v4833_v60 }
 0x53a   : > { %v11447_v53 = vsel %vm4627_vm7, %v8057_v13, %v4675_v8  ;;  %v4838_v24 = vmul.f32 %v11445_v57, %v11445_v57  ;;  %v4567_v63 = vadd.f32 %v7789_v37, %v11350_v4  ;;  %vm4630_vm9 = vcmp.gt.f32.partialorder %v8059_v30, 0.0  ;;  %v8708_v4 = vld [vmem:[%s12905_s5 + $0x80] ss:$8 sps:$4 sm:$0xff]   ;;  %v8713_v37 = vld [vmem:[%s12905_s5 + $0x94] ss:$8 sps:$4 sm:$0xff]  }
 0x53b   : > { %v11455_v11 = vsel %vm4628_vm8, %v8058_v35, %v4676_v46  ;;  %v4678_v10 = vmul.f32 0.01, %v8059_v30  ;;  %v4788_v2 = vadd.f32 %v11423_v22, %v11397_v3  ;;  %v4902_v61 = vadd.f32 %v4837_v58, %v4834_v14  ;;  %5490 = vmatpush1.bf16.msra.mxu0 %v8708_v4  ;;  %v8714_v4 = vld [vmem:[%s12905_s5 + $0xa0] ss:$8 sps:$4 sm:$0xff]  }
 0x53c   : > { %v4839_v47 = vmul.f32 %v11447_v53, %v11447_v53  ;;  %v4840_v31 = vmul.f32 %v11455_v11, %v11455_v11  ;;  %v4809_v5 = vadd.f32 %v11445_v57, %v11429_v51  ;;  %vm4629_vm10 = vcmp.gt.f32.partialorder %v4567_v63, 0.0  ;;  %5491 = vmatprep.subr.bf16.mxu0 %v8713_v37 }
 0x53d   : > { %v4368_v32 = vpop.f32.mrb[72].mxu0  ;;  %v7793_v15 = vpop.f32.mrb[104].mxu1  ;;  %v4677_v27 = vmul.f32 0.01, %v4567_v63  ;;  %vm4631_vm11 = vcmp.gt.f32.partialorder %v8060_v19, 0.0  ;;  %v4923_v60 = vadd.f32 %v4838_v24, %v4835_v1  ;;  %v4768_v13 = vadd.f32 %v4767_v44, %v11447_v53 }
 0x53e   : > { %v4370_v34 = vpop.f32.mrb[73].mxu0  ;;  %v7794_v62 = vpop.f32.mrb[105].mxu1  ;;  %v11474_v25 = vsel %vm4630_vm9, %v8059_v30, %v4678_v10  ;;  %v4679_v39 = vmul.f32 0.01, %v8060_v19  ;;  %v7792_v9 = vadd.f32 %v7791_v29, %v7790_v50  ;;  %v8061_v8 = vadd.f32 %v4368_v32, %v11336_v6  ;;  %v8711_v50 = vld [vmem:[%s12905_s5 + $0x90] ss:$8 sps:$4 sm:$0xff]  }
 0x53f   : > { %v4372_v14 = vpop.f32.mrb[74].mxu0  ;;  %v11476_v7 = vpop.f32.mrb[106].mxu1  ;;  %v11478_v40 = vsel %vm4629_vm10, %v4567_v63, %v4677_v27  ;;  %v8062_v35 = vadd.f32 %v4370_v34, %v11339_v36  ;;  %v4882_v45 = vadd.f32 %v4881_v12, %v4839_v47  ;;  %v4789_v30 = vadd.f32 %v4788_v2, %v11455_v11  ;;  %5492 = vmatpush1.bf16.msra.mxu0 %v8711_v50  ;;  %v8716_v27 = vld [vmem:[%s12905_s5 + $0xa4] ss:$8 sps:$4 sm:$0xff]  }
 0x540   : > { %13233 = vst [vmem:[#allocation29_spill] sm:$0xff] %v11478_v40  ;;  %v4374_v59 = vpop.f32.mrb[75].mxu0  ;;  %v7797_v58 = vpop.f32.mrb[107].mxu1  ;;  %v4903_v43 = vadd.f32 %v4902_v61, %v4840_v31  ;;  %v11487_v46 = vsel %vm4631_vm11, %v8060_v19, %v4679_v39  ;;  %v4841_v29 = vmul.f32 %v11478_v40, %v11478_v40  ;;  %v4842_v1 = vmul.f32 %v11474_v25, %v11474_v25 }
 0x541   : > { %v4570_v44 = vadd.f32 %v7792_v9, %v11353_v56  ;;  %vm4633_vm12 = vcmp.gt.f32.partialorder %v8061_v8, 0.0  ;;  %v4843_v12 = vmul.f32 %v11487_v46, %v11487_v46  ;;  %v4681_v19 = vmul.f32 0.01, %v8061_v8  ;;  %5493 = vmatprep.subr.bf16.mxu0 %v8716_v27 }
 0x542   : > { %vm4634_vm13 = vcmp.gt.f32.partialorder %v8062_v35, 0.0  ;;  %v4682_v24 = vmul.f32 0.01, %v8062_v35  ;;  %v4769_v63 = vadd.f32 %v4768_v13, %v11474_v25  ;;  %v7795_v26 = vadd.f32 %v7794_v62, %v7793_v15 }
 0x543   : > { %vm4632_vm14 = vcmp.gt.f32.partialorder %v4570_v44, 0.0  ;;  %v4680_v10 = vmul.f32 0.01, %v4570_v44  ;;  %v4810_v2 = vadd.f32 %v4809_v5, %v11478_v40  ;;  %v11501_v61 = vsel %vm4633_vm12, %v8061_v8, %v4681_v19  ;;  %5494 = vmatpush1.bf16.msra.mxu0 %v8714_v4 }
 0x544   : > { %13234 = vst [vmem:[#allocation41_spill] sm:$0xff] %v11501_v61  ;;  %v8063_v47 = vadd.f32 %v4372_v14, %v11336_v6  ;;  %v8064_v56 = vadd.f32 %v4374_v59, %v11339_v36  ;;  %v4883_v15 = vadd.f32 %v4882_v45, %v4842_v1  ;;  %v4790_v5 = vadd.f32 %v4789_v30, %v11487_v46  ;;  %v8719_v14 = vld [vmem:[%s12905_s5 + $0xb4] ss:$8 sps:$4 sm:$0xff]  }
 0x545   : > { %v4378_v31 = vpop.f32.mrb[76].mxu0  ;;  %v7799_v32 = vpop.f32.mrb[108].mxu1  ;;  %v11512_v34 = vsel %vm4632_vm14, %v4570_v44, %v4680_v10  ;;  %v11515_v62 = vsel %vm4634_vm13, %v8062_v35, %v4682_v24  ;;  %v4924_v9 = vadd.f32 %v4923_v60, %v4841_v29  ;;  %v4904_v8 = vadd.f32 %v4903_v43, %v4843_v12  ;;  %v8717_v43 = vld [vmem:[%s12905_s5 + $0xb0] ss:$8 sps:$4 sm:$0xff]   ;;  %5495 = vmatprep.subr.bf16.mxu0 %v8719_v14  ;;  %v8722_v10 = vld [vmem:[%s12905_s5 + $0xc4] ss:$8 sps:$4 sm:$0xff]  }
 0x546   : > { %13235 = vst [vmem:[#allocation49_spill] sm:$0xff] %v11512_v34  ;;  %v4380_v13 = vpop.f32.mrb[77].mxu0  ;;  %v7800_v39 = vpop.f32.mrb[109].mxu1  ;;  %v4770_v59 = vadd.f32 %v4769_v63, %v11501_v61  ;;  %v4575_v37 = vadd.f32 %v7795_v26, %v11359_v49  ;;  %v4844_v35 = vmul.f32 %v11512_v34, %v11512_v34  ;;  %v4845_v30 = vmul.f32 %v11501_v61, %v11501_v61 }
 0x547   : > { %v4382_v45 = vpop.f32.mrb[78].mxu0  ;;  %v11522_v50 = vpop.f32.mrb[110].mxu1  ;;  %vm4636_vm15 = vcmp.gt.f32.partialorder %v8063_v47, 0.0  ;;  %v4684_v1 = vmul.f32 0.01, %v8063_v47  ;;  %v4846_v60 = vmul.f32 %v11515_v62, %v11515_v62  ;;  %vm4637_vm1 = vcmp.gt.f32.partialorder %v8064_v56, 0.0  ;;  %5496 = vmatpush1.bf16.msra.mxu0 %v8717_v43 }
 0x548   : > { %v4384_v44 = vpop.f32.mrb[79].mxu0  ;;  %v11528_v19 = vpop.f32.mrb[111].mxu1  ;;  %vm4635_vm0 = vcmp.gt.f32.partialorder %v4575_v37, 0.0  ;;  %v4683_v49 = vmul.f32 0.01, %v4575_v37  ;;  %v7798_v24 = vadd.f32 %v7797_v58, %v11476_v7  ;;  %v8065_v63 = vadd.f32 %v4378_v31, %v11336_v6  ;;  %5497 = vmatprep.subr.bf16.mxu0 %v8722_v10 }
 0x549   : > { %v11535_v29 = vsel %vm4636_vm15, %v8063_v47, %v4684_v1  ;;  %v4685_v12 = vmul.f32 0.01, %v8064_v56  ;;  %v4811_v26 = vadd.f32 %v4810_v2, %v11512_v34  ;;  %v4791_v4 = vadd.f32 %v4790_v5, %v11515_v62  ;;  %v8720_v58 = vld [vmem:[%s12905_s5 + $0xc0] ss:$8 sps:$4 sm:$0xff]  }
 0x54a   : > { %13236 = vst [vmem:[#allocation31_spill] sm:$0xff] %v11535_v29  ;;  %v11544_v27 = vsel %vm4635_vm0, %v4575_v37, %v4683_v49  ;;  %v8066_v40 = vadd.f32 %v4380_v13, %v11339_v36  ;;  %v4925_v47 = vadd.f32 %v4924_v9, %v4844_v35  ;;  %v4884_v1 = vadd.f32 %v4883_v15, %v4845_v30 }
 0x54b   : > { %13237 = vst [vmem:[#allocation39_spill] sm:$0xff] %v11544_v27  ;;  %v11547_v57 = vsel %vm4637_vm1, %v8064_v56, %v4685_v12  ;;  %v4578_v7 = vadd.f32 %v7798_v24, %v11362_v18  ;;  %v4905_v31 = vadd.f32 %v4904_v8, %v4846_v60  ;;  %v4847_v2 = vmul.f32 %v11544_v27, %v11544_v27  ;;  %v8725_v18 = vld [vmem:[%s12905_s5 + $0xd4] ss:$8 sps:$4 sm:$0xff]  }
 0x54c   : > { %13238 = vst [vmem:[#allocation23_spill] sm:$0xff] %v11547_v57  ;;  %v4848_v5 = vmul.f32 %v11535_v29, %v11535_v29  ;;  %vm4639_vm2 = vcmp.gt.f32.partialorder %v8065_v63, 0.0  ;;  %v4812_v56 = vadd.f32 %v4811_v26, %v11544_v27  ;;  %v4687_v9 = vmul.f32 0.01, %v8065_v63  ;;  %5498 = vmatpush1.bf16.msra.mxu0 %v8720_v58 }
 0x54d   : > { %v4388_v14 = vpop.f32.mrb[80].mxu0  ;;  %v11557_v13 = vpop.f32.mrb[112].mxu1  ;;  %vm4638_vm3 = vcmp.gt.f32.partialorder %v4578_v7, 0.0  ;;  %v4686_v15 = vmul.f32 0.01, %v4578_v7  ;;  %v4849_v37 = vmul.f32 %v11547_v57, %v11547_v57  ;;  %vm4640_vm4 = vcmp.gt.f32.partialorder %v8066_v40, 0.0  ;;  %5499 = vmatprep.subr.bf16.mxu0 %v8725_v18 }
 0x54e   : > { %v4390_v8 = vpop.f32.mrb[81].mxu0  ;;  %v4688_v35 = vmul.f32 0.01, %v8066_v40  ;;  %v7801_v30 = vadd.f32 %v7800_v39, %v7799_v32  ;;  %v11565_v60 = vpop.f32.mrb[113].mxu1  ;;  %v11572_v12 = vsel %vm4639_vm2, %v8065_v63, %v4687_v9  ;;  %v8067_v24 = vadd.f32 %v4382_v45, %v11336_v6  ;;  %v8723_v45 = vld [vmem:[%s12905_s5 + $0xd0] ss:$8 sps:$4 sm:$0xff]  }
 0x54f   : > { %v11567_v49 = vpop.f32.mrb[82].mxu0  ;;  %v11569_v43 = vsel %vm4638_vm3, %v4578_v7, %v4686_v15  ;;  %13240 = vst [vmem:[#allocation47_spill] sm:$0xff] %v11572_v12  ;;  %v8068_v26 = vadd.f32 %v4384_v44, %v11339_v36  ;;  %v11576_v10 = vpop.f32.mrb[114].mxu1  ;;  %v4926_v34 = vadd.f32 %v4925_v47, %v4847_v2  ;;  %v4771_v32 = vadd.f32 %v4770_v59, %v11535_v29  ;;  %v8728_v59 = vld [vmem:[%s12905_s5 + $0xe4] ss:$8 sps:$4 sm:$0xff]  }
 0x550   : > { %13239 = vst [vmem:[#allocation30_spill] sm:$0xff] %v11569_v43  ;;  %v11578_v27 = vpop.f32.mrb[83].mxu0  ;;  %v4885_v39 = vadd.f32 %v4884_v1, %v4848_v5  ;;  %v4850_v51 = vmul.f32 %v11569_v43, %v11569_v43  ;;  %v11583_v7 = vpop.f32.mrb[115].mxu1  ;;  %v11589_v44 = vsel %vm4640_vm4, %v8066_v40, %v4688_v35  ;;  %v4583_v63 = vadd.f32 %v7801_v30, %v11365_v28 }
 0x551   : > { %13241 = vst [vmem:[#allocation22_spill] sm:$0xff] %v11589_v44  ;;  %vm4642_vm5 = vcmp.gt.f32.partialorder %v8067_v24, 0.0  ;;  %v4690_v47 = vmul.f32 0.01, %v8067_v24  ;;  %v4792_v1 = vadd.f32 %v4791_v4, %v11547_v57  ;;  %v4906_v2 = vadd.f32 %v4905_v31, %v4849_v37  ;;  %5500 = vmatpush1.bf16.msra.mxu0 %v8723_v45  ;;  %v8726_v31 = vld [vmem:[%s12905_s5 + $0xe0] ss:$8 sps:$4 sm:$0xff]  }
 0x552   : > { %v4851_v58 = vmul.f32 %v11572_v12, %v11572_v12  ;;  %v4852_v5 = vmul.f32 %v11589_v44, %v11589_v44  ;;  %v4813_v40 = vadd.f32 %v4812_v56, %v11569_v43  ;;  %vm4641_vm6 = vcmp.gt.f32.partialorder %v4583_v63, 0.0  ;;  %5501 = vmatprep.subr.bf16.mxu0 %v8728_v59  ;;  %v8731_v45 = vld [vmem:[%s12905_s5 + $0xf4] ss:$8 sps:$4 sm:$0xff]  }
 0x553   : > { %v4689_v28 = vmul.f32 0.01, %v4583_v63  ;;  %vm4643_vm7 = vcmp.gt.f32.partialorder %v8068_v26, 0.0  ;;  %v4927_v15 = vadd.f32 %v4926_v34, %v4850_v51  ;;  %v4772_v18 = vadd.f32 %v4771_v32, %v11572_v12  ;;  %v8734_v12 = vld [vmem:[%s12905_s5 + $0x104] ss:$8 sps:$4 sm:$0xff]  }
 0x554   : > { %v11602_v9 = vsel %vm4642_vm5, %v8067_v24, %v4690_v47  ;;  %v4691_v35 = vmul.f32 0.01, %v8068_v26  ;;  %v7804_v56 = vadd.f32 %v11528_v19, %v11522_v50  ;;  %v8069_v51 = vadd.f32 %v4388_v14, %v11336_v6 }
 0x555   : > { %13242 = vst [vmem:[#allocation38_spill] sm:$0xff] %v11602_v9  ;;  %v11604_v30 = vpop.f32.mrb[84].mxu0  ;;  %v11606_v4 = vpop.f32.mrb[116].mxu1  ;;  %v11611_v37 = vsel %vm4641_vm6, %v4583_v63, %v4689_v28  ;;  %v8070_v34 = vadd.f32 %v4390_v8, %v11339_v36  ;;  %v4886_v47 = vadd.f32 %v4885_v39, %v4851_v58  ;;  %v4793_v63 = vadd.f32 %v4792_v1, %v11589_v44 }
 0x556   : > { %13243 = vst [vmem:[#allocation46_spill] sm:$0xff] %v11611_v37  ;;  %v11617_v24 = vpop.f32.mrb[85].mxu0  ;;  %v11619_v32 = vpop.f32.mrb[117].mxu1  ;;  %v4907_v28 = vadd.f32 %v4906_v2, %v4852_v5  ;;  %v11626_v43 = vsel %vm4643_vm7, %v8068_v26, %v4691_v35  ;;  %v4853_v14 = vmul.f32 %v11611_v37, %v11611_v37  ;;  %v4854_v8 = vmul.f32 %v11602_v9, %v11602_v9  ;;  %v8729_v26 = vld [vmem:[%s12905_s5 + $0xf0] ss:$8 sps:$4 sm:$0xff]  }
 0x557   : > { %13244 = vst [vmem:[#allocation28_spill] sm:$0xff] %v11626_v43  ;;  %v11628_v50 = vpop.f32.mrb[86].mxu0  ;;  %v11630_v19 = vpop.f32.mrb[118].mxu1  ;;  %v4586_v59 = vadd.f32 %v7804_v56, %v11369_v23  ;;  %vm4645_vm8 = vcmp.gt.f32.partialorder %v8069_v51, 0.0  ;;  %v4855_v2 = vmul.f32 %v11626_v43, %v11626_v43  ;;  %v4693_v58 = vmul.f32 0.01, %v8069_v51  ;;  %5502 = vmatpush1.bf16.msra.mxu0 %v8726_v31 }
 0x558   : > { %v11637_v39 = vpop.f32.mrb[87].mxu0  ;;  %v11639_v1 = vpop.f32.mrb[119].mxu1  ;;  %vm4646_vm9 = vcmp.gt.f32.partialorder %v8070_v34, 0.0  ;;  %v4694_v5 = vmul.f32 0.01, %v8070_v34  ;;  %v4773_v35 = vadd.f32 %v4772_v18, %v11602_v9  ;;  %v7807_v56 = vadd.f32 %v11565_v60, %v11557_v13  ;;  %5503 = vmatprep.subr.bf16.mxu0 %v8731_v45 }
 0x559   : > { %vm4644_vm10 = vcmp.gt.f32.partialorder %v4586_v59, 0.0  ;;  %v4692_v23 = vmul.f32 0.01, %v4586_v59  ;;  %v11652_v44 = vsel %vm4645_vm8, %v8069_v51, %v4693_v58  ;;  %v8071_v61 = vadd.f32 %v11567_v49, %v11336_v6 }
 0x55a   : > { %13245 = vst [vmem:[#allocation36_spill] sm:$0xff] %v11652_v44  ;;  %v11654_v29 = vsel %vm4646_vm9, %v8070_v34, %v4694_v5  ;;  %v8072_v18 = vadd.f32 %v11578_v27, %v11339_v36  ;;  %v4814_v31 = vadd.f32 %v4813_v40, %v11611_v37  ;;  %v4887_v9 = vadd.f32 %v4886_v47, %v4854_v8 }
 0x55b   : > { %13246 = vst [vmem:[#allocation44_spill] sm:$0xff] %v11654_v29  ;;  %v4794_v13 = vadd.f32 %v4793_v63, %v11626_v43  ;;  %v11662_v60 = vsel %vm4644_vm10, %v4586_v59, %v4692_v23  ;;  %v4928_v45 = vadd.f32 %v4927_v15, %v4853_v14  ;;  %v4908_v57 = vadd.f32 %v4907_v28, %v4855_v2 }
 0x55c   : > { %13247 = vst [vmem:[#allocation24_spill] sm:$0xff] %v11662_v60  ;;  %v4857_v51 = vmul.f32 %v11652_v44, %v11652_v44  ;;  %v4591_v34 = vadd.f32 %v7807_v56, %v11372_v0  ;;  %5504 = vmatpush1.bf16.msra.mxu0 %v8729_v26  ;;  %v4856_v27 = vmul.f32 %v11662_v60, %v11662_v60  ;;  %vm4648_vm11 = vcmp.gt.f32.partialorder %v8071_v61, 0.0 }
 0x55d   : > { %v11667_v58 = vpop.f32.mrb[88].mxu0  ;;  %v11669_v49 = vpop.f32.mrb[120].mxu1  ;;  %v4858_v40 = vmul.f32 %v11654_v29, %v11654_v29  ;;  %v4696_v47 = vmul.f32 0.01, %v8071_v61  ;;  %5586 = vmatprep.subr.bf16.mxu0 %v8734_v12  ;;  %v4774_v0 = vadd.f32 %v4773_v35, %v11652_v44  ;;  %vm4649_vm13 = vcmp.gt.f32.partialorder %v8072_v18, 0.0 }
 0x55e   : > { %v11675_v15 = vpop.f32.mrb[89].mxu0  ;;  %v11677_v63 = vpop.f32.mrb[121].mxu1  ;;  %vm4647_vm12 = vcmp.gt.f32.partialorder %v4591_v34, 0.0  ;;  %v4695_v28 = vmul.f32 0.01, %v4591_v34  ;;  %v7810_v2 = vadd.f32 %v11583_v7, %v11576_v10  ;;  %v8073_v5 = vadd.f32 %v11604_v30, %v11336_v6 }
 0x55f   : > { %v11680_v14 = vpop.f32.mrb[90].mxu0  ;;  %v11682_v8 = vpop.f32.mrb[122].mxu1  ;;  %v11684_v59 = vsel %vm4648_vm11, %v8071_v61, %v4696_v47  ;;  %v4697_v26 = vmul.f32 0.01, %v8072_v18  ;;  %v4815_v35 = vadd.f32 %v4814_v31, %v11662_v60  ;;  %v4795_v56 = vadd.f32 %v4794_v13, %v11654_v29 }
 0x560   : > { %13248 = vst [vmem:[#allocation27_spill] sm:$0xff] %v11684_v59  ;;  %v11690_v23 = vpop.f32.mrb[91].mxu0  ;;  %v11692_v12 = vpop.f32.mrb[123].mxu1  ;;  %v11696_v37 = vsel %vm4647_vm12, %v4591_v34, %v4695_v28  ;;  %v8074_v61 = vadd.f32 %v11617_v24, %v11339_v36  ;;  %v4929_v47 = vadd.f32 %v4928_v45, %v4856_v27  ;;  %v4888_v44 = vadd.f32 %v4887_v9, %v4857_v51 }
 0x561   : > { %13249 = vst [vmem:[#allocation21_spill] sm:$0xff] %v11696_v37  ;;  %v4909_v43 = vadd.f32 %v4908_v57, %v4858_v40  ;;  %v4594_v10 = vadd.f32 %v7810_v2, %v11376_v16  ;;  %v4859_v7 = vmul.f32 %v11696_v37, %v11696_v37  ;;  %v4860_v30 = vmul.f32 %v11684_v59, %v11684_v59 }
 0x562   : > { %v11706_v31 = vsel %vm4649_vm13, %v8072_v18, %v4697_v26  ;;  %vm4651_vm14 = vcmp.gt.f32.partialorder %v8073_v5, 0.0  ;;  %v4775_v13 = vadd.f32 %v4774_v0, %v11684_v59  ;;  %v4699_v24 = vmul.f32 0.01, %v8073_v5 }
 0x563   : > { %vm4650_vm15 = vcmp.gt.f32.partialorder %v4594_v10, 0.0  ;;  %v4698_v34 = vmul.f32 0.01, %v4594_v10  ;;  %v4816_v9 = vadd.f32 %v4815_v35, %v11696_v37  ;;  %vm4652_vm0 = vcmp.gt.f32.partialorder %v8074_v61, 0.0 }
 0x564   : > { %v4700_v57 = vmul.f32 0.01, %v8074_v61  ;;  %v7813_v16 = vadd.f32 %v11619_v32, %v11606_v4  ;;  %v4861_v18 = vmul.f32 %v11706_v31, %v11706_v31  ;;  %v11720_v40 = vsel %vm4651_vm14, %v8073_v5, %v4699_v24 }
 0x565   : > { %v11712_v45 = vpop.f32.mrb[92].mxu0  ;;  %v11714_v51 = vpop.f32.mrb[124].mxu1  ;;  %v11718_v27 = vsel %vm4650_vm15, %v4594_v10, %v4698_v34  ;;  %v8075_v0 = vadd.f32 %v11628_v50, %v11336_v6  ;;  %v4930_v2 = vadd.f32 %v4929_v47, %v4859_v7  ;;  %v4889_v4 = vadd.f32 %v4888_v44, %v4860_v30 }
 0x566   : > { %v11724_v28 = vpop.f32.mrb[93].mxu0  ;;  %v11726_v26 = vpop.f32.mrb[125].mxu1  ;;  %v4862_v32 = vmul.f32 %v11718_v27, %v11718_v27  ;;  %v8076_v35 = vadd.f32 %v11637_v39, %v11339_v36  ;;  %v11737_v5 = vsel %vm4652_vm0, %v8074_v61, %v4700_v57  ;;  %v4599_v50 = vadd.f32 %v7813_v16, %v11385_v54 }
 0x567   : > { %v11732_v37 = vpop.f32.mrb[94].mxu0  ;;  %v11734_v10 = vpop.f32.mrb[126].mxu1  ;;  %vm4654_vm1 = vcmp.gt.f32.partialorder %v8075_v0, 0.0  ;;  %v4702_v34 = vmul.f32 0.01, %v8075_v0  ;;  %v4796_v47 = vadd.f32 %v4795_v56, %v11706_v31  ;;  %v4776_v7 = vadd.f32 %v4775_v13, %v11720_v40 }
 0x568   : > { %v11740_v24 = vpop.f32.mrb[95].mxu0  ;;  %v11742_v44 = vpop.f32.mrb[127].mxu1  ;;  %v4863_v39 = vmul.f32 %v11720_v40, %v11720_v40  ;;  %v4864_v30 = vmul.f32 %v11737_v5, %v11737_v5  ;;  %v4910_v61 = vadd.f32 %v4909_v43, %v4861_v18  ;;  %vm4653_vm2 = vcmp.gt.f32.partialorder %v4599_v50, 0.0 }
 0x569   : > { %v4701_v57 = vmul.f32 0.01, %v4599_v50  ;;  %v11750_v54 = vsel %vm4654_vm1, %v8075_v0, %v4702_v34  ;;  %v4817_v16 = vadd.f32 %v4816_v9, %v11718_v27  ;;  %v4931_v60 = vadd.f32 %v4930_v2, %v4862_v32 }
 0x56a   : > { %vm4655_vm3 = vcmp.gt.f32.partialorder %v8076_v35, 0.0  ;;  %v4703_v59 = vmul.f32 0.01, %v8076_v35  ;;  %v7816_v56 = vadd.f32 %v11639_v1, %v11630_v19  ;;  %v8077_v13 = vadd.f32 %v11667_v58, %v11336_v6 }
 0x56b   : > { %v11753_v29 = vsel %vm4653_vm2, %v4599_v50, %v4701_v57  ;;  %v8078_v43 = vadd.f32 %v11675_v15, %v11339_v36  ;;  %v4890_v18 = vadd.f32 %v4889_v4, %v4863_v39  ;;  %v4797_v0 = vadd.f32 %v4796_v47, %v11737_v5 }
 0x56c   : > { %v4911_v34 = vadd.f32 %v4910_v61, %v4864_v30  ;;  %v4777_v9 = vadd.f32 %v4776_v7, %v11750_v54  ;;  %v4865_v2 = vmul.f32 %v11753_v29, %v11753_v29  ;;  %v4866_v32 = vmul.f32 %v11750_v54, %v11750_v54 }
 0x56d   : > { %v4602_v19 = vadd.f32 %v7816_v56, %v11392_v33  ;;  %vm4657_vm4 = vcmp.gt.f32.partialorder %v8077_v13, 0.0  ;;  %v11768_v1 = vsel %vm4655_vm3, %v8076_v35, %v4703_v59  ;;  %v4705_v58 = vmul.f32 0.01, %v8077_v13 }
 0x56e   : > { %vm4658_vm5 = vcmp.gt.f32.partialorder %v8078_v43, 0.0  ;;  %v4706_v15 = vmul.f32 0.01, %v8078_v43  ;;  %v4818_v4 = vadd.f32 %v4817_v16, %v11753_v29  ;;  %v7819_v47 = vadd.f32 %v11677_v63, %v11669_v49 }
 0x56f   : > { %vm4656_vm6 = vcmp.gt.f32.partialorder %v4602_v19, 0.0  ;;  %v4704_v50 = vmul.f32 0.01, %v4602_v19  ;;  %v11773_v7 = vsel %vm4657_vm4, %v8077_v13, %v4705_v58  ;;  %v8079_v33 = vadd.f32 %v11680_v14, %v11336_v6 }
 0x570   : > { %v11775_v39 = vsel %vm4658_vm5, %v8078_v43, %v4706_v15  ;;  %v8080_v59 = vadd.f32 %v11690_v23, %v11339_v36  ;;  %v4891_v35 = vadd.f32 %v4890_v18, %v4866_v32  ;;  %v4798_v30 = vadd.f32 %v4797_v0, %v11768_v1 }
 0x571   : > { %v11782_v61 = vsel %vm4656_vm6, %v4602_v19, %v4704_v50  ;;  %v4869_v57 = vmul.f32 %v11773_v7, %v11773_v7  ;;  %v4932_v16 = vadd.f32 %v4931_v60, %v4865_v2  ;;  %v4867_v49 = vmul.f32 %v11768_v1, %v11768_v1 }
 0x572   : > { %v4778_v63 = vadd.f32 %v4777_v9, %v11773_v7  ;;  %v4607_v56 = vadd.f32 %v7819_v47, %v11406_v52  ;;  %v4868_v14 = vmul.f32 %v11782_v61, %v11782_v61  ;;  %v4870_v23 = vmul.f32 %v11775_v39, %v11775_v39 }
 0x573   : > { %vm4660_vm7 = vcmp.gt.f32.partialorder %v8079_v33, 0.0  ;;  %v4708_v13 = vmul.f32 0.01, %v8079_v33  ;;  %v4892_v43 = vadd.f32 %v4891_v35, %v4869_v57  ;;  %vm4661_vm9 = vcmp.gt.f32.partialorder %v8080_v59, 0.0 }
 0x574   : > { %vm4659_vm8 = vcmp.gt.f32.partialorder %v4607_v56, 0.0  ;;  %v4707_v18 = vmul.f32 0.01, %v4607_v56  ;;  %v4709_v0 = vmul.f32 0.01, %v8080_v59  ;;  %v7822_v9 = vadd.f32 %v11692_v12, %v11682_v8 }
 0x575   : > { %v11794_v60 = vsel %vm4660_vm7, %v8079_v33, %v4708_v13  ;;  %v8081_v52 = vadd.f32 %v11712_v45, %v11336_v6  ;;  %v4912_v2 = vadd.f32 %v4911_v34, %v4867_v49  ;;  %v8082_v58 = vadd.f32 %v11724_v28, %v11339_v36 }
 0x576   : > { %v11800_v32 = vsel %vm4659_vm8, %v4607_v56, %v4707_v18  ;;  %v4872_v19 = vmul.f32 %v11794_v60, %v11794_v60  ;;  %v4819_v15 = vadd.f32 %v4818_v4, %v11782_v61  ;;  %v4933_v50 = vadd.f32 %v4932_v16, %v4868_v14 }
 0x577   : > { %v4799_v47 = vadd.f32 %v4798_v30, %v11775_v39  ;;  %v4610_v33 = vadd.f32 %v7822_v9, %v11410_v21  ;;  %v4913_v8 = vadd.f32 %v4912_v2, %v4870_v23  ;;  %v4779_v12 = vadd.f32 %v4778_v63, %v11794_v60 }
 0x578   : > { %v11810_v45 = vsel %vm4661_vm9, %v8080_v59, %v4709_v0  ;;  %vm4663_vm10 = vcmp.gt.f32.partialorder %v8081_v52, 0.0  ;;  %v4820_v34 = vadd.f32 %v4819_v15, %v11800_v32  ;;  %v4871_v35 = vmul.f32 %v11800_v32, %v11800_v32 }
 0x579   : > { %v4893_v57 = vadd.f32 %v4892_v43, %v4872_v19  ;;  %v4711_v28 = vmul.f32 0.01, %v8081_v52  ;;  %v4710_v49 = vmul.f32 0.01, %v4610_v33  ;;  %vm4664_vm11 = vcmp.gt.f32.partialorder %v8082_v58, 0.0 }
 0x57a   : > { %v4712_v4 = vmul.f32 0.01, %v8082_v58  ;;  %v7825_v30 = vadd.f32 %v11726_v26, %v11714_v51  ;;  %v4800_v21 = vadd.f32 %v4799_v47, %v11810_v45  ;;  %vm4662_vm12 = vcmp.gt.f32.partialorder %v4610_v33, 0.0 }
 0x57b   : > { %v11818_v16 = vsel %vm4663_vm10, %v8081_v52, %v4711_v28  ;;  %v8083_v59 = vadd.f32 %v11732_v37, %v11336_v6  ;;  %v4873_v63 = vmul.f32 %v11810_v45, %v11810_v45  ;;  %v8084_v23 = vadd.f32 %v11740_v24, %v11339_v36 }
 0x57c   : > { %v4780_v56 = vadd.f32 %v4779_v12, %v11818_v16  ;;  %v4875_v14 = vmul.f32 %v11818_v16, %v11818_v16  ;;  %v11829_v51 = vsel %vm4664_vm11, %v8082_v58, %v4712_v4  ;;  %v4615_v26 = vadd.f32 %v7825_v30, %v11413_v20 }
 0x57d   : > { %vm4666_vm13 = vcmp.gt.f32.partialorder %v8083_v59, 0.0  ;;  %v4714_v13 = vmul.f32 0.01, %v8083_v59  ;;  %v4934_v43 = vadd.f32 %v4933_v50, %v4871_v35  ;;  %v11832_v18 = vsel %vm4662_vm12, %v4610_v33, %v4710_v49 }
 0x57e   : > { %v4894_v6 = vadd.f32 %v4893_v57, %v4875_v14  ;;  %v4801_v37 = vadd.f32 %v4800_v21, %v11829_v51  ;;  %v4876_v0 = vmul.f32 %v11829_v51, %v11829_v51  ;;  %vm4665_vm14 = vcmp.gt.f32.partialorder %v4615_v26, 0.0 }
 0x57f   : > { %v4713_v9 = vmul.f32 0.01, %v4615_v26  ;;  %v11837_v52 = vsel %vm4666_vm13, %v8083_v59, %v4714_v13  ;;  %vm4667_vm15 = vcmp.gt.f32.partialorder %v8084_v23, 0.0  ;;  %v4715_v24 = vmul.f32 0.01, %v8084_v23 }
 0x580   : > { %v4781_v36 = vadd.f32 %v4780_v56, %v11837_v52  ;;  %v4878_v20 = vmul.f32 %v11837_v52, %v11837_v52  ;;  %v4914_v2 = vadd.f32 %v4913_v8, %v4873_v63  ;;  %v4874_v19 = vmul.f32 %v11832_v18, %v11832_v18 }
 0x581   : > { %v11844_v58 = vsel %vm4665_vm14, %v4615_v26, %v4713_v9  ;;  %v7828_v15 = vadd.f32 %v11742_v44, %v11734_v10  ;;  %v4821_v50 = vadd.f32 %v4820_v34, %v11832_v18  ;;  %v11851_v57 = vsel %vm4667_vm15, %v8084_v23, %v4715_v24 }
 0x582   : > { %v4782_v47 = vrot.slane %v4781_v36, 4  ;;  %v4895_v33 = vadd.f32 %v4894_v6, %v4878_v20  ;;  %v4915_v12 = vadd.f32 %v4914_v2, %v4876_v0  ;;  %v4877_v35 = vmul.f32 %v11844_v58, %v11844_v58 }
 0x583   : > { %v4618_v8 = vadd.f32 %v7828_v15, %v11419_v17  ;;  %v4822_v28 = vadd.f32 %v4821_v50, %v11844_v58  ;;  %v4802_v30 = vadd.f32 %v4801_v37, %v11851_v57  ;;  %v4935_v21 = vadd.f32 %v4934_v43, %v4874_v19 }
 0x584   : > { %v4783_v49 = vadd.f32 %v4782_v47, %v4781_v36  ;;  %v4896_v4 = vrot.slane %v4895_v33, 4  ;;  %v4879_v10 = vmul.f32 %v11851_v57, %v11851_v57 }
 0x585   : > { %vm4668_vm0 = vcmp.gt.f32.partialorder %v4618_v8, 0.0  ;;  %v4716_v44 = vmul.f32 0.01, %v4618_v8  ;;  %v4803_v63 = vrot.slane %v4802_v30, 4  ;;  %v4936_v56 = vadd.f32 %v4935_v21, %v4877_v35 }
 0x586   : > { %v4784_v34 = vrot.slane %v4783_v49, 2  ;;  %v4897_v59 = vadd.f32 %v4896_v4, %v4895_v33  ;;  %v4916_v14 = vadd.f32 %v4915_v12, %v4879_v10 }
 0x587   : > { %v11858_v23 = vsel %vm4668_vm0, %v4618_v8, %v4716_v44  ;;  %v4804_v13 = vadd.f32 %v4803_v63, %v4802_v30 }
 0x588   : > { %13250 = vst [vmem:[#allocation33_spill] sm:$0xff] %v11858_v23  ;;  %v4785_v17 = vadd.f32 %v4784_v34, %v4783_v49  ;;  %v4898_v26 = vrot.slane %v4897_v59, 2  ;;  %v4823_v6 = vadd.f32 %v4822_v28, %v11858_v23  ;;  %v4917_v0 = vrot.slane %v4916_v14, 4 }
 0x589   : > { %v4880_v43 = vmul.f32 %v11858_v23, %v11858_v23  ;;  %v4805_v36 = vrot.slane %v4804_v13, 2 }
 0x58a   : > { %v4786_v37 = vrot.slane %v4785_v17, 1  ;;  %v4899_v9 = vadd.f32 %v4898_v26, %v4897_v59  ;;  %v4824_v20 = vrot.slane %v4823_v6, 4  ;;  %v4918_v24 = vadd.f32 %v4917_v0, %v4916_v14 }
 0x58b   : > { %v4937_v2 = vadd.f32 %v4936_v56, %v4880_v43  ;;  %v4806_v50 = vadd.f32 %v4805_v36, %v4804_v13 }
 0x58c   : > { %v4787_v19 = vadd.f32 %v4786_v37, %v4785_v17  ;;  %v4900_v15 = vrot.slane %v4899_v9, 1  ;;  %v4825_v47 = vadd.f32 %v4824_v20, %v4823_v6  ;;  %v4919_v33 = vrot.slane %v4918_v24, 2 }
 0x58d   : > { %v4938_v12 = vrot.slane %v4937_v2, 4  ;;  %v4807_v49 = vrot.slane %v4806_v50, 1 }
 0x58e   : > { %v4830_v35 = vmul.f32 0.0078125, %v4787_v19  ;;  %v4901_v8 = vadd.f32 %v4900_v15, %v4899_v9  ;;  %v4826_v28 = vrot.slane %v4825_v47, 2  ;;  %v4920_v4 = vadd.f32 %v4919_v33, %v4918_v24 }
 0x58f   : > { %v4939_v30 = vadd.f32 %v4938_v12, %v4937_v2  ;;  %v4808_v44 = vadd.f32 %v4807_v49, %v4806_v50 }
 0x590   : > { %v4944_v21 = vmul.f32 0.0078125, %v4901_v8  ;;  %v4947_v10 = vmul.f32 %v4830_v35, %v4830_v35  ;;  %v4827_v34 = vadd.f32 %v4826_v28, %v4825_v47  ;;  %v4921_v59 = vrot.slane %v4920_v4, 1 }
 0x591   : > { %v4940_v63 = vrot.slane %v4939_v30, 2  ;;  %v4831_v56 = vmul.f32 0.0078125, %v4808_v44 }
 0x592   : > { %v4950_v14 = vsub.f32 %v4944_v21, %v4947_v10  ;;  %v4828_v17 = vrot.slane %v4827_v34, 1  ;;  %v4922_v26 = vadd.f32 %v4921_v59, %v4920_v4  ;;  %v4765_v59 = vld [vmem:[#allocation2 + $0x1b] sm:$0x7] }
 0x593   : > { %v4941_v13 = vadd.f32 %v4940_v63, %v4939_v30  ;;  %v4948_v0 = vmul.f32 %v4831_v56, %v4831_v56  ;;  %v13251_v30 = vld [vmem:[#allocation63_spill] sm:$0xff] }
 0x594   : > { %v4953_v6 = vmax.f32 %v4950_v14, 0.0  ;;  %v4829_v43 = vadd.f32 %v4828_v17, %v4827_v34  ;;  %v4945_v37 = vmul.f32 0.0078125, %v4922_v26 }
 0x595   : > { %v4942_v9 = vrot.slane %v4941_v13, 1 }
 0x596   : > { %v4832_v36 = vmul.f32 0.0078125, %v4829_v43  ;;  %v4956_v20 = vadd.f32 1e-05, %v4953_v6  ;;  %v4951_v24 = vsub.f32 %v4945_v37, %v4948_v0 }
 0x597   : > { %v4943_v2 = vadd.f32 %v4942_v9, %v4941_v13 }
 0x598   : > { %v4949_v19 = vmul.f32 %v4832_v36, %v4832_v36  ;;  %v4954_v15 = vmax.f32 %v4951_v24, 0.0  ;;  %8804 = vrsqrt.f32 %v4956_v20 }
 0x599   : > { %v4946_v50 = vmul.f32 0.0078125, %v4943_v2 }
 0x59a   : > { %v4957_v47 = vadd.f32 1e-05, %v4954_v15 }
 0x59b   : > { %v4952_v33 = vsub.f32 %v4946_v50, %v4949_v19 }
 0x59c   : > { %8806 = vrsqrt.f32 %v4957_v47 }
 0x59d   : > { %v4955_v12 = vmax.f32 %v4952_v33, 0.0 }
 0x59f   : > { %v4958_v8 = vadd.f32 1e-05, %v4955_v12 }
 0x5a1   : > { %8808 = vrsqrt.f32 %v4958_v8 }
 0x5a2   : > { %v8805_v49 = vpop.eup %8804 }
 0x5a6   : > { %v8807_v28 = vpop.eup %8806 }
 0x5a7   : > { %v4965_v4 = vcombine.low %v8805_v49, %v8807_v28  ;;  %v13256_v49 = vld [vmem:[#allocation28_spill] sm:$0xff] }
 0x5a9   : > { %v4972_v21 = vrot.slane %v4965_v4, %v13251_v30  ;;  %v13257_v4 = vld [vmem:[#allocation47_spill] sm:$0xff] }
 0x5ab   : > { %v8809_v10 = vpop.eup %8808 }
 0x5ac   : > { %v4979_v44 = vrot.slane %v8809_v10, %v13251_v30  ;;  %v13259_v10 = vld [vmem:[#allocation44_spill] sm:$0xff] }
 0x5ae   : > { %v4980_v34 = vcombine.low %v4972_v21, %v4979_v44  ;;  %v13258_v21 = vld [vmem:[#allocation38_spill] sm:$0xff] }
 0x5b0   : > { %v4987_v63 = vrot.slane %v4980_v34, %v13251_v30  ;;  %v13260_v34 = vld [vmem:[#allocation36_spill] sm:$0xff] }
 0x5b2   : > { %v4989_v14 = vmul.f32 %v4987_v63, %v4765_v59  ;;  %v13261_v63 = vld [vmem:[#allocation27_spill] sm:$0xff] }
 0x5b4   : > { %v4994_v17 = vrot.slane %v4989_v14, %v13229_v55  ;;  %v4998_v26 = vrot.slane %v4989_v14, %v13230_v38  ;;  %v11869_v13 = vrot.slane %v4989_v14, %v13228_v42 }
 0x5b6   : > { %v5006_v6 = vmul.f32 %v4994_v17, %v4830_v35  ;;  %v5007_v0 = vmul.f32 %v4998_v26, %v4831_v56  ;;  %v5008_v43 = vmul.f32 %v11869_v13, %v4832_v36  ;;  %v5038_v37 = vmul.f32 %v4998_v26, %v11397_v3  ;;  %v13252_v3 = vld [vmem:[#allocation23_spill] sm:$0xff] }
 0x5b7   : > { %v5041_v9 = vmul.f32 %v4998_v26, %v11423_v22  ;;  %v5037_v20 = vmul.f32 %v4994_v17, %v11395_v48  ;;  %v5040_v24 = vmul.f32 %v4994_v17, %v11399_v41  ;;  %v5044_v2 = vmul.f32 %v4998_v26, %v11455_v11  ;;  %v13253_v22 = vld [vmem:[#allocation41_spill] sm:$0xff]  ;;  %v13254_v41 = vld [vmem:[#allocation31_spill] sm:$0xff]  ;;  %v13255_v11 = vld [vmem:[#allocation22_spill] sm:$0xff] }
 0x5b8   : > { %v5012_v19 = vcombine.low %v5006_v6, %v5007_v0  ;;  %v5026_v15 = vrot.slane %v5008_v43, %v13251_v30  ;;  %v5047_v50 = vmul.f32 %v4998_v26, %v11487_v46  ;;  %v5043_v35 = vmul.f32 %v4994_v17, %v11447_v53  ;;  %v4766_v0 = vld [vmem:[#allocation2 + $0x1e] sm:$0x7] }
 0x5b9   : > { %v5046_v56 = vmul.f32 %v4994_v17, %v11474_v25  ;;  %v5050_v36 = vmul.f32 %v4998_v26, %v11515_v62  ;;  %v5053_v47 = vmul.f32 %v4998_v26, %v13252_v3  ;;  %v5049_v33 = vmul.f32 %v4994_v17, %v13253_v22 }
 0x5ba   : > { %v5019_v48 = vrot.slane %v5012_v19, %v13251_v30  ;;  %v5052_v12 = vmul.f32 %v4994_v17, %v13254_v41  ;;  %v5056_v8 = vmul.f32 %v4998_v26, %v13255_v11  ;;  %v5059_v28 = vmul.f32 %v4998_v26, %v13256_v49  ;;  %v13262_v41 = vld [vmem:[#allocation62_spill] sm:$0xff]  ;;  %v13263_v11 = vld [vmem:[#allocation20_spill] sm:$0xff] }
 0x5bb   : > { %v5055_v46 = vmul.f32 %v4994_v17, %v13257_v4  ;;  %v5058_v53 = vmul.f32 %v4994_v17, %v13258_v21  ;;  %v5062_v25 = vmul.f32 %v4998_v26, %v13259_v10  ;;  %v5065_v62 = vmul.f32 %v4998_v26, %v11706_v31  ;;  %v13268_v21 = vld [vmem:[#allocation46_spill] sm:$0xff] }
 0x5bc   : > { %v5027_v44 = vcombine.low %v5019_v48, %v5026_v15  ;;  %v11893_v59 = vmul.f32 %v4994_v17, %v13260_v34  ;;  %v11896_v14 = vmul.f32 %v4994_v17, %v13261_v63  ;;  %v11899_v6 = vmul.f32 %v4998_v26, %v11737_v5 }
 0x5bd   : > { %v11902_v43 = vmul.f32 %v4998_v26, %v11768_v1  ;;  %v11905_v19 = vmul.f32 %v4994_v17, %v11720_v40  ;;  %v11908_v3 = vmul.f32 %v4994_v17, %v11750_v54  ;;  %v11911_v31 = vmul.f32 %v4998_v26, %v11775_v39 }
 0x5be   : > { %v5034_v15 = vrot.slane %v5027_v44, %v13251_v30  ;;  %v11915_v22 = vmul.f32 %v4998_v26, %v11810_v45  ;;  %v11918_v5 = vmul.f32 %v4994_v17, %v11773_v7  ;;  %v11921_v1 = vmul.f32 %v4994_v17, %v11794_v60 }
 0x5bf   : > { %v11924_v40 = vmul.f32 %v4998_v26, %v11829_v51  ;;  %v11927_v54 = vmul.f32 %v4998_v26, %v11851_v57  ;;  %v11930_v39 = vmul.f32 %v4994_v17, %v11818_v16  ;;  %v11933_v48 = vmul.f32 %v4994_v17, %v11837_v52  ;;  %v13264_v51 = vld [vmem:[#allocation29_spill] sm:$0xff]  ;;  %v13266_v26 = vld [vmem:[#allocation39_spill] sm:$0xff]  ;;  %v13267_v17 = vld [vmem:[#allocation30_spill] sm:$0xff] }
 0x5c0   : > { %v5036_v45 = vsub.f32 %v4766_v0, %v5034_v15  ;;  %v11937_v7 = vmul.f32 %v11869_v13, %v13262_v41  ;;  %v11941_v60 = vmul.f32 %v11869_v13, %v13263_v11  ;;  %v11945_v49 = vmul.f32 %v11869_v13, %v13264_v51  ;;  %v13265_v57 = vld [vmem:[#allocation49_spill] sm:$0xff]  ;;  %v13269_v0 = vld [vmem:[#allocation24_spill] sm:$0xff] }
 0x5c1   : > { %v11949_v16 = vmul.f32 %v11869_v13, %v13265_v57  ;;  %v11953_v52 = vmul.f32 %v11869_v13, %v13266_v26  ;;  %v11957_v4 = vmul.f32 %v11869_v13, %v13267_v17  ;;  %v11961_v10 = vmul.f32 %v11869_v13, %v13268_v21  ;;  %v13270_v41 = vld [vmem:[#allocation21_spill] sm:$0xff] }
 0x5c2   : > { %v11964_v44 = vrot.slane %v5036_v45, %v13229_v55  ;;  %v5093_v34 = vrot.slane %v5036_v45, %v13230_v38  ;;  %v11968_v63 = vrot.slane %v5036_v45, %v13228_v42  ;;  %v11972_v15 = vmul.f32 %v11869_v13, %v13269_v0 }
 0x5c3   : > { %v11976_v11 = vmul.f32 %v11869_v13, %v13270_v41  ;;  %v11980_v51 = vmul.f32 %v11869_v13, %v11718_v27  ;;  %v11984_v57 = vmul.f32 %v11869_v13, %v11753_v29  ;;  %v11988_v42 = vmul.f32 %v11869_v13, %v11782_v61  ;;  %v8732_v29 = vld [vmem:[%s12905_s5 + $0x100] ss:$8 sps:$4 sm:$0xff]  }
 0x5c4   : > { %v5102_v45 = vadd.f32 %v5093_v34, %v5038_v37  ;;  %v5105_v26 = vadd.f32 %v5093_v34, %v5041_v9  ;;  %v5101_v17 = vadd.f32 %v11964_v44, %v5037_v20  ;;  %v5104_v21 = vadd.f32 %v11964_v44, %v5040_v24  ;;  %v8737_v9 = vld [vmem:[%s12905_s5 + $0x114] ss:$8 sps:$4 sm:$0xff]  }
 0x5c5   : > { %v5108_v0 = vadd.f32 %v5093_v34, %v5044_v2  ;;  %v5111_v41 = vadd.f32 %v5093_v34, %v5047_v50  ;;  %v5107_v30 = vadd.f32 %v11964_v44, %v5043_v35  ;;  %v5110_v27 = vadd.f32 %v11964_v44, %v5046_v56 }
 0x5c6   : > { %v5151_v38 = vpack.c.bf16 %v5105_v26, %v5102_v45  ;;  %v5150_v55 = vpack.c.bf16 %v5104_v21, %v5101_v17  ;;  %v5114_v61 = vadd.f32 %v5093_v34, %v5050_v36  ;;  %v5117_v23 = vadd.f32 %v5093_v34, %v5053_v47 }
 0x5c7   : > { %v5154_v37 = vpack.c.bf16 %v5111_v41, %v5108_v0  ;;  %v5153_v20 = vpack.c.bf16 %v5110_v27, %v5107_v30  ;;  %v12001_v24 = vadd.f32 %v11964_v44, %v5049_v33  ;;  %v12004_v2 = vadd.f32 %v11964_v44, %v5052_v12 }
 0x5c8   : > { %5505 = vmatprep.mubr.bf16.mxu0 %v5151_v38  ;;  %v5157_v50 = vpack.c.bf16 %v5117_v23, %v5114_v61  ;;  %v12006_v35 = vadd.f32 %v5093_v34, %v5056_v8  ;;  %v12008_v56 = vadd.f32 %v5093_v34, %v5059_v28  ;;  %v12011_v36 = vadd.f32 %v11964_v44, %v5055_v46  ;;  %v8735_v38 = vld [vmem:[%s12905_s5 + $0x110] ss:$8 sps:$4 sm:$0xff]   ;;  %v8740_v28 = vld [vmem:[%s12905_s5 + $0x124] ss:$8 sps:$4 sm:$0xff]  }
 0x5c9   : > { %5506 = vmatmul.mubr.bf16.vlgmr.msra.gmra.mrb[96].mxu0 %v5150_v55  ;;  %v5156_v47 = vpack.c.bf16 %v12004_v2, %v12001_v24  ;;  %v12016_v30 = vadd.f32 %v11964_v44, %v5058_v53  ;;  %v12018_v33 = vadd.f32 %v5093_v34, %v5062_v25  ;;  %v12020_v12 = vadd.f32 %v5093_v34, %v5065_v62  ;;  %v8750_v24 = vld [vmem:[%s12905_s5 + $0x160] ss:$8 sps:$4 sm:$0xff]   ;;  %v8755_v2 = vld [vmem:[%s12905_s5 + $0x174] ss:$8 sps:$4 sm:$0xff]  }
 0x5ca   : > { %5587 = vmatpush1.bf16.msra.mxu0 %v8732_v29  ;;  %5515 = vmatprep.mubr.bf16.mxu0 %v5154_v37  ;;  %v5160_v23 = vpack.c.bf16 %v12008_v56, %v12006_v35  ;;  %v12029_v55 = vadd.f32 %v11964_v44, %v11893_v59  ;;  %v12033_v8 = vadd.f32 %v11964_v44, %v11896_v14  ;;  %v8753_v35 = vld [vmem:[%s12905_s5 + $0x170] ss:$8 sps:$4 sm:$0xff]   ;;  %v13272_v56 = vmov 0  }
 0x5cb   : > { %5588 = vmatprep.subr.bf16.mxu0 %v8737_v9  ;;  %v5159_v46 = vpack.c.bf16 %v12016_v30, %v12011_v36  ;;  %v5163_v53 = vpack.c.bf16 %v12020_v12, %v12018_v33  ;;  %v12043_v25 = vadd.f32 %v5093_v34, %v11899_v6  ;;  %v12046_v62 = vadd.f32 %v5093_v34, %v11902_v43  ;;  %v8756_v36 = vld [vmem:[#allocation9 + $0x40] sm:$0xff]   ;;  %v8758_v30 = vld [vmem:[#allocation9 + $0x48] sm:$0xff]   ;;  %v5149_v33 = vld [vmem:[#allocation2 + $0x21] sm:$0x3] }
 0x5cc   : > { %v5162_v59 = vpack.c.bf16 %v12033_v8, %v12029_v55  ;;  %v12052_v14 = vadd.f32 %v11964_v44, %v11905_v19  ;;  %v12056_v45 = vadd.f32 %v11964_v44, %v11908_v3  ;;  %v12059_v26 = vadd.f32 %v5093_v34, %v11911_v31  ;;  %v8738_v3 = vld [vmem:[%s12905_s5 + $0x120] ss:$8 sps:$4 sm:$0xff]   ;;  %7829 = vmatprep.subr.bf16.mxu1 %v8756_v36  ;;  %v8759_v12 = vld [vmem:[#allocation9 + $0x8] sm:$0xff]  }
 0x5cd   : > { %v5166_v6 = vpack.c.bf16 %v12046_v62, %v12043_v25  ;;  %v12064_v43 = vadd.f32 %v5093_v34, %v11915_v22  ;;  %v12068_v17 = vadd.f32 %v11964_v44, %v11918_v5  ;;  %v12072_v19 = vadd.f32 %v11964_v44, %v11921_v1  ;;  %v8743_v1 = vld [vmem:[%s12905_s5 + $0x134] ss:$8 sps:$4 sm:$0xff]  }
 0x5ce   : > { %5589 = vmatpush1.bf16.msra.mxu0 %v8735_v38  ;;  %v5165_v31 = vpack.c.bf16 %v12056_v45, %v12052_v14  ;;  %v12080_v21 = vadd.f32 %v5093_v34, %v11924_v40  ;;  %v12083_v22 = vadd.f32 %v5093_v34, %v11927_v54  ;;  %v12087_v5 = vadd.f32 %v11964_v44, %v11930_v39  ;;  %v8760_v8 = vld [vmem:[#allocation9 + $0x50] sm:$0xff]   ;;  %v8762_v45 = vld [vmem:[#allocation9 + $0x58] sm:$0xff]  }
 0x5cf   : > { %5590 = vmatprep.subr.bf16.mxu0 %v8740_v28  ;;  %v5169_v0 = vpack.c.bf16 %v12064_v43, %v12059_v26  ;;  %v5168_v41 = vpack.c.bf16 %v12072_v19, %v12068_v17  ;;  %v12098_v40 = vadd.f32 %v11964_v44, %v11933_v48  ;;  %v12102_v54 = vadd.f32 %v11968_v63, %v11937_v7  ;;  %v13271_v43 = vld [vmem:[#allocation33_spill] sm:$0xff]  ;;  %v8761_v62 = vld [vmem:[#allocation9 + $0x10] sm:$0xff]  }
 0x5d0   : > { %v5172_v39 = vpack.c.bf16 %v12083_v22, %v12080_v21  ;;  %v5106_v34 = vadd.f32 %v11968_v63, %v11941_v60  ;;  %v12110_v27 = vadd.f32 %v11968_v63, %v11945_v49  ;;  %v5112_v29 = vadd.f32 %v11968_v63, %v11949_v16  ;;  %v8741_v49 = vld [vmem:[%s12905_s5 + $0x130] ss:$8 sps:$4 sm:$0xff]  }
 0x5d1   : > { %5516 = vmatmul.mubr.bf16.gmra.mrb[100].mxu0 %v5153_v20  ;;  %v5171_v48 = vpack.c.bf16 %v12098_v40, %v12087_v5  ;;  %v5115_v7 = vadd.f32 %v11968_v63, %v11953_v52  ;;  %v5118_v44 = vadd.f32 %v11968_v63, %v11957_v4  ;;  %v5121_v60 = vadd.f32 %v11968_v63, %v11961_v10  ;;  %v8746_v52 = vld [vmem:[%s12905_s5 + $0x144] ss:$8 sps:$4 sm:$0xff]   ;;  %v8747_v21 = vld [vmem:[%s12905_s5 + $0x150] ss:$8 sps:$4 sm:$0xff]  }
 0x5d2   : > { %5525 = vmatprep.mubr.bf16.mxu0 %v5157_v50  ;;  %5591 = vmatpush1.bf16.msra.mxu0 %v8738_v3  ;;  %v5152_v16 = vpack.c.bf16 %v5106_v34, %v12102_v54  ;;  %v5155_v61 = vpack.c.bf16 %v5112_v29, %v12110_v27  ;;  %v5124_v37 = vadd.f32 %v11968_v63, %v11972_v15  ;;  %v8764_v54 = vld [vmem:[#allocation9 + $0x60] sm:$0xff]  }
 0x5d3   : > { %5592 = vmatprep.subr.bf16.mxu0 %v8743_v1  ;;  %v5158_v4 = vpack.c.bf16 %v5118_v44, %v5115_v7  ;;  %v5127_v10 = vadd.f32 %v11968_v63, %v11976_v11  ;;  %v5130_v9 = vadd.f32 %v11968_v63, %v11980_v51  ;;  %v5133_v20 = vadd.f32 %v11968_v63, %v11984_v57  ;;  %v8744_v57 = vld [vmem:[%s12905_s5 + $0x140] ss:$8 sps:$4 sm:$0xff]   ;;  %v8765_v7 = vld [vmem:[#allocation9 + $0x20] sm:$0xff]  }
 0x5d4   : > { %v5161_v50 = vpack.c.bf16 %v5124_v37, %v5121_v60  ;;  %v5136_v38 = vadd.f32 %v11968_v63, %v11988_v42  ;;  %v5075_v15 = vmul.f32 %v11869_v13, %v11800_v32  ;;  %v5078_v28 = vmul.f32 %v11869_v13, %v11832_v18  ;;  %v8749_v18 = vld [vmem:[%s12905_s5 + $0x154] ss:$8 sps:$4 sm:$0xff]  }
 0x5d5   : > { %v5164_v26 = vpack.c.bf16 %v5130_v9, %v5127_v10  ;;  %v5081_v11 = vmul.f32 %v11869_v13, %v11844_v58  ;;  %v5084_v51 = vmul.f32 %v11869_v13, %v13271_v43 }
 0x5d6   : > { %5593 = vmatpush1.bf16.msra.mxu0 %v8741_v49  ;;  %v5167_v17 = vpack.c.bf16 %v5136_v38, %v5133_v20  ;;  %v5139_v42 = vadd.f32 %v11968_v63, %v5075_v15  ;;  %v5142_v32 = vadd.f32 %v11968_v63, %v5078_v28  ;;  %v8766_v49 = vld [vmem:[#allocation9 + $0x68] sm:$0xff]  }
 0x5d7   : > { %5594 = vmatprep.subr.bf16.mxu0 %v8746_v52  ;;  %v5145_v58 = vadd.f32 %v11968_v63, %v5081_v11  ;;  %v5148_v19 = vadd.f32 %v11968_v63, %v5084_v51  ;;  %v8752_v63 = vld [vmem:[%s12905_s5 + $0x164] ss:$8 sps:$4 sm:$0xff]  }
 0x5d8   : > { %v5170_v13 = vpack.c.bf16 %v5142_v32, %v5139_v42 }
 0x5d9   : > { %5526 = vmatmul.mubr.bf16.gmra.mrb[104].mxu0 %v5156_v47  ;;  %v5173_v3 = vpack.c.bf16 %v5148_v19, %v5145_v58  ;;  %v8757_v47 = vld [vmem:[#allocation9] sm:$0xff]  }
 0x5da   : > { %5535 = vmatprep.mubr.bf16.mxu0 %v5160_v23  ;;  %5595 = vmatpush1.bf16.msra.mxu0 %v8744_v57  ;;  %v13273_v23 = vld [vmem:[#allocation17_spill] sm:$0xff]  ;;  %v8768_v57 = vld [vmem:[#allocation9 + $0x70] sm:$0xff]  }
 0x5db   : > { %5596 = vmatprep.subr.bf16.mxu0 %v8749_v18  ;;  %7830 = vmatpush3.bf16.msra.mxu1 %v8757_v47  ;;  %v12203_v55 = vrot.slane %v5149_v33, %v13273_v23  ;;  %v8770_v47 = vld [vmem:[#allocation9 + $0x78] sm:$0xff]  }
 0x5dc   : > { %7831 = vmatprep.subr.bf16.mxu1 %v8758_v30 }
 0x5de   : > { %5597 = vmatpush1.bf16.msra.mxu0 %v8747_v21 }
 0x5df   : > { %5598 = vmatprep.subr.bf16.mxu0 %v8752_v63  ;;  %7832 = vmatpush3.bf16.msra.mxu1 %v8759_v12 }
 0x5e0   : > { %7833 = vmatprep.subr.bf16.mxu1 %v8760_v8 }
 0x5e1   : > { %5536 = vmatmul.mubr.bf16.gmra.mrb[108].mxu0 %v5159_v46  ;;  %v13274_v46 = vld [vmem:[#allocation19_spill] sm:$0xff] }
 0x5e2   : > { %5545 = vmatprep.mubr.bf16.mxu0 %v5163_v53  ;;  %5599 = vmatpush1.bf16.msra.mxu0 %v8750_v24  ;;  %v12206_v53 = vrot.slane %v5149_v33, %v13274_v46  ;;  %v8769_v24 = vld [vmem:[#allocation9 + $0x30] sm:$0xff]  }
 0x5e3   : > { %5600 = vmatprep.subr.bf16.mxu0 %v8755_v2  ;;  %7834 = vmatpush3.bf16.msra.mxu1 %v8761_v62 }
 0x5e4   : > { %7835 = vmatprep.subr.bf16.mxu1 %v8762_v45 }
 0x5e6   : > { %5601 = vmatpush1.bf16.msra.mxu0 %v8753_v35 }
 0x5e9   : > { %5546 = vmatmul.mubr.bf16.gmra.mrb[112].mxu0 %v5162_v59 }
 0x5ea   : > { %5555 = vmatprep.mubr.bf16.mxu0 %v5166_v6 }
 0x5f1   : > { %5556 = vmatmul.mubr.bf16.gmra.mrb[116].mxu0 %v5165_v31 }
 0x5f2   : > { %5565 = vmatprep.mubr.bf16.mxu0 %v5169_v0 }
 0x5f9   : > { %5566 = vmatmul.mubr.bf16.gmra.mrb[120].mxu0 %v5168_v41  ;;  %v8763_v41 = vld [vmem:[#allocation9 + $0x18] sm:$0xff]  }
 0x5fa   : > { %5575 = vmatprep.mubr.bf16.mxu0 %v5172_v39  ;;  %7836 = vmatpush3.bf16.msra.mxu1 %v8763_v41 }
 0x5fb   : > { %7837 = vmatprep.subr.bf16.mxu1 %v8764_v54 }
 0x5fe   : > { %7838 = vmatpush3.bf16.msra.mxu1 %v8765_v7 }
 0x5ff   : > { %7839 = vmatprep.subr.bf16.mxu1 %v8766_v49 }
 0x601   : > { %5576 = vmatmul.mubr.bf16.gmra.mrb[124].mxu0 %v5171_v48 }
 0x602   : > { %5618 = vmatprep.mubr.bf16.mxu0 %v13272_v56 }
 0x609   : > { %5619 = vmatmul.mubr.bf16.vlgmr.msra.gmra.mrb[96].mxu0 %v5152_v16 }
 0x60a   : > { %5628 = vmatprep.mubr.bf16.mxu0 %v13272_v56 }
 0x611   : > { %5629 = vmatmul.mubr.bf16.gmra.mrb[100].mxu0 %v5155_v61 }
 0x612   : > { %5638 = vmatprep.mubr.bf16.mxu0 %v13272_v56 }
 0x619   : > { %5639 = vmatmul.mubr.bf16.gmra.mrb[104].mxu0 %v5158_v4 }
 0x61a   : > { %5648 = vmatprep.mubr.bf16.mxu0 %v13272_v56 }
 0x621   : > { %5649 = vmatmul.mubr.bf16.gmra.mrb[108].mxu0 %v5161_v50 }
 0x622   : > { %5658 = vmatprep.mubr.bf16.mxu0 %v13272_v56 }
 0x629   : > { %5659 = vmatmul.mubr.bf16.gmra.mrb[112].mxu0 %v5164_v26  ;;  %v8767_v26 = vld [vmem:[#allocation9 + $0x28] sm:$0xff]  }
 0x62a   : > { %5668 = vmatprep.mubr.bf16.mxu0 %v13272_v56  ;;  %7840 = vmatpush3.bf16.msra.mxu1 %v8767_v26 }
 0x62b   : > { %7841 = vmatprep.subr.bf16.mxu1 %v8768_v57 }
 0x62e   : > { %7842 = vmatpush3.bf16.msra.mxu1 %v8769_v24 }
 0x62f   : > { %7843 = vmatprep.subr.bf16.mxu1 %v8770_v47 }
 0x631   : > { %5669 = vmatmul.mubr.bf16.gmra.mrb[116].mxu0 %v5167_v17 }
 0x632   : > { %5678 = vmatprep.mubr.bf16.mxu0 %v13272_v56 }
 0x639   : > { %5679 = vmatmul.mubr.bf16.gmra.mrb[120].mxu0 %v5170_v13 }
 0x63a   : > { %5688 = vmatprep.mubr.bf16.mxu0 %v13272_v56 }
 0x641   : > { %5689 = vmatmul.mubr.bf16.gmra.mrb[124].mxu0 %v5173_v3 }
 0x6dc   : > { %v5620_v25 = vpop.f32.mrb[96].mxu0 }
 0x6dd   : > { %v8085_v59 = vadd.f32 %v5620_v25, %v12203_v55  ;;  %v5622_v14 = vpop.f32.mrb[97].mxu0 }
 0x6de   : > { %v8086_v6 = vadd.f32 %v5622_v14, %v12206_v53  ;;  %v5624_v31 = vpop.f32.mrb[98].mxu0 }
 0x6df   : > { %v5731_v22 = vmul.f32 0.01, %v8085_v59  ;;  %v8087_v5 = vadd.f32 %v5624_v31, %v12203_v55  ;;  %v5626_v1 = vpop.f32.mrb[99].mxu0  ;;  %vm5699_vm1 = vcmp.gt.f32.partialorder %v8085_v59, 0.0 }
 0x6e0   : > { %v8088_v0 = vadd.f32 %v5626_v1, %v12206_v53  ;;  %v5732_v39 = vmul.f32 0.01, %v8086_v6  ;;  %vm5700_vm3 = vcmp.gt.f32.partialorder %v8086_v6, 0.0 }
 0x6e1   : > { %vm5701_vm2 = vcmp.gt.f32.partialorder %v8087_v5, 0.0  ;;  %v5733_v40 = vmul.f32 0.01, %v8087_v5  ;;  %v12212_v27 = vsel %vm5699_vm1, %v8085_v59, %v5731_v22 }
 0x6e2   : > { %v5734_v34 = vmul.f32 0.01, %v8088_v0  ;;  %vm5702_vm4 = vcmp.gt.f32.partialorder %v8088_v0, 0.0  ;;  %v5841_v16 = vmul.f32 %v12212_v27, %v12212_v27  ;;  %v12219_v61 = vsel %vm5700_vm3, %v8086_v6, %v5732_v39 }
 0x6e3   : > { %v12214_v29 = vsel %vm5701_vm2, %v8087_v5, %v5733_v40  ;;  %v5842_v17 = vmul.f32 %v12219_v61, %v12219_v61  ;;  %v8771_v5 = vld [vmem:[#allocation9 + $0x38] sm:$0xff]  }
 0x6e4   : > { %v5630_v48 = vpop.f32.mrb[100].mxu0  ;;  %v12221_v37 = vsel %vm5702_vm4, %v8088_v0, %v5734_v34  ;;  %v5797_v10 = vadd.f32 %v12214_v29, %v12212_v27  ;;  %v5843_v38 = vmul.f32 %v12214_v29, %v12214_v29  ;;  %7844 = vmatpush3.bf16.msra.mxu1 %v8771_v5 }
 0x6e5   : > { %v8089_v44 = vadd.f32 %v5630_v48, %v12203_v55  ;;  %v5632_v60 = vpop.f32.mrb[101].mxu0  ;;  %v5844_v11 = vmul.f32 %v12221_v37, %v12221_v37  ;;  %v5818_v58 = vadd.f32 %v12221_v37, %v12219_v61 }
 0x6e6   : > { %v8090_v52 = vadd.f32 %v5632_v60, %v12206_v53  ;;  %v5634_v4 = vpop.f32.mrb[102].mxu0  ;;  %v5873_v3 = vadd.f32 %v5843_v38, %v5841_v16 }
 0x6e7   : > { %vm5703_vm5 = vcmp.gt.f32.partialorder %v8089_v44, 0.0  ;;  %v5735_v9 = vmul.f32 0.01, %v8089_v44  ;;  %v8091_v20 = vadd.f32 %v5634_v4, %v12203_v55  ;;  %v5636_v50 = vpop.f32.mrb[103].mxu0  ;;  %v5894_v2 = vadd.f32 %v5844_v11, %v5842_v17 }
 0x6e8   : > { %vm5704_vm6 = vcmp.gt.f32.partialorder %v8090_v52, 0.0  ;;  %v5736_v15 = vmul.f32 0.01, %v8090_v52  ;;  %v8092_v28 = vadd.f32 %v5636_v50, %v12206_v53 }
 0x6e9   : > { %v12232_v43 = vsel %vm5703_vm5, %v8089_v44, %v5735_v9  ;;  %vm5705_vm7 = vcmp.gt.f32.partialorder %v8091_v20, 0.0  ;;  %v5737_v51 = vmul.f32 0.01, %v8091_v20 }
 0x6ea   : > { %v5798_v42 = vadd.f32 %v5797_v10, %v12232_v43  ;;  %v5845_v32 = vmul.f32 %v12232_v43, %v12232_v43  ;;  %v12239_v18 = vsel %vm5704_vm6, %v8090_v52, %v5736_v15  ;;  %vm5706_vm8 = vcmp.gt.f32.partialorder %v8092_v28, 0.0 }
 0x6eb   : > { %v12243_v19 = vsel %vm5705_vm7, %v8091_v20, %v5737_v51  ;;  %v5738_v13 = vmul.f32 0.01, %v8092_v28  ;;  %v5846_v21 = vmul.f32 %v12239_v18, %v12239_v18  ;;  %v5819_v35 = vadd.f32 %v5818_v58, %v12239_v18 }
 0x6ec   : > { %v5640_v63 = vpop.f32.mrb[104].mxu0  ;;  %v5874_v30 = vadd.f32 %v5873_v3, %v5845_v32  ;;  %v5799_v33 = vadd.f32 %v5798_v42, %v12243_v19  ;;  %v5847_v62 = vmul.f32 %v12243_v19, %v12243_v19 }
 0x6ed   : > { %v8093_v56 = vadd.f32 %v5640_v63, %v12203_v55  ;;  %v5642_v36 = vpop.f32.mrb[105].mxu0  ;;  %v12250_v12 = vsel %vm5706_vm8, %v8092_v28, %v5738_v13  ;;  %v5895_v6 = vadd.f32 %v5894_v2, %v5846_v21 }
 0x6ee   : > { %v8094_v8 = vadd.f32 %v5642_v36, %v12206_v53  ;;  %v5644_v25 = vpop.f32.mrb[106].mxu0  ;;  %v5848_v1 = vmul.f32 %v12250_v12, %v12250_v12  ;;  %v5820_v34 = vadd.f32 %v5819_v35, %v12250_v12  ;;  %v5875_v60 = vadd.f32 %v5874_v30, %v5847_v62 }
 0x6ef   : > { %vm5707_vm9 = vcmp.gt.f32.partialorder %v8093_v56, 0.0  ;;  %v5739_v59 = vmul.f32 0.01, %v8093_v56  ;;  %v8095_v14 = vadd.f32 %v5644_v25, %v12203_v55  ;;  %v5646_v45 = vpop.f32.mrb[107].mxu0 }
 0x6f0   : > { %vm5708_vm10 = vcmp.gt.f32.partialorder %v8094_v8, 0.0  ;;  %v5740_v31 = vmul.f32 0.01, %v8094_v8  ;;  %v8096_v22 = vadd.f32 %v5646_v45, %v12206_v53  ;;  %v5896_v16 = vadd.f32 %v5895_v6, %v5848_v1 }
 0x6f1   : > { %v12259_v0 = vsel %vm5707_vm9, %v8093_v56, %v5739_v59  ;;  %vm5709_vm11 = vcmp.gt.f32.partialorder %v8095_v14, 0.0  ;;  %v5741_v41 = vmul.f32 0.01, %v8095_v14 }
 0x6f2   : > { %v5800_v40 = vadd.f32 %v5799_v33, %v12259_v0  ;;  %v5849_v54 = vmul.f32 %v12259_v0, %v12259_v0  ;;  %v12264_v39 = vsel %vm5708_vm10, %v8094_v8, %v5740_v31  ;;  %vm5710_vm12 = vcmp.gt.f32.partialorder %v8096_v22, 0.0 }
 0x6f3   : > { %v5850_v48 = vmul.f32 %v12264_v39, %v12264_v39  ;;  %v12269_v7 = vsel %vm5709_vm11, %v8095_v14, %v5741_v41  ;;  %v5742_v44 = vmul.f32 0.01, %v8096_v22  ;;  %v5821_v52 = vadd.f32 %v5820_v34, %v12264_v39 }
 0x6f4   : > { %v5650_v49 = vpop.f32.mrb[108].mxu0  ;;  %v5876_v20 = vadd.f32 %v5875_v60, %v5849_v54  ;;  %v5801_v50 = vadd.f32 %v5800_v40, %v12269_v7  ;;  %v5851_v38 = vmul.f32 %v12269_v7, %v12269_v7 }
 0x6f5   : > { %v12272_v4 = vsel %vm5710_vm12, %v8096_v22, %v5742_v44  ;;  %v8097_v10 = vadd.f32 %v5650_v49, %v12203_v55  ;;  %v5652_v9 = vpop.f32.mrb[109].mxu0  ;;  %v5897_v26 = vadd.f32 %v5896_v16, %v5850_v48 }
 0x6f6   : > { %v8098_v15 = vadd.f32 %v5652_v9, %v12206_v53  ;;  %v5654_v28 = vpop.f32.mrb[110].mxu0  ;;  %v5852_v17 = vmul.f32 %v12272_v4, %v12272_v4  ;;  %v5877_v24 = vadd.f32 %v5876_v20, %v5851_v38  ;;  %v5822_v36 = vadd.f32 %v5821_v52, %v12272_v4 }
 0x6f7   : > { %vm5711_vm13 = vcmp.gt.f32.partialorder %v8097_v10, 0.0  ;;  %v5743_v11 = vmul.f32 0.01, %v8097_v10  ;;  %v8099_v51 = vadd.f32 %v5654_v28, %v12203_v55  ;;  %v5656_v57 = vpop.f32.mrb[111].mxu0 }
 0x6f8   : > { %vm5712_vm14 = vcmp.gt.f32.partialorder %v8098_v15, 0.0  ;;  %v5744_v42 = vmul.f32 0.01, %v8098_v15  ;;  %v8100_v32 = vadd.f32 %v5656_v57, %v12206_v53  ;;  %v5898_v47 = vadd.f32 %v5897_v26, %v5852_v17 }
 0x6f9   : > { %v12283_v58 = vsel %vm5711_vm13, %v8097_v10, %v5743_v11  ;;  %vm5713_vm15 = vcmp.gt.f32.partialorder %v8099_v51, 0.0  ;;  %v5745_v13 = vmul.f32 0.01, %v8099_v51 }
 0x6fa   : > { %v5802_v3 = vadd.f32 %v5801_v50, %v12283_v58  ;;  %v5853_v21 = vmul.f32 %v12283_v58, %v12283_v58  ;;  %v12288_v63 = vsel %vm5712_vm14, %v8098_v15, %v5744_v42  ;;  %vm5714_vm0 = vcmp.gt.f32.partialorder %v8100_v32, 0.0 }
 0x6fb   : > { %v5854_v2 = vmul.f32 %v12288_v63, %v12288_v63  ;;  %v12292_v35 = vsel %vm5713_vm15, %v8099_v51, %v5745_v13  ;;  %v5746_v56 = vmul.f32 0.01, %v8100_v32  ;;  %v5823_v14 = vadd.f32 %v5822_v36, %v12288_v63 }
 0x6fc   : > { %v5660_v30 = vpop.f32.mrb[112].mxu0  ;;  %v5878_v33 = vadd.f32 %v5877_v24, %v5853_v21  ;;  %v5855_v8 = vmul.f32 %v12292_v35, %v12292_v35  ;;  %v5803_v45 = vadd.f32 %v5802_v3, %v12292_v35 }
 0x6fd   : > { %v12297_v25 = vsel %vm5714_vm0, %v8100_v32, %v5746_v56  ;;  %v8101_v62 = vadd.f32 %v5660_v30, %v12203_v55  ;;  %v5662_v59 = vpop.f32.mrb[113].mxu0  ;;  %v5899_v22 = vadd.f32 %v5898_v47, %v5854_v2 }
 0x6fe   : > { %v8102_v6 = vadd.f32 %v5662_v59, %v12206_v53  ;;  %v5664_v31 = vpop.f32.mrb[114].mxu0  ;;  %v5856_v40 = vmul.f32 %v12297_v25, %v12297_v25  ;;  %v5879_v48 = vadd.f32 %v5878_v33, %v5855_v8  ;;  %v5824_v10 = vadd.f32 %v5823_v14, %v12297_v25 }
 0x6ff   : > { %vm5715_vm1 = vcmp.gt.f32.partialorder %v8101_v62, 0.0  ;;  %v5747_v5 = vmul.f32 0.01, %v8101_v62  ;;  %v8103_v1 = vadd.f32 %v5664_v31, %v12203_v55  ;;  %v5666_v41 = vpop.f32.mrb[115].mxu0 }
 0x700   : > { %vm5716_vm2 = vcmp.gt.f32.partialorder %v8102_v6, 0.0  ;;  %v5748_v54 = vmul.f32 0.01, %v8102_v6  ;;  %v8104_v34 = vadd.f32 %v5666_v41, %v12206_v53  ;;  %v5900_v38 = vadd.f32 %v5899_v22, %v5856_v40 }
 0x701   : > { %v12307_v44 = vsel %vm5715_vm1, %v8101_v62, %v5747_v5  ;;  %vm5717_vm3 = vcmp.gt.f32.partialorder %v8103_v1, 0.0  ;;  %v5749_v60 = vmul.f32 0.01, %v8103_v1 }
 0x702   : > { %v5804_v49 = vadd.f32 %v5803_v45, %v12307_v44  ;;  %v5857_v16 = vmul.f32 %v12307_v44, %v12307_v44  ;;  %v12312_v52 = vsel %vm5716_vm2, %v8102_v6, %v5748_v54  ;;  %vm5718_vm4 = vcmp.gt.f32.partialorder %v8104_v34, 0.0 }
 0x703   : > { %v5858_v9 = vmul.f32 %v12312_v52, %v12312_v52  ;;  %v12317_v20 = vsel %vm5717_vm3, %v8103_v1, %v5749_v60  ;;  %v5750_v50 = vmul.f32 0.01, %v8104_v34  ;;  %v5825_v11 = vadd.f32 %v5824_v10, %v12312_v52 }
 0x704   : > { %v5880_v15 = vadd.f32 %v5879_v48, %v5857_v16  ;;  %v5859_v28 = vmul.f32 %v12317_v20, %v12317_v20  ;;  %v5670_v26 = vpop.f32.mrb[116].mxu0  ;;  %v5805_v32 = vadd.f32 %v5804_v49, %v12317_v20 }
 0x705   : > { %v12322_v51 = vsel %vm5718_vm4, %v8104_v34, %v5750_v50  ;;  %v8105_v57 = vadd.f32 %v5670_v26, %v12203_v55  ;;  %v5672_v17 = vpop.f32.mrb[117].mxu0  ;;  %v5901_v42 = vadd.f32 %v5900_v38, %v5858_v9 }
 0x706   : > { %v8106_v13 = vadd.f32 %v5672_v17, %v12206_v53  ;;  %v5674_v3 = vpop.f32.mrb[118].mxu0  ;;  %v5860_v21 = vmul.f32 %v12322_v51, %v12322_v51  ;;  %v5881_v36 = vadd.f32 %v5880_v15, %v5859_v28  ;;  %v5826_v33 = vadd.f32 %v5825_v11, %v12322_v51 }
 0x707   : > { %vm5719_vm5 = vcmp.gt.f32.partialorder %v8105_v57, 0.0  ;;  %v5751_v24 = vmul.f32 0.01, %v8105_v57  ;;  %v8107_v2 = vadd.f32 %v5674_v3, %v12203_v55  ;;  %v5676_v56 = vpop.f32.mrb[119].mxu0 }
 0x708   : > { %vm5720_vm6 = vcmp.gt.f32.partialorder %v8106_v13, 0.0  ;;  %v5752_v47 = vmul.f32 0.01, %v8106_v13  ;;  %v8108_v30 = vadd.f32 %v5676_v56, %v12206_v53  ;;  %v5902_v6 = vadd.f32 %v5901_v42, %v5860_v21 }
 0x709   : > { %v12332_v8 = vsel %vm5719_vm5, %v8105_v57, %v5751_v24  ;;  %vm5721_vm7 = vcmp.gt.f32.partialorder %v8107_v2, 0.0  ;;  %v5753_v62 = vmul.f32 0.01, %v8107_v2 }
 0x70a   : > { %v5806_v59 = vadd.f32 %v5805_v32, %v12332_v8  ;;  %v5861_v14 = vmul.f32 %v12332_v8, %v12332_v8  ;;  %v12337_v45 = vsel %vm5720_vm6, %v8106_v13, %v5752_v47  ;;  %vm5722_vm8 = vcmp.gt.f32.partialorder %v8108_v30, 0.0 }
 0x70b   : > { %v5862_v31 = vmul.f32 %v12337_v45, %v12337_v45  ;;  %v12341_v22 = vsel %vm5721_vm7, %v8107_v2, %v5753_v62  ;;  %v5754_v5 = vmul.f32 0.01, %v8108_v30  ;;  %v5827_v41 = vadd.f32 %v5826_v33, %v12337_v45 }
 0x70c   : > { %v5882_v1 = vadd.f32 %v5881_v36, %v5861_v14  ;;  %v5863_v40 = vmul.f32 %v12341_v22, %v12341_v22  ;;  %v5680_v54 = vpop.f32.mrb[120].mxu0  ;;  %v5807_v16 = vadd.f32 %v5806_v59, %v12341_v22 }
 0x70d   : > { %v5903_v34 = vadd.f32 %v5902_v6, %v5862_v31  ;;  %v12346_v48 = vsel %vm5722_vm8, %v8108_v30, %v5754_v5  ;;  %v8109_v60 = vadd.f32 %v5680_v54, %v12203_v55  ;;  %v5682_v49 = vpop.f32.mrb[121].mxu0 }
 0x70e   : > { %v5864_v10 = vmul.f32 %v12346_v48, %v12346_v48  ;;  %v8110_v9 = vadd.f32 %v5682_v49, %v12206_v53  ;;  %v5684_v50 = vpop.f32.mrb[122].mxu0  ;;  %v5883_v38 = vadd.f32 %v5882_v1, %v5863_v40  ;;  %v5828_v11 = vadd.f32 %v5827_v41, %v12346_v48 }
 0x70f   : > { %vm5723_vm9 = vcmp.gt.f32.partialorder %v8109_v60, 0.0  ;;  %v5755_v15 = vmul.f32 0.01, %v8109_v60  ;;  %v8111_v28 = vadd.f32 %v5684_v50, %v12203_v55  ;;  %v5686_v26 = vpop.f32.mrb[123].mxu0 }
 0x710   : > { %vm5724_vm10 = vcmp.gt.f32.partialorder %v8110_v9, 0.0  ;;  %v5756_v57 = vmul.f32 0.01, %v8110_v9  ;;  %v8112_v17 = vadd.f32 %v5686_v26, %v12206_v53  ;;  %v5904_v42 = vadd.f32 %v5903_v34, %v5864_v10 }
 0x711   : > { %v12356_v32 = vsel %vm5723_vm9, %v8109_v60, %v5755_v15  ;;  %vm5725_vm11 = vcmp.gt.f32.partialorder %v8111_v28, 0.0  ;;  %v5757_v13 = vmul.f32 0.01, %v8111_v28 }
 0x712   : > { %v5808_v3 = vadd.f32 %v5807_v16, %v12356_v32  ;;  %v5865_v21 = vmul.f32 %v12356_v32, %v12356_v32  ;;  %v12361_v24 = vsel %vm5724_vm10, %v8110_v9, %v5756_v57  ;;  %vm5726_vm12 = vcmp.gt.f32.partialorder %v8112_v17, 0.0 }
 0x713   : > { %v5829_v2 = vadd.f32 %v5828_v11, %v12361_v24  ;;  %v5866_v56 = vmul.f32 %v12361_v24, %v12361_v24  ;;  %v12366_v36 = vsel %vm5725_vm11, %v8111_v28, %v5757_v13  ;;  %v5758_v47 = vmul.f32 0.01, %v8112_v17 }
 0x714   : > { %v5884_v30 = vadd.f32 %v5883_v38, %v5865_v21  ;;  %v5690_v33 = vpop.f32.mrb[124].mxu0  ;;  %v5867_v59 = vmul.f32 %v12366_v36, %v12366_v36  ;;  %v5809_v54 = vadd.f32 %v5808_v3, %v12366_v36 }
 0x715   : > { %v5905_v62 = vadd.f32 %v5904_v42, %v5866_v56  ;;  %v12370_v14 = vsel %vm5726_vm12, %v8112_v17, %v5758_v47  ;;  %v8113_v6 = vadd.f32 %v5690_v33, %v12203_v55  ;;  %v5692_v31 = vpop.f32.mrb[125].mxu0 }
 0x716   : > { %v5830_v5 = vadd.f32 %v5829_v2, %v12370_v14  ;;  %v5868_v1 = vmul.f32 %v12370_v14, %v12370_v14  ;;  %v8114_v41 = vadd.f32 %v5692_v31, %v12206_v53  ;;  %v5694_v40 = vpop.f32.mrb[126].mxu0  ;;  %v5885_v50 = vadd.f32 %v5884_v30, %v5867_v59 }
 0x717   : > { %vm5727_vm13 = vcmp.gt.f32.partialorder %v8113_v6, 0.0  ;;  %v5759_v34 = vmul.f32 0.01, %v8113_v6  ;;  %v8115_v60 = vadd.f32 %v5694_v40, %v12203_v55  ;;  %v5696_v49 = vpop.f32.mrb[127].mxu0 }
 0x718   : > { %v5906_v16 = vadd.f32 %v5905_v62, %v5868_v1  ;;  %vm5728_vm14 = vcmp.gt.f32.partialorder %v8114_v41, 0.0  ;;  %v5760_v10 = vmul.f32 0.01, %v8114_v41  ;;  %v8116_v9 = vadd.f32 %v5696_v49, %v12206_v53 }
 0x719   : > { %v12380_v38 = vsel %vm5727_vm13, %v8113_v6, %v5759_v34  ;;  %vm5729_vm15 = vcmp.gt.f32.partialorder %v8115_v60, 0.0  ;;  %v5761_v15 = vmul.f32 0.01, %v8115_v60 }
 0x71a   : > { %v5810_v28 = vadd.f32 %v5809_v54, %v12380_v38  ;;  %v5869_v26 = vmul.f32 %v12380_v38, %v12380_v38  ;;  %v12385_v11 = vsel %vm5728_vm14, %v8114_v41, %v5760_v10  ;;  %vm5730_vm0 = vcmp.gt.f32.partialorder %v8116_v9, 0.0 }
 0x71b   : > { %v5831_v55 = vadd.f32 %v5830_v5, %v12385_v11  ;;  %v5870_v57 = vmul.f32 %v12385_v11, %v12385_v11  ;;  %v12390_v17 = vsel %vm5729_vm15, %v8115_v60, %v5761_v15  ;;  %v5762_v53 = vmul.f32 0.01, %v8116_v9 }
 0x71c   : > { %v5886_v42 = vadd.f32 %v5885_v50, %v5869_v26  ;;  %v5811_v13 = vadd.f32 %v5810_v28, %v12390_v17  ;;  %v5871_v3 = vmul.f32 %v12390_v17, %v12390_v17 }
 0x71d   : > { %v5907_v21 = vadd.f32 %v5906_v16, %v5870_v57  ;;  %v5794_v2 = vsel %vm5730_vm0, %v8116_v9, %v5762_v53 }
 0x71e   : > { %v5812_v56 = vrot.slane %v5811_v13, 4  ;;  %v5887_v47 = vadd.f32 %v5886_v42, %v5871_v3  ;;  %v5832_v30 = vadd.f32 %v5831_v55, %v5794_v2  ;;  %v5872_v33 = vmul.f32 %v5794_v2, %v5794_v2 }
 0x720   : > { %v5813_v62 = vadd.f32 %v5812_v56, %v5811_v13  ;;  %v5888_v59 = vrot.slane %v5887_v47, 4  ;;  %v5833_v6 = vrot.slane %v5832_v30, 4  ;;  %v5908_v31 = vadd.f32 %v5907_v21, %v5872_v33 }
 0x722   : > { %v5814_v5 = vrot.slane %v5813_v62, 2  ;;  %v5889_v1 = vadd.f32 %v5888_v59, %v5887_v47  ;;  %v5834_v41 = vadd.f32 %v5833_v6, %v5832_v30  ;;  %v5909_v40 = vrot.slane %v5908_v31, 4 }
 0x724   : > { %v5815_v54 = vadd.f32 %v5814_v5, %v5813_v62  ;;  %v5890_v34 = vrot.slane %v5889_v1, 2  ;;  %v5835_v60 = vrot.slane %v5834_v41, 2  ;;  %v5910_v49 = vadd.f32 %v5909_v40, %v5908_v31 }
 0x726   : > { %v5816_v10 = vrot.slane %v5815_v54, 1  ;;  %v5891_v50 = vadd.f32 %v5890_v34, %v5889_v1  ;;  %v5836_v16 = vadd.f32 %v5835_v60, %v5834_v41  ;;  %v5911_v9 = vrot.slane %v5910_v49, 2  ;;  %v13275_v34 = vld [vmem:[#allocation63_spill] sm:$0xff] }
 0x728   : > { %v5817_v15 = vadd.f32 %v5816_v10, %v5815_v54  ;;  %v5892_v28 = vrot.slane %v5891_v50, 1  ;;  %v5837_v26 = vrot.slane %v5836_v16, 1  ;;  %v5912_v55 = vadd.f32 %v5911_v9, %v5910_v49  ;;  %v5795_v49 = vld [vmem:[#allocation2 + $0x23] sm:$0x3] }
 0x72a   : > { %v5839_v57 = vmul.f32 0.0078125, %v5817_v15  ;;  %v5893_v53 = vadd.f32 %v5892_v28, %v5891_v50  ;;  %v5838_v42 = vadd.f32 %v5837_v26, %v5836_v16  ;;  %v5913_v13 = vrot.slane %v5912_v55, 1 }
 0x72c   : > { %v5915_v3 = vmul.f32 0.0078125, %v5893_v53  ;;  %v5917_v21 = vmul.f32 %v5839_v57, %v5839_v57  ;;  %v5840_v56 = vmul.f32 0.0078125, %v5838_v42  ;;  %v5914_v47 = vadd.f32 %v5913_v13, %v5912_v55 }
 0x72e   : > { %v5919_v30 = vsub.f32 %v5915_v3, %v5917_v21  ;;  %v5916_v33 = vmul.f32 0.0078125, %v5914_v47  ;;  %v5918_v62 = vmul.f32 %v5840_v56, %v5840_v56 }
 0x730   : > { %v5921_v59 = vmax.f32 %v5919_v30, 0.0  ;;  %v5920_v6 = vsub.f32 %v5916_v33, %v5918_v62 }
 0x732   : > { %v5923_v31 = vadd.f32 1e-05, %v5921_v59  ;;  %v5922_v5 = vmax.f32 %v5920_v6, 0.0 }
 0x734   : > { %8810 = vrsqrt.f32 %v5923_v31  ;;  %v5924_v1 = vadd.f32 1e-05, %v5922_v5 }
 0x736   : > { %8812 = vrsqrt.f32 %v5924_v1 }
 0x73e   : > { %v8811_v41 = vpop.eup %8810 }
 0x740   : > { %v8813_v40 = vpop.eup %8812 }
 0x741   : > { %v5929_v54 = vcombine.low %v8811_v41, %v8813_v40 }
 0x743   : > { %v5936_v60 = vrot.slane %v5929_v54, %v13275_v34 }
 0x745   : > { %v5943_v10 = vrot.slane %v5936_v60, %v13275_v34 }
 0x747   : > { %v5945_v50 = vmul.f32 %v5943_v10, %v5795_v49 }
 0x749   : > { %v5950_v16 = vrot.slane %v5945_v50, %v13273_v23  ;;  %v5954_v9 = vrot.slane %v5945_v50, %v13274_v46 }
 0x74b   : > { %v5957_v15 = vmul.f32 %v5950_v16, %v5839_v57  ;;  %v5958_v28 = vmul.f32 %v5954_v9, %v5840_v56  ;;  %v12399_v26 = vmul.f32 %v5954_v9, %v5794_v2  ;;  %v5979_v53 = vmul.f32 %v5954_v9, %v12219_v61  ;;  %v5796_v56 = vld [vmem:[#allocation2 + $0x25] sm:$0x3] }
 0x74c   : > { %v5981_v42 = vmul.f32 %v5954_v9, %v12221_v37  ;;  %v5978_v13 = vmul.f32 %v5950_v16, %v12212_v27  ;;  %v5980_v3 = vmul.f32 %v5950_v16, %v12214_v29  ;;  %v5983_v47 = vmul.f32 %v5954_v9, %v12239_v18 }
 0x74d   : > { %v5961_v55 = vcombine.low %v5957_v15, %v5958_v28  ;;  %v5985_v30 = vmul.f32 %v5954_v9, %v12250_v12  ;;  %v5982_v57 = vmul.f32 %v5950_v16, %v12232_v43  ;;  %v5984_v2 = vmul.f32 %v5950_v16, %v12243_v19 }
 0x74e   : > { %v5987_v33 = vmul.f32 %v5954_v9, %v12264_v39  ;;  %v5989_v61 = vmul.f32 %v5954_v9, %v12272_v4  ;;  %v5986_v37 = vmul.f32 %v5950_v16, %v12259_v0  ;;  %v5988_v29 = vmul.f32 %v5950_v16, %v12269_v7 }
 0x74f   : > { %v5968_v21 = vrot.slane %v5961_v55, %v13275_v34  ;;  %v5991_v62 = vmul.f32 %v5954_v9, %v12288_v63  ;;  %v5993_v18 = vmul.f32 %v5954_v9, %v12297_v25  ;;  %v5990_v12 = vmul.f32 %v5950_v16, %v12283_v58 }
 0x750   : > { %v5992_v43 = vmul.f32 %v5950_v16, %v12292_v35  ;;  %v6003_v19 = vmul.f32 %v5954_v9, %v12361_v24  ;;  %v6005_v39 = vmul.f32 %v5954_v9, %v12370_v14  ;;  %v5995_v4 = vmul.f32 %v5954_v9, %v12312_v52 }
 0x751   : > { %v5975_v27 = vrot.slane %v5968_v21, %v13275_v34  ;;  %v6004_v0 = vmul.f32 %v5950_v16, %v12366_v36  ;;  %v6007_v6 = vmul.f32 %v5954_v9, %v12385_v11  ;;  %v5997_v7 = vmul.f32 %v5954_v9, %v12322_v51 }
 0x752   : > { %v5994_v63 = vmul.f32 %v5950_v16, %v12307_v44  ;;  %v6006_v25 = vmul.f32 %v5950_v16, %v12380_v38  ;;  %v6008_v58 = vmul.f32 %v5950_v16, %v12390_v17  ;;  %v5996_v14 = vmul.f32 %v5950_v16, %v12317_v20 }
 0x753   : > { %v5977_v59 = vsub.f32 %v5796_v56, %v5975_v27  ;;  %v5999_v52 = vmul.f32 %v5954_v9, %v12337_v45  ;;  %v6001_v36 = vmul.f32 %v5954_v9, %v12346_v48  ;;  %v5998_v11 = vmul.f32 %v5950_v16, %v12332_v8 }
 0x754   : > { %v6000_v51 = vmul.f32 %v5950_v16, %v12341_v22  ;;  %v6002_v44 = vmul.f32 %v5950_v16, %v12356_v32 }
 0x755   : > { %v6014_v35 = vrot.slane %v5977_v59, %v13273_v23  ;;  %v6018_v24 = vrot.slane %v5977_v59, %v13274_v46 }
 0x757   : > { %v6022_v31 = vadd.f32 %v6018_v24, %v5979_v53  ;;  %v6024_v38 = vadd.f32 %v6018_v24, %v5981_v42  ;;  %v6021_v5 = vadd.f32 %v6014_v35, %v5978_v13  ;;  %v6023_v17 = vadd.f32 %v6014_v35, %v5980_v3 }
 0x758   : > { %v6026_v1 = vadd.f32 %v6018_v24, %v5983_v47  ;;  %v6028_v41 = vadd.f32 %v6018_v24, %v5985_v30  ;;  %v6025_v40 = vadd.f32 %v6014_v35, %v5982_v57  ;;  %v6027_v46 = vadd.f32 %v6014_v35, %v5984_v2 }
 0x759   : > { %v6055_v54 = vpack.c.bf16 %v6024_v38, %v6022_v31  ;;  %v6054_v20 = vpack.c.bf16 %v6023_v17, %v6021_v5  ;;  %v6030_v34 = vadd.f32 %v6018_v24, %v5987_v33  ;;  %v6032_v45 = vadd.f32 %v6018_v24, %v5989_v61 }
 0x75a   : > { %v6057_v60 = vpack.c.bf16 %v6028_v41, %v6026_v1  ;;  %v6056_v48 = vpack.c.bf16 %v6027_v46, %v6025_v40  ;;  %v6029_v49 = vadd.f32 %v6014_v35, %v5986_v37  ;;  %v6031_v8 = vadd.f32 %v6014_v35, %v5988_v29 }
 0x75b   : > { %6236 = vmatprep.mubr.bf16.mxu1 %v6055_v54  ;;  %v6059_v22 = vpack.c.bf16 %v6032_v45, %v6030_v34  ;;  %v6034_v10 = vadd.f32 %v6018_v24, %v5991_v62  ;;  %v6036_v32 = vadd.f32 %v6018_v24, %v5993_v18  ;;  %v6033_v50 = vadd.f32 %v6014_v35, %v5990_v12 }
 0x75c   : > { %6237 = vmatmul.mubr.bf16.vlgmr.msra.gmra.mrb[128].mxu1 %v6054_v20  ;;  %v6058_v16 = vpack.c.bf16 %v6031_v8, %v6029_v49  ;;  %v6035_v9 = vadd.f32 %v6014_v35, %v5992_v43  ;;  %v6038_v15 = vadd.f32 %v6018_v24, %v5995_v4  ;;  %v6040_v28 = vadd.f32 %v6018_v24, %v5997_v7 }
 0x75d   : > { %6244 = vmatprep.mubr.bf16.mxu1 %v6057_v60  ;;  %v6061_v55 = vpack.c.bf16 %v6036_v32, %v6034_v10  ;;  %v6037_v53 = vadd.f32 %v6014_v35, %v5994_v63  ;;  %v6039_v42 = vadd.f32 %v6014_v35, %v5996_v14  ;;  %v6042_v13 = vadd.f32 %v6018_v24, %v5999_v52 }
 0x75e   : > { %v6060_v3 = vpack.c.bf16 %v6035_v9, %v6033_v50  ;;  %v6063_v21 = vpack.c.bf16 %v6040_v28, %v6038_v15  ;;  %v6044_v47 = vadd.f32 %v6018_v24, %v6001_v36  ;;  %v6041_v30 = vadd.f32 %v6014_v35, %v5998_v11 }
 0x75f   : > { %v6062_v57 = vpack.c.bf16 %v6039_v42, %v6037_v53  ;;  %v6043_v56 = vadd.f32 %v6014_v35, %v6000_v51  ;;  %v6046_v2 = vadd.f32 %v6018_v24, %v6003_v19  ;;  %v6048_v33 = vadd.f32 %v6018_v24, %v6005_v39  ;;  %v8772_v19 = vld [vmem:[#allocation10] sm:$0xff]   ;;  %v8774_v39 = vld [vmem:[#allocation10 + $0x10] sm:$0xff]  }
 0x760   : > { %v6065_v61 = vpack.c.bf16 %v6044_v47, %v6042_v13  ;;  %v6045_v37 = vadd.f32 %v6014_v35, %v6002_v44  ;;  %v6047_v27 = vadd.f32 %v6014_v35, %v6004_v0  ;;  %v6050_v29 = vadd.f32 %v6018_v24, %v6007_v6  ;;  %7925 = vmatprep.subr.bf16.mxu1 %v8772_v19  ;;  %v8775_v0 = vld [vmem:[#allocation10 + $0x18] sm:$0xff]   ;;  %v8776_v6 = vld [vmem:[#allocation10 + $0x20] sm:$0xff]  }
 0x761   : > { %v6064_v62 = vpack.c.bf16 %v6043_v56, %v6041_v30  ;;  %v6067_v18 = vpack.c.bf16 %v6048_v33, %v6046_v2  ;;  %v6052_v12 = vadd.f32 %v6018_v24, %v12399_v26  ;;  %v6049_v43 = vadd.f32 %v6014_v35, %v6006_v25  ;;  %7926 = vmatpush3.bf16.msra.mxu1 %v8772_v19  ;;  %v8773_v26 = vld [vmem:[#allocation10 + $0x8] sm:$0xff]   ;;  %v12437_v44 = vld [vmem:[#allocation2 + $0x27] ss:$0 sm:$0xff] }
 0x762   : > { %v6066_v59 = vpack.c.bf16 %v6047_v27, %v6045_v37  ;;  %v6051_v4 = vadd.f32 %v6014_v35, %v6008_v58  ;;  %7927 = vmatprep.subr.bf16.mxu1 %v8773_v26  ;;  %v8777_v25 = vld [vmem:[#allocation10 + $0x28] sm:$0xff]   ;;  %v8778_v58 = vld [vmem:[#allocation10 + $0x30] sm:$0xff]   ;;  %v8779_v35 = vld [vmem:[#allocation10 + $0x38] sm:$0xff]  }
 0x763   : > { %v6069_v7 = vpack.c.bf16 %v6052_v12, %v6050_v29 }
 0x764   : > { %6245 = vmatmul.mubr.bf16.gmra.mrb[132].mxu1 %v6056_v48  ;;  %v6068_v63 = vpack.c.bf16 %v6051_v4, %v6049_v43 }
 0x765   : > { %6252 = vmatprep.mubr.bf16.mxu1 %v6059_v22  ;;  %7928 = vmatpush3.bf16.msra.mxu1 %v8773_v26 }
 0x766   : > { %7929 = vmatprep.subr.bf16.mxu1 %v8774_v39 }
 0x769   : > { %7930 = vmatpush3.bf16.msra.mxu1 %v8774_v39 }
 0x76a   : > { %7931 = vmatprep.subr.bf16.mxu1 %v8775_v0 }
 0x76c   : > { %6253 = vmatmul.mubr.bf16.gmra.mrb[136].mxu1 %v6058_v16 }
 0x76d   : > { %6260 = vmatprep.mubr.bf16.mxu1 %v6061_v55  ;;  %7932 = vmatpush3.bf16.msra.mxu1 %v8775_v0 }
 0x76e   : > { %7933 = vmatprep.subr.bf16.mxu1 %v8776_v6 }
 0x771   : > { %7934 = vmatpush3.bf16.msra.mxu1 %v8776_v6 }
 0x772   : > { %7935 = vmatprep.subr.bf16.mxu1 %v8777_v25 }
 0x774   : > { %6261 = vmatmul.mubr.bf16.gmra.mrb[140].mxu1 %v6060_v3 }
 0x775   : > { %6268 = vmatprep.mubr.bf16.mxu1 %v6063_v21  ;;  %7936 = vmatpush3.bf16.msra.mxu1 %v8777_v25 }
 0x776   : > { %7937 = vmatprep.subr.bf16.mxu1 %v8778_v58 }
 0x779   : > { %7938 = vmatpush3.bf16.msra.mxu1 %v8778_v58 }
 0x77a   : > { %7939 = vmatprep.subr.bf16.mxu1 %v8779_v35 }
 0x77c   : > { %6269 = vmatmul.mubr.bf16.gmra.mrb[144].mxu1 %v6062_v57 }
 0x77d   : > { %6276 = vmatprep.mubr.bf16.mxu1 %v6065_v61  ;;  %7940 = vmatpush3.bf16.msra.mxu1 %v8779_v35 }
 0x784   : > { %6277 = vmatmul.mubr.bf16.gmra.mrb[148].mxu1 %v6064_v62 }
 0x785   : > { %6284 = vmatprep.mubr.bf16.mxu1 %v6067_v18 }
 0x78c   : > { %6285 = vmatmul.mubr.bf16.gmra.mrb[152].mxu1 %v6066_v59 }
 0x78d   : > { %6292 = vmatprep.mubr.bf16.mxu1 %v6069_v7 }
 0x794   : > { %6293 = vmatmul.mubr.bf16.gmra.mrb[156].mxu1 %v6068_v63 }
 0x82f   : > { %v7845_v24 = vpop.f32.mrb[128].mxu1 }
 0x830   : > { %v7846_v14 = vpop.f32.mrb[129].mxu1 }
 0x831   : > { %v7847_v52 = vadd.f32 %v7846_v14, %v7845_v24  ;;  %v7848_v36 = vpop.f32.mrb[130].mxu1 }
 0x832   : > { %v7849_v11 = vpop.f32.mrb[131].mxu1 }
 0x833   : > { %v7850_v51 = vadd.f32 %v7849_v11, %v7848_v36  ;;  %v6239_v17 = vadd.f32 %v7847_v52, %v12437_v44 }
 0x835   : > { %v6242_v31 = vadd.f32 %v7850_v51, %v12437_v44  ;;  %v6317_v34 = vmul.f32 0.01, %v6239_v17  ;;  %vm6301_vm2 = vcmp.gt.f32.partialorder %v6239_v17, 0.0 }
 0x837   : > { %v7851_v38 = vpop.f32.mrb[132].mxu1  ;;  %v6318_v46 = vmul.f32 0.01, %v6242_v31  ;;  %vm6302_vm1 = vcmp.gt.f32.partialorder %v6242_v31, 0.0  ;;  %v12445_v22 = vsel %vm6301_vm2, %v6239_v17, %v6317_v34 }
 0x838   : > { %v7852_v5 = vpop.f32.mrb[133].mxu1  ;;  %v6373_v53 = vmul.f32 %v12445_v22, %v12445_v22 }
 0x839   : > { %v7853_v1 = vadd.f32 %v7852_v5, %v7851_v38  ;;  %v7854_v41 = vpop.f32.mrb[134].mxu1  ;;  %v12443_v48 = vsel %vm6302_vm1, %v6242_v31, %v6318_v46 }
 0x83a   : > { %v7855_v40 = vpop.f32.mrb[135].mxu1  ;;  %v6374_v9 = vmul.f32 %v12443_v48, %v12443_v48  ;;  %v6351_v42 = vadd.f32 %v12443_v48, %v12445_v22 }
 0x83b   : > { %v6247_v54 = vadd.f32 %v7853_v1, %v12437_v44  ;;  %v7856_v20 = vadd.f32 %v7855_v40, %v7854_v41 }
 0x83c   : > { %v6389_v30 = vadd.f32 %v6374_v9, %v6373_v53 }
 0x83d   : > { %v6319_v45 = vmul.f32 0.01, %v6247_v54  ;;  %v6250_v60 = vadd.f32 %v7856_v20, %v12437_v44  ;;  %vm6303_vm3 = vcmp.gt.f32.partialorder %v6247_v54, 0.0 }
 0x83f   : > { %v7857_v49 = vpop.f32.mrb[136].mxu1  ;;  %v12447_v10 = vsel %vm6303_vm3, %v6247_v54, %v6319_v45  ;;  %v6320_v32 = vmul.f32 0.01, %v6250_v60  ;;  %vm6304_vm4 = vcmp.gt.f32.partialorder %v6250_v60, 0.0 }
 0x840   : > { %v7858_v8 = vpop.f32.mrb[137].mxu1  ;;  %v6375_v13 = vmul.f32 %v12447_v10, %v12447_v10  ;;  %v6352_v57 = vadd.f32 %v6351_v42, %v12447_v10 }
 0x841   : > { %v7859_v50 = vadd.f32 %v7858_v8, %v7857_v49  ;;  %v7860_v16 = vpop.f32.mrb[138].mxu1  ;;  %v12458_v3 = vsel %vm6304_vm4, %v6250_v60, %v6320_v32 }
 0x842   : > { %v7861_v15 = vpop.f32.mrb[139].mxu1  ;;  %v6390_v61 = vadd.f32 %v6389_v30, %v6375_v13  ;;  %v6376_v37 = vmul.f32 %v12458_v3, %v12458_v3  ;;  %v6353_v18 = vadd.f32 %v6352_v57, %v12458_v3 }
 0x843   : > { %v6255_v28 = vadd.f32 %v7859_v50, %v12437_v44  ;;  %v7862_v55 = vadd.f32 %v7861_v15, %v7860_v16 }
 0x844   : > { %v6391_v63 = vadd.f32 %v6390_v61, %v6376_v37 }
 0x845   : > { %vm6305_vm5 = vcmp.gt.f32.partialorder %v6255_v28, 0.0  ;;  %v6321_v21 = vmul.f32 0.01, %v6255_v28  ;;  %v6258_v47 = vadd.f32 %v7862_v55, %v12437_v44 }
 0x847   : > { %v12462_v56 = vsel %vm6305_vm5, %v6255_v28, %v6321_v21  ;;  %v6322_v2 = vmul.f32 0.01, %v6258_v47  ;;  %v7863_v33 = vpop.f32.mrb[140].mxu1  ;;  %vm6306_vm6 = vcmp.gt.f32.partialorder %v6258_v47, 0.0 }
 0x848   : > { %v7864_v27 = vpop.f32.mrb[141].mxu1  ;;  %v6377_v12 = vmul.f32 %v12462_v56, %v12462_v56  ;;  %v6354_v19 = vadd.f32 %v6353_v18, %v12462_v56 }
 0x849   : > { %v7865_v29 = vadd.f32 %v7864_v27, %v7863_v33  ;;  %v7866_v62 = vpop.f32.mrb[142].mxu1  ;;  %v12469_v59 = vsel %vm6306_vm6, %v6258_v47, %v6322_v2 }
 0x84a   : > { %v7867_v43 = vpop.f32.mrb[143].mxu1  ;;  %v6392_v0 = vadd.f32 %v6391_v63, %v6377_v12  ;;  %v6378_v6 = vmul.f32 %v12469_v59, %v12469_v59  ;;  %v6355_v24 = vadd.f32 %v6354_v19, %v12469_v59 }
 0x84b   : > { %v6263_v4 = vadd.f32 %v7865_v29, %v12437_v44  ;;  %v7868_v7 = vadd.f32 %v7867_v43, %v7866_v62 }
 0x84c   : > { %v6393_v31 = vadd.f32 %v6392_v0, %v6378_v6 }
 0x84d   : > { %vm6307_vm7 = vcmp.gt.f32.partialorder %v6263_v4, 0.0  ;;  %v6323_v26 = vmul.f32 0.01, %v6263_v4  ;;  %v6266_v39 = vadd.f32 %v7868_v7, %v12437_v44 }
 0x84f   : > { %v12476_v25 = vsel %vm6307_vm7, %v6263_v4, %v6323_v26  ;;  %vm6308_vm8 = vcmp.gt.f32.partialorder %v6266_v39, 0.0  ;;  %v6324_v58 = vmul.f32 0.01, %v6266_v39  ;;  %v7869_v35 = vpop.f32.mrb[144].mxu1 }
 0x850   : > { %v6379_v14 = vmul.f32 %v12476_v25, %v12476_v25  ;;  %v7870_v52 = vpop.f32.mrb[145].mxu1  ;;  %v6356_v38 = vadd.f32 %v6355_v24, %v12476_v25 }
 0x851   : > { %v12481_v36 = vsel %vm6308_vm8, %v6266_v39, %v6324_v58  ;;  %v7871_v11 = vadd.f32 %v7870_v52, %v7869_v35  ;;  %v7872_v51 = vpop.f32.mrb[146].mxu1 }
 0x852   : > { %v7873_v5 = vpop.f32.mrb[147].mxu1  ;;  %v6394_v41 = vadd.f32 %v6393_v31, %v6379_v14  ;;  %v6380_v40 = vmul.f32 %v12481_v36, %v12481_v36  ;;  %v6357_v20 = vadd.f32 %v6356_v38, %v12481_v36 }
 0x853   : > { %v6271_v17 = vadd.f32 %v7871_v11, %v12437_v44  ;;  %v7874_v1 = vadd.f32 %v7873_v5, %v7872_v51 }
 0x854   : > { %v6395_v49 = vadd.f32 %v6394_v41, %v6380_v40 }
 0x855   : > { %vm6309_vm9 = vcmp.gt.f32.partialorder %v6271_v17, 0.0  ;;  %v6325_v46 = vmul.f32 0.01, %v6271_v17  ;;  %v6274_v54 = vadd.f32 %v7874_v1, %v12437_v44 }
 0x857   : > { %v12489_v34 = vsel %vm6309_vm9, %v6271_v17, %v6325_v46  ;;  %vm6310_vm10 = vcmp.gt.f32.partialorder %v6274_v54, 0.0  ;;  %v6326_v45 = vmul.f32 0.01, %v6274_v54  ;;  %v7875_v60 = vpop.f32.mrb[148].mxu1 }
 0x858   : > { %v6358_v8 = vadd.f32 %v6357_v20, %v12489_v34  ;;  %v6381_v32 = vmul.f32 %v12489_v34, %v12489_v34  ;;  %v7876_v50 = vpop.f32.mrb[149].mxu1 }
 0x859   : > { %v12494_v16 = vsel %vm6310_vm10, %v6274_v54, %v6326_v45  ;;  %v7877_v9 = vadd.f32 %v7876_v50, %v7875_v60  ;;  %v7878_v15 = vpop.f32.mrb[150].mxu1 }
 0x85a   : > { %v6396_v28 = vadd.f32 %v6395_v49, %v6381_v32  ;;  %v6359_v55 = vadd.f32 %v6358_v8, %v12494_v16  ;;  %v6382_v53 = vmul.f32 %v12494_v16, %v12494_v16  ;;  %v7879_v42 = vpop.f32.mrb[151].mxu1 }
 0x85b   : > { %v6279_v13 = vadd.f32 %v7877_v9, %v12437_v44  ;;  %v7880_v21 = vadd.f32 %v7879_v42, %v7878_v15 }
 0x85c   : > { %v6397_v47 = vadd.f32 %v6396_v28, %v6382_v53 }
 0x85d   : > { %vm6311_vm11 = vcmp.gt.f32.partialorder %v6279_v13, 0.0  ;;  %v6327_v30 = vmul.f32 0.01, %v6279_v13  ;;  %v6282_v57 = vadd.f32 %v7880_v21, %v12437_v44 }
 0x85f   : > { %v12501_v2 = vsel %vm6311_vm11, %v6279_v13, %v6327_v30  ;;  %vm6312_vm12 = vcmp.gt.f32.partialorder %v6282_v57, 0.0  ;;  %v6328_v33 = vmul.f32 0.01, %v6282_v57  ;;  %v7881_v61 = vpop.f32.mrb[152].mxu1 }
 0x860   : > { %v6360_v37 = vadd.f32 %v6359_v55, %v12501_v2  ;;  %v6383_v27 = vmul.f32 %v12501_v2, %v12501_v2  ;;  %v7882_v29 = vpop.f32.mrb[153].mxu1 }
 0x861   : > { %v12506_v62 = vsel %vm6312_vm12, %v6282_v57, %v6328_v33  ;;  %v7883_v18 = vadd.f32 %v7882_v29, %v7881_v61  ;;  %v7884_v12 = vpop.f32.mrb[154].mxu1 }
 0x862   : > { %v6398_v43 = vadd.f32 %v6397_v47, %v6383_v27  ;;  %v6361_v4 = vadd.f32 %v6360_v37, %v12506_v62  ;;  %v6384_v7 = vmul.f32 %v12506_v62, %v12506_v62  ;;  %v7885_v63 = vpop.f32.mrb[155].mxu1 }
 0x863   : > { %v6287_v19 = vadd.f32 %v7883_v18, %v12437_v44  ;;  %v7886_v26 = vadd.f32 %v7885_v63, %v7884_v12  ;;  %v6349_v63 = vld [vmem:[#allocation2 + $0x28] sm:$0x1] }
 0x864   : > { %v6399_v39 = vadd.f32 %v6398_v43, %v6384_v7 }
 0x865   : > { %vm6313_vm13 = vcmp.gt.f32.partialorder %v6287_v19, 0.0  ;;  %v6329_v0 = vmul.f32 0.01, %v6287_v19  ;;  %v6290_v6 = vadd.f32 %v7886_v26, %v12437_v44 }
 0x867   : > { %v12513_v58 = vsel %vm6313_vm13, %v6287_v19, %v6329_v0  ;;  %vm6314_vm14 = vcmp.gt.f32.partialorder %v6290_v6, 0.0  ;;  %v6330_v35 = vmul.f32 0.01, %v6290_v6  ;;  %v7887_v24 = vpop.f32.mrb[156].mxu1 }
 0x868   : > { %v6362_v14 = vadd.f32 %v6361_v4, %v12513_v58  ;;  %v6385_v52 = vmul.f32 %v12513_v58, %v12513_v58  ;;  %v7888_v11 = vpop.f32.mrb[157].mxu1 }
 0x869   : > { %v12518_v51 = vsel %vm6314_vm14, %v6290_v6, %v6330_v35  ;;  %v7889_v31 = vadd.f32 %v7888_v11, %v7887_v24  ;;  %v7890_v38 = vpop.f32.mrb[158].mxu1 }
 0x86a   : > { %v6400_v5 = vadd.f32 %v6399_v39, %v6385_v52  ;;  %v6363_v17 = vadd.f32 %v6362_v14, %v12518_v51  ;;  %v6386_v1 = vmul.f32 %v12518_v51, %v12518_v51  ;;  %v7891_v41 = vpop.f32.mrb[159].mxu1  ;;  %v6350_v39 = vld [vmem:[#allocation2 + $0x29] sm:$0x1] }
 0x86b   : > { %v6295_v40 = vadd.f32 %v7889_v31, %v12437_v44  ;;  %v7892_v46 = vadd.f32 %v7891_v41, %v7890_v38 }
 0x86c   : > { %v6401_v54 = vadd.f32 %v6400_v5, %v6386_v1 }
 0x86d   : > { %vm6315_vm15 = vcmp.gt.f32.partialorder %v6295_v40, 0.0  ;;  %v6331_v20 = vmul.f32 0.01, %v6295_v40  ;;  %v6298_v45 = vadd.f32 %v7892_v46, %v12437_v44 }
 0x86f   : > { %v12525_v60 = vsel %vm6315_vm15, %v6295_v40, %v6331_v20  ;;  %vm6316_vm0 = vcmp.gt.f32.partialorder %v6298_v45, 0.0  ;;  %v6332_v49 = vmul.f32 0.01, %v6298_v45 }
 0x870   : > { %v6364_v8 = vadd.f32 %v6363_v17, %v12525_v60  ;;  %v6387_v32 = vmul.f32 %v12525_v60, %v12525_v60 }
 0x871   : > { %v12530_v50 = vsel %vm6316_vm0, %v6298_v45, %v6332_v49 }
 0x872   : > { %v6402_v9 = vadd.f32 %v6401_v54, %v6387_v32  ;;  %v6365_v15 = vadd.f32 %v6364_v8, %v12530_v50  ;;  %v6388_v28 = vmul.f32 %v12530_v50, %v12530_v50 }
 0x874   : > { %v6366_v55 = vrot.slane %v6365_v15, 4  ;;  %v6403_v53 = vadd.f32 %v6402_v9, %v6388_v28 }
 0x876   : > { %v6367_v44 = vadd.f32 %v6366_v55, %v6365_v15  ;;  %v6404_v42 = vrot.slane %v6403_v53, 4 }
 0x878   : > { %v6368_v13 = vrot.slane %v6367_v44, 2  ;;  %v6405_v21 = vadd.f32 %v6404_v42, %v6403_v53 }
 0x87a   : > { %v6369_v47 = vadd.f32 %v6368_v13, %v6367_v44  ;;  %v6406_v30 = vrot.slane %v6405_v21, 2 }
 0x87c   : > { %v6370_v57 = vrot.slane %v6369_v47, 1  ;;  %v6407_v33 = vadd.f32 %v6406_v30, %v6405_v21  ;;  %v8781_v30 = vld [vmem:[#allocation12 + $0x8] sm:$0xff]  }
 0x87e   : > { %v6371_v61 = vadd.f32 %v6370_v57, %v6369_v47  ;;  %v6408_v37 = vrot.slane %v6407_v33, 1  ;;  %v8780_v47 = vld [vmem:[#allocation12] sm:$0xff]   ;;  %v8783_v57 = vld [vmem:[#allocation12 + $0x18] sm:$0xff]  }
 0x87f   : > { %7957 = vmatprep.subr.bf16.mxu1 %v8780_v47 }
 0x880   : > { %v6372_v27 = vmul.f32 0.0078125, %v6371_v61  ;;  %v6409_v29 = vadd.f32 %v6408_v37, %v6407_v33  ;;  %v8785_v33 = vld [vmem:[#allocation12 + $0x28] sm:$0xff]   ;;  %v8786_v61 = vld [vmem:[#allocation12 + $0x30] sm:$0xff]   ;;  %v8787_v37 = vld [vmem:[#allocation12 + $0x38] sm:$0xff]  }
 0x882   : > { %v6410_v18 = vmul.f32 0.0078125, %v6409_v29  ;;  %v6411_v12 = vmul.f32 %v6372_v27, %v6372_v27 }
 0x884   : > { %v6412_v43 = vsub.f32 %v6410_v18, %v6411_v12 }
 0x886   : > { %v6413_v4 = vmax.f32 %v6412_v43, 0.0 }
 0x888   : > { %v6414_v7 = vadd.f32 1e-05, %v6413_v4 }
 0x88a   : > { %8814 = vrsqrt.f32 %v6414_v7 }
 0x894   : > { %v8815_v19 = vpop.eup %8814 }
 0x895   : > { %v6416_v26 = vmul.f32 %v8815_v19, %v6349_v63 }
 0x897   : > { %v6417_v0 = vmul.f32 %v6416_v26, %v6372_v27  ;;  %v6423_v6 = vrot.slane %v6416_v26, %v13273_v23  ;;  %v12553_v27 = vld [vmem:[#allocation2 + $0x2a] ss:$0 sm:$0xff] }
 0x899   : > { %v6418_v35 = vsub.f32 %v6350_v39, %v6417_v0  ;;  %v6425_v24 = vmul.f32 %v6423_v6, %v12445_v22  ;;  %v6426_v14 = vmul.f32 %v6423_v6, %v12443_v48  ;;  %v6427_v52 = vmul.f32 %v6423_v6, %v12447_v10 }
 0x89a   : > { %v6428_v11 = vmul.f32 %v6423_v6, %v12458_v3  ;;  %v6429_v31 = vmul.f32 %v6423_v6, %v12462_v56  ;;  %v6430_v38 = vmul.f32 %v6423_v6, %v12469_v59  ;;  %v6431_v5 = vmul.f32 %v6423_v6, %v12476_v25 }
 0x89b   : > { %v6445_v17 = vrot.slane %v6418_v35, %v13273_v23  ;;  %v6432_v1 = vmul.f32 %v6423_v6, %v12481_v36  ;;  %v6433_v41 = vmul.f32 %v6423_v6, %v12489_v34  ;;  %v6434_v22 = vmul.f32 %v6423_v6, %v12494_v16 }
 0x89c   : > { %v6435_v48 = vmul.f32 %v6423_v6, %v12501_v2  ;;  %v6436_v10 = vmul.f32 %v6423_v6, %v12506_v62  ;;  %v6437_v3 = vmul.f32 %v6423_v6, %v12513_v58  ;;  %v6438_v56 = vmul.f32 %v6423_v6, %v12518_v51 }
 0x89d   : > { %v6447_v40 = vadd.f32 %v6445_v17, %v6425_v24  ;;  %v6448_v59 = vadd.f32 %v6445_v17, %v6426_v14  ;;  %v6449_v46 = vadd.f32 %v6445_v17, %v6427_v52  ;;  %v6450_v25 = vadd.f32 %v6445_v17, %v6428_v11 }
 0x89e   : > { %v6451_v54 = vadd.f32 %v6445_v17, %v6429_v31  ;;  %v6452_v20 = vadd.f32 %v6445_v17, %v6430_v38  ;;  %v6453_v45 = vadd.f32 %v6445_v17, %v6431_v5  ;;  %v6454_v36 = vadd.f32 %v6445_v17, %v6432_v1 }
 0x89f   : > { %v6464_v49 = vpack.c.bf16 %v6448_v59, %v6447_v40  ;;  %v6465_v34 = vpack.c.bf16 %v6450_v25, %v6449_v46  ;;  %v6455_v8 = vadd.f32 %v6445_v17, %v6433_v41  ;;  %v6456_v16 = vadd.f32 %v6445_v17, %v6434_v22 }
 0x8a0   : > { %v6466_v32 = vpack.c.bf16 %v6452_v20, %v6451_v54  ;;  %v6467_v2 = vpack.c.bf16 %v6454_v36, %v6453_v45  ;;  %v6457_v9 = vadd.f32 %v6445_v17, %v6435_v48  ;;  %v6458_v62 = vadd.f32 %v6445_v17, %v6436_v10 }
 0x8a1   : > { %7941 = vmatprep.mubr.bf16.mxu1 %v6464_v49  ;;  %v6468_v58 = vpack.c.bf16 %v6456_v16, %v6455_v8  ;;  %v6459_v15 = vadd.f32 %v6445_v17, %v6437_v3  ;;  %v6460_v51 = vadd.f32 %v6445_v17, %v6438_v56  ;;  %v6439_v28 = vmul.f32 %v6423_v6, %v12525_v60  ;;  %v8782_v60 = vld [vmem:[#allocation12 + $0x10] sm:$0xff]  }
 0x8a2   : > { %7942 = vmatmul.mubr.bf16.vlgmr.msra.gmra.mrb[160].mxu1 %v6465_v34  ;;  %v6469_v55 = vpack.c.bf16 %v6458_v62, %v6457_v9  ;;  %v6440_v53 = vmul.f32 %v6423_v6, %v12530_v50  ;;  %v8784_v50 = vld [vmem:[#allocation12 + $0x20] sm:$0xff]  }
 0x8a3   : > { %7945 = vmatprep.mubr.bf16.mxu1 %v6466_v32  ;;  %v6470_v44 = vpack.c.bf16 %v6460_v51, %v6459_v15  ;;  %v6461_v42 = vadd.f32 %v6445_v17, %v6439_v28  ;;  %7958 = vmatpush3.bf16.msra.mxu1 %v8780_v47 }
 0x8a4   : > { %v6462_v13 = vadd.f32 %v6445_v17, %v6440_v53  ;;  %7959 = vmatprep.subr.bf16.mxu1 %v8781_v30 }
 0x8a6   : > { %v6471_v21 = vpack.c.bf16 %v6462_v13, %v6461_v42 }
 0x8a7   : > { %7960 = vmatpush3.bf16.msra.mxu1 %v8781_v30 }
 0x8a8   : > { %7961 = vmatprep.subr.bf16.mxu1 %v8782_v60 }
 0x8aa   : > { %7946 = vmatmul.mubr.bf16.gmra.mrb[164].mxu1 %v6467_v2 }
 0x8ab   : > { %7949 = vmatprep.mubr.bf16.mxu1 %v6468_v58  ;;  %7962 = vmatpush3.bf16.msra.mxu1 %v8782_v60 }
 0x8ac   : > { %7963 = vmatprep.subr.bf16.mxu1 %v8783_v57 }
 0x8af   : > { %7964 = vmatpush3.bf16.msra.mxu1 %v8783_v57 }
 0x8b0   : > { %7965 = vmatprep.subr.bf16.mxu1 %v8784_v50 }
 0x8b2   : > { %7950 = vmatmul.mubr.bf16.gmra.mrb[168].mxu1 %v6469_v55 }
 0x8b3   : > { %7953 = vmatprep.mubr.bf16.mxu1 %v6470_v44  ;;  %7966 = vmatpush3.bf16.msra.mxu1 %v8784_v50 }
 0x8b4   : > { %7967 = vmatprep.subr.bf16.mxu1 %v8785_v33 }
 0x8b7   : > { %7968 = vmatpush3.bf16.msra.mxu1 %v8785_v33 }
 0x8b8   : > { %7969 = vmatprep.subr.bf16.mxu1 %v8786_v61 }
 0x8ba   : > { %7954 = vmatmul.mubr.bf16.gmra.mrb[172].mxu1 %v6471_v21 }
 0x8bb   : > { %7970 = vmatpush3.bf16.msra.mxu1 %v8786_v61 }
 0x8bc   : > { %7971 = vmatprep.subr.bf16.mxu1 %v8787_v37 }
 0x8bf   : > { %7972 = vmatpush3.bf16.msra.mxu1 %v8787_v37 }
 0x975   : > { %v7943_v29 = vpop.f32.mrb[160].mxu1 }
 0x976   : > { %v6585_v18 = vadd.f32 %v7943_v29, %v12553_v27  ;;  %v6576_v12 = vpop.f32.mrb[161].mxu1 }
 0x977   : > { %v6577_v43 = vadd.f32 %v12553_v27, %v6576_v12  ;;  %v7944_v4 = vpop.f32.mrb[162].mxu1 }
 0x978   : > { %v6588_v7 = vadd.f32 %v7944_v4, %v12553_v27  ;;  %v6579_v63 = vpop.f32.mrb[163].mxu1  ;;  %v6657_v19 = vmul.f32 0.01, %v6585_v18  ;;  %vm6641_vm2 = vcmp.gt.f32.partialorder %v6585_v18, 0.0 }
 0x979   : > { %vm6639_vm1 = vcmp.gt.f32.partialorder %v6577_v43, 0.0  ;;  %v6655_v26 = vmul.f32 0.01, %v6577_v43  ;;  %v6580_v39 = vadd.f32 %v12553_v27, %v6579_v63 }
 0x97a   : > { %v6658_v6 = vmul.f32 0.01, %v6588_v7  ;;  %vm6642_vm4 = vcmp.gt.f32.partialorder %v6588_v7, 0.0  ;;  %v12561_v24 = vsel %vm6641_vm2, %v6585_v18, %v6657_v19 }
 0x97b   : > { %v12559_v0 = vsel %vm6639_vm1, %v6577_v43, %v6655_v26  ;;  %vm6640_vm3 = vcmp.gt.f32.partialorder %v6580_v39, 0.0  ;;  %v6656_v35 = vmul.f32 0.01, %v6580_v39  ;;  %v6713_v48 = vmul.f32 %v12561_v24, %v12561_v24 }
 0x97c   : > { %v6711_v11 = vmul.f32 %v12559_v0, %v12559_v0  ;;  %v12572_v1 = vsel %vm6642_vm4, %v6588_v7, %v6658_v6 }
 0x97d   : > { %v12563_v14 = vsel %vm6640_vm3, %v6580_v39, %v6656_v35  ;;  %v7947_v52 = vpop.f32.mrb[164].mxu1  ;;  %v6714_v25 = vmul.f32 %v12572_v1, %v12572_v1 }
 0x97e   : > { %v6689_v31 = vadd.f32 %v12563_v14, %v12559_v0  ;;  %v6712_v38 = vmul.f32 %v12563_v14, %v12563_v14  ;;  %v6601_v5 = vadd.f32 %v7947_v52, %v12553_v27  ;;  %v6592_v17 = vpop.f32.mrb[165].mxu1 }
 0x97f   : > { %v6593_v41 = vadd.f32 %v12553_v27, %v6592_v17  ;;  %v7948_v22 = vpop.f32.mrb[166].mxu1 }
 0x980   : > { %v6690_v10 = vadd.f32 %v6689_v31, %v12561_v24  ;;  %v6727_v3 = vadd.f32 %v6712_v38, %v6711_v11  ;;  %v6595_v56 = vpop.f32.mrb[167].mxu1  ;;  %v6604_v59 = vadd.f32 %v7948_v22, %v12553_v27  ;;  %v6661_v20 = vmul.f32 0.01, %v6601_v5 }
 0x981   : > { %vm6643_vm5 = vcmp.gt.f32.partialorder %v6593_v41, 0.0  ;;  %v6659_v40 = vmul.f32 0.01, %v6593_v41  ;;  %v6596_v46 = vadd.f32 %v12553_v27, %v6595_v56  ;;  %vm6645_vm6 = vcmp.gt.f32.partialorder %v6601_v5, 0.0 }
 0x982   : > { %v6728_v54 = vadd.f32 %v6727_v3, %v6713_v48  ;;  %v6691_v45 = vadd.f32 %v6690_v10, %v12572_v1  ;;  %vm6646_vm7 = vcmp.gt.f32.partialorder %v6604_v59, 0.0  ;;  %v6662_v49 = vmul.f32 0.01, %v6604_v59 }
 0x983   : > { %v12583_v36 = vsel %vm6643_vm5, %v6593_v41, %v6659_v40  ;;  %vm6644_vm8 = vcmp.gt.f32.partialorder %v6596_v46, 0.0  ;;  %v6660_v32 = vmul.f32 0.01, %v6596_v46  ;;  %v12588_v9 = vsel %vm6645_vm6, %v6601_v5, %v6661_v20 }
 0x984   : > { %v6692_v34 = vadd.f32 %v6691_v45, %v12583_v36  ;;  %v6715_v8 = vmul.f32 %v12583_v36, %v12583_v36  ;;  %v6729_v16 = vadd.f32 %v6728_v54, %v6714_v25  ;;  %v12590_v15 = vsel %vm6646_vm7, %v6604_v59, %v6662_v49 }
 0x985   : > { %v7951_v2 = vpop.f32.mrb[168].mxu1  ;;  %v12592_v51 = vsel %vm6644_vm8, %v6596_v46, %v6660_v32  ;;  %v6717_v60 = vmul.f32 %v12588_v9, %v12588_v9  ;;  %v6718_v57 = vmul.f32 %v12590_v15, %v12590_v15 }
 0x986   : > { %v6730_v62 = vadd.f32 %v6729_v16, %v6715_v8  ;;  %v6608_v58 = vpop.f32.mrb[169].mxu1  ;;  %v6617_v28 = vadd.f32 %v7951_v2, %v12553_v27  ;;  %v6693_v44 = vadd.f32 %v6692_v34, %v12592_v51  ;;  %v6716_v42 = vmul.f32 %v12592_v51, %v12592_v51 }
 0x987   : > { %v6609_v55 = vadd.f32 %v12553_v27, %v6608_v58  ;;  %v7952_v53 = vpop.f32.mrb[170].mxu1 }
 0x988   : > { %v6611_v13 = vpop.f32.mrb[171].mxu1  ;;  %v6620_v47 = vadd.f32 %v7952_v53, %v12553_v27  ;;  %v6694_v50 = vadd.f32 %v6693_v44, %v12588_v9  ;;  %v6731_v33 = vadd.f32 %v6730_v62, %v6716_v42  ;;  %vm6649_vm10 = vcmp.gt.f32.partialorder %v6617_v28, 0.0 }
 0x989   : > { %vm6647_vm9 = vcmp.gt.f32.partialorder %v6609_v55, 0.0  ;;  %v6663_v21 = vmul.f32 0.01, %v6609_v55  ;;  %v6612_v30 = vadd.f32 %v12553_v27, %v6611_v13  ;;  %v6665_v61 = vmul.f32 0.01, %v6617_v28 }
 0x98a   : > { %v6666_v29 = vmul.f32 0.01, %v6620_v47  ;;  %v6732_v18 = vadd.f32 %v6731_v33, %v6717_v60  ;;  %v6695_v12 = vadd.f32 %v6694_v50, %v12590_v15  ;;  %vm6650_vm12 = vcmp.gt.f32.partialorder %v6620_v47, 0.0 }
 0x98b   : > { %v12606_v37 = vsel %vm6647_vm9, %v6609_v55, %v6663_v21  ;;  %vm6648_vm11 = vcmp.gt.f32.partialorder %v6612_v30, 0.0  ;;  %v6664_v4 = vmul.f32 0.01, %v6612_v30  ;;  %v12612_v39 = vsel %vm6649_vm10, %v6617_v28, %v6665_v61 }
 0x98c   : > { %v6719_v43 = vmul.f32 %v12606_v37, %v12606_v37  ;;  %v6696_v63 = vadd.f32 %v6695_v12, %v12606_v37  ;;  %v6733_v19 = vadd.f32 %v6732_v18, %v6718_v57  ;;  %v12618_v38 = vsel %vm6650_vm12, %v6620_v47, %v6666_v29 }
 0x98d   : > { %v7955_v7 = vpop.f32.mrb[172].mxu1  ;;  %v12614_v6 = vsel %vm6648_vm11, %v6612_v30, %v6664_v4  ;;  %v6721_v10 = vmul.f32 %v12612_v39, %v12612_v39  ;;  %v6722_v59 = vmul.f32 %v12618_v38, %v12618_v38 }
 0x98e   : > { %v6624_v26 = vpop.f32.mrb[173].mxu1  ;;  %v6633_v35 = vadd.f32 %v7955_v7, %v12553_v27  ;;  %v6734_v31 = vadd.f32 %v6733_v19, %v6719_v43  ;;  %v6697_v5 = vadd.f32 %v6696_v63, %v12614_v6  ;;  %v6720_v17 = vmul.f32 %v12614_v6, %v12614_v6 }
 0x98f   : > { %v6625_v52 = vadd.f32 %v12553_v27, %v6624_v26  ;;  %v7956_v11 = vpop.f32.mrb[174].mxu1 }
 0x990   : > { %v6627_v41 = vpop.f32.mrb[175].mxu1  ;;  %v6636_v48 = vadd.f32 %v7956_v11, %v12553_v27  ;;  %v6698_v3 = vadd.f32 %v6697_v5, %v12612_v39  ;;  %v6735_v56 = vadd.f32 %v6734_v31, %v6720_v17  ;;  %v6669_v46 = vmul.f32 0.01, %v6633_v35  ;;  %v6687_v31 = vld [vmem:[#allocation2 + $0x2b] sm:$0x1] }
 0x991   : > { %vm6651_vm13 = vcmp.gt.f32.partialorder %v6625_v52, 0.0  ;;  %v6667_v22 = vmul.f32 0.01, %v6625_v52  ;;  %v6628_v40 = vadd.f32 %v12553_v27, %v6627_v41  ;;  %vm6653_vm14 = vcmp.gt.f32.partialorder %v6633_v35, 0.0  ;;  %v6688_v41 = vld [vmem:[#allocation2 + $0x2c] sm:$0x1] }
 0x992   : > { %v6736_v54 = vadd.f32 %v6735_v56, %v6721_v10  ;;  %v6699_v20 = vadd.f32 %v6698_v3, %v12618_v38  ;;  %v6670_v49 = vmul.f32 0.01, %v6636_v48  ;;  %vm6654_vm0 = vcmp.gt.f32.partialorder %v6636_v48, 0.0 }
 0x993   : > { %v12630_v25 = vsel %vm6651_vm13, %v6625_v52, %v6667_v22  ;;  %vm6652_vm15 = vcmp.gt.f32.partialorder %v6628_v40, 0.0  ;;  %v6668_v34 = vmul.f32 0.01, %v6628_v40  ;;  %v12636_v27 = vsel %vm6653_vm14, %v6633_v35, %v6669_v46 }
 0x994   : > { %v6723_v45 = vmul.f32 %v12630_v25, %v12630_v25  ;;  %v6700_v8 = vadd.f32 %v6699_v20, %v12630_v25  ;;  %v6737_v16 = vadd.f32 %v6736_v54, %v6722_v59  ;;  %v12638_v28 = vsel %vm6654_vm0, %v6636_v48, %v6670_v49 }
 0x995   : > { %v6684_v32 = vsel %vm6652_vm15, %v6628_v40, %v6668_v34  ;;  %v6725_v55 = vmul.f32 %v12636_v27, %v12636_v27  ;;  %v6726_v42 = vmul.f32 %v12638_v28, %v12638_v28 }
 0x996   : > { %v6738_v2 = vadd.f32 %v6737_v16, %v6723_v45  ;;  %v6701_v62 = vadd.f32 %v6700_v8, %v6684_v32  ;;  %v6724_v58 = vmul.f32 %v6684_v32, %v6684_v32 }
 0x998   : > { %v6702_v53 = vadd.f32 %v6701_v62, %v12636_v27  ;;  %v6739_v44 = vadd.f32 %v6738_v2, %v6724_v58 }
 0x99a   : > { %v6703_v13 = vadd.f32 %v6702_v53, %v12638_v28  ;;  %v6740_v21 = vadd.f32 %v6739_v44, %v6725_v55 }
 0x99c   : > { %v6704_v47 = vrot.slane %v6703_v13, 4  ;;  %v6741_v30 = vadd.f32 %v6740_v21, %v6726_v42 }
 0x99e   : > { %v6705_v60 = vadd.f32 %v6704_v47, %v6703_v13  ;;  %v6742_v57 = vrot.slane %v6741_v30, 4 }
 0x9a0   : > { %v6706_v50 = vrot.slane %v6705_v60, 2  ;;  %v6743_v33 = vadd.f32 %v6742_v57, %v6741_v30 }
 0x9a2   : > { %v6707_v61 = vadd.f32 %v6706_v50, %v6705_v60  ;;  %v6744_v29 = vrot.slane %v6743_v33, 2 }
 0x9a4   : > { %v6708_v18 = vrot.slane %v6707_v61, 1  ;;  %v6745_v12 = vadd.f32 %v6744_v29, %v6743_v33  ;;  %v13276_v33 = vlaneseq  ;;  %v7690_v29 = vld [vmem:[#allocation2 + $0x2d] ss:$0 sm:$0xff] }
 0x9a6   : > { %v6709_v43 = vadd.f32 %v6708_v18, %v6707_v61  ;;  %v6746_v4 = vrot.slane %v6745_v12, 1  ;;  %v12664_v61 = vand.u32 127, %v13276_v33 }
 0x9a8   : > { %v6710_v7 = vmul.f32 0.0078125, %v6709_v43  ;;  %v6747_v63 = vadd.f32 %v6746_v4, %v6745_v12  ;;  %vm6979_vm1 = vcmp.lt.s32.totalorder %v12664_v61, 10 }
 0x9aa   : > { %v6748_v19 = vmul.f32 0.0078125, %v6747_v63  ;;  %v6749_v26 = vmul.f32 %v6710_v7, %v6710_v7 }
 0x9ac   : > { %v6750_v35 = vsub.f32 %v6748_v19, %v6749_v26 }
 0x9ae   : > { %v6751_v52 = vmax.f32 %v6750_v35, 0.0 }
 0x9b0   : > { %v6752_v11 = vadd.f32 1e-05, %v6751_v52 }
 0x9b2   : > { %8816 = vrsqrt.f32 %v6752_v11 }
 0x9bc   : > { %v8817_v5 = vpop.eup %8816 }
 0x9bd   : > { %v6754_v17 = vmul.f32 %v8817_v5, %v6687_v31 }
 0x9bf   : > { %v6755_v22 = vmul.f32 %v6754_v17, %v6710_v7  ;;  %v6761_v48 = vrot.slane %v6754_v17, %v13273_v23 }
 0x9c1   : > { %v6756_v10 = vsub.f32 %v6688_v41, %v6755_v22  ;;  %v6776_v3 = vmul.f32 %v6761_v48, %v6684_v32  ;;  %v6763_v56 = vmul.f32 %v6761_v48, %v12559_v0  ;;  %v6764_v40 = vmul.f32 %v6761_v48, %v12563_v14 }
 0x9c2   : > { %v6765_v59 = vmul.f32 %v6761_v48, %v12561_v24  ;;  %v6766_v46 = vmul.f32 %v6761_v48, %v12572_v1  ;;  %v6767_v54 = vmul.f32 %v6761_v48, %v12583_v36  ;;  %v6768_v20 = vmul.f32 %v6761_v48, %v12592_v51 }
 0x9c3   : > { %v6783_v45 = vrot.slane %v6756_v10, %v13273_v23  ;;  %v6769_v49 = vmul.f32 %v6761_v48, %v12588_v9  ;;  %v6770_v34 = vmul.f32 %v6761_v48, %v12590_v15  ;;  %v6771_v8 = vmul.f32 %v6761_v48, %v12606_v37 }
 0x9c4   : > { %v6772_v0 = vmul.f32 %v6761_v48, %v12614_v6  ;;  %v6773_v14 = vmul.f32 %v6761_v48, %v12612_v39  ;;  %v6774_v24 = vmul.f32 %v6761_v48, %v12618_v38  ;;  %v6775_v1 = vmul.f32 %v6761_v48, %v12630_v25 }
 0x9c5   : > { %v6785_v16 = vadd.f32 %v6783_v45, %v6763_v56  ;;  %v6786_v36 = vadd.f32 %v6783_v45, %v6764_v40  ;;  %v6787_v32 = vadd.f32 %v6783_v45, %v6765_v59  ;;  %v6788_v51 = vadd.f32 %v6783_v45, %v6766_v46 }
 0x9c6   : > { %v6789_v2 = vadd.f32 %v6783_v45, %v6767_v54  ;;  %v6790_v23 = vadd.f32 %v6783_v45, %v6768_v20  ;;  %v6791_v62 = vadd.f32 %v6783_v45, %v6769_v49  ;;  %v6792_v9 = vadd.f32 %v6783_v45, %v6770_v34 }
 0x9c7   : > { %v6802_v58 = vpack.c.bf16 %v6786_v36, %v6785_v16  ;;  %v6803_v15 = vpack.c.bf16 %v6788_v51, %v6787_v32  ;;  %v6793_v55 = vadd.f32 %v6783_v45, %v6771_v8  ;;  %v6794_v37 = vadd.f32 %v6783_v45, %v6772_v0 }
 0x9c8   : > { %v6804_v53 = vpack.c.bf16 %v6790_v23, %v6789_v2  ;;  %v6805_v6 = vpack.c.bf16 %v6792_v9, %v6791_v62  ;;  %v6795_v44 = vadd.f32 %v6783_v45, %v6773_v14  ;;  %v6796_v39 = vadd.f32 %v6783_v45, %v6774_v24 }
 0x9c9   : > { %7973 = vmatprep.mubr.bf16.mxu1 %v6802_v58  ;;  %v6806_v38 = vpack.c.bf16 %v6794_v37, %v6793_v55  ;;  %v6797_v42 = vadd.f32 %v6783_v45, %v6775_v1  ;;  %v6798_v25 = vadd.f32 %v6783_v45, %v6776_v3  ;;  %v6777_v13 = vmul.f32 %v6761_v48, %v12636_v27 }
 0x9ca   : > { %7974 = vmatmul.mubr.bf16.vlgmr.msra.gmra.mrb[176].mxu1 %v6803_v15  ;;  %v6807_v21 = vpack.c.bf16 %v6796_v39, %v6795_v44  ;;  %v6778_v47 = vmul.f32 %v6761_v48, %v12638_v28 }
 0x9cb   : > { %7977 = vmatprep.mubr.bf16.mxu1 %v6804_v53  ;;  %v6808_v30 = vpack.c.bf16 %v6798_v25, %v6797_v42  ;;  %v6799_v60 = vadd.f32 %v6783_v45, %v6777_v13 }
 0x9cc   : > { %v6800_v57 = vadd.f32 %v6783_v45, %v6778_v47 }
 0x9ce   : > { %v6809_v50 = vpack.c.bf16 %v6800_v57, %v6799_v60 }
 0x9d2   : > { %7978 = vmatmul.mubr.bf16.gmra.mrb[180].mxu1 %v6805_v6 }
 0x9d3   : > { %7981 = vmatprep.mubr.bf16.mxu1 %v6806_v38 }
 0x9da   : > { %7982 = vmatmul.mubr.bf16.gmra.mrb[184].mxu1 %v6807_v21 }
 0x9db   : > { %7985 = vmatprep.mubr.bf16.mxu1 %v6808_v30 }
 0x9e2   : > { %7986 = vmatmul.mubr.bf16.gmra.mrb[188].mxu1 %v6809_v50 }
 0xa9d   : > { %v7975_v27 = vpop.f32.mrb[176].mxu1 }
 0xa9e   : > { %v12667_v18 = vadd.f32 %v7975_v27, %v7690_v29  ;;  %v6914_v28 = vpop.f32.mrb[177].mxu1 }
 0xa9f   : > { %v12669_v12 = vadd.f32 %v7690_v29, %v6914_v28  ;;  %v7976_v43 = vpop.f32.mrb[178].mxu1 }
 0xaa0   : > { %v12671_v4 = vadd.f32 %v7976_v43, %v7690_v29  ;;  %v6917_v7 = vpop.f32.mrb[179].mxu1  ;;  %v6982_v63 = vsel %vm6979_vm1, %v12667_v18, -inf }
 0xaa1   : > { %v12676_v19 = vadd.f32 %v7690_v29, %v6917_v7  ;;  %7000 = vmax.xlane.f32.xlu1 %v6982_v63  ;;  %v6980_v26 = vsel %vm6979_vm1, %v12669_v12, -inf }
 0xaa2   : > { %6996 = vmax.xlane.f32.xlu0 %v6980_v26  ;;  %v6983_v35 = vsel %vm6979_vm1, %v12671_v4, -inf }
 0xaa3   : > { %v6981_v11 = vsel %vm6979_vm1, %v12676_v19, -inf }
 0xaa5   : > { %7002 = vmax.xlane.f32.xlu1 %v6983_v35  ;;  %v7979_v52 = vpop.f32.mrb[180].mxu1 }
 0xaa6   : > { %v12687_v31 = vadd.f32 %v7979_v52, %v7690_v29  ;;  %v6930_v5 = vpop.f32.mrb[181].mxu1  ;;  %6998 = vmax.xlane.f32.xlu0 %v6981_v11 }
 0xaa7   : > { %v7980_v17 = vpop.f32.mrb[182].mxu1  ;;  %v12694_v10 = vadd.f32 %v7690_v29, %v6930_v5 }
 0xaa8   : > { %v12689_v41 = vadd.f32 %v7980_v17, %v7690_v29  ;;  %v6933_v22 = vpop.f32.mrb[183].mxu1  ;;  %v6986_v48 = vsel %vm6979_vm1, %v12687_v31, -inf }
 0xaa9   : > { %v12696_v3 = vadd.f32 %v7690_v29, %v6933_v22  ;;  %v6984_v59 = vsel %vm6979_vm1, %v12694_v10, -inf }
 0xaaa   : > { %7008 = vmax.xlane.f32.xlu0 %v6986_v48  ;;  %v6987_v56 = vsel %vm6979_vm1, %v12689_v41, -inf }
 0xaab   : > { %7010 = vmax.xlane.f32.xlu1 %v6987_v56  ;;  %v6985_v20 = vsel %vm6979_vm1, %v12696_v3, -inf }
 0xaad   : > { %v7983_v40 = vpop.f32.mrb[184].mxu1 }
 0xaae   : > { %v12704_v46 = vadd.f32 %v7983_v40, %v7690_v29  ;;  %v6946_v54 = vpop.f32.mrb[185].mxu1  ;;  %7004 = vmax.xlane.f32.xlu0 %v6984_v59 }
 0xaaf   : > { %v7984_v45 = vpop.f32.mrb[186].mxu1  ;;  %7006 = vmax.xlane.f32.xlu1 %v6985_v20  ;;  %v12714_v0 = vadd.f32 %v7690_v29, %v6946_v54 }
 0xab0   : > { %v12709_v49 = vadd.f32 %v7984_v45, %v7690_v29  ;;  %v6949_v34 = vpop.f32.mrb[187].mxu1  ;;  %v6990_v8 = vsel %vm6979_vm1, %v12704_v46, -inf }
 0xab1   : > { %v12716_v14 = vadd.f32 %v7690_v29, %v6949_v34  ;;  %v6988_v16 = vsel %vm6979_vm1, %v12714_v0, -inf }
 0xab2   : > { %7016 = vmax.xlane.f32.xlu0 %v6990_v8  ;;  %v6991_v24 = vsel %vm6979_vm1, %v12709_v49, -inf }
 0xab3   : > { %7018 = vmax.xlane.f32.xlu1 %v6991_v24  ;;  %v6989_v32 = vsel %vm6979_vm1, %v12716_v14, -inf }
 0xab5   : > { %v7987_v1 = vpop.f32.mrb[188].mxu1 }
 0xab6   : > { %v6962_v36 = vpop.f32.mrb[189].mxu1  ;;  %7012 = vmax.xlane.f32.xlu0 %v6988_v16  ;;  %v12729_v62 = vadd.f32 %v7987_v1, %v7690_v29 }
 0xab7   : > { %v12727_v51 = vadd.f32 %v7690_v29, %v6962_v36  ;;  %v7988_v2 = vpop.f32.mrb[190].mxu1  ;;  %7014 = vmax.xlane.f32.xlu1 %v6989_v32 }
 0xab8   : > { %v6965_v23 = vpop.f32.mrb[191].mxu1  ;;  %v12736_v15 = vadd.f32 %v7988_v2, %v7690_v29  ;;  %v6994_v37 = vsel %vm6979_vm1, %v12729_v62, -inf }
 0xab9   : > { %v12731_v9 = vadd.f32 %v7690_v29, %v6965_v23  ;;  %v6992_v58 = vsel %vm6979_vm1, %v12727_v51, -inf }
 0xaba   : > { %7020 = vmax.xlane.f32.xlu0 %v6992_v58  ;;  %v6995_v53 = vsel %vm6979_vm1, %v12736_v15, -inf }
 0xabb   : > { %v6993_v55 = vsel %vm6979_vm1, %v12731_v9, -inf }
 0xabc   : > { %7022 = vmax.xlane.f32.xlu1 %v6993_v55 }
 0xabe   : > { %7024 = vmax.xlane.f32.xlu0 %v6994_v37 }
 0xac0   : > { %7026 = vmax.xlane.f32.xlu1 %v6995_v53 }
 0xb2e   : > { %v12747_v6 = vpop.xlane.xlu1 %7000 }
 0xb2f   : > { %v7030_v44 = vsub.f32 %v12667_v18, %v12747_v6  ;;  %v12751_v39 = vpop.xlane.xlu0 %6996 }
 0xb30   : > { %v7028_v38 = vsub.f32 %v12669_v12, %v12751_v39 }
 0xb31   : > { %v7048_v42 = vmul.f32 1.442695, %v7030_v44 }
 0xb32   : > { %v7044_v25 = vmul.f32 1.442695, %v7028_v38  ;;  %v12755_v13 = vpop.xlane.xlu1 %7002 }
 0xb33   : > { %8818 = vpow2.f32 %v7048_v42  ;;  %v7031_v21 = vsub.f32 %v12671_v4, %v12755_v13  ;;  %v12759_v47 = vpop.xlane.xlu0 %6998 }
 0xb34   : > { %v7029_v30 = vsub.f32 %v12676_v19, %v12759_v47  ;;  %8820 = vpow2.f32 %v7044_v25 }
 0xb35   : > { %v7050_v60 = vmul.f32 1.442695, %v7031_v21 }
 0xb36   : > { %v7046_v57 = vmul.f32 1.442695, %v7029_v30 }
 0xb37   : > { %8822 = vpow2.f32 %v7050_v60  ;;  %v12763_v50 = vpop.xlane.xlu0 %7008 }
 0xb38   : > { %v7034_v33 = vsub.f32 %v12687_v31, %v12763_v50  ;;  %v12767_v29 = vpop.xlane.xlu1 %7010  ;;  %8824 = vpow2.f32 %v7046_v57 }
 0xb39   : > { %v7035_v27 = vsub.f32 %v12689_v41, %v12767_v29 }
 0xb3a   : > { %v7056_v28 = vmul.f32 1.442695, %v7034_v33 }
 0xb3b   : > { %v7058_v43 = vmul.f32 1.442695, %v7035_v27  ;;  %v12771_v7 = vpop.xlane.xlu0 %7004 }
 0xb3c   : > { %8826 = vpow2.f32 %v7056_v28  ;;  %v7032_v63 = vsub.f32 %v12694_v10, %v12771_v7  ;;  %v12775_v26 = vpop.xlane.xlu1 %7006 }
 0xb3d   : > { %v8819_v35 = vpop.eup %8818  ;;  %8828 = vpow2.f32 %v7058_v43  ;;  %v7033_v52 = vsub.f32 %v12696_v3, %v12775_v26 }
 0xb3e   : > { %v7052_v11 = vmul.f32 1.442695, %v7032_v63  ;;  %v7078_v5 = vsel %vm6979_vm1, %v8819_v35, 0.0  ;;  %v8821_v17 = vpop.eup %8820 }
 0xb3f   : > { %v7054_v22 = vmul.f32 1.442695, %v7033_v52  ;;  %7096 = vadd.xlane.f32.xlu0 %v7078_v5  ;;  %v12781_v48 = vpop.xlane.xlu0 %7016  ;;  %v7076_v34 = vsel %vm6979_vm1, %v8821_v17, 0.0 }
 0xb40   : > { %8830 = vpow2.f32 %v7052_v11  ;;  %v7038_v56 = vsub.f32 %v12704_v46, %v12781_v48  ;;  %v12785_v40 = vpop.xlane.xlu1 %7018 }
 0xb41   : > { %v8823_v59 = vpop.eup %8822  ;;  %8832 = vpow2.f32 %v7054_v22  ;;  %v7039_v54 = vsub.f32 %v12709_v49, %v12785_v40 }
 0xb42   : > { %v7064_v20 = vmul.f32 1.442695, %v7038_v56  ;;  %v7079_v45 = vsel %vm6979_vm1, %v8823_v59, 0.0  ;;  %v8825_v8 = vpop.eup %8824 }
 0xb43   : > { %v7066_v24 = vmul.f32 1.442695, %v7039_v54  ;;  %7098 = vadd.xlane.f32.xlu1 %v7079_v45  ;;  %7092 = vadd.xlane.f32.xlu0 %v7076_v34  ;;  %v12793_v1 = vpop.xlane.xlu0 %7012  ;;  %v7077_v58 = vsel %vm6979_vm1, %v8825_v8, 0.0 }
 0xb44   : > { %8834 = vpow2.f32 %v7064_v20  ;;  %v7036_v16 = vsub.f32 %v12714_v0, %v12793_v1  ;;  %v12797_v36 = vpop.xlane.xlu1 %7014 }
 0xb45   : > { %8836 = vpow2.f32 %v7066_v24  ;;  %v7037_v32 = vsub.f32 %v12716_v14, %v12797_v36 }
 0xb46   : > { %v8827_v2 = vpop.eup %8826  ;;  %v7060_v23 = vmul.f32 1.442695, %v7036_v16 }
 0xb47   : > { %v8829_v55 = vpop.eup %8828  ;;  %v7062_v37 = vmul.f32 1.442695, %v7037_v32  ;;  %7094 = vadd.xlane.f32.xlu1 %v7077_v58  ;;  %v12803_v53 = vpop.xlane.xlu0 %7020  ;;  %v7082_v44 = vsel %vm6979_vm1, %v8827_v2, 0.0 }
 0xb48   : > { %8838 = vpow2.f32 %v7060_v23  ;;  %v7040_v38 = vsub.f32 %v12727_v51, %v12803_v53  ;;  %7104 = vadd.xlane.f32.xlu0 %v7082_v44  ;;  %v7083_v60 = vsel %vm6979_vm1, %v8829_v55, 0.0 }
 0xb49   : > { %8840 = vpow2.f32 %v7062_v37  ;;  %v12809_v42 = vpop.xlane.xlu1 %7022 }
 0xb4a   : > { %v8831_v25 = vpop.eup %8830  ;;  %v7068_v21 = vmul.f32 1.442695, %v7040_v38  ;;  %v7041_v30 = vsub.f32 %v12731_v9, %v12809_v42 }
 0xb4b   : > { %v8833_v57 = vpop.eup %8832  ;;  %7106 = vadd.xlane.f32.xlu1 %v7083_v60  ;;  %v12815_v33 = vpop.xlane.xlu0 %7024  ;;  %v7080_v27 = vsel %vm6979_vm1, %v8831_v25, 0.0 }
 0xb4c   : > { %8842 = vpow2.f32 %v7068_v21  ;;  %v7070_v28 = vmul.f32 1.442695, %v7041_v30  ;;  %v7042_v43 = vsub.f32 %v12729_v62, %v12815_v33  ;;  %7100 = vadd.xlane.f32.xlu0 %v7080_v27  ;;  %v7081_v5 = vsel %vm6979_vm1, %v8833_v57, 0.0 }
 0xb4d   : > { %v12821_v63 = vpop.xlane.xlu1 %7026 }
 0xb4e   : > { %v8835_v35 = vpop.eup %8834  ;;  %8844 = vpow2.f32 %v7070_v28  ;;  %v7072_v52 = vmul.f32 1.442695, %v7042_v43  ;;  %v7043_v11 = vsub.f32 %v12736_v15, %v12821_v63 }
 0xb4f   : > { %v8837_v17 = vpop.eup %8836  ;;  %7102 = vadd.xlane.f32.xlu1 %v7081_v5  ;;  %v7086_v22 = vsel %vm6979_vm1, %v8835_v35, 0.0 }
 0xb50   : > { %8846 = vpow2.f32 %v7072_v52  ;;  %v7074_v56 = vmul.f32 1.442695, %v7043_v11  ;;  %7112 = vadd.xlane.f32.xlu0 %v7086_v22  ;;  %v7087_v54 = vsel %vm6979_vm1, %v8837_v17, 0.0 }
 0xb52   : > { %v8839_v59 = vpop.eup %8838  ;;  %8848 = vpow2.f32 %v7074_v56 }
 0xb53   : > { %v8841_v20 = vpop.eup %8840  ;;  %7114 = vadd.xlane.f32.xlu1 %v7087_v54  ;;  %v7084_v45 = vsel %vm6979_vm1, %v8839_v59, 0.0 }
 0xb54   : > { %7108 = vadd.xlane.f32.xlu0 %v7084_v45  ;;  %v7085_v8 = vsel %vm6979_vm1, %v8841_v20, 0.0 }
 0xb56   : > { %v8843_v34 = vpop.eup %8842 }
 0xb57   : > { %7110 = vadd.xlane.f32.xlu1 %v7085_v8  ;;  %v7088_v24 = vsel %vm6979_vm1, %v8843_v34, 0.0 }
 0xb58   : > { %v8845_v16 = vpop.eup %8844  ;;  %7116 = vadd.xlane.f32.xlu0 %v7088_v24 }
 0xb59   : > { %v7089_v32 = vsel %vm6979_vm1, %v8845_v16, 0.0 }
 0xb5a   : > { %v8847_v2 = vpop.eup %8846 }
 0xb5b   : > { %7118 = vadd.xlane.f32.xlu1 %v7089_v32  ;;  %v7090_v23 = vsel %vm6979_vm1, %v8847_v2, 0.0 }
 0xb5c   : > { %v8849_v58 = vpop.eup %8848  ;;  %7120 = vadd.xlane.f32.xlu0 %v7090_v23 }
 0xb5d   : > { %v7091_v55 = vsel %vm6979_vm1, %v8849_v58, 0.0 }
 0xb5f   : > { %7122 = vadd.xlane.f32.xlu1 %v7091_v55 }
 0xbcc   : > { %v7097_v37 = vpop.xlane.xlu0 %7096 }
 0xbcd   : > { %8850 = vlog2.f32 %v7097_v37 }
 0xbd0   : > { %v7099_v44 = vpop.xlane.xlu1 %7098  ;;  %v7093_v38 = vpop.xlane.xlu0 %7092 }
 0xbd1   : > { %8852 = vlog2.f32 %v7099_v44 }
 0xbd2   : > { %8854 = vlog2.f32 %v7093_v38 }
 0xbd4   : > { %v7095_v25 = vpop.xlane.xlu1 %7094 }
 0xbd5   : > { %8856 = vlog2.f32 %v7095_v25  ;;  %v7105_v21 = vpop.xlane.xlu0 %7104 }
 0xbd6   : > { %8858 = vlog2.f32 %v7105_v21 }
 0xbd7   : > { %v8851_v30 = vpop.eup %8850 }
 0xbd8   : > { %v7129_v60 = vmul.f32 0.6931472, %v8851_v30  ;;  %v7107_v57 = vpop.xlane.xlu1 %7106 }
 0xbd9   : > { %8860 = vlog2.f32 %v7107_v57  ;;  %v7101_v27 = vpop.xlane.xlu0 %7100 }
 0xbda   : > { %v7158_v61 = vadd.f32 %v7129_v60, %v12747_v6  ;;  %8862 = vlog2.f32 %v7101_v27 }
 0xbdb   : > { %v8853_v28 = vpop.eup %8852 }
 0xbdc   : > { %v8855_v43 = vpop.eup %8854  ;;  %v7174_v35 = vsub.f32 %v12667_v18, %v7158_v61  ;;  %v7131_v52 = vmul.f32 0.6931472, %v8853_v28  ;;  %v7103_v11 = vpop.xlane.xlu1 %7102 }
 0xbdd   : > { %v7125_v5 = vmul.f32 0.6931472, %v8855_v43  ;;  %8864 = vlog2.f32 %v7103_v11  ;;  %v7113_v17 = vpop.xlane.xlu0 %7112 }
 0xbde   : > { %7190 = vst [vmem:[%s12848_s28 + $0x10] sm:$0xff] %v7174_v35  ;;  %v7159_v6 = vadd.f32 %v7131_v52, %v12755_v13  ;;  %8866 = vlog2.f32 %v7113_v17 }
 0xbdf   : > { %v8857_v22 = vpop.eup %8856  ;;  %v7156_v56 = vadd.f32 %v7125_v5, %v12751_v39 }
 0xbe0   : > { %v8859_v59 = vpop.eup %8858  ;;  %v7175_v54 = vsub.f32 %v12671_v4, %v7159_v6  ;;  %v7127_v20 = vmul.f32 0.6931472, %v8857_v22  ;;  %v7115_v45 = vpop.xlane.xlu1 %7114 }
 0xbe1   : > { %v7172_v18 = vsub.f32 %v12669_v12, %v7156_v56  ;;  %v7137_v34 = vmul.f32 0.6931472, %v8859_v59  ;;  %8868 = vlog2.f32 %v7115_v45  ;;  %v7109_v8 = vpop.xlane.xlu0 %7108 }
 0xbe2   : > { %7191 = vst [vmem:[%s12848_s28 + $0x18] sm:$0xff] %v7175_v54  ;;  %v7157_v24 = vadd.f32 %v7127_v20, %v12759_v47  ;;  %8870 = vlog2.f32 %v7109_v8 }
 0xbe3   : > { %v8861_v13 = vpop.eup %8860  ;;  %7188 = vst [vmem:[%s12848_s28] sm:$0xff] %v7172_v18  ;;  %v7162_v39 = vadd.f32 %v7137_v34, %v12763_v50 }
 0xbe4   : > { %v8863_v16 = vpop.eup %8862  ;;  %v7173_v4 = vsub.f32 %v12676_v19, %v7157_v24  ;;  %v7139_v32 = vmul.f32 0.6931472, %v8861_v13  ;;  %v7111_v2 = vpop.xlane.xlu1 %7110 }
 0xbe5   : > { %v7178_v12 = vsub.f32 %v12687_v31, %v7162_v39  ;;  %v7133_v23 = vmul.f32 0.6931472, %v8863_v16  ;;  %8872 = vlog2.f32 %v7111_v2  ;;  %v7117_v58 = vpop.xlane.xlu0 %7116 }
 0xbe6   : > { %7189 = vst [vmem:[%s12848_s28 + $0x8] sm:$0xff] %v7173_v4  ;;  %v7163_v47 = vadd.f32 %v7139_v32, %v12767_v29  ;;  %8874 = vlog2.f32 %v7117_v58 }
 0xbe7   : > { %v8865_v55 = vpop.eup %8864  ;;  %7194 = vst [vmem:[%s12848_s28 + $0x30] sm:$0xff] %v7178_v12  ;;  %v7160_v50 = vadd.f32 %v7133_v23, %v12771_v7 }
 0xbe8   : > { %v8867_v37 = vpop.eup %8866  ;;  %v7179_v19 = vsub.f32 %v12689_v41, %v7163_v47  ;;  %v7135_v44 = vmul.f32 0.6931472, %v8865_v55  ;;  %v7119_v38 = vpop.xlane.xlu1 %7118 }
 0xbe9   : > { %v7176_v31 = vsub.f32 %v12694_v10, %v7160_v50  ;;  %v7145_v25 = vmul.f32 0.6931472, %v8867_v37  ;;  %8876 = vlog2.f32 %v7119_v38  ;;  %v7121_v21 = vpop.xlane.xlu0 %7120 }
 0xbea   : > { %7195 = vst [vmem:[%s12848_s28 + $0x38] sm:$0xff] %v7179_v19  ;;  %v7161_v29 = vadd.f32 %v7135_v44, %v12775_v26  ;;  %8878 = vlog2.f32 %v7121_v21 }
 0xbeb   : > { %v8869_v30 = vpop.eup %8868  ;;  %7192 = vst [vmem:[%s12848_s28 + $0x20] sm:$0xff] %v7176_v31  ;;  %v7166_v7 = vadd.f32 %v7145_v25, %v12781_v48 }
 0xbec   : > { %v8871_v60 = vpop.eup %8870  ;;  %v7177_v41 = vsub.f32 %v12696_v3, %v7161_v29  ;;  %v7147_v57 = vmul.f32 0.6931472, %v8869_v30  ;;  %v7123_v27 = vpop.xlane.xlu1 %7122 }
 0xbed   : > { %v7182_v10 = vsub.f32 %v12704_v46, %v7166_v7  ;;  %v7141_v61 = vmul.f32 0.6931472, %v8871_v60  ;;  %8880 = vlog2.f32 %v7123_v27 }
 0xbee   : > { %7193 = vst [vmem:[%s12848_s28 + $0x28] sm:$0xff] %v7177_v41  ;;  %v7167_v28 = vadd.f32 %v7147_v57, %v12785_v40 }
 0xbef   : > { %v8873_v26 = vpop.eup %8872  ;;  %7198 = vst [vmem:[%s12848_s28 + $0x50] sm:$0xff] %v7182_v10  ;;  %v7164_v43 = vadd.f32 %v7141_v61, %v12793_v1 }
 0xbf0   : > { %v8875_v48 = vpop.eup %8874  ;;  %v7183_v35 = vsub.f32 %v12709_v49, %v7167_v28  ;;  %v7143_v3 = vmul.f32 0.6931472, %v8873_v26 }
 0xbf1   : > { %v7180_v52 = vsub.f32 %v12714_v0, %v7164_v43  ;;  %v7149_v11 = vmul.f32 0.6931472, %v8875_v48 }
 0xbf2   : > { %7199 = vst [vmem:[%s12848_s28 + $0x58] sm:$0xff] %v7183_v35  ;;  %v7165_v46 = vadd.f32 %v7143_v3, %v12797_v36 }
 0xbf3   : > { %v8877_v5 = vpop.eup %8876  ;;  %7196 = vst [vmem:[%s12848_s28 + $0x40] sm:$0xff] %v7180_v52  ;;  %v7168_v40 = vadd.f32 %v7149_v11, %v12803_v53 }
 0xbf4   : > { %v8879_v17 = vpop.eup %8878  ;;  %v7181_v1 = vsub.f32 %v12716_v14, %v7165_v46  ;;  %v7151_v6 = vmul.f32 0.6931472, %v8877_v5 }
 0xbf5   : > { %v7184_v49 = vsub.f32 %v12727_v51, %v7168_v40  ;;  %v7153_v22 = vmul.f32 0.6931472, %v8879_v17 }
 0xbf6   : > { %7197 = vst [vmem:[%s12848_s28 + $0x48] sm:$0xff] %v7181_v1  ;;  %v7169_v0 = vadd.f32 %v7151_v6, %v12809_v42 }
 0xbf7   : > { %v8881_v56 = vpop.eup %8880  ;;  %7200 = vst [vmem:[%s12848_s28 + $0x60] sm:$0xff] %v7184_v49  ;;  %v7170_v36 = vadd.f32 %v7153_v22, %v12815_v33 }
 0xbf8   : > { %v7185_v59 = vsub.f32 %v12731_v9, %v7169_v0  ;;  %v7155_v54 = vmul.f32 0.6931472, %v8881_v56 }
 0xbf9   : > { %v7186_v53 = vsub.f32 %v12729_v62, %v7170_v36 }
 0xbfa   : > { %7201 = vst [vmem:[%s12848_s28 + $0x68] sm:$0xff] %v7185_v59  ;;  %v7171_v14 = vadd.f32 %v7155_v54, %v12821_v63 }
 0xbfb   : > { %7202 = vst [vmem:[%s12848_s28 + $0x70] sm:$0xff] %v7186_v53 }
 0xbfc   : > { %v7187_v20 = vsub.f32 %v12736_v15, %v7171_v14 }
 0xbfe   : > { %7203 = vst [vmem:[%s12848_s28 + $0x78] sm:$0xff] %v7187_v20 }
 0xbff PF: > { %s23_s30 = sadd.s32 1, %s9100_s30  }
 0xc00   : > { %p20_p3 = scmp.ge.s32.totalorder %s23_s30, 4  }
 0xc02   :  { %22 = sbr.rel (!%p20_p3) target bundleno = 4 (0x4), region = 115 }
 0xc09   :  { %7226 = vsyncpa [#allocation3], 1 }
 0xc0a   :  { %7228 = vsyncpa [#allocation3 + $0x1], 1 }
 0xc0b   :  { %7229 = vsyncpa [#allocation5], 1 }
 0xc0c   :  { %7230 = vsyncpa [#allocation8], 1 }
 0xc0d   :  { %7231 = vsyncpa [#allocation11], 1 }

</bundles_post_ra>
